<compile_context>
chip_gen: v7x
topology: tpu7x:2x2x1
jax: 0.10.0
libtpu: 0.0.40
codegen_flags: <defaults>
</compile_context>

<pallas_src>
import numpy as np

import jax
import jax.numpy as jnp
from jax.experimental import pallas as pl
from jax.experimental.pallas import tpu as pltpu


def _ceil_to(x, m):
    return ((x + m - 1) // m) * m


# ----------------------------------------------------------------------------------
# Fused Pallas kernel: one grid step == one tile of B_TILE samples
# ----------------------------------------------------------------------------------
def _encoder_block_kernel(cols_ref, w1_ref, e1_ref, w2_ref, e2_ref, p2_ref,
                          wfc1_ref, bfc1_ref, wfc2_ref, bfc2_ref,
                          out_ref, flat_ref):
    f32, bf16 = jnp.float32, jnp.bfloat16

    bt = out_ref.shape[0]                       # samples per grid step
    K5 = cols_ref.shape[2]                      # 25 * Cin
    P1 = cols_ref.shape[1] // bt                # pooled stage-1 positions
    c4 = w1_ref.shape[1]                        # 4 pool phases * 8 conv1 channels
    c1 = c4 // 4
    F = wfc1_ref.shape[0]                       # flattened features (c2*hq*wq)

    b1, s1, t1 = e1_ref[0:1, :], e1_ref[1:2, :], e1_ref[2:3, :]
    b2, s2, t2 = e2_ref[0:1, :], e2_ref[1:2, :], e2_ref[2:3, :]

    # ---- Stage 1: Conv(3,s2,p1)+bias+ReLU+BN(eval)+MaxPool(2,2) ----------------
    # One GEMM per chunk of pooled positions; the 4 pool phases live on the lane
    # axis of the folded weight, the pool is a max over 4 lane slices, and the
    # pooled rows are scattered into the per-sample flattened (B, P1*c1) scratch.
    w1 = w1_ref[...]
    POS_CHUNK = 8
    for g in range(P1 // POS_CHUNK):
        r0 = g * POS_CHUNK * bt
        rhs = cols_ref[0, r0:r0 + POS_CHUNK * bt, :]            # (POS_CHUNK*bt, K5) bf16
        a = jnp.dot(rhs, w1, preferred_element_type=f32)        # (POS_CHUNK*bt, 4*c1)
        a = jnp.maximum(a + b1, 0.0) * s1 + t1                  # bias + ReLU + BN(eval)
        for pp in range(POS_CHUNK):
            blk = a[pp * bt:(pp + 1) * bt, :]                   # (bt, 4*c1)
            v = jnp.maximum(
                jnp.maximum(blk[:, 0:c1], blk[:, c1:2 * c1]),
                jnp.maximum(blk[:, 2 * c1:3 * c1], blk[:, 3 * c1:4 * c1]))
            p = g * POS_CHUNK + pp
            flat_ref[:, p * c1:(p + 1) * c1] = v                # (bt, c1) lane-offset store

    # ---- Stage 2: Conv(3,s2,p1) with im2col gather folded into w2 --------------
    flat = flat_ref[...].astype(bf16)                           # (bt, P1*c1)
    y2 = jnp.dot(flat, w2_ref[...], preferred_element_type=f32)  # (bt, Q)
    y2 = jnp.maximum(y2 + b2, 0.0) * s2 + t2                    # bias + ReLU + BN(eval)

    # ---- MaxPool(2,2) + NCHW Flatten folded into one selection GEMM + max ------
    z = jnp.dot(y2.astype(bf16), p2_ref[...], preferred_element_type=f32)  # (bt, 4*F)
    pool2 = jnp.maximum(jnp.maximum(z[:, 0:F], z[:, F:2 * F]),
                        jnp.maximum(z[:, 2 * F:3 * F], z[:, 3 * F:4 * F]))

    # ---- Linear(F, 800) + ReLU + Linear(800, 400 padded to 512) ----------------
    h = jnp.dot(pool2.astype(bf16), wfc1_ref[...], preferred_element_type=f32)
    h = jnp.maximum(h + bfc1_ref[...], 0.0)
    out = jnp.dot(h.astype(bf16), wfc2_ref[...], preferred_element_type=f32)
    out_ref[...] = out + bfc2_ref[...]                          # (bt, 512) lane-dense store


# ----------------------------------------------------------------------------------
# One-time parameter preparation (weight folding, BN folding, selection matrices)
# ----------------------------------------------------------------------------------
def prepare_params(p, image_hw, eps=1e-5):
    H, W = image_hw
    assert H % 16 == 0 and W % 16 == 0, "EncoderBlock geometry requires H, W % 16 == 0"
    hp1, wp1 = H // 4, W // 4               # pooled map after stage 1
    h2, w2 = hp1 // 2, wp1 // 2             # conv2 output map
    hq, wq = h2 // 2, w2 // 2               # pooled map after stage 2
    P1 = hp1 * wp1

    conv1_w = np.asarray(p["conv1_w"], np.float32)   # (c1, cin, 3, 3)
    conv2_w = np.asarray(p["conv2_w"], np.float32)   # (c2, c1, 3, 3)
    c1, cin = conv1_w.shape[0], conv1_w.shape[1]
    c2 = conv2_w.shape[0]
    Q = h2 * w2 * c2
    F = c2 * hq * wq
    n_fc1 = p["fc1_w"].shape[1]
    n_out = p["fc2_w"].shape[1]
    n_out_pad = _ceil_to(max(n_out, 128), 128)

    # Stage-1 conv + the 2x2 pool phases folded into one (25*cin, 4*c1) GEMM weight.
    # Rows: 5x5-patch tap (iy, ix) x input channel; columns: (pool phase, out channel).
    w1 = np.zeros((25 * cin, 4 * c1), np.float32)
    for py in range(2):
        for px in range(2):
            ph = py * 2 + px
            for ky in range(3):
                for kx in range(3):
                    iy, ix = 2 * py + ky, 2 * px + kx
                    for c in range(cin):
                        w1[(iy * 5 + ix) * cin + c, ph * c1:(ph + 1) * c1] = conv1_w[:, c, ky, kx]

    def bn_fold(bias, gamma, beta, mean, var, reps):
        s = np.asarray(gamma, np.float32) / np.sqrt(np.asarray(var, np.float32) + eps)
        b = np.asarray(bias, np.float32)
        t = np.asarray(beta, np.float32) - np.asarray(mean, np.float32) * s
        return np.stack([np.tile(b, reps), np.tile(s, reps), np.tile(t, reps)]).astype(np.float32)

    e1 = bn_fold(p["conv1_b"], p["bn1_gamma"], p["bn1_beta"], p["bn1_mean"], p["bn1_var"], 4)
    e2 = bn_fold(p["conv2_b"], p["bn2_gamma"], p["bn2_beta"], p["bn2_mean"], p["bn2_var"], h2 * w2)

    # Stage-2 conv with its im2col gather folded in (exact; zero rows encode padding).
    # Row = p_in*c1 + c_in over the stage-1 pooled map; column = (oh*w2 + ow)*c2 + c_out.
    w2m = np.zeros((P1 * c1, Q), np.float32)
    for oh in range(h2):
        for ow in range(w2):
            q = oh * w2 + ow
            for ky in range(3):
                for kx in range(3):
                    r, s_ = 2 * oh + ky - 1, 2 * ow + kx - 1
                    if 0 <= r < hp1 and 0 <= s_ < wp1:
                        p_in = r * wp1 + s_
                        for ci in range(c1):
                            w2m[p_in * c1 + ci, q * c2:(q + 1) * c2] = conv2_w[:, ci, ky, kx]

    # Stage-2 2x2 max-pool phase selections with the NCHW Flatten(1) order folded into
    # the columns (so fc1 consumes the pooled features directly, no activation permute).
    p2 = np.zeros((Q, 4 * F), np.float32)
    for ki in range(2):
        for kj in range(2):
            k = ki * 2 + kj
            for i in range(hq):
                for j in range(wq):
                    q = (2 * i + ki) * w2 + (2 * j + kj)
                    for c in range(c2):
                        p2[q * c2 + c, k * F + c * (hq * wq) + i * wq + j] = 1.0

    wfc2 = np.zeros((n_fc1, n_out_pad), np.float32)
    wfc2[:, :n_out] = np.asarray(p["fc2_w"], np.float32)
    bfc2 = np.zeros((1, n_out_pad), np.float32)
    bfc2[0, :n_out] = np.asarray(p["fc2_b"], np.float32)

    return {
        "w1": jnp.asarray(w1, jnp.bfloat16),
        "e1": jnp.asarray(e1, jnp.float32),
        "w2": jnp.asarray(w2m, jnp.bfloat16),
        "e2": jnp.asarray(e2, jnp.float32),
        "p2": jnp.asarray(p2, jnp.bfloat16),
        "wfc1": jnp.asarray(np.asarray(p["fc1_w"], np.float32), jnp.bfloat16),
        "bfc1": jnp.asarray(np.asarray(p["fc1_b"], np.float32).reshape(1, -1), jnp.float32),
        "wfc2": jnp.asarray(wfc2, jnp.bfloat16),
        "bfc2": jnp.asarray(bfc2, jnp.float32),
    }


# ----------------------------------------------------------------------------------
# Host-side bf16 im2col (layout transform only, ~same bytes as the raw input)
# ----------------------------------------------------------------------------------
def _stage1_im2col(x_nchw, n_pad):
    """(N, Cin, H, W) -> (P1, n_pad, 25*Cin) bf16: one 5x5/stride-4 patch per 2x2-pooled
    stage-1 output position (covers all 4 pool phases' 3x3 taps)."""
    N, cin, H, W = x_nchw.shape
    hp1, wp1 = H // 4, W // 4
    if n_pad > N:
        x_nchw = jnp.concatenate(
            [x_nchw, jnp.zeros((n_pad - N, cin, H, W), x_nchw.dtype)], axis=0)
    xp = jnp.pad(x_nchw, ((0, 0), (0, 0), (1, 0), (1, 0)))      # conv padding (top/left only)
    taps = []
    for iy in range(5):
        for ix in range(5):
            taps.append(xp[:, :, iy:iy + 4 * (hp1 - 1) + 1:4,
                               ix:ix + 4 * (wp1 - 1) + 1:4])    # (n_pad, cin, hp1, wp1)
    t = jnp.stack(taps, axis=0)                                 # (25, n_pad, cin, hp1, wp1)
    t = t.transpose(3, 4, 1, 0, 2)                              # (hp1, wp1, n_pad, 25, cin)
    return t.reshape(hp1 * wp1, n_pad, 25 * cin).astype(jnp.bfloat16)


# ----------------------------------------------------------------------------------
# Forward wrapper: host im2col + the single fused pallas_call
# ----------------------------------------------------------------------------------
def encoder_block_forward(x_nchw, prep, *, out_features=400, block_n=128):
    N, cin, H, W = x_nchw.shape
    hp1, wp1 = H // 4, W // 4
    P1 = hp1 * wp1
    K5 = 25 * cin
    c1 = prep["w1"].shape[1] // 4
    n_out_pad = prep["wfc2"].shape[1]

    # Batch tile: multiple of 16 (bf16 sublane packing); split into >=2 grid steps when
    # the batch allows it so v7x can shard across its 2 TensorCores.
    bt = _ceil_to(min(block_n, max(N, 16)), 16)
    n_pad = _ceil_to(N, bt)
    if n_pad // bt < 2 and bt > 16:
        bt = _ceil_to(max(16, -(-N // 2)), 16)
        n_pad = _ceil_to(N, bt)
    grid = n_pad // bt

    cols = _stage1_im2col(x_nchw, n_pad)                        # (P1, n_pad, K5) bf16
    # Regroup so each grid step's block is one contiguous (P1*bt, K5) slab, rows (pos, sample).
    cols = cols.reshape(P1, grid, bt, K5).transpose(1, 0, 2, 3).reshape(grid, P1 * bt, K5)

    def _const_spec(a):
        zeros = (0,) * a.ndim
        return pl.BlockSpec(tuple(a.shape), lambda n, _z=zeros: _z)

    out = pl.pallas_call(
        _encoder_block_kernel,
        out_shape=jax.ShapeDtypeStruct((n_pad, n_out_pad), jnp.float32),
        grid=(grid,),
        in_specs=[
            pl.BlockSpec((1, P1 * bt, K5), lambda n: (n, 0, 0)),
            _const_spec(prep["w1"]), _const_spec(prep["e1"]),
            _const_spec(prep["w2"]), _const_spec(prep["e2"]),
            _const_spec(prep["p2"]),
            _const_spec(prep["wfc1"]), _const_spec(prep["bfc1"]),
            _const_spec(prep["wfc2"]), _const_spec(prep["bfc2"]),
        ],
        out_specs=pl.BlockSpec((bt, n_out_pad), lambda n: (n, 0)),
        scratch_shapes=[pltpu.VMEM((bt, P1 * c1), jnp.float32)],
        compiler_params=pltpu.CompilerParams(
            dimension_semantics=("parallel",),
            vmem_limit_bytes=32 * 1024 * 1024),
    )(cols, prep["w1"], prep["e1"], prep["w2"], prep["e2"], prep["p2"],
      prep["wfc1"], prep["bfc1"], prep["wfc2"], prep["bfc2"])
    return out[:N, :out_features]


# ----------------------------------------------------------------------------------
# Pure-JAX reference (eval-mode BN), deterministic params, driver
# ----------------------------------------------------------------------------------
def encoder_block_reference(x, p, eps=1e-5):
    def conv_relu_bn_pool(h, w, b, gamma, beta, mean, var):
        h = jax.lax.conv_general_dilated(
            h, w, window_strides=(2, 2), padding=((1, 1), (1, 1)),
            dimension_numbers=("NCHW", "OIHW", "NCHW"))
        h = h + b[None, :, None, None]
        h = jnp.maximum(h, 0.0)
        s = gamma / jnp.sqrt(var + eps)
        h = h * s[None, :, None, None] + (beta - mean * s)[None, :, None, None]
        return jax.lax.reduce_window(h, -jnp.inf, jax.lax.max,
                                     (1, 1, 2, 2), (1, 1, 2, 2), "VALID")

    h = conv_relu_bn_pool(x, p["conv1_w"], p["conv1_b"],
                          p["bn1_gamma"], p["bn1_beta"], p["bn1_mean"], p["bn1_var"])
    h = conv_relu_bn_pool(h, p["conv2_w"], p["conv2_b"],
                          p["bn2_gamma"], p["bn2_beta"], p["bn2_mean"], p["bn2_var"])
    h = h.reshape(h.shape[0], -1)                     # NCHW Flatten(1)
    h = jnp.maximum(h @ p["fc1_w"] + p["fc1_b"], 0.0)
    return h @ p["fc2_w"] + p["fc2_b"]


def make_params(key, in_channels, features):
    ks = jax.random.split(key, 12)
    f32 = jnp.float32
    return {
        "conv1_w": 0.1 * jax.random.normal(ks[0], (8, in_channels, 3, 3), f32),
        "conv1_b": 0.1 * jax.random.normal(ks[1], (8,), f32),
        "bn1_gamma": 1.0 + 0.1 * jax.random.normal(ks[2], (8,), f32),
        "bn1_beta": 0.1 * jax.random.normal(ks[3], (8,), f32),
        "bn1_mean": 0.1 * jax.random.normal(ks[4], (8,), f32),
        "bn1_var": 0.5 + jnp.abs(jax.random.normal(ks[5], (8,), f32)),
        "conv2_w": 0.1 * jax.random.normal(ks[6], (16, 8, 3, 3), f32),
        "conv2_b": 0.1 * jax.random.normal(ks[7], (16,), f32),
        "bn2_gamma": 1.0 + 0.1 * jax.random.normal(ks[8], (16,), f32),
        "bn2_beta": 0.1 * jax.random.normal(ks[9], (16,), f32),
        "bn2_mean": 0.1 * jax.random.normal(ks[10], (16,), f32),
        "bn2_var": 0.5 + jnp.abs(jax.random.normal(ks[11], (16,), f32)),
        "fc1_w": 0.05 * jax.random.normal(jax.random.fold_in(key, 100), (features, 800), f32),
        "fc1_b": 0.05 * jax.random.normal(jax.random.fold_in(key, 101), (800,), f32),
        "fc2_w": 0.05 * jax.random.normal(jax.random.fold_in(key, 102), (800, 400), f32),
        "fc2_b": 0.05 * jax.random.normal(jax.random.fold_in(key, 103), (400,), f32),
    }


if __name__ == "__main__":
    key = jax.random.PRNGKey(0)
    k_x, k_p = jax.random.split(key)

    # Input: NCHW, batch=32, channels=4, spatial=32x32.
    # Spatial trace: 32 -conv s2-> 16 -pool-> 8 -conv s2-> 4 -pool-> 2 ; features = 16*2*2 = 64.
    # With the default block_n the wrapper picks B_TILE=16 -> grid=(2,) (>=2 steps for v7x).
    N, Cin, H, W = 32, 4, 32, 32
    features = 16 * (H // 16) * (W // 16)   # = 64

    x = jax.random.normal(k_x, (N, Cin, H, W), jnp.float32)
    params = make_params(k_p, Cin, features)
    prep = prepare_params(params, (H, W))

    fwd = jax.jit(lambda xx, pp: encoder_block_forward(xx, pp, out_features=400, block_n=128))
    out = jax.block_until_ready(fwd(x, prep))

    ref = jax.block_until_ready(jax.jit(encoder_block_reference)(x, params))

    assert out.shape == (N, 400), out.shape
    assert bool(jnp.all(jnp.isfinite(out)))
    max_err = float(jnp.max(jnp.abs(out - ref)))
    assert max_err < 1e-1, f"mismatch vs pure-JAX reference: max |diff| = {max_err}"
    print("KERNEL_OK")
</pallas_src>

<mosaic_0001>
module attributes {stable_mosaic.version = 11 : i64} {
  func.func @_encoder_block_kernel(%arg0: i32, %arg1: memref<1x1024x100xbf16, #tpu.memory_space<vmem>>, %arg2: memref<100x32xbf16, #tpu.memory_space<vmem>>, %arg3: memref<3x32xf32, #tpu.memory_space<vmem>>, %arg4: memref<512x256xbf16, #tpu.memory_space<vmem>>, %arg5: memref<3x256xf32, #tpu.memory_space<vmem>>, %arg6: memref<256x256xbf16, #tpu.memory_space<vmem>>, %arg7: memref<64x800xbf16, #tpu.memory_space<vmem>>, %arg8: memref<1x800xf32, #tpu.memory_space<vmem>>, %arg9: memref<800x512xbf16, #tpu.memory_space<vmem>>, %arg10: memref<1x512xf32, #tpu.memory_space<vmem>>, %arg11: memref<16x512xf32, #tpu.memory_space<vmem>>, %arg12: memref<16x512xf32, #tpu.memory_space<vmem>>) attributes {dimension_semantics = [#tpu.dimension_semantics<parallel>], iteration_bounds = array<i64: 2>, scalar_prefetch = 0 : i64, scratch_operands = 1 : i64, tpu.core_type = #tpu.core_type<tc>, window_params = [{transform_indices = @transform_0, window_bounds = array<i64: 1, 1024, 100>}, {pipeline_mode = #tpu.pipeline_mode<synchronous>, transform_indices = @transform_1, window_bounds = array<i64: 100, 32>}, {pipeline_mode = #tpu.pipeline_mode<synchronous>, transform_indices = @transform_2, window_bounds = array<i64: 3, 32>}, {pipeline_mode = #tpu.pipeline_mode<synchronous>, transform_indices = @transform_3, window_bounds = array<i64: 512, 256>}, {pipeline_mode = #tpu.pipeline_mode<synchronous>, transform_indices = @transform_4, window_bounds = array<i64: 3, 256>}, {pipeline_mode = #tpu.pipeline_mode<synchronous>, transform_indices = @transform_5, window_bounds = array<i64: 256, 256>}, {pipeline_mode = #tpu.pipeline_mode<synchronous>, transform_indices = @transform_6, window_bounds = array<i64: 64, 800>}, {pipeline_mode = #tpu.pipeline_mode<synchronous>, transform_indices = @transform_7, window_bounds = array<i64: 1, 800>}, {pipeline_mode = #tpu.pipeline_mode<synchronous>, transform_indices = @transform_8, window_bounds = array<i64: 800, 512>}, {pipeline_mode = #tpu.pipeline_mode<synchronous>, transform_indices = @transform_9, window_bounds = array<i64: 1, 512>}, {transform_indices = @transform_10, window_bounds = array<i64: 16, 512>}]} {
    %c0 = arith.constant 0 : index
    %c0_0 = arith.constant 0 : index
    %0 = vector.load %arg3[%c0, %c0_0] : memref<3x32xf32, #tpu.memory_space<vmem>>, vector<1x32xf32>
    %c1 = arith.constant 1 : index
    %c0_1 = arith.constant 0 : index
    %1 = vector.load %arg3[%c1, %c0_1] : memref<3x32xf32, #tpu.memory_space<vmem>>, vector<1x32xf32>
    %c2 = arith.constant 2 : index
    %c0_2 = arith.constant 0 : index
    %2 = vector.load %arg3[%c2, %c0_2] : memref<3x32xf32, #tpu.memory_space<vmem>>, vector<1x32xf32>
    %c0_3 = arith.constant 0 : index
    %c0_4 = arith.constant 0 : index
    %3 = vector.load %arg5[%c0_3, %c0_4] : memref<3x256xf32, #tpu.memory_space<vmem>>, vector<1x256xf32>
    %c1_5 = arith.constant 1 : index
    %c0_6 = arith.constant 0 : index
    %4 = vector.load %arg5[%c1_5, %c0_6] : memref<3x256xf32, #tpu.memory_space<vmem>>, vector<1x256xf32>
    %c2_7 = arith.constant 2 : index
    %c0_8 = arith.constant 0 : index
    %5 = vector.load %arg5[%c2_7, %c0_8] : memref<3x256xf32, #tpu.memory_space<vmem>>, vector<1x256xf32>
    %c0_9 = arith.constant 0 : index
    %c0_10 = arith.constant 0 : index
    %6 = vector.load %arg2[%c0_9, %c0_10] : memref<100x32xbf16, #tpu.memory_space<vmem>>, vector<100x32xbf16>
    %c0_11 = arith.constant 0 : index
    %c0_12 = arith.constant 0 : index
    %c0_13 = arith.constant 0 : index
    %7 = vector.load %arg1[%c0_11, %c0_12, %c0_13] : memref<1x1024x100xbf16, #tpu.memory_space<vmem>>, vector<1x128x100xbf16>
    %8 = vector.shape_cast %7 : vector<1x128x100xbf16> to vector<128x100xbf16>
    %cst = arith.constant dense<0.000000e+00> : vector<128x32xf32>
    %9 = tpu.matmul %8, %6, %cst {dimension_numbers = #tpu.dot_dimension_numbers<[1], [0], [0], [1], [0, 0, 1, 1], [], []>} : vector<128x100xbf16>, vector<100x32xbf16>, vector<128x32xf32> -> vector<128x32xf32>
    %10 = vector.broadcast %0 : vector<1x32xf32> to vector<128x32xf32>
    %11 = arith.addf %9, %10 : vector<128x32xf32>
    %cst_14 = arith.constant 0.000000e+00 : f32
    %12 = vector.broadcast %cst_14 : f32 to vector<128x32xf32>
    %13 = arith.maximumf %11, %12 : vector<128x32xf32>
    %14 = vector.broadcast %1 : vector<1x32xf32> to vector<128x32xf32>
    %15 = arith.mulf %13, %14 : vector<128x32xf32>
    %16 = vector.broadcast %2 : vector<1x32xf32> to vector<128x32xf32>
    %17 = arith.addf %15, %16 : vector<128x32xf32>
    %18 = vector.extract_strided_slice %17 {offsets = [0, 0], sizes = [16, 32], strides = [1, 1]} : vector<128x32xf32> to vector<16x32xf32>
    %19 = vector.extract_strided_slice %18 {offsets = [0, 0], sizes = [16, 8], strides = [1, 1]} : vector<16x32xf32> to vector<16x8xf32>
    %20 = vector.extract_strided_slice %18 {offsets = [0, 8], sizes = [16, 8], strides = [1, 1]} : vector<16x32xf32> to vector<16x8xf32>
    %21 = arith.maximumf %19, %20 : vector<16x8xf32>
    %22 = vector.extract_strided_slice %18 {offsets = [0, 16], sizes = [16, 8], strides = [1, 1]} : vector<16x32xf32> to vector<16x8xf32>
    %23 = vector.extract_strided_slice %18 {offsets = [0, 24], sizes = [16, 8], strides = [1, 1]} : vector<16x32xf32> to vector<16x8xf32>
    %24 = arith.maximumf %22, %23 : vector<16x8xf32>
    %25 = arith.maximumf %21, %24 : vector<16x8xf32>
    %c0_15 = arith.constant 0 : index
    %c0_16 = arith.constant 0 : index
    %26 = vector.load %arg12[%c0_15, %c0_16] : memref<16x512xf32, #tpu.memory_space<vmem>>, vector<16x8xf32>
    tpu.vector_store %arg12[%c0_15, %c0_16], %25 {strides = array<i32>} : memref<16x512xf32, #tpu.memory_space<vmem>>, vector<16x8xf32>,
    %27 = vector.extract_strided_slice %17 {offsets = [16, 0], sizes = [16, 32], strides = [1, 1]} : vector<128x32xf32> to vector<16x32xf32>
    %28 = vector.extract_strided_slice %27 {offsets = [0, 0], sizes = [16, 8], strides = [1, 1]} : vector<16x32xf32> to vector<16x8xf32>
    %29 = vector.extract_strided_slice %27 {offsets = [0, 8], sizes = [16, 8], strides = [1, 1]} : vector<16x32xf32> to vector<16x8xf32>
    %30 = arith.maximumf %28, %29 : vector<16x8xf32>
    %31 = vector.extract_strided_slice %27 {offsets = [0, 16], sizes = [16, 8], strides = [1, 1]} : vector<16x32xf32> to vector<16x8xf32>
    %32 = vector.extract_strided_slice %27 {offsets = [0, 24], sizes = [16, 8], strides = [1, 1]} : vector<16x32xf32> to vector<16x8xf32>
    %33 = arith.maximumf %31, %32 : vector<16x8xf32>
    %34 = arith.maximumf %30, %33 : vector<16x8xf32>
    %c0_17 = arith.constant 0 : index
    %c8 = arith.constant 8 : index
    %35 = vector.load %arg12[%c0_17, %c8] : memref<16x512xf32, #tpu.memory_space<vmem>>, vector<16x8xf32>
    tpu.vector_store %arg12[%c0_17, %c8], %34 {strides = array<i32>} : memref<16x512xf32, #tpu.memory_space<vmem>>, vector<16x8xf32>,
    %36 = vector.extract_strided_slice %17 {offsets = [32, 0], sizes = [16, 32], strides = [1, 1]} : vector<128x32xf32> to vector<16x32xf32>
    %37 = vector.extract_strided_slice %36 {offsets = [0, 0], sizes = [16, 8], strides = [1, 1]} : vector<16x32xf32> to vector<16x8xf32>
    %38 = vector.extract_strided_slice %36 {offsets = [0, 8], sizes = [16, 8], strides = [1, 1]} : vector<16x32xf32> to vector<16x8xf32>
    %39 = arith.maximumf %37, %38 : vector<16x8xf32>
    %40 = vector.extract_strided_slice %36 {offsets = [0, 16], sizes = [16, 8], strides = [1, 1]} : vector<16x32xf32> to vector<16x8xf32>
    %41 = vector.extract_strided_slice %36 {offsets = [0, 24], sizes = [16, 8], strides = [1, 1]} : vector<16x32xf32> to vector<16x8xf32>
    %42 = arith.maximumf %40, %41 : vector<16x8xf32>
    %43 = arith.maximumf %39, %42 : vector<16x8xf32>
    %c0_18 = arith.constant 0 : index
    %c16 = arith.constant 16 : index
    %44 = vector.load %arg12[%c0_18, %c16] : memref<16x512xf32, #tpu.memory_space<vmem>>, vector<16x8xf32>
    tpu.vector_store %arg12[%c0_18, %c16], %43 {strides = array<i32>} : memref<16x512xf32, #tpu.memory_space<vmem>>, vector<16x8xf32>,
    %45 = vector.extract_strided_slice %17 {offsets = [48, 0], sizes = [16, 32], strides = [1, 1]} : vector<128x32xf32> to vector<16x32xf32>
    %46 = vector.extract_strided_slice %45 {offsets = [0, 0], sizes = [16, 8], strides = [1, 1]} : vector<16x32xf32> to vector<16x8xf32>
    %47 = vector.extract_strided_slice %45 {offsets = [0, 8], sizes = [16, 8], strides = [1, 1]} : vector<16x32xf32> to vector<16x8xf32>
    %48 = arith.maximumf %46, %47 : vector<16x8xf32>
    %49 = vector.extract_strided_slice %45 {offsets = [0, 16], sizes = [16, 8], strides = [1, 1]} : vector<16x32xf32> to vector<16x8xf32>
    %50 = vector.extract_strided_slice %45 {offsets = [0, 24], sizes = [16, 8], strides = [1, 1]} : vector<16x32xf32> to vector<16x8xf32>
    %51 = arith.maximumf %49, %50 : vector<16x8xf32>
    %52 = arith.maximumf %48, %51 : vector<16x8xf32>
    %c0_19 = arith.constant 0 : index
    %c24 = arith.constant 24 : index
    %53 = vector.load %arg12[%c0_19, %c24] : memref<16x512xf32, #tpu.memory_space<vmem>>, vector<16x8xf32>
    tpu.vector_store %arg12[%c0_19, %c24], %52 {strides = array<i32>} : memref<16x512xf32, #tpu.memory_space<vmem>>, vector<16x8xf32>,
    %54 = vector.extract_strided_slice %17 {offsets = [64, 0], sizes = [16, 32], strides = [1, 1]} : vector<128x32xf32> to vector<16x32xf32>
    %55 = vector.extract_strided_slice %54 {offsets = [0, 0], sizes = [16, 8], strides = [1, 1]} : vector<16x32xf32> to vector<16x8xf32>
    %56 = vector.extract_strided_slice %54 {offsets = [0, 8], sizes = [16, 8], strides = [1, 1]} : vector<16x32xf32> to vector<16x8xf32>
    %57 = arith.maximumf %55, %56 : vector<16x8xf32>
    %58 = vector.extract_strided_slice %54 {offsets = [0, 16], sizes = [16, 8], strides = [1, 1]} : vector<16x32xf32> to vector<16x8xf32>
    %59 = vector.extract_strided_slice %54 {offsets = [0, 24], sizes = [16, 8], strides = [1, 1]} : vector<16x32xf32> to vector<16x8xf32>
    %60 = arith.maximumf %58, %59 : vector<16x8xf32>
    %61 = arith.maximumf %57, %60 : vector<16x8xf32>
    %c0_20 = arith.constant 0 : index
    %c32 = arith.constant 32 : index
    %62 = vector.load %arg12[%c0_20, %c32] : memref<16x512xf32, #tpu.memory_space<vmem>>, vector<16x8xf32>
    tpu.vector_store %arg12[%c0_20, %c32], %61 {strides = array<i32>} : memref<16x512xf32, #tpu.memory_space<vmem>>, vector<16x8xf32>,
    %63 = vector.extract_strided_slice %17 {offsets = [80, 0], sizes = [16, 32], strides = [1, 1]} : vector<128x32xf32> to vector<16x32xf32>
    %64 = vector.extract_strided_slice %63 {offsets = [0, 0], sizes = [16, 8], strides = [1, 1]} : vector<16x32xf32> to vector<16x8xf32>
    %65 = vector.extract_strided_slice %63 {offsets = [0, 8], sizes = [16, 8], strides = [1, 1]} : vector<16x32xf32> to vector<16x8xf32>
    %66 = arith.maximumf %64, %65 : vector<16x8xf32>
    %67 = vector.extract_strided_slice %63 {offsets = [0, 16], sizes = [16, 8], strides = [1, 1]} : vector<16x32xf32> to vector<16x8xf32>
    %68 = vector.extract_strided_slice %63 {offsets = [0, 24], sizes = [16, 8], strides = [1, 1]} : vector<16x32xf32> to vector<16x8xf32>
    %69 = arith.maximumf %67, %68 : vector<16x8xf32>
    %70 = arith.maximumf %66, %69 : vector<16x8xf32>
    %c0_21 = arith.constant 0 : index
    %c40 = arith.constant 40 : index
    %71 = vector.load %arg12[%c0_21, %c40] : memref<16x512xf32, #tpu.memory_space<vmem>>, vector<16x8xf32>
    tpu.vector_store %arg12[%c0_21, %c40], %70 {strides = array<i32>} : memref<16x512xf32, #tpu.memory_space<vmem>>, vector<16x8xf32>,
    %72 = vector.extract_strided_slice %17 {offsets = [96, 0], sizes = [16, 32], strides = [1, 1]} : vector<128x32xf32> to vector<16x32xf32>
    %73 = vector.extract_strided_slice %72 {offsets = [0, 0], sizes = [16, 8], strides = [1, 1]} : vector<16x32xf32> to vector<16x8xf32>
    %74 = vector.extract_strided_slice %72 {offsets = [0, 8], sizes = [16, 8], strides = [1, 1]} : vector<16x32xf32> to vector<16x8xf32>
    %75 = arith.maximumf %73, %74 : vector<16x8xf32>
    %76 = vector.extract_strided_slice %72 {offsets = [0, 16], sizes = [16, 8], strides = [1, 1]} : vector<16x32xf32> to vector<16x8xf32>
    %77 = vector.extract_strided_slice %72 {offsets = [0, 24], sizes = [16, 8], strides = [1, 1]} : vector<16x32xf32> to vector<16x8xf32>
    %78 = arith.maximumf %76, %77 : vector<16x8xf32>
    %79 = arith.maximumf %75, %78 : vector<16x8xf32>
    %c0_22 = arith.constant 0 : index
    %c48 = arith.constant 48 : index
    %80 = vector.load %arg12[%c0_22, %c48] : memref<16x512xf32, #tpu.memory_space<vmem>>, vector<16x8xf32>
    tpu.vector_store %arg12[%c0_22, %c48], %79 {strides = array<i32>} : memref<16x512xf32, #tpu.memory_space<vmem>>, vector<16x8xf32>,
    %81 = vector.extract_strided_slice %17 {offsets = [112, 0], sizes = [16, 32], strides = [1, 1]} : vector<128x32xf32> to vector<16x32xf32>
    %82 = vector.extract_strided_slice %81 {offsets = [0, 0], sizes = [16, 8], strides = [1, 1]} : vector<16x32xf32> to vector<16x8xf32>
    %83 = vector.extract_strided_slice %81 {offsets = [0, 8], sizes = [16, 8], strides = [1, 1]} : vector<16x32xf32> to vector<16x8xf32>
    %84 = arith.maximumf %82, %83 : vector<16x8xf32>
    %85 = vector.extract_strided_slice %81 {offsets = [0, 16], sizes = [16, 8], strides = [1, 1]} : vector<16x32xf32> to vector<16x8xf32>
    %86 = vector.extract_strided_slice %81 {offsets = [0, 24], sizes = [16, 8], strides = [1, 1]} : vector<16x32xf32> to vector<16x8xf32>
    %87 = arith.maximumf %85, %86 : vector<16x8xf32>
    %88 = arith.maximumf %84, %87 : vector<16x8xf32>
    %c0_23 = arith.constant 0 : index
    %c56 = arith.constant 56 : index
    %89 = vector.load %arg12[%c0_23, %c56] : memref<16x512xf32, #tpu.memory_space<vmem>>, vector<16x8xf32>
    tpu.vector_store %arg12[%c0_23, %c56], %88 {strides = array<i32>} : memref<16x512xf32, #tpu.memory_space<vmem>>, vector<16x8xf32>,
    %c0_24 = arith.constant 0 : index
    %c128 = arith.constant 128 : index
    %c0_25 = arith.constant 0 : index
    %90 = vector.load %arg1[%c0_24, %c128, %c0_25] : memref<1x1024x100xbf16, #tpu.memory_space<vmem>>, vector<1x128x100xbf16>
    %91 = vector.shape_cast %90 : vector<1x128x100xbf16> to vector<128x100xbf16>
    %cst_26 = arith.constant dense<0.000000e+00> : vector<128x32xf32>
    %92 = tpu.matmul %91, %6, %cst_26 {dimension_numbers = #tpu.dot_dimension_numbers<[1], [0], [0], [1], [0, 0, 1, 1], [], []>} : vector<128x100xbf16>, vector<100x32xbf16>, vector<128x32xf32> -> vector<128x32xf32>
    %93 = vector.broadcast %0 : vector<1x32xf32> to vector<128x32xf32>
    %94 = arith.addf %92, %93 : vector<128x32xf32>
    %cst_27 = arith.constant 0.000000e+00 : f32
    %95 = vector.broadcast %cst_27 : f32 to vector<128x32xf32>
    %96 = arith.maximumf %94, %95 : vector<128x32xf32>
    %97 = vector.broadcast %1 : vector<1x32xf32> to vector<128x32xf32>
    %98 = arith.mulf %96, %97 : vector<128x32xf32>
    %99 = vector.broadcast %2 : vector<1x32xf32> to vector<128x32xf32>
    %100 = arith.addf %98, %99 : vector<128x32xf32>
    %101 = vector.extract_strided_slice %100 {offsets = [0, 0], sizes = [16, 32], strides = [1, 1]} : vector<128x32xf32> to vector<16x32xf32>
    %102 = vector.extract_strided_slice %101 {offsets = [0, 0], sizes = [16, 8], strides = [1, 1]} : vector<16x32xf32> to vector<16x8xf32>
    %103 = vector.extract_strided_slice %101 {offsets = [0, 8], sizes = [16, 8], strides = [1, 1]} : vector<16x32xf32> to vector<16x8xf32>
    %104 = arith.maximumf %102, %103 : vector<16x8xf32>
    %105 = vector.extract_strided_slice %101 {offsets = [0, 16], sizes = [16, 8], strides = [1, 1]} : vector<16x32xf32> to vector<16x8xf32>
    %106 = vector.extract_strided_slice %101 {offsets = [0, 24], sizes = [16, 8], strides = [1, 1]} : vector<16x32xf32> to vector<16x8xf32>
    %107 = arith.maximumf %105, %106 : vector<16x8xf32>
    %108 = arith.maximumf %104, %107 : vector<16x8xf32>
    %c0_28 = arith.constant 0 : index
    %c64 = arith.constant 64 : index
    %109 = vector.load %arg12[%c0_28, %c64] : memref<16x512xf32, #tpu.memory_space<vmem>>, vector<16x8xf32>
    tpu.vector_store %arg12[%c0_28, %c64], %108 {strides = array<i32>} : memref<16x512xf32, #tpu.memory_space<vmem>>, vector<16x8xf32>,
    %110 = vector.extract_strided_slice %100 {offsets = [16, 0], sizes = [16, 32], strides = [1, 1]} : vector<128x32xf32> to vector<16x32xf32>
    %111 = vector.extract_strided_slice %110 {offsets = [0, 0], sizes = [16, 8], strides = [1, 1]} : vector<16x32xf32> to vector<16x8xf32>
    %112 = vector.extract_strided_slice %110 {offsets = [0, 8], sizes = [16, 8], strides = [1, 1]} : vector<16x32xf32> to vector<16x8xf32>
    %113 = arith.maximumf %111, %112 : vector<16x8xf32>
    %114 = vector.extract_strided_slice %110 {offsets = [0, 16], sizes = [16, 8], strides = [1, 1]} : vector<16x32xf32> to vector<16x8xf32>
    %115 = vector.extract_strided_slice %110 {offsets = [0, 24], sizes = [16, 8], strides = [1, 1]} : vector<16x32xf32> to vector<16x8xf32>
    %116 = arith.maximumf %114, %115 : vector<16x8xf32>
    %117 = arith.maximumf %113, %116 : vector<16x8xf32>
    %c0_29 = arith.constant 0 : index
    %c72 = arith.constant 72 : index
    %118 = vector.load %arg12[%c0_29, %c72] : memref<16x512xf32, #tpu.memory_space<vmem>>, vector<16x8xf32>
    tpu.vector_store %arg12[%c0_29, %c72], %117 {strides = array<i32>} : memref<16x512xf32, #tpu.memory_space<vmem>>, vector<16x8xf32>,
    %119 = vector.extract_strided_slice %100 {offsets = [32, 0], sizes = [16, 32], strides = [1, 1]} : vector<128x32xf32> to vector<16x32xf32>
    %120 = vector.extract_strided_slice %119 {offsets = [0, 0], sizes = [16, 8], strides = [1, 1]} : vector<16x32xf32> to vector<16x8xf32>
    %121 = vector.extract_strided_slice %119 {offsets = [0, 8], sizes = [16, 8], strides = [1, 1]} : vector<16x32xf32> to vector<16x8xf32>
    %122 = arith.maximumf %120, %121 : vector<16x8xf32>
    %123 = vector.extract_strided_slice %119 {offsets = [0, 16], sizes = [16, 8], strides = [1, 1]} : vector<16x32xf32> to vector<16x8xf32>
    %124 = vector.extract_strided_slice %119 {offsets = [0, 24], sizes = [16, 8], strides = [1, 1]} : vector<16x32xf32> to vector<16x8xf32>
    %125 = arith.maximumf %123, %124 : vector<16x8xf32>
    %126 = arith.maximumf %122, %125 : vector<16x8xf32>
    %c0_30 = arith.constant 0 : index
    %c80 = arith.constant 80 : index
    %127 = vector.load %arg12[%c0_30, %c80] : memref<16x512xf32, #tpu.memory_space<vmem>>, vector<16x8xf32>
    tpu.vector_store %arg12[%c0_30, %c80], %126 {strides = array<i32>} : memref<16x512xf32, #tpu.memory_space<vmem>>, vector<16x8xf32>,
    %128 = vector.extract_strided_slice %100 {offsets = [48, 0], sizes = [16, 32], strides = [1, 1]} : vector<128x32xf32> to vector<16x32xf32>
    %129 = vector.extract_strided_slice %128 {offsets = [0, 0], sizes = [16, 8], strides = [1, 1]} : vector<16x32xf32> to vector<16x8xf32>
    %130 = vector.extract_strided_slice %128 {offsets = [0, 8], sizes = [16, 8], strides = [1, 1]} : vector<16x32xf32> to vector<16x8xf32>
    %131 = arith.maximumf %129, %130 : vector<16x8xf32>
    %132 = vector.extract_strided_slice %128 {offsets = [0, 16], sizes = [16, 8], strides = [1, 1]} : vector<16x32xf32> to vector<16x8xf32>
    %133 = vector.extract_strided_slice %128 {offsets = [0, 24], sizes = [16, 8], strides = [1, 1]} : vector<16x32xf32> to vector<16x8xf32>
    %134 = arith.maximumf %132, %133 : vector<16x8xf32>
    %135 = arith.maximumf %131, %134 : vector<16x8xf32>
    %c0_31 = arith.constant 0 : index
    %c88 = arith.constant 88 : index
    %136 = vector.load %arg12[%c0_31, %c88] : memref<16x512xf32, #tpu.memory_space<vmem>>, vector<16x8xf32>
    tpu.vector_store %arg12[%c0_31, %c88], %135 {strides = array<i32>} : memref<16x512xf32, #tpu.memory_space<vmem>>, vector<16x8xf32>,
    %137 = vector.extract_strided_slice %100 {offsets = [64, 0], sizes = [16, 32], strides = [1, 1]} : vector<128x32xf32> to vector<16x32xf32>
    %138 = vector.extract_strided_slice %137 {offsets = [0, 0], sizes = [16, 8], strides = [1, 1]} : vector<16x32xf32> to vector<16x8xf32>
    %139 = vector.extract_strided_slice %137 {offsets = [0, 8], sizes = [16, 8], strides = [1, 1]} : vector<16x32xf32> to vector<16x8xf32>
    %140 = arith.maximumf %138, %139 : vector<16x8xf32>
    %141 = vector.extract_strided_slice %137 {offsets = [0, 16], sizes = [16, 8], strides = [1, 1]} : vector<16x32xf32> to vector<16x8xf32>
    %142 = vector.extract_strided_slice %137 {offsets = [0, 24], sizes = [16, 8], strides = [1, 1]} : vector<16x32xf32> to vector<16x8xf32>
    %143 = arith.maximumf %141, %142 : vector<16x8xf32>
    %144 = arith.maximumf %140, %143 : vector<16x8xf32>
    %c0_32 = arith.constant 0 : index
    %c96 = arith.constant 96 : index
    %145 = vector.load %arg12[%c0_32, %c96] : memref<16x512xf32, #tpu.memory_space<vmem>>, vector<16x8xf32>
    tpu.vector_store %arg12[%c0_32, %c96], %144 {strides = array<i32>} : memref<16x512xf32, #tpu.memory_space<vmem>>, vector<16x8xf32>,
    %146 = vector.extract_strided_slice %100 {offsets = [80, 0], sizes = [16, 32], strides = [1, 1]} : vector<128x32xf32> to vector<16x32xf32>
    %147 = vector.extract_strided_slice %146 {offsets = [0, 0], sizes = [16, 8], strides = [1, 1]} : vector<16x32xf32> to vector<16x8xf32>
    %148 = vector.extract_strided_slice %146 {offsets = [0, 8], sizes = [16, 8], strides = [1, 1]} : vector<16x32xf32> to vector<16x8xf32>
    %149 = arith.maximumf %147, %148 : vector<16x8xf32>
    %150 = vector.extract_strided_slice %146 {offsets = [0, 16], sizes = [16, 8], strides = [1, 1]} : vector<16x32xf32> to vector<16x8xf32>
    %151 = vector.extract_strided_slice %146 {offsets = [0, 24], sizes = [16, 8], strides = [1, 1]} : vector<16x32xf32> to vector<16x8xf32>
    %152 = arith.maximumf %150, %151 : vector<16x8xf32>
    %153 = arith.maximumf %149, %152 : vector<16x8xf32>
    %c0_33 = arith.constant 0 : index
    %c104 = arith.constant 104 : index
    %154 = vector.load %arg12[%c0_33, %c104] : memref<16x512xf32, #tpu.memory_space<vmem>>, vector<16x8xf32>
    tpu.vector_store %arg12[%c0_33, %c104], %153 {strides = array<i32>} : memref<16x512xf32, #tpu.memory_space<vmem>>, vector<16x8xf32>,
    %155 = vector.extract_strided_slice %100 {offsets = [96, 0], sizes = [16, 32], strides = [1, 1]} : vector<128x32xf32> to vector<16x32xf32>
    %156 = vector.extract_strided_slice %155 {offsets = [0, 0], sizes = [16, 8], strides = [1, 1]} : vector<16x32xf32> to vector<16x8xf32>
    %157 = vector.extract_strided_slice %155 {offsets = [0, 8], sizes = [16, 8], strides = [1, 1]} : vector<16x32xf32> to vector<16x8xf32>
    %158 = arith.maximumf %156, %157 : vector<16x8xf32>
    %159 = vector.extract_strided_slice %155 {offsets = [0, 16], sizes = [16, 8], strides = [1, 1]} : vector<16x32xf32> to vector<16x8xf32>
    %160 = vector.extract_strided_slice %155 {offsets = [0, 24], sizes = [16, 8], strides = [1, 1]} : vector<16x32xf32> to vector<16x8xf32>
    %161 = arith.maximumf %159, %160 : vector<16x8xf32>
    %162 = arith.maximumf %158, %161 : vector<16x8xf32>
    %c0_34 = arith.constant 0 : index
    %c112 = arith.constant 112 : index
    %163 = vector.load %arg12[%c0_34, %c112] : memref<16x512xf32, #tpu.memory_space<vmem>>, vector<16x8xf32>
    tpu.vector_store %arg12[%c0_34, %c112], %162 {strides = array<i32>} : memref<16x512xf32, #tpu.memory_space<vmem>>, vector<16x8xf32>,
    %164 = vector.extract_strided_slice %100 {offsets = [112, 0], sizes = [16, 32], strides = [1, 1]} : vector<128x32xf32> to vector<16x32xf32>
    %165 = vector.extract_strided_slice %164 {offsets = [0, 0], sizes = [16, 8], strides = [1, 1]} : vector<16x32xf32> to vector<16x8xf32>
    %166 = vector.extract_strided_slice %164 {offsets = [0, 8], sizes = [16, 8], strides = [1, 1]} : vector<16x32xf32> to vector<16x8xf32>
    %167 = arith.maximumf %165, %166 : vector<16x8xf32>
    %168 = vector.extract_strided_slice %164 {offsets = [0, 16], sizes = [16, 8], strides = [1, 1]} : vector<16x32xf32> to vector<16x8xf32>
    %169 = vector.extract_strided_slice %164 {offsets = [0, 24], sizes = [16, 8], strides = [1, 1]} : vector<16x32xf32> to vector<16x8xf32>
    %170 = arith.maximumf %168, %169 : vector<16x8xf32>
    %171 = arith.maximumf %167, %170 : vector<16x8xf32>
    %c0_35 = arith.constant 0 : index
    %c120 = arith.constant 120 : index
    %172 = vector.load %arg12[%c0_35, %c120] : memref<16x512xf32, #tpu.memory_space<vmem>>, vector<16x8xf32>
    tpu.vector_store %arg12[%c0_35, %c120], %171 {strides = array<i32>} : memref<16x512xf32, #tpu.memory_space<vmem>>, vector<16x8xf32>,
    %c0_36 = arith.constant 0 : index
    %c256 = arith.constant 256 : index
    %c0_37 = arith.constant 0 : index
    %173 = vector.load %arg1[%c0_36, %c256, %c0_37] : memref<1x1024x100xbf16, #tpu.memory_space<vmem>>, vector<1x128x100xbf16>
    %174 = vector.shape_cast %173 : vector<1x128x100xbf16> to vector<128x100xbf16>
    %cst_38 = arith.constant dense<0.000000e+00> : vector<128x32xf32>
    %175 = tpu.matmul %174, %6, %cst_38 {dimension_numbers = #tpu.dot_dimension_numbers<[1], [0], [0], [1], [0, 0, 1, 1], [], []>} : vector<128x100xbf16>, vector<100x32xbf16>, vector<128x32xf32> -> vector<128x32xf32>
    %176 = vector.broadcast %0 : vector<1x32xf32> to vector<128x32xf32>
    %177 = arith.addf %175, %176 : vector<128x32xf32>
    %cst_39 = arith.constant 0.000000e+00 : f32
    %178 = vector.broadcast %cst_39 : f32 to vector<128x32xf32>
    %179 = arith.maximumf %177, %178 : vector<128x32xf32>
    %180 = vector.broadcast %1 : vector<1x32xf32> to vector<128x32xf32>
    %181 = arith.mulf %179, %180 : vector<128x32xf32>
    %182 = vector.broadcast %2 : vector<1x32xf32> to vector<128x32xf32>
    %183 = arith.addf %181, %182 : vector<128x32xf32>
    %184 = vector.extract_strided_slice %183 {offsets = [0, 0], sizes = [16, 32], strides = [1, 1]} : vector<128x32xf32> to vector<16x32xf32>
    %185 = vector.extract_strided_slice %184 {offsets = [0, 0], sizes = [16, 8], strides = [1, 1]} : vector<16x32xf32> to vector<16x8xf32>
    %186 = vector.extract_strided_slice %184 {offsets = [0, 8], sizes = [16, 8], strides = [1, 1]} : vector<16x32xf32> to vector<16x8xf32>
    %187 = arith.maximumf %185, %186 : vector<16x8xf32>
    %188 = vector.extract_strided_slice %184 {offsets = [0, 16], sizes = [16, 8], strides = [1, 1]} : vector<16x32xf32> to vector<16x8xf32>
    %189 = vector.extract_strided_slice %184 {offsets = [0, 24], sizes = [16, 8], strides = [1, 1]} : vector<16x32xf32> to vector<16x8xf32>
    %190 = arith.maximumf %188, %189 : vector<16x8xf32>
    %191 = arith.maximumf %187, %190 : vector<16x8xf32>
    %c0_40 = arith.constant 0 : index
    %c128_41 = arith.constant 128 : index
    %192 = vector.load %arg12[%c0_40, %c128_41] : memref<16x512xf32, #tpu.memory_space<vmem>>, vector<16x8xf32>
    tpu.vector_store %arg12[%c0_40, %c128_41], %191 {strides = array<i32>} : memref<16x512xf32, #tpu.memory_space<vmem>>, vector<16x8xf32>,
    %193 = vector.extract_strided_slice %183 {offsets = [16, 0], sizes = [16, 32], strides = [1, 1]} : vector<128x32xf32> to vector<16x32xf32>
    %194 = vector.extract_strided_slice %193 {offsets = [0, 0], sizes = [16, 8], strides = [1, 1]} : vector<16x32xf32> to vector<16x8xf32>
    %195 = vector.extract_strided_slice %193 {offsets = [0, 8], sizes = [16, 8], strides = [1, 1]} : vector<16x32xf32> to vector<16x8xf32>
    %196 = arith.maximumf %194, %195 : vector<16x8xf32>
    %197 = vector.extract_strided_slice %193 {offsets = [0, 16], sizes = [16, 8], strides = [1, 1]} : vector<16x32xf32> to vector<16x8xf32>
    %198 = vector.extract_strided_slice %193 {offsets = [0, 24], sizes = [16, 8], strides = [1, 1]} : vector<16x32xf32> to vector<16x8xf32>
    %199 = arith.maximumf %197, %198 : vector<16x8xf32>
    %200 = arith.maximumf %196, %199 : vector<16x8xf32>
    %c0_42 = arith.constant 0 : index
    %c136 = arith.constant 136 : index
    %201 = vector.load %arg12[%c0_42, %c136] : memref<16x512xf32, #tpu.memory_space<vmem>>, vector<16x8xf32>
    tpu.vector_store %arg12[%c0_42, %c136], %200 {strides = array<i32>} : memref<16x512xf32, #tpu.memory_space<vmem>>, vector<16x8xf32>,
    %202 = vector.extract_strided_slice %183 {offsets = [32, 0], sizes = [16, 32], strides = [1, 1]} : vector<128x32xf32> to vector<16x32xf32>
    %203 = vector.extract_strided_slice %202 {offsets = [0, 0], sizes = [16, 8], strides = [1, 1]} : vector<16x32xf32> to vector<16x8xf32>
    %204 = vector.extract_strided_slice %202 {offsets = [0, 8], sizes = [16, 8], strides = [1, 1]} : vector<16x32xf32> to vector<16x8xf32>
    %205 = arith.maximumf %203, %204 : vector<16x8xf32>
    %206 = vector.extract_strided_slice %202 {offsets = [0, 16], sizes = [16, 8], strides = [1, 1]} : vector<16x32xf32> to vector<16x8xf32>
    %207 = vector.extract_strided_slice %202 {offsets = [0, 24], sizes = [16, 8], strides = [1, 1]} : vector<16x32xf32> to vector<16x8xf32>
    %208 = arith.maximumf %206, %207 : vector<16x8xf32>
    %209 = arith.maximumf %205, %208 : vector<16x8xf32>
    %c0_43 = arith.constant 0 : index
    %c144 = arith.constant 144 : index
    %210 = vector.load %arg12[%c0_43, %c144] : memref<16x512xf32, #tpu.memory_space<vmem>>, vector<16x8xf32>
    tpu.vector_store %arg12[%c0_43, %c144], %209 {strides = array<i32>} : memref<16x512xf32, #tpu.memory_space<vmem>>, vector<16x8xf32>,
    %211 = vector.extract_strided_slice %183 {offsets = [48, 0], sizes = [16, 32], strides = [1, 1]} : vector<128x32xf32> to vector<16x32xf32>
    %212 = vector.extract_strided_slice %211 {offsets = [0, 0], sizes = [16, 8], strides = [1, 1]} : vector<16x32xf32> to vector<16x8xf32>
    %213 = vector.extract_strided_slice %211 {offsets = [0, 8], sizes = [16, 8], strides = [1, 1]} : vector<16x32xf32> to vector<16x8xf32>
    %214 = arith.maximumf %212, %213 : vector<16x8xf32>
    %215 = vector.extract_strided_slice %211 {offsets = [0, 16], sizes = [16, 8], strides = [1, 1]} : vector<16x32xf32> to vector<16x8xf32>
    %216 = vector.extract_strided_slice %211 {offsets = [0, 24], sizes = [16, 8], strides = [1, 1]} : vector<16x32xf32> to vector<16x8xf32>
    %217 = arith.maximumf %215, %216 : vector<16x8xf32>
    %218 = arith.maximumf %214, %217 : vector<16x8xf32>
    %c0_44 = arith.constant 0 : index
    %c152 = arith.constant 152 : index
    %219 = vector.load %arg12[%c0_44, %c152] : memref<16x512xf32, #tpu.memory_space<vmem>>, vector<16x8xf32>
    tpu.vector_store %arg12[%c0_44, %c152], %218 {strides = array<i32>} : memref<16x512xf32, #tpu.memory_space<vmem>>, vector<16x8xf32>,
    %220 = vector.extract_strided_slice %183 {offsets = [64, 0], sizes = [16, 32], strides = [1, 1]} : vector<128x32xf32> to vector<16x32xf32>
    %221 = vector.extract_strided_slice %220 {offsets = [0, 0], sizes = [16, 8], strides = [1, 1]} : vector<16x32xf32> to vector<16x8xf32>
    %222 = vector.extract_strided_slice %220 {offsets = [0, 8], sizes = [16, 8], strides = [1, 1]} : vector<16x32xf32> to vector<16x8xf32>
    %223 = arith.maximumf %221, %222 : vector<16x8xf32>
    %224 = vector.extract_strided_slice %220 {offsets = [0, 16], sizes = [16, 8], strides = [1, 1]} : vector<16x32xf32> to vector<16x8xf32>
    %225 = vector.extract_strided_slice %220 {offsets = [0, 24], sizes = [16, 8], strides = [1, 1]} : vector<16x32xf32> to vector<16x8xf32>
    %226 = arith.maximumf %224, %225 : vector<16x8xf32>
    %227 = arith.maximumf %223, %226 : vector<16x8xf32>
    %c0_45 = arith.constant 0 : index
    %c160 = arith.constant 160 : index
    %228 = vector.load %arg12[%c0_45, %c160] : memref<16x512xf32, #tpu.memory_space<vmem>>, vector<16x8xf32>
    tpu.vector_store %arg12[%c0_45, %c160], %227 {strides = array<i32>} : memref<16x512xf32, #tpu.memory_space<vmem>>, vector<16x8xf32>,
    %229 = vector.extract_strided_slice %183 {offsets = [80, 0], sizes = [16, 32], strides = [1, 1]} : vector<128x32xf32> to vector<16x32xf32>
    %230 = vector.extract_strided_slice %229 {offsets = [0, 0], sizes = [16, 8], strides = [1, 1]} : vector<16x32xf32> to vector<16x8xf32>
    %231 = vector.extract_strided_slice %229 {offsets = [0, 8], sizes = [16, 8], strides = [1, 1]} : vector<16x32xf32> to vector<16x8xf32>
    %232 = arith.maximumf %230, %231 : vector<16x8xf32>
    %233 = vector.extract_strided_slice %229 {offsets = [0, 16], sizes = [16, 8], strides = [1, 1]} : vector<16x32xf32> to vector<16x8xf32>
    %234 = vector.extract_strided_slice %229 {offsets = [0, 24], sizes = [16, 8], strides = [1, 1]} : vector<16x32xf32> to vector<16x8xf32>
    %235 = arith.maximumf %233, %234 : vector<16x8xf32>
    %236 = arith.maximumf %232, %235 : vector<16x8xf32>
    %c0_46 = arith.constant 0 : index
    %c168 = arith.constant 168 : index
    %237 = vector.load %arg12[%c0_46, %c168] : memref<16x512xf32, #tpu.memory_space<vmem>>, vector<16x8xf32>
    tpu.vector_store %arg12[%c0_46, %c168], %236 {strides = array<i32>} : memref<16x512xf32, #tpu.memory_space<vmem>>, vector<16x8xf32>,
    %238 = vector.extract_strided_slice %183 {offsets = [96, 0], sizes = [16, 32], strides = [1, 1]} : vector<128x32xf32> to vector<16x32xf32>
    %239 = vector.extract_strided_slice %238 {offsets = [0, 0], sizes = [16, 8], strides = [1, 1]} : vector<16x32xf32> to vector<16x8xf32>
    %240 = vector.extract_strided_slice %238 {offsets = [0, 8], sizes = [16, 8], strides = [1, 1]} : vector<16x32xf32> to vector<16x8xf32>
    %241 = arith.maximumf %239, %240 : vector<16x8xf32>
    %242 = vector.extract_strided_slice %238 {offsets = [0, 16], sizes = [16, 8], strides = [1, 1]} : vector<16x32xf32> to vector<16x8xf32>
    %243 = vector.extract_strided_slice %238 {offsets = [0, 24], sizes = [16, 8], strides = [1, 1]} : vector<16x32xf32> to vector<16x8xf32>
    %244 = arith.maximumf %242, %243 : vector<16x8xf32>
    %245 = arith.maximumf %241, %244 : vector<16x8xf32>
    %c0_47 = arith.constant 0 : index
    %c176 = arith.constant 176 : index
    %246 = vector.load %arg12[%c0_47, %c176] : memref<16x512xf32, #tpu.memory_space<vmem>>, vector<16x8xf32>
    tpu.vector_store %arg12[%c0_47, %c176], %245 {strides = array<i32>} : memref<16x512xf32, #tpu.memory_space<vmem>>, vector<16x8xf32>,
    %247 = vector.extract_strided_slice %183 {offsets = [112, 0], sizes = [16, 32], strides = [1, 1]} : vector<128x32xf32> to vector<16x32xf32>
    %248 = vector.extract_strided_slice %247 {offsets = [0, 0], sizes = [16, 8], strides = [1, 1]} : vector<16x32xf32> to vector<16x8xf32>
    %249 = vector.extract_strided_slice %247 {offsets = [0, 8], sizes = [16, 8], strides = [1, 1]} : vector<16x32xf32> to vector<16x8xf32>
    %250 = arith.maximumf %248, %249 : vector<16x8xf32>
    %251 = vector.extract_strided_slice %247 {offsets = [0, 16], sizes = [16, 8], strides = [1, 1]} : vector<16x32xf32> to vector<16x8xf32>
    %252 = vector.extract_strided_slice %247 {offsets = [0, 24], sizes = [16, 8], strides = [1, 1]} : vector<16x32xf32> to vector<16x8xf32>
    %253 = arith.maximumf %251, %252 : vector<16x8xf32>
    %254 = arith.maximumf %250, %253 : vector<16x8xf32>
    %c0_48 = arith.constant 0 : index
    %c184 = arith.constant 184 : index
    %255 = vector.load %arg12[%c0_48, %c184] : memref<16x512xf32, #tpu.memory_space<vmem>>, vector<16x8xf32>
    tpu.vector_store %arg12[%c0_48, %c184], %254 {strides = array<i32>} : memref<16x512xf32, #tpu.memory_space<vmem>>, vector<16x8xf32>,
    %c0_49 = arith.constant 0 : index
    %c384 = arith.constant 384 : index
    %c0_50 = arith.constant 0 : index
    %256 = vector.load %arg1[%c0_49, %c384, %c0_50] : memref<1x1024x100xbf16, #tpu.memory_space<vmem>>, vector<1x128x100xbf16>
    %257 = vector.shape_cast %256 : vector<1x128x100xbf16> to vector<128x100xbf16>
    %cst_51 = arith.constant dense<0.000000e+00> : vector<128x32xf32>
    %258 = tpu.matmul %257, %6, %cst_51 {dimension_numbers = #tpu.dot_dimension_numbers<[1], [0], [0], [1], [0, 0, 1, 1], [], []>} : vector<128x100xbf16>, vector<100x32xbf16>, vector<128x32xf32> -> vector<128x32xf32>
    %259 = vector.broadcast %0 : vector<1x32xf32> to vector<128x32xf32>
    %260 = arith.addf %258, %259 : vector<128x32xf32>
    %cst_52 = arith.constant 0.000000e+00 : f32
    %261 = vector.broadcast %cst_52 : f32 to vector<128x32xf32>
    %262 = arith.maximumf %260, %261 : vector<128x32xf32>
    %263 = vector.broadcast %1 : vector<1x32xf32> to vector<128x32xf32>
    %264 = arith.mulf %262, %263 : vector<128x32xf32>
    %265 = vector.broadcast %2 : vector<1x32xf32> to vector<128x32xf32>
    %266 = arith.addf %264, %265 : vector<128x32xf32>
    %267 = vector.extract_strided_slice %266 {offsets = [0, 0], sizes = [16, 32], strides = [1, 1]} : vector<128x32xf32> to vector<16x32xf32>
    %268 = vector.extract_strided_slice %267 {offsets = [0, 0], sizes = [16, 8], strides = [1, 1]} : vector<16x32xf32> to vector<16x8xf32>
    %269 = vector.extract_strided_slice %267 {offsets = [0, 8], sizes = [16, 8], strides = [1, 1]} : vector<16x32xf32> to vector<16x8xf32>
    %270 = arith.maximumf %268, %269 : vector<16x8xf32>
    %271 = vector.extract_strided_slice %267 {offsets = [0, 16], sizes = [16, 8], strides = [1, 1]} : vector<16x32xf32> to vector<16x8xf32>
    %272 = vector.extract_strided_slice %267 {offsets = [0, 24], sizes = [16, 8], strides = [1, 1]} : vector<16x32xf32> to vector<16x8xf32>
    %273 = arith.maximumf %271, %272 : vector<16x8xf32>
    %274 = arith.maximumf %270, %273 : vector<16x8xf32>
    %c0_53 = arith.constant 0 : index
    %c192 = arith.constant 192 : index
    %275 = vector.load %arg12[%c0_53, %c192] : memref<16x512xf32, #tpu.memory_space<vmem>>, vector<16x8xf32>
    tpu.vector_store %arg12[%c0_53, %c192], %274 {strides = array<i32>} : memref<16x512xf32, #tpu.memory_space<vmem>>, vector<16x8xf32>,
    %276 = vector.extract_strided_slice %266 {offsets = [16, 0], sizes = [16, 32], strides = [1, 1]} : vector<128x32xf32> to vector<16x32xf32>
    %277 = vector.extract_strided_slice %276 {offsets = [0, 0], sizes = [16, 8], strides = [1, 1]} : vector<16x32xf32> to vector<16x8xf32>
    %278 = vector.extract_strided_slice %276 {offsets = [0, 8], sizes = [16, 8], strides = [1, 1]} : vector<16x32xf32> to vector<16x8xf32>
    %279 = arith.maximumf %277, %278 : vector<16x8xf32>
    %280 = vector.extract_strided_slice %276 {offsets = [0, 16], sizes = [16, 8], strides = [1, 1]} : vector<16x32xf32> to vector<16x8xf32>
    %281 = vector.extract_strided_slice %276 {offsets = [0, 24], sizes = [16, 8], strides = [1, 1]} : vector<16x32xf32> to vector<16x8xf32>
    %282 = arith.maximumf %280, %281 : vector<16x8xf32>
    %283 = arith.maximumf %279, %282 : vector<16x8xf32>
    %c0_54 = arith.constant 0 : index
    %c200 = arith.constant 200 : index
    %284 = vector.load %arg12[%c0_54, %c200] : memref<16x512xf32, #tpu.memory_space<vmem>>, vector<16x8xf32>
    tpu.vector_store %arg12[%c0_54, %c200], %283 {strides = array<i32>} : memref<16x512xf32, #tpu.memory_space<vmem>>, vector<16x8xf32>,
    %285 = vector.extract_strided_slice %266 {offsets = [32, 0], sizes = [16, 32], strides = [1, 1]} : vector<128x32xf32> to vector<16x32xf32>
    %286 = vector.extract_strided_slice %285 {offsets = [0, 0], sizes = [16, 8], strides = [1, 1]} : vector<16x32xf32> to vector<16x8xf32>
    %287 = vector.extract_strided_slice %285 {offsets = [0, 8], sizes = [16, 8], strides = [1, 1]} : vector<16x32xf32> to vector<16x8xf32>
    %288 = arith.maximumf %286, %287 : vector<16x8xf32>
    %289 = vector.extract_strided_slice %285 {offsets = [0, 16], sizes = [16, 8], strides = [1, 1]} : vector<16x32xf32> to vector<16x8xf32>
    %290 = vector.extract_strided_slice %285 {offsets = [0, 24], sizes = [16, 8], strides = [1, 1]} : vector<16x32xf32> to vector<16x8xf32>
    %291 = arith.maximumf %289, %290 : vector<16x8xf32>
    %292 = arith.maximumf %288, %291 : vector<16x8xf32>
    %c0_55 = arith.constant 0 : index
    %c208 = arith.constant 208 : index
    %293 = vector.load %arg12[%c0_55, %c208] : memref<16x512xf32, #tpu.memory_space<vmem>>, vector<16x8xf32>
    tpu.vector_store %arg12[%c0_55, %c208], %292 {strides = array<i32>} : memref<16x512xf32, #tpu.memory_space<vmem>>, vector<16x8xf32>,
    %294 = vector.extract_strided_slice %266 {offsets = [48, 0], sizes = [16, 32], strides = [1, 1]} : vector<128x32xf32> to vector<16x32xf32>
    %295 = vector.extract_strided_slice %294 {offsets = [0, 0], sizes = [16, 8], strides = [1, 1]} : vector<16x32xf32> to vector<16x8xf32>
    %296 = vector.extract_strided_slice %294 {offsets = [0, 8], sizes = [16, 8], strides = [1, 1]} : vector<16x32xf32> to vector<16x8xf32>
    %297 = arith.maximumf %295, %296 : vector<16x8xf32>
    %298 = vector.extract_strided_slice %294 {offsets = [0, 16], sizes = [16, 8], strides = [1, 1]} : vector<16x32xf32> to vector<16x8xf32>
    %299 = vector.extract_strided_slice %294 {offsets = [0, 24], sizes = [16, 8], strides = [1, 1]} : vector<16x32xf32> to vector<16x8xf32>
    %300 = arith.maximumf %298, %299 : vector<16x8xf32>
    %301 = arith.maximumf %297, %300 : vector<16x8xf32>
    %c0_56 = arith.constant 0 : index
    %c216 = arith.constant 216 : index
    %302 = vector.load %arg12[%c0_56, %c216] : memref<16x512xf32, #tpu.memory_space<vmem>>, vector<16x8xf32>
    tpu.vector_store %arg12[%c0_56, %c216], %301 {strides = array<i32>} : memref<16x512xf32, #tpu.memory_space<vmem>>, vector<16x8xf32>,
    %303 = vector.extract_strided_slice %266 {offsets = [64, 0], sizes = [16, 32], strides = [1, 1]} : vector<128x32xf32> to vector<16x32xf32>
    %304 = vector.extract_strided_slice %303 {offsets = [0, 0], sizes = [16, 8], strides = [1, 1]} : vector<16x32xf32> to vector<16x8xf32>
    %305 = vector.extract_strided_slice %303 {offsets = [0, 8], sizes = [16, 8], strides = [1, 1]} : vector<16x32xf32> to vector<16x8xf32>
    %306 = arith.maximumf %304, %305 : vector<16x8xf32>
    %307 = vector.extract_strided_slice %303 {offsets = [0, 16], sizes = [16, 8], strides = [1, 1]} : vector<16x32xf32> to vector<16x8xf32>
    %308 = vector.extract_strided_slice %303 {offsets = [0, 24], sizes = [16, 8], strides = [1, 1]} : vector<16x32xf32> to vector<16x8xf32>
    %309 = arith.maximumf %307, %308 : vector<16x8xf32>
    %310 = arith.maximumf %306, %309 : vector<16x8xf32>
    %c0_57 = arith.constant 0 : index
    %c224 = arith.constant 224 : index
    %311 = vector.load %arg12[%c0_57, %c224] : memref<16x512xf32, #tpu.memory_space<vmem>>, vector<16x8xf32>
    tpu.vector_store %arg12[%c0_57, %c224], %310 {strides = array<i32>} : memref<16x512xf32, #tpu.memory_space<vmem>>, vector<16x8xf32>,
    %312 = vector.extract_strided_slice %266 {offsets = [80, 0], sizes = [16, 32], strides = [1, 1]} : vector<128x32xf32> to vector<16x32xf32>
    %313 = vector.extract_strided_slice %312 {offsets = [0, 0], sizes = [16, 8], strides = [1, 1]} : vector<16x32xf32> to vector<16x8xf32>
    %314 = vector.extract_strided_slice %312 {offsets = [0, 8], sizes = [16, 8], strides = [1, 1]} : vector<16x32xf32> to vector<16x8xf32>
    %315 = arith.maximumf %313, %314 : vector<16x8xf32>
    %316 = vector.extract_strided_slice %312 {offsets = [0, 16], sizes = [16, 8], strides = [1, 1]} : vector<16x32xf32> to vector<16x8xf32>
    %317 = vector.extract_strided_slice %312 {offsets = [0, 24], sizes = [16, 8], strides = [1, 1]} : vector<16x32xf32> to vector<16x8xf32>
    %318 = arith.maximumf %316, %317 : vector<16x8xf32>
    %319 = arith.maximumf %315, %318 : vector<16x8xf32>
    %c0_58 = arith.constant 0 : index
    %c232 = arith.constant 232 : index
    %320 = vector.load %arg12[%c0_58, %c232] : memref<16x512xf32, #tpu.memory_space<vmem>>, vector<16x8xf32>
    tpu.vector_store %arg12[%c0_58, %c232], %319 {strides = array<i32>} : memref<16x512xf32, #tpu.memory_space<vmem>>, vector<16x8xf32>,
    %321 = vector.extract_strided_slice %266 {offsets = [96, 0], sizes = [16, 32], strides = [1, 1]} : vector<128x32xf32> to vector<16x32xf32>
    %322 = vector.extract_strided_slice %321 {offsets = [0, 0], sizes = [16, 8], strides = [1, 1]} : vector<16x32xf32> to vector<16x8xf32>
    %323 = vector.extract_strided_slice %321 {offsets = [0, 8], sizes = [16, 8], strides = [1, 1]} : vector<16x32xf32> to vector<16x8xf32>
    %324 = arith.maximumf %322, %323 : vector<16x8xf32>
    %325 = vector.extract_strided_slice %321 {offsets = [0, 16], sizes = [16, 8], strides = [1, 1]} : vector<16x32xf32> to vector<16x8xf32>
    %326 = vector.extract_strided_slice %321 {offsets = [0, 24], sizes = [16, 8], strides = [1, 1]} : vector<16x32xf32> to vector<16x8xf32>
    %327 = arith.maximumf %325, %326 : vector<16x8xf32>
    %328 = arith.maximumf %324, %327 : vector<16x8xf32>
    %c0_59 = arith.constant 0 : index
    %c240 = arith.constant 240 : index
    %329 = vector.load %arg12[%c0_59, %c240] : memref<16x512xf32, #tpu.memory_space<vmem>>, vector<16x8xf32>
    tpu.vector_store %arg12[%c0_59, %c240], %328 {strides = array<i32>} : memref<16x512xf32, #tpu.memory_space<vmem>>, vector<16x8xf32>,
    %330 = vector.extract_strided_slice %266 {offsets = [112, 0], sizes = [16, 32], strides = [1, 1]} : vector<128x32xf32> to vector<16x32xf32>
    %331 = vector.extract_strided_slice %330 {offsets = [0, 0], sizes = [16, 8], strides = [1, 1]} : vector<16x32xf32> to vector<16x8xf32>
    %332 = vector.extract_strided_slice %330 {offsets = [0, 8], sizes = [16, 8], strides = [1, 1]} : vector<16x32xf32> to vector<16x8xf32>
    %333 = arith.maximumf %331, %332 : vector<16x8xf32>
    %334 = vector.extract_strided_slice %330 {offsets = [0, 16], sizes = [16, 8], strides = [1, 1]} : vector<16x32xf32> to vector<16x8xf32>
    %335 = vector.extract_strided_slice %330 {offsets = [0, 24], sizes = [16, 8], strides = [1, 1]} : vector<16x32xf32> to vector<16x8xf32>
    %336 = arith.maximumf %334, %335 : vector<16x8xf32>
    %337 = arith.maximumf %333, %336 : vector<16x8xf32>
    %c0_60 = arith.constant 0 : index
    %c248 = arith.constant 248 : index
    %338 = vector.load %arg12[%c0_60, %c248] : memref<16x512xf32, #tpu.memory_space<vmem>>, vector<16x8xf32>
    tpu.vector_store %arg12[%c0_60, %c248], %337 {strides = array<i32>} : memref<16x512xf32, #tpu.memory_space<vmem>>, vector<16x8xf32>,
    %c0_61 = arith.constant 0 : index
    %c512 = arith.constant 512 : index
    %c0_62 = arith.constant 0 : index
    %339 = vector.load %arg1[%c0_61, %c512, %c0_62] : memref<1x1024x100xbf16, #tpu.memory_space<vmem>>, vector<1x128x100xbf16>
    %340 = vector.shape_cast %339 : vector<1x128x100xbf16> to vector<128x100xbf16>
    %cst_63 = arith.constant dense<0.000000e+00> : vector<128x32xf32>
    %341 = tpu.matmul %340, %6, %cst_63 {dimension_numbers = #tpu.dot_dimension_numbers<[1], [0], [0], [1], [0, 0, 1, 1], [], []>} : vector<128x100xbf16>, vector<100x32xbf16>, vector<128x32xf32> -> vector<128x32xf32>
    %342 = vector.broadcast %0 : vector<1x32xf32> to vector<128x32xf32>
    %343 = arith.addf %341, %342 : vector<128x32xf32>
    %cst_64 = arith.constant 0.000000e+00 : f32
    %344 = vector.broadcast %cst_64 : f32 to vector<128x32xf32>
    %345 = arith.maximumf %343, %344 : vector<128x32xf32>
    %346 = vector.broadcast %1 : vector<1x32xf32> to vector<128x32xf32>
    %347 = arith.mulf %345, %346 : vector<128x32xf32>
    %348 = vector.broadcast %2 : vector<1x32xf32> to vector<128x32xf32>
    %349 = arith.addf %347, %348 : vector<128x32xf32>
    %350 = vector.extract_strided_slice %349 {offsets = [0, 0], sizes = [16, 32], strides = [1, 1]} : vector<128x32xf32> to vector<16x32xf32>
    %351 = vector.extract_strided_slice %350 {offsets = [0, 0], sizes = [16, 8], strides = [1, 1]} : vector<16x32xf32> to vector<16x8xf32>
    %352 = vector.extract_strided_slice %350 {offsets = [0, 8], sizes = [16, 8], strides = [1, 1]} : vector<16x32xf32> to vector<16x8xf32>
    %353 = arith.maximumf %351, %352 : vector<16x8xf32>
    %354 = vector.extract_strided_slice %350 {offsets = [0, 16], sizes = [16, 8], strides = [1, 1]} : vector<16x32xf32> to vector<16x8xf32>
    %355 = vector.extract_strided_slice %350 {offsets = [0, 24], sizes = [16, 8], strides = [1, 1]} : vector<16x32xf32> to vector<16x8xf32>
    %356 = arith.maximumf %354, %355 : vector<16x8xf32>
    %357 = arith.maximumf %353, %356 : vector<16x8xf32>
    %c0_65 = arith.constant 0 : index
    %c256_66 = arith.constant 256 : index
    %358 = vector.load %arg12[%c0_65, %c256_66] : memref<16x512xf32, #tpu.memory_space<vmem>>, vector<16x8xf32>
    tpu.vector_store %arg12[%c0_65, %c256_66], %357 {strides = array<i32>} : memref<16x512xf32, #tpu.memory_space<vmem>>, vector<16x8xf32>,
    %359 = vector.extract_strided_slice %349 {offsets = [16, 0], sizes = [16, 32], strides = [1, 1]} : vector<128x32xf32> to vector<16x32xf32>
    %360 = vector.extract_strided_slice %359 {offsets = [0, 0], sizes = [16, 8], strides = [1, 1]} : vector<16x32xf32> to vector<16x8xf32>
    %361 = vector.extract_strided_slice %359 {offsets = [0, 8], sizes = [16, 8], strides = [1, 1]} : vector<16x32xf32> to vector<16x8xf32>
    %362 = arith.maximumf %360, %361 : vector<16x8xf32>
    %363 = vector.extract_strided_slice %359 {offsets = [0, 16], sizes = [16, 8], strides = [1, 1]} : vector<16x32xf32> to vector<16x8xf32>
    %364 = vector.extract_strided_slice %359 {offsets = [0, 24], sizes = [16, 8], strides = [1, 1]} : vector<16x32xf32> to vector<16x8xf32>
    %365 = arith.maximumf %363, %364 : vector<16x8xf32>
    %366 = arith.maximumf %362, %365 : vector<16x8xf32>
    %c0_67 = arith.constant 0 : index
    %c264 = arith.constant 264 : index
    %367 = vector.load %arg12[%c0_67, %c264] : memref<16x512xf32, #tpu.memory_space<vmem>>, vector<16x8xf32>
    tpu.vector_store %arg12[%c0_67, %c264], %366 {strides = array<i32>} : memref<16x512xf32, #tpu.memory_space<vmem>>, vector<16x8xf32>,
    %368 = vector.extract_strided_slice %349 {offsets = [32, 0], sizes = [16, 32], strides = [1, 1]} : vector<128x32xf32> to vector<16x32xf32>
    %369 = vector.extract_strided_slice %368 {offsets = [0, 0], sizes = [16, 8], strides = [1, 1]} : vector<16x32xf32> to vector<16x8xf32>
    %370 = vector.extract_strided_slice %368 {offsets = [0, 8], sizes = [16, 8], strides = [1, 1]} : vector<16x32xf32> to vector<16x8xf32>
    %371 = arith.maximumf %369, %370 : vector<16x8xf32>
    %372 = vector.extract_strided_slice %368 {offsets = [0, 16], sizes = [16, 8], strides = [1, 1]} : vector<16x32xf32> to vector<16x8xf32>
    %373 = vector.extract_strided_slice %368 {offsets = [0, 24], sizes = [16, 8], strides = [1, 1]} : vector<16x32xf32> to vector<16x8xf32>
    %374 = arith.maximumf %372, %373 : vector<16x8xf32>
    %375 = arith.maximumf %371, %374 : vector<16x8xf32>
    %c0_68 = arith.constant 0 : index
    %c272 = arith.constant 272 : index
    %376 = vector.load %arg12[%c0_68, %c272] : memref<16x512xf32, #tpu.memory_space<vmem>>, vector<16x8xf32>
    tpu.vector_store %arg12[%c0_68, %c272], %375 {strides = array<i32>} : memref<16x512xf32, #tpu.memory_space<vmem>>, vector<16x8xf32>,
    %377 = vector.extract_strided_slice %349 {offsets = [48, 0], sizes = [16, 32], strides = [1, 1]} : vector<128x32xf32> to vector<16x32xf32>
    %378 = vector.extract_strided_slice %377 {offsets = [0, 0], sizes = [16, 8], strides = [1, 1]} : vector<16x32xf32> to vector<16x8xf32>
    %379 = vector.extract_strided_slice %377 {offsets = [0, 8], sizes = [16, 8], strides = [1, 1]} : vector<16x32xf32> to vector<16x8xf32>
    %380 = arith.maximumf %378, %379 : vector<16x8xf32>
    %381 = vector.extract_strided_slice %377 {offsets = [0, 16], sizes = [16, 8], strides = [1, 1]} : vector<16x32xf32> to vector<16x8xf32>
    %382 = vector.extract_strided_slice %377 {offsets = [0, 24], sizes = [16, 8], strides = [1, 1]} : vector<16x32xf32> to vector<16x8xf32>
    %383 = arith.maximumf %381, %382 : vector<16x8xf32>
    %384 = arith.maximumf %380, %383 : vector<16x8xf32>
    %c0_69 = arith.constant 0 : index
    %c280 = arith.constant 280 : index
    %385 = vector.load %arg12[%c0_69, %c280] : memref<16x512xf32, #tpu.memory_space<vmem>>, vector<16x8xf32>
    tpu.vector_store %arg12[%c0_69, %c280], %384 {strides = array<i32>} : memref<16x512xf32, #tpu.memory_space<vmem>>, vector<16x8xf32>,
    %386 = vector.extract_strided_slice %349 {offsets = [64, 0], sizes = [16, 32], strides = [1, 1]} : vector<128x32xf32> to vector<16x32xf32>
    %387 = vector.extract_strided_slice %386 {offsets = [0, 0], sizes = [16, 8], strides = [1, 1]} : vector<16x32xf32> to vector<16x8xf32>
    %388 = vector.extract_strided_slice %386 {offsets = [0, 8], sizes = [16, 8], strides = [1, 1]} : vector<16x32xf32> to vector<16x8xf32>
    %389 = arith.maximumf %387, %388 : vector<16x8xf32>
    %390 = vector.extract_strided_slice %386 {offsets = [0, 16], sizes = [16, 8], strides = [1, 1]} : vector<16x32xf32> to vector<16x8xf32>
    %391 = vector.extract_strided_slice %386 {offsets = [0, 24], sizes = [16, 8], strides = [1, 1]} : vector<16x32xf32> to vector<16x8xf32>
    %392 = arith.maximumf %390, %391 : vector<16x8xf32>
    %393 = arith.maximumf %389, %392 : vector<16x8xf32>
    %c0_70 = arith.constant 0 : index
    %c288 = arith.constant 288 : index
    %394 = vector.load %arg12[%c0_70, %c288] : memref<16x512xf32, #tpu.memory_space<vmem>>, vector<16x8xf32>
    tpu.vector_store %arg12[%c0_70, %c288], %393 {strides = array<i32>} : memref<16x512xf32, #tpu.memory_space<vmem>>, vector<16x8xf32>,
    %395 = vector.extract_strided_slice %349 {offsets = [80, 0], sizes = [16, 32], strides = [1, 1]} : vector<128x32xf32> to vector<16x32xf32>
    %396 = vector.extract_strided_slice %395 {offsets = [0, 0], sizes = [16, 8], strides = [1, 1]} : vector<16x32xf32> to vector<16x8xf32>
    %397 = vector.extract_strided_slice %395 {offsets = [0, 8], sizes = [16, 8], strides = [1, 1]} : vector<16x32xf32> to vector<16x8xf32>
    %398 = arith.maximumf %396, %397 : vector<16x8xf32>
    %399 = vector.extract_strided_slice %395 {offsets = [0, 16], sizes = [16, 8], strides = [1, 1]} : vector<16x32xf32> to vector<16x8xf32>
    %400 = vector.extract_strided_slice %395 {offsets = [0, 24], sizes = [16, 8], strides = [1, 1]} : vector<16x32xf32> to vector<16x8xf32>
    %401 = arith.maximumf %399, %400 : vector<16x8xf32>
    %402 = arith.maximumf %398, %401 : vector<16x8xf32>
    %c0_71 = arith.constant 0 : index
    %c296 = arith.constant 296 : index
    %403 = vector.load %arg12[%c0_71, %c296] : memref<16x512xf32, #tpu.memory_space<vmem>>, vector<16x8xf32>
    tpu.vector_store %arg12[%c0_71, %c296], %402 {strides = array<i32>} : memref<16x512xf32, #tpu.memory_space<vmem>>, vector<16x8xf32>,
    %404 = vector.extract_strided_slice %349 {offsets = [96, 0], sizes = [16, 32], strides = [1, 1]} : vector<128x32xf32> to vector<16x32xf32>
    %405 = vector.extract_strided_slice %404 {offsets = [0, 0], sizes = [16, 8], strides = [1, 1]} : vector<16x32xf32> to vector<16x8xf32>
    %406 = vector.extract_strided_slice %404 {offsets = [0, 8], sizes = [16, 8], strides = [1, 1]} : vector<16x32xf32> to vector<16x8xf32>
    %407 = arith.maximumf %405, %406 : vector<16x8xf32>
    %408 = vector.extract_strided_slice %404 {offsets = [0, 16], sizes = [16, 8], strides = [1, 1]} : vector<16x32xf32> to vector<16x8xf32>
    %409 = vector.extract_strided_slice %404 {offsets = [0, 24], sizes = [16, 8], strides = [1, 1]} : vector<16x32xf32> to vector<16x8xf32>
    %410 = arith.maximumf %408, %409 : vector<16x8xf32>
    %411 = arith.maximumf %407, %410 : vector<16x8xf32>
    %c0_72 = arith.constant 0 : index
    %c304 = arith.constant 304 : index
    %412 = vector.load %arg12[%c0_72, %c304] : memref<16x512xf32, #tpu.memory_space<vmem>>, vector<16x8xf32>
    tpu.vector_store %arg12[%c0_72, %c304], %411 {strides = array<i32>} : memref<16x512xf32, #tpu.memory_space<vmem>>, vector<16x8xf32>,
    %413 = vector.extract_strided_slice %349 {offsets = [112, 0], sizes = [16, 32], strides = [1, 1]} : vector<128x32xf32> to vector<16x32xf32>
    %414 = vector.extract_strided_slice %413 {offsets = [0, 0], sizes = [16, 8], strides = [1, 1]} : vector<16x32xf32> to vector<16x8xf32>
    %415 = vector.extract_strided_slice %413 {offsets = [0, 8], sizes = [16, 8], strides = [1, 1]} : vector<16x32xf32> to vector<16x8xf32>
    %416 = arith.maximumf %414, %415 : vector<16x8xf32>
    %417 = vector.extract_strided_slice %413 {offsets = [0, 16], sizes = [16, 8], strides = [1, 1]} : vector<16x32xf32> to vector<16x8xf32>
    %418 = vector.extract_strided_slice %413 {offsets = [0, 24], sizes = [16, 8], strides = [1, 1]} : vector<16x32xf32> to vector<16x8xf32>
    %419 = arith.maximumf %417, %418 : vector<16x8xf32>
    %420 = arith.maximumf %416, %419 : vector<16x8xf32>
    %c0_73 = arith.constant 0 : index
    %c312 = arith.constant 312 : index
    %421 = vector.load %arg12[%c0_73, %c312] : memref<16x512xf32, #tpu.memory_space<vmem>>, vector<16x8xf32>
    tpu.vector_store %arg12[%c0_73, %c312], %420 {strides = array<i32>} : memref<16x512xf32, #tpu.memory_space<vmem>>, vector<16x8xf32>,
    %c0_74 = arith.constant 0 : index
    %c640 = arith.constant 640 : index
    %c0_75 = arith.constant 0 : index
    %422 = vector.load %arg1[%c0_74, %c640, %c0_75] : memref<1x1024x100xbf16, #tpu.memory_space<vmem>>, vector<1x128x100xbf16>
    %423 = vector.shape_cast %422 : vector<1x128x100xbf16> to vector<128x100xbf16>
    %cst_76 = arith.constant dense<0.000000e+00> : vector<128x32xf32>
    %424 = tpu.matmul %423, %6, %cst_76 {dimension_numbers = #tpu.dot_dimension_numbers<[1], [0], [0], [1], [0, 0, 1, 1], [], []>} : vector<128x100xbf16>, vector<100x32xbf16>, vector<128x32xf32> -> vector<128x32xf32>
    %425 = vector.broadcast %0 : vector<1x32xf32> to vector<128x32xf32>
    %426 = arith.addf %424, %425 : vector<128x32xf32>
    %cst_77 = arith.constant 0.000000e+00 : f32
    %427 = vector.broadcast %cst_77 : f32 to vector<128x32xf32>
    %428 = arith.maximumf %426, %427 : vector<128x32xf32>
    %429 = vector.broadcast %1 : vector<1x32xf32> to vector<128x32xf32>
    %430 = arith.mulf %428, %429 : vector<128x32xf32>
    %431 = vector.broadcast %2 : vector<1x32xf32> to vector<128x32xf32>
    %432 = arith.addf %430, %431 : vector<128x32xf32>
    %433 = vector.extract_strided_slice %432 {offsets = [0, 0], sizes = [16, 32], strides = [1, 1]} : vector<128x32xf32> to vector<16x32xf32>
    %434 = vector.extract_strided_slice %433 {offsets = [0, 0], sizes = [16, 8], strides = [1, 1]} : vector<16x32xf32> to vector<16x8xf32>
    %435 = vector.extract_strided_slice %433 {offsets = [0, 8], sizes = [16, 8], strides = [1, 1]} : vector<16x32xf32> to vector<16x8xf32>
    %436 = arith.maximumf %434, %435 : vector<16x8xf32>
    %437 = vector.extract_strided_slice %433 {offsets = [0, 16], sizes = [16, 8], strides = [1, 1]} : vector<16x32xf32> to vector<16x8xf32>
    %438 = vector.extract_strided_slice %433 {offsets = [0, 24], sizes = [16, 8], strides = [1, 1]} : vector<16x32xf32> to vector<16x8xf32>
    %439 = arith.maximumf %437, %438 : vector<16x8xf32>
    %440 = arith.maximumf %436, %439 : vector<16x8xf32>
    %c0_78 = arith.constant 0 : index
    %c320 = arith.constant 320 : index
    %441 = vector.load %arg12[%c0_78, %c320] : memref<16x512xf32, #tpu.memory_space<vmem>>, vector<16x8xf32>
    tpu.vector_store %arg12[%c0_78, %c320], %440 {strides = array<i32>} : memref<16x512xf32, #tpu.memory_space<vmem>>, vector<16x8xf32>,
    %442 = vector.extract_strided_slice %432 {offsets = [16, 0], sizes = [16, 32], strides = [1, 1]} : vector<128x32xf32> to vector<16x32xf32>
    %443 = vector.extract_strided_slice %442 {offsets = [0, 0], sizes = [16, 8], strides = [1, 1]} : vector<16x32xf32> to vector<16x8xf32>
    %444 = vector.extract_strided_slice %442 {offsets = [0, 8], sizes = [16, 8], strides = [1, 1]} : vector<16x32xf32> to vector<16x8xf32>
    %445 = arith.maximumf %443, %444 : vector<16x8xf32>
    %446 = vector.extract_strided_slice %442 {offsets = [0, 16], sizes = [16, 8], strides = [1, 1]} : vector<16x32xf32> to vector<16x8xf32>
    %447 = vector.extract_strided_slice %442 {offsets = [0, 24], sizes = [16, 8], strides = [1, 1]} : vector<16x32xf32> to vector<16x8xf32>
    %448 = arith.maximumf %446, %447 : vector<16x8xf32>
    %449 = arith.maximumf %445, %448 : vector<16x8xf32>
    %c0_79 = arith.constant 0 : index
    %c328 = arith.constant 328 : index
    %450 = vector.load %arg12[%c0_79, %c328] : memref<16x512xf32, #tpu.memory_space<vmem>>, vector<16x8xf32>
    tpu.vector_store %arg12[%c0_79, %c328], %449 {strides = array<i32>} : memref<16x512xf32, #tpu.memory_space<vmem>>, vector<16x8xf32>,
    %451 = vector.extract_strided_slice %432 {offsets = [32, 0], sizes = [16, 32], strides = [1, 1]} : vector<128x32xf32> to vector<16x32xf32>
    %452 = vector.extract_strided_slice %451 {offsets = [0, 0], sizes = [16, 8], strides = [1, 1]} : vector<16x32xf32> to vector<16x8xf32>
    %453 = vector.extract_strided_slice %451 {offsets = [0, 8], sizes = [16, 8], strides = [1, 1]} : vector<16x32xf32> to vector<16x8xf32>
    %454 = arith.maximumf %452, %453 : vector<16x8xf32>
    %455 = vector.extract_strided_slice %451 {offsets = [0, 16], sizes = [16, 8], strides = [1, 1]} : vector<16x32xf32> to vector<16x8xf32>
    %456 = vector.extract_strided_slice %451 {offsets = [0, 24], sizes = [16, 8], strides = [1, 1]} : vector<16x32xf32> to vector<16x8xf32>
    %457 = arith.maximumf %455, %456 : vector<16x8xf32>
    %458 = arith.maximumf %454, %457 : vector<16x8xf32>
    %c0_80 = arith.constant 0 : index
    %c336 = arith.constant 336 : index
    %459 = vector.load %arg12[%c0_80, %c336] : memref<16x512xf32, #tpu.memory_space<vmem>>, vector<16x8xf32>
    tpu.vector_store %arg12[%c0_80, %c336], %458 {strides = array<i32>} : memref<16x512xf32, #tpu.memory_space<vmem>>, vector<16x8xf32>,
    %460 = vector.extract_strided_slice %432 {offsets = [48, 0], sizes = [16, 32], strides = [1, 1]} : vector<128x32xf32> to vector<16x32xf32>
    %461 = vector.extract_strided_slice %460 {offsets = [0, 0], sizes = [16, 8], strides = [1, 1]} : vector<16x32xf32> to vector<16x8xf32>
    %462 = vector.extract_strided_slice %460 {offsets = [0, 8], sizes = [16, 8], strides = [1, 1]} : vector<16x32xf32> to vector<16x8xf32>
    %463 = arith.maximumf %461, %462 : vector<16x8xf32>
    %464 = vector.extract_strided_slice %460 {offsets = [0, 16], sizes = [16, 8], strides = [1, 1]} : vector<16x32xf32> to vector<16x8xf32>
    %465 = vector.extract_strided_slice %460 {offsets = [0, 24], sizes = [16, 8], strides = [1, 1]} : vector<16x32xf32> to vector<16x8xf32>
    %466 = arith.maximumf %464, %465 : vector<16x8xf32>
    %467 = arith.maximumf %463, %466 : vector<16x8xf32>
    %c0_81 = arith.constant 0 : index
    %c344 = arith.constant 344 : index
    %468 = vector.load %arg12[%c0_81, %c344] : memref<16x512xf32, #tpu.memory_space<vmem>>, vector<16x8xf32>
    tpu.vector_store %arg12[%c0_81, %c344], %467 {strides = array<i32>} : memref<16x512xf32, #tpu.memory_space<vmem>>, vector<16x8xf32>,
    %469 = vector.extract_strided_slice %432 {offsets = [64, 0], sizes = [16, 32], strides = [1, 1]} : vector<128x32xf32> to vector<16x32xf32>
    %470 = vector.extract_strided_slice %469 {offsets = [0, 0], sizes = [16, 8], strides = [1, 1]} : vector<16x32xf32> to vector<16x8xf32>
    %471 = vector.extract_strided_slice %469 {offsets = [0, 8], sizes = [16, 8], strides = [1, 1]} : vector<16x32xf32> to vector<16x8xf32>
    %472 = arith.maximumf %470, %471 : vector<16x8xf32>
    %473 = vector.extract_strided_slice %469 {offsets = [0, 16], sizes = [16, 8], strides = [1, 1]} : vector<16x32xf32> to vector<16x8xf32>
    %474 = vector.extract_strided_slice %469 {offsets = [0, 24], sizes = [16, 8], strides = [1, 1]} : vector<16x32xf32> to vector<16x8xf32>
    %475 = arith.maximumf %473, %474 : vector<16x8xf32>
    %476 = arith.maximumf %472, %475 : vector<16x8xf32>
    %c0_82 = arith.constant 0 : index
    %c352 = arith.constant 352 : index
    %477 = vector.load %arg12[%c0_82, %c352] : memref<16x512xf32, #tpu.memory_space<vmem>>, vector<16x8xf32>
    tpu.vector_store %arg12[%c0_82, %c352], %476 {strides = array<i32>} : memref<16x512xf32, #tpu.memory_space<vmem>>, vector<16x8xf32>,
    %478 = vector.extract_strided_slice %432 {offsets = [80, 0], sizes = [16, 32], strides = [1, 1]} : vector<128x32xf32> to vector<16x32xf32>
    %479 = vector.extract_strided_slice %478 {offsets = [0, 0], sizes = [16, 8], strides = [1, 1]} : vector<16x32xf32> to vector<16x8xf32>
    %480 = vector.extract_strided_slice %478 {offsets = [0, 8], sizes = [16, 8], strides = [1, 1]} : vector<16x32xf32> to vector<16x8xf32>
    %481 = arith.maximumf %479, %480 : vector<16x8xf32>
    %482 = vector.extract_strided_slice %478 {offsets = [0, 16], sizes = [16, 8], strides = [1, 1]} : vector<16x32xf32> to vector<16x8xf32>
    %483 = vector.extract_strided_slice %478 {offsets = [0, 24], sizes = [16, 8], strides = [1, 1]} : vector<16x32xf32> to vector<16x8xf32>
    %484 = arith.maximumf %482, %483 : vector<16x8xf32>
    %485 = arith.maximumf %481, %484 : vector<16x8xf32>
    %c0_83 = arith.constant 0 : index
    %c360 = arith.constant 360 : index
    %486 = vector.load %arg12[%c0_83, %c360] : memref<16x512xf32, #tpu.memory_space<vmem>>, vector<16x8xf32>
    tpu.vector_store %arg12[%c0_83, %c360], %485 {strides = array<i32>} : memref<16x512xf32, #tpu.memory_space<vmem>>, vector<16x8xf32>,
    %487 = vector.extract_strided_slice %432 {offsets = [96, 0], sizes = [16, 32], strides = [1, 1]} : vector<128x32xf32> to vector<16x32xf32>
    %488 = vector.extract_strided_slice %487 {offsets = [0, 0], sizes = [16, 8], strides = [1, 1]} : vector<16x32xf32> to vector<16x8xf32>
    %489 = vector.extract_strided_slice %487 {offsets = [0, 8], sizes = [16, 8], strides = [1, 1]} : vector<16x32xf32> to vector<16x8xf32>
    %490 = arith.maximumf %488, %489 : vector<16x8xf32>
    %491 = vector.extract_strided_slice %487 {offsets = [0, 16], sizes = [16, 8], strides = [1, 1]} : vector<16x32xf32> to vector<16x8xf32>
    %492 = vector.extract_strided_slice %487 {offsets = [0, 24], sizes = [16, 8], strides = [1, 1]} : vector<16x32xf32> to vector<16x8xf32>
    %493 = arith.maximumf %491, %492 : vector<16x8xf32>
    %494 = arith.maximumf %490, %493 : vector<16x8xf32>
    %c0_84 = arith.constant 0 : index
    %c368 = arith.constant 368 : index
    %495 = vector.load %arg12[%c0_84, %c368] : memref<16x512xf32, #tpu.memory_space<vmem>>, vector<16x8xf32>
    tpu.vector_store %arg12[%c0_84, %c368], %494 {strides = array<i32>} : memref<16x512xf32, #tpu.memory_space<vmem>>, vector<16x8xf32>,
    %496 = vector.extract_strided_slice %432 {offsets = [112, 0], sizes = [16, 32], strides = [1, 1]} : vector<128x32xf32> to vector<16x32xf32>
    %497 = vector.extract_strided_slice %496 {offsets = [0, 0], sizes = [16, 8], strides = [1, 1]} : vector<16x32xf32> to vector<16x8xf32>
    %498 = vector.extract_strided_slice %496 {offsets = [0, 8], sizes = [16, 8], strides = [1, 1]} : vector<16x32xf32> to vector<16x8xf32>
    %499 = arith.maximumf %497, %498 : vector<16x8xf32>
    %500 = vector.extract_strided_slice %496 {offsets = [0, 16], sizes = [16, 8], strides = [1, 1]} : vector<16x32xf32> to vector<16x8xf32>
    %501 = vector.extract_strided_slice %496 {offsets = [0, 24], sizes = [16, 8], strides = [1, 1]} : vector<16x32xf32> to vector<16x8xf32>
    %502 = arith.maximumf %500, %501 : vector<16x8xf32>
    %503 = arith.maximumf %499, %502 : vector<16x8xf32>
    %c0_85 = arith.constant 0 : index
    %c376 = arith.constant 376 : index
    %504 = vector.load %arg12[%c0_85, %c376] : memref<16x512xf32, #tpu.memory_space<vmem>>, vector<16x8xf32>
    tpu.vector_store %arg12[%c0_85, %c376], %503 {strides = array<i32>} : memref<16x512xf32, #tpu.memory_space<vmem>>, vector<16x8xf32>,
    %c0_86 = arith.constant 0 : index
    %c768 = arith.constant 768 : index
    %c0_87 = arith.constant 0 : index
    %505 = vector.load %arg1[%c0_86, %c768, %c0_87] : memref<1x1024x100xbf16, #tpu.memory_space<vmem>>, vector<1x128x100xbf16>
    %506 = vector.shape_cast %505 : vector<1x128x100xbf16> to vector<128x100xbf16>
    %cst_88 = arith.constant dense<0.000000e+00> : vector<128x32xf32>
    %507 = tpu.matmul %506, %6, %cst_88 {dimension_numbers = #tpu.dot_dimension_numbers<[1], [0], [0], [1], [0, 0, 1, 1], [], []>} : vector<128x100xbf16>, vector<100x32xbf16>, vector<128x32xf32> -> vector<128x32xf32>
    %508 = vector.broadcast %0 : vector<1x32xf32> to vector<128x32xf32>
    %509 = arith.addf %507, %508 : vector<128x32xf32>
    %cst_89 = arith.constant 0.000000e+00 : f32
    %510 = vector.broadcast %cst_89 : f32 to vector<128x32xf32>
    %511 = arith.maximumf %509, %510 : vector<128x32xf32>
    %512 = vector.broadcast %1 : vector<1x32xf32> to vector<128x32xf32>
    %513 = arith.mulf %511, %512 : vector<128x32xf32>
    %514 = vector.broadcast %2 : vector<1x32xf32> to vector<128x32xf32>
    %515 = arith.addf %513, %514 : vector<128x32xf32>
    %516 = vector.extract_strided_slice %515 {offsets = [0, 0], sizes = [16, 32], strides = [1, 1]} : vector<128x32xf32> to vector<16x32xf32>
    %517 = vector.extract_strided_slice %516 {offsets = [0, 0], sizes = [16, 8], strides = [1, 1]} : vector<16x32xf32> to vector<16x8xf32>
    %518 = vector.extract_strided_slice %516 {offsets = [0, 8], sizes = [16, 8], strides = [1, 1]} : vector<16x32xf32> to vector<16x8xf32>
    %519 = arith.maximumf %517, %518 : vector<16x8xf32>
    %520 = vector.extract_strided_slice %516 {offsets = [0, 16], sizes = [16, 8], strides = [1, 1]} : vector<16x32xf32> to vector<16x8xf32>
    %521 = vector.extract_strided_slice %516 {offsets = [0, 24], sizes = [16, 8], strides = [1, 1]} : vector<16x32xf32> to vector<16x8xf32>
    %522 = arith.maximumf %520, %521 : vector<16x8xf32>
    %523 = arith.maximumf %519, %522 : vector<16x8xf32>
    %c0_90 = arith.constant 0 : index
    %c384_91 = arith.constant 384 : index
    %524 = vector.load %arg12[%c0_90, %c384_91] : memref<16x512xf32, #tpu.memory_space<vmem>>, vector<16x8xf32>
    tpu.vector_store %arg12[%c0_90, %c384_91], %523 {strides = array<i32>} : memref<16x512xf32, #tpu.memory_space<vmem>>, vector<16x8xf32>,
    %525 = vector.extract_strided_slice %515 {offsets = [16, 0], sizes = [16, 32], strides = [1, 1]} : vector<128x32xf32> to vector<16x32xf32>
    %526 = vector.extract_strided_slice %525 {offsets = [0, 0], sizes = [16, 8], strides = [1, 1]} : vector<16x32xf32> to vector<16x8xf32>
    %527 = vector.extract_strided_slice %525 {offsets = [0, 8], sizes = [16, 8], strides = [1, 1]} : vector<16x32xf32> to vector<16x8xf32>
    %528 = arith.maximumf %526, %527 : vector<16x8xf32>
    %529 = vector.extract_strided_slice %525 {offsets = [0, 16], sizes = [16, 8], strides = [1, 1]} : vector<16x32xf32> to vector<16x8xf32>
    %530 = vector.extract_strided_slice %525 {offsets = [0, 24], sizes = [16, 8], strides = [1, 1]} : vector<16x32xf32> to vector<16x8xf32>
    %531 = arith.maximumf %529, %530 : vector<16x8xf32>
    %532 = arith.maximumf %528, %531 : vector<16x8xf32>
    %c0_92 = arith.constant 0 : index
    %c392 = arith.constant 392 : index
    %533 = vector.load %arg12[%c0_92, %c392] : memref<16x512xf32, #tpu.memory_space<vmem>>, vector<16x8xf32>
    tpu.vector_store %arg12[%c0_92, %c392], %532 {strides = array<i32>} : memref<16x512xf32, #tpu.memory_space<vmem>>, vector<16x8xf32>,
    %534 = vector.extract_strided_slice %515 {offsets = [32, 0], sizes = [16, 32], strides = [1, 1]} : vector<128x32xf32> to vector<16x32xf32>
    %535 = vector.extract_strided_slice %534 {offsets = [0, 0], sizes = [16, 8], strides = [1, 1]} : vector<16x32xf32> to vector<16x8xf32>
    %536 = vector.extract_strided_slice %534 {offsets = [0, 8], sizes = [16, 8], strides = [1, 1]} : vector<16x32xf32> to vector<16x8xf32>
    %537 = arith.maximumf %535, %536 : vector<16x8xf32>
    %538 = vector.extract_strided_slice %534 {offsets = [0, 16], sizes = [16, 8], strides = [1, 1]} : vector<16x32xf32> to vector<16x8xf32>
    %539 = vector.extract_strided_slice %534 {offsets = [0, 24], sizes = [16, 8], strides = [1, 1]} : vector<16x32xf32> to vector<16x8xf32>
    %540 = arith.maximumf %538, %539 : vector<16x8xf32>
    %541 = arith.maximumf %537, %540 : vector<16x8xf32>
    %c0_93 = arith.constant 0 : index
    %c400 = arith.constant 400 : index
    %542 = vector.load %arg12[%c0_93, %c400] : memref<16x512xf32, #tpu.memory_space<vmem>>, vector<16x8xf32>
    tpu.vector_store %arg12[%c0_93, %c400], %541 {strides = array<i32>} : memref<16x512xf32, #tpu.memory_space<vmem>>, vector<16x8xf32>,
    %543 = vector.extract_strided_slice %515 {offsets = [48, 0], sizes = [16, 32], strides = [1, 1]} : vector<128x32xf32> to vector<16x32xf32>
    %544 = vector.extract_strided_slice %543 {offsets = [0, 0], sizes = [16, 8], strides = [1, 1]} : vector<16x32xf32> to vector<16x8xf32>
    %545 = vector.extract_strided_slice %543 {offsets = [0, 8], sizes = [16, 8], strides = [1, 1]} : vector<16x32xf32> to vector<16x8xf32>
    %546 = arith.maximumf %544, %545 : vector<16x8xf32>
    %547 = vector.extract_strided_slice %543 {offsets = [0, 16], sizes = [16, 8], strides = [1, 1]} : vector<16x32xf32> to vector<16x8xf32>
    %548 = vector.extract_strided_slice %543 {offsets = [0, 24], sizes = [16, 8], strides = [1, 1]} : vector<16x32xf32> to vector<16x8xf32>
    %549 = arith.maximumf %547, %548 : vector<16x8xf32>
    %550 = arith.maximumf %546, %549 : vector<16x8xf32>
    %c0_94 = arith.constant 0 : index
    %c408 = arith.constant 408 : index
    %551 = vector.load %arg12[%c0_94, %c408] : memref<16x512xf32, #tpu.memory_space<vmem>>, vector<16x8xf32>
    tpu.vector_store %arg12[%c0_94, %c408], %550 {strides = array<i32>} : memref<16x512xf32, #tpu.memory_space<vmem>>, vector<16x8xf32>,
    %552 = vector.extract_strided_slice %515 {offsets = [64, 0], sizes = [16, 32], strides = [1, 1]} : vector<128x32xf32> to vector<16x32xf32>
    %553 = vector.extract_strided_slice %552 {offsets = [0, 0], sizes = [16, 8], strides = [1, 1]} : vector<16x32xf32> to vector<16x8xf32>
    %554 = vector.extract_strided_slice %552 {offsets = [0, 8], sizes = [16, 8], strides = [1, 1]} : vector<16x32xf32> to vector<16x8xf32>
    %555 = arith.maximumf %553, %554 : vector<16x8xf32>
    %556 = vector.extract_strided_slice %552 {offsets = [0, 16], sizes = [16, 8], strides = [1, 1]} : vector<16x32xf32> to vector<16x8xf32>
    %557 = vector.extract_strided_slice %552 {offsets = [0, 24], sizes = [16, 8], strides = [1, 1]} : vector<16x32xf32> to vector<16x8xf32>
    %558 = arith.maximumf %556, %557 : vector<16x8xf32>
    %559 = arith.maximumf %555, %558 : vector<16x8xf32>
    %c0_95 = arith.constant 0 : index
    %c416 = arith.constant 416 : index
    %560 = vector.load %arg12[%c0_95, %c416] : memref<16x512xf32, #tpu.memory_space<vmem>>, vector<16x8xf32>
    tpu.vector_store %arg12[%c0_95, %c416], %559 {strides = array<i32>} : memref<16x512xf32, #tpu.memory_space<vmem>>, vector<16x8xf32>,
    %561 = vector.extract_strided_slice %515 {offsets = [80, 0], sizes = [16, 32], strides = [1, 1]} : vector<128x32xf32> to vector<16x32xf32>
    %562 = vector.extract_strided_slice %561 {offsets = [0, 0], sizes = [16, 8], strides = [1, 1]} : vector<16x32xf32> to vector<16x8xf32>
    %563 = vector.extract_strided_slice %561 {offsets = [0, 8], sizes = [16, 8], strides = [1, 1]} : vector<16x32xf32> to vector<16x8xf32>
    %564 = arith.maximumf %562, %563 : vector<16x8xf32>
    %565 = vector.extract_strided_slice %561 {offsets = [0, 16], sizes = [16, 8], strides = [1, 1]} : vector<16x32xf32> to vector<16x8xf32>
    %566 = vector.extract_strided_slice %561 {offsets = [0, 24], sizes = [16, 8], strides = [1, 1]} : vector<16x32xf32> to vector<16x8xf32>
    %567 = arith.maximumf %565, %566 : vector<16x8xf32>
    %568 = arith.maximumf %564, %567 : vector<16x8xf32>
    %c0_96 = arith.constant 0 : index
    %c424 = arith.constant 424 : index
    %569 = vector.load %arg12[%c0_96, %c424] : memref<16x512xf32, #tpu.memory_space<vmem>>, vector<16x8xf32>
    tpu.vector_store %arg12[%c0_96, %c424], %568 {strides = array<i32>} : memref<16x512xf32, #tpu.memory_space<vmem>>, vector<16x8xf32>,
    %570 = vector.extract_strided_slice %515 {offsets = [96, 0], sizes = [16, 32], strides = [1, 1]} : vector<128x32xf32> to vector<16x32xf32>
    %571 = vector.extract_strided_slice %570 {offsets = [0, 0], sizes = [16, 8], strides = [1, 1]} : vector<16x32xf32> to vector<16x8xf32>
    %572 = vector.extract_strided_slice %570 {offsets = [0, 8], sizes = [16, 8], strides = [1, 1]} : vector<16x32xf32> to vector<16x8xf32>
    %573 = arith.maximumf %571, %572 : vector<16x8xf32>
    %574 = vector.extract_strided_slice %570 {offsets = [0, 16], sizes = [16, 8], strides = [1, 1]} : vector<16x32xf32> to vector<16x8xf32>
    %575 = vector.extract_strided_slice %570 {offsets = [0, 24], sizes = [16, 8], strides = [1, 1]} : vector<16x32xf32> to vector<16x8xf32>
    %576 = arith.maximumf %574, %575 : vector<16x8xf32>
    %577 = arith.maximumf %573, %576 : vector<16x8xf32>
    %c0_97 = arith.constant 0 : index
    %c432 = arith.constant 432 : index
    %578 = vector.load %arg12[%c0_97, %c432] : memref<16x512xf32, #tpu.memory_space<vmem>>, vector<16x8xf32>
    tpu.vector_store %arg12[%c0_97, %c432], %577 {strides = array<i32>} : memref<16x512xf32, #tpu.memory_space<vmem>>, vector<16x8xf32>,
    %579 = vector.extract_strided_slice %515 {offsets = [112, 0], sizes = [16, 32], strides = [1, 1]} : vector<128x32xf32> to vector<16x32xf32>
    %580 = vector.extract_strided_slice %579 {offsets = [0, 0], sizes = [16, 8], strides = [1, 1]} : vector<16x32xf32> to vector<16x8xf32>
    %581 = vector.extract_strided_slice %579 {offsets = [0, 8], sizes = [16, 8], strides = [1, 1]} : vector<16x32xf32> to vector<16x8xf32>
    %582 = arith.maximumf %580, %581 : vector<16x8xf32>
    %583 = vector.extract_strided_slice %579 {offsets = [0, 16], sizes = [16, 8], strides = [1, 1]} : vector<16x32xf32> to vector<16x8xf32>
    %584 = vector.extract_strided_slice %579 {offsets = [0, 24], sizes = [16, 8], strides = [1, 1]} : vector<16x32xf32> to vector<16x8xf32>
    %585 = arith.maximumf %583, %584 : vector<16x8xf32>
    %586 = arith.maximumf %582, %585 : vector<16x8xf32>
    %c0_98 = arith.constant 0 : index
    %c440 = arith.constant 440 : index
    %587 = vector.load %arg12[%c0_98, %c440] : memref<16x512xf32, #tpu.memory_space<vmem>>, vector<16x8xf32>
    tpu.vector_store %arg12[%c0_98, %c440], %586 {strides = array<i32>} : memref<16x512xf32, #tpu.memory_space<vmem>>, vector<16x8xf32>,
    %c0_99 = arith.constant 0 : index
    %c896 = arith.constant 896 : index
    %c0_100 = arith.constant 0 : index
    %588 = vector.load %arg1[%c0_99, %c896, %c0_100] : memref<1x1024x100xbf16, #tpu.memory_space<vmem>>, vector<1x128x100xbf16>
    %589 = vector.shape_cast %588 : vector<1x128x100xbf16> to vector<128x100xbf16>
    %cst_101 = arith.constant dense<0.000000e+00> : vector<128x32xf32>
    %590 = tpu.matmul %589, %6, %cst_101 {dimension_numbers = #tpu.dot_dimension_numbers<[1], [0], [0], [1], [0, 0, 1, 1], [], []>} : vector<128x100xbf16>, vector<100x32xbf16>, vector<128x32xf32> -> vector<128x32xf32>
    %591 = vector.broadcast %0 : vector<1x32xf32> to vector<128x32xf32>
    %592 = arith.addf %590, %591 : vector<128x32xf32>
    %cst_102 = arith.constant 0.000000e+00 : f32
    %593 = vector.broadcast %cst_102 : f32 to vector<128x32xf32>
    %594 = arith.maximumf %592, %593 : vector<128x32xf32>
    %595 = vector.broadcast %1 : vector<1x32xf32> to vector<128x32xf32>
    %596 = arith.mulf %594, %595 : vector<128x32xf32>
    %597 = vector.broadcast %2 : vector<1x32xf32> to vector<128x32xf32>
    %598 = arith.addf %596, %597 : vector<128x32xf32>
    %599 = vector.extract_strided_slice %598 {offsets = [0, 0], sizes = [16, 32], strides = [1, 1]} : vector<128x32xf32> to vector<16x32xf32>
    %600 = vector.extract_strided_slice %599 {offsets = [0, 0], sizes = [16, 8], strides = [1, 1]} : vector<16x32xf32> to vector<16x8xf32>
    %601 = vector.extract_strided_slice %599 {offsets = [0, 8], sizes = [16, 8], strides = [1, 1]} : vector<16x32xf32> to vector<16x8xf32>
    %602 = arith.maximumf %600, %601 : vector<16x8xf32>
    %603 = vector.extract_strided_slice %599 {offsets = [0, 16], sizes = [16, 8], strides = [1, 1]} : vector<16x32xf32> to vector<16x8xf32>
    %604 = vector.extract_strided_slice %599 {offsets = [0, 24], sizes = [16, 8], strides = [1, 1]} : vector<16x32xf32> to vector<16x8xf32>
    %605 = arith.maximumf %603, %604 : vector<16x8xf32>
    %606 = arith.maximumf %602, %605 : vector<16x8xf32>
    %c0_103 = arith.constant 0 : index
    %c448 = arith.constant 448 : index
    %607 = vector.load %arg12[%c0_103, %c448] : memref<16x512xf32, #tpu.memory_space<vmem>>, vector<16x8xf32>
    tpu.vector_store %arg12[%c0_103, %c448], %606 {strides = array<i32>} : memref<16x512xf32, #tpu.memory_space<vmem>>, vector<16x8xf32>,
    %608 = vector.extract_strided_slice %598 {offsets = [16, 0], sizes = [16, 32], strides = [1, 1]} : vector<128x32xf32> to vector<16x32xf32>
    %609 = vector.extract_strided_slice %608 {offsets = [0, 0], sizes = [16, 8], strides = [1, 1]} : vector<16x32xf32> to vector<16x8xf32>
    %610 = vector.extract_strided_slice %608 {offsets = [0, 8], sizes = [16, 8], strides = [1, 1]} : vector<16x32xf32> to vector<16x8xf32>
    %611 = arith.maximumf %609, %610 : vector<16x8xf32>
    %612 = vector.extract_strided_slice %608 {offsets = [0, 16], sizes = [16, 8], strides = [1, 1]} : vector<16x32xf32> to vector<16x8xf32>
    %613 = vector.extract_strided_slice %608 {offsets = [0, 24], sizes = [16, 8], strides = [1, 1]} : vector<16x32xf32> to vector<16x8xf32>
    %614 = arith.maximumf %612, %613 : vector<16x8xf32>
    %615 = arith.maximumf %611, %614 : vector<16x8xf32>
    %c0_104 = arith.constant 0 : index
    %c456 = arith.constant 456 : index
    %616 = vector.load %arg12[%c0_104, %c456] : memref<16x512xf32, #tpu.memory_space<vmem>>, vector<16x8xf32>
    tpu.vector_store %arg12[%c0_104, %c456], %615 {strides = array<i32>} : memref<16x512xf32, #tpu.memory_space<vmem>>, vector<16x8xf32>,
    %617 = vector.extract_strided_slice %598 {offsets = [32, 0], sizes = [16, 32], strides = [1, 1]} : vector<128x32xf32> to vector<16x32xf32>
    %618 = vector.extract_strided_slice %617 {offsets = [0, 0], sizes = [16, 8], strides = [1, 1]} : vector<16x32xf32> to vector<16x8xf32>
    %619 = vector.extract_strided_slice %617 {offsets = [0, 8], sizes = [16, 8], strides = [1, 1]} : vector<16x32xf32> to vector<16x8xf32>
    %620 = arith.maximumf %618, %619 : vector<16x8xf32>
    %621 = vector.extract_strided_slice %617 {offsets = [0, 16], sizes = [16, 8], strides = [1, 1]} : vector<16x32xf32> to vector<16x8xf32>
    %622 = vector.extract_strided_slice %617 {offsets = [0, 24], sizes = [16, 8], strides = [1, 1]} : vector<16x32xf32> to vector<16x8xf32>
    %623 = arith.maximumf %621, %622 : vector<16x8xf32>
    %624 = arith.maximumf %620, %623 : vector<16x8xf32>
    %c0_105 = arith.constant 0 : index
    %c464 = arith.constant 464 : index
    %625 = vector.load %arg12[%c0_105, %c464] : memref<16x512xf32, #tpu.memory_space<vmem>>, vector<16x8xf32>
    tpu.vector_store %arg12[%c0_105, %c464], %624 {strides = array<i32>} : memref<16x512xf32, #tpu.memory_space<vmem>>, vector<16x8xf32>,
    %626 = vector.extract_strided_slice %598 {offsets = [48, 0], sizes = [16, 32], strides = [1, 1]} : vector<128x32xf32> to vector<16x32xf32>
    %627 = vector.extract_strided_slice %626 {offsets = [0, 0], sizes = [16, 8], strides = [1, 1]} : vector<16x32xf32> to vector<16x8xf32>
    %628 = vector.extract_strided_slice %626 {offsets = [0, 8], sizes = [16, 8], strides = [1, 1]} : vector<16x32xf32> to vector<16x8xf32>
    %629 = arith.maximumf %627, %628 : vector<16x8xf32>
    %630 = vector.extract_strided_slice %626 {offsets = [0, 16], sizes = [16, 8], strides = [1, 1]} : vector<16x32xf32> to vector<16x8xf32>
    %631 = vector.extract_strided_slice %626 {offsets = [0, 24], sizes = [16, 8], strides = [1, 1]} : vector<16x32xf32> to vector<16x8xf32>
    %632 = arith.maximumf %630, %631 : vector<16x8xf32>
    %633 = arith.maximumf %629, %632 : vector<16x8xf32>
    %c0_106 = arith.constant 0 : index
    %c472 = arith.constant 472 : index
    %634 = vector.load %arg12[%c0_106, %c472] : memref<16x512xf32, #tpu.memory_space<vmem>>, vector<16x8xf32>
    tpu.vector_store %arg12[%c0_106, %c472], %633 {strides = array<i32>} : memref<16x512xf32, #tpu.memory_space<vmem>>, vector<16x8xf32>,
    %635 = vector.extract_strided_slice %598 {offsets = [64, 0], sizes = [16, 32], strides = [1, 1]} : vector<128x32xf32> to vector<16x32xf32>
    %636 = vector.extract_strided_slice %635 {offsets = [0, 0], sizes = [16, 8], strides = [1, 1]} : vector<16x32xf32> to vector<16x8xf32>
    %637 = vector.extract_strided_slice %635 {offsets = [0, 8], sizes = [16, 8], strides = [1, 1]} : vector<16x32xf32> to vector<16x8xf32>
    %638 = arith.maximumf %636, %637 : vector<16x8xf32>
    %639 = vector.extract_strided_slice %635 {offsets = [0, 16], sizes = [16, 8], strides = [1, 1]} : vector<16x32xf32> to vector<16x8xf32>
    %640 = vector.extract_strided_slice %635 {offsets = [0, 24], sizes = [16, 8], strides = [1, 1]} : vector<16x32xf32> to vector<16x8xf32>
    %641 = arith.maximumf %639, %640 : vector<16x8xf32>
    %642 = arith.maximumf %638, %641 : vector<16x8xf32>
    %c0_107 = arith.constant 0 : index
    %c480 = arith.constant 480 : index
    %643 = vector.load %arg12[%c0_107, %c480] : memref<16x512xf32, #tpu.memory_space<vmem>>, vector<16x8xf32>
    tpu.vector_store %arg12[%c0_107, %c480], %642 {strides = array<i32>} : memref<16x512xf32, #tpu.memory_space<vmem>>, vector<16x8xf32>,
    %644 = vector.extract_strided_slice %598 {offsets = [80, 0], sizes = [16, 32], strides = [1, 1]} : vector<128x32xf32> to vector<16x32xf32>
    %645 = vector.extract_strided_slice %644 {offsets = [0, 0], sizes = [16, 8], strides = [1, 1]} : vector<16x32xf32> to vector<16x8xf32>
    %646 = vector.extract_strided_slice %644 {offsets = [0, 8], sizes = [16, 8], strides = [1, 1]} : vector<16x32xf32> to vector<16x8xf32>
    %647 = arith.maximumf %645, %646 : vector<16x8xf32>
    %648 = vector.extract_strided_slice %644 {offsets = [0, 16], sizes = [16, 8], strides = [1, 1]} : vector<16x32xf32> to vector<16x8xf32>
    %649 = vector.extract_strided_slice %644 {offsets = [0, 24], sizes = [16, 8], strides = [1, 1]} : vector<16x32xf32> to vector<16x8xf32>
    %650 = arith.maximumf %648, %649 : vector<16x8xf32>
    %651 = arith.maximumf %647, %650 : vector<16x8xf32>
    %c0_108 = arith.constant 0 : index
    %c488 = arith.constant 488 : index
    %652 = vector.load %arg12[%c0_108, %c488] : memref<16x512xf32, #tpu.memory_space<vmem>>, vector<16x8xf32>
    tpu.vector_store %arg12[%c0_108, %c488], %651 {strides = array<i32>} : memref<16x512xf32, #tpu.memory_space<vmem>>, vector<16x8xf32>,
    %653 = vector.extract_strided_slice %598 {offsets = [96, 0], sizes = [16, 32], strides = [1, 1]} : vector<128x32xf32> to vector<16x32xf32>
    %654 = vector.extract_strided_slice %653 {offsets = [0, 0], sizes = [16, 8], strides = [1, 1]} : vector<16x32xf32> to vector<16x8xf32>
    %655 = vector.extract_strided_slice %653 {offsets = [0, 8], sizes = [16, 8], strides = [1, 1]} : vector<16x32xf32> to vector<16x8xf32>
    %656 = arith.maximumf %654, %655 : vector<16x8xf32>
    %657 = vector.extract_strided_slice %653 {offsets = [0, 16], sizes = [16, 8], strides = [1, 1]} : vector<16x32xf32> to vector<16x8xf32>
    %658 = vector.extract_strided_slice %653 {offsets = [0, 24], sizes = [16, 8], strides = [1, 1]} : vector<16x32xf32> to vector<16x8xf32>
    %659 = arith.maximumf %657, %658 : vector<16x8xf32>
    %660 = arith.maximumf %656, %659 : vector<16x8xf32>
    %c0_109 = arith.constant 0 : index
    %c496 = arith.constant 496 : index
    %661 = vector.load %arg12[%c0_109, %c496] : memref<16x512xf32, #tpu.memory_space<vmem>>, vector<16x8xf32>
    tpu.vector_store %arg12[%c0_109, %c496], %660 {strides = array<i32>} : memref<16x512xf32, #tpu.memory_space<vmem>>, vector<16x8xf32>,
    %662 = vector.extract_strided_slice %598 {offsets = [112, 0], sizes = [16, 32], strides = [1, 1]} : vector<128x32xf32> to vector<16x32xf32>
    %663 = vector.extract_strided_slice %662 {offsets = [0, 0], sizes = [16, 8], strides = [1, 1]} : vector<16x32xf32> to vector<16x8xf32>
    %664 = vector.extract_strided_slice %662 {offsets = [0, 8], sizes = [16, 8], strides = [1, 1]} : vector<16x32xf32> to vector<16x8xf32>
    %665 = arith.maximumf %663, %664 : vector<16x8xf32>
    %666 = vector.extract_strided_slice %662 {offsets = [0, 16], sizes = [16, 8], strides = [1, 1]} : vector<16x32xf32> to vector<16x8xf32>
    %667 = vector.extract_strided_slice %662 {offsets = [0, 24], sizes = [16, 8], strides = [1, 1]} : vector<16x32xf32> to vector<16x8xf32>
    %668 = arith.maximumf %666, %667 : vector<16x8xf32>
    %669 = arith.maximumf %665, %668 : vector<16x8xf32>
    %c0_110 = arith.constant 0 : index
    %c504 = arith.constant 504 : index
    %670 = vector.load %arg12[%c0_110, %c504] : memref<16x512xf32, #tpu.memory_space<vmem>>, vector<16x8xf32>
    tpu.vector_store %arg12[%c0_110, %c504], %669 {strides = array<i32>} : memref<16x512xf32, #tpu.memory_space<vmem>>, vector<16x8xf32>,
    %c0_111 = arith.constant 0 : index
    %c0_112 = arith.constant 0 : index
    %671 = vector.load %arg12[%c0_111, %c0_112] : memref<16x512xf32, #tpu.memory_space<vmem>>, vector<16x512xf32>
    %672 = arith.truncf %671 : vector<16x512xf32> to vector<16x512xbf16>
    %c0_113 = arith.constant 0 : index
    %c0_114 = arith.constant 0 : index
    %673 = vector.load %arg4[%c0_113, %c0_114] : memref<512x256xbf16, #tpu.memory_space<vmem>>, vector<512x256xbf16>
    %cst_115 = arith.constant dense<0.000000e+00> : vector<16x256xf32>
    %674 = tpu.matmul %672, %673, %cst_115 {dimension_numbers = #tpu.dot_dimension_numbers<[1], [0], [0], [1], [0, 0, 1, 1], [], []>} : vector<16x512xbf16>, vector<512x256xbf16>, vector<16x256xf32> -> vector<16x256xf32>
    %675 = vector.broadcast %3 : vector<1x256xf32> to vector<16x256xf32>
    %676 = arith.addf %674, %675 : vector<16x256xf32>
    %cst_116 = arith.constant 0.000000e+00 : f32
    %677 = vector.broadcast %cst_116 : f32 to vector<16x256xf32>
    %678 = arith.maximumf %676, %677 : vector<16x256xf32>
    %679 = vector.broadcast %4 : vector<1x256xf32> to vector<16x256xf32>
    %680 = arith.mulf %678, %679 : vector<16x256xf32>
    %681 = vector.broadcast %5 : vector<1x256xf32> to vector<16x256xf32>
    %682 = arith.addf %680, %681 : vector<16x256xf32>
    %683 = arith.truncf %682 : vector<16x256xf32> to vector<16x256xbf16>
    %c0_117 = arith.constant 0 : index
    %c0_118 = arith.constant 0 : index
    %684 = vector.load %arg6[%c0_117, %c0_118] : memref<256x256xbf16, #tpu.memory_space<vmem>>, vector<256x256xbf16>
    %cst_119 = arith.constant dense<0.000000e+00> : vector<16x256xf32>
    %685 = tpu.matmul %683, %684, %cst_119 {dimension_numbers = #tpu.dot_dimension_numbers<[1], [0], [0], [1], [0, 0, 1, 1], [], []>} : vector<16x256xbf16>, vector<256x256xbf16>, vector<16x256xf32> -> vector<16x256xf32>
    %686 = vector.extract_strided_slice %685 {offsets = [0, 0], sizes = [16, 64], strides = [1, 1]} : vector<16x256xf32> to vector<16x64xf32>
    %687 = vector.extract_strided_slice %685 {offsets = [0, 64], sizes = [16, 64], strides = [1, 1]} : vector<16x256xf32> to vector<16x64xf32>
    %688 = arith.maximumf %686, %687 : vector<16x64xf32>
    %689 = vector.extract_strided_slice %685 {offsets = [0, 128], sizes = [16, 64], strides = [1, 1]} : vector<16x256xf32> to vector<16x64xf32>
    %690 = vector.extract_strided_slice %685 {offsets = [0, 192], sizes = [16, 64], strides = [1, 1]} : vector<16x256xf32> to vector<16x64xf32>
    %691 = arith.maximumf %689, %690 : vector<16x64xf32>
    %692 = arith.maximumf %688, %691 : vector<16x64xf32>
    %693 = arith.truncf %692 : vector<16x64xf32> to vector<16x64xbf16>
    %c0_120 = arith.constant 0 : index
    %c0_121 = arith.constant 0 : index
    %694 = vector.load %arg7[%c0_120, %c0_121] : memref<64x800xbf16, #tpu.memory_space<vmem>>, vector<64x800xbf16>
    %cst_122 = arith.constant dense<0.000000e+00> : vector<16x800xf32>
    %695 = tpu.matmul %693, %694, %cst_122 {dimension_numbers = #tpu.dot_dimension_numbers<[1], [0], [0], [1], [0, 0, 1, 1], [], []>} : vector<16x64xbf16>, vector<64x800xbf16>, vector<16x800xf32> -> vector<16x800xf32>
    %c0_123 = arith.constant 0 : index
    %c0_124 = arith.constant 0 : index
    %696 = vector.load %arg8[%c0_123, %c0_124] : memref<1x800xf32, #tpu.memory_space<vmem>>, vector<1x800xf32>
    %697 = vector.broadcast %696 : vector<1x800xf32> to vector<16x800xf32>
    %698 = arith.addf %695, %697 : vector<16x800xf32>
    %cst_125 = arith.constant 0.000000e+00 : f32
    %699 = vector.broadcast %cst_125 : f32 to vector<16x800xf32>
    %700 = arith.maximumf %698, %699 : vector<16x800xf32>
    %701 = arith.truncf %700 : vector<16x800xf32> to vector<16x800xbf16>
    %c0_126 = arith.constant 0 : index
    %c0_127 = arith.constant 0 : index
    %702 = vector.load %arg9[%c0_126, %c0_127] : memref<800x512xbf16, #tpu.memory_space<vmem>>, vector<800x512xbf16>
    %cst_128 = arith.constant dense<0.000000e+00> : vector<16x512xf32>
    %703 = tpu.matmul %701, %702, %cst_128 {dimension_numbers = #tpu.dot_dimension_numbers<[1], [0], [0], [1], [0, 0, 1, 1], [], []>} : vector<16x800xbf16>, vector<800x512xbf16>, vector<16x512xf32> -> vector<16x512xf32>
    %c0_129 = arith.constant 0 : index
    %c0_130 = arith.constant 0 : index
    %704 = vector.load %arg10[%c0_129, %c0_130] : memref<1x512xf32, #tpu.memory_space<vmem>>, vector<1x512xf32>
    %705 = vector.broadcast %704 : vector<1x512xf32> to vector<16x512xf32>
    %706 = arith.addf %703, %705 : vector<16x512xf32>
    %c0_131 = arith.constant 0 : index
    %c0_132 = arith.constant 0 : index
    %707 = vector.load %arg11[%c0_131, %c0_132] : memref<16x512xf32, #tpu.memory_space<vmem>>, vector<16x512xf32>
    tpu.vector_store %arg11[%c0_131, %c0_132], %706 {strides = array<i32>} : memref<16x512xf32, #tpu.memory_space<vmem>>, vector<16x512xf32>,
    return
  }
  func.func @transform_0(%arg0: i32) -> (i32, i32, i32) {
    %c0_i32 = arith.constant 0 : i32
    %c0_i32_0 = arith.constant 0 : i32
    %c0_i32_1 = arith.constant 0 : i32
    return %arg0, %c0_i32, %c0_i32_0 : i32, i32, i32
  }
  func.func @transform_1(%arg0: i32) -> (i32, i32) {
    %c0_i32 = arith.constant 0 : i32
    %c0_i32_0 = arith.constant 0 : i32
    %c0_i32_1 = arith.constant 0 : i32
    return %c0_i32, %c0_i32_0 : i32, i32
  }
  func.func @transform_2(%arg0: i32) -> (i32, i32) {
    %c0_i32 = arith.constant 0 : i32
    %c0_i32_0 = arith.constant 0 : i32
    %c0_i32_1 = arith.constant 0 : i32
    return %c0_i32, %c0_i32_0 : i32, i32
  }
  func.func @transform_3(%arg0: i32) -> (i32, i32) {
    %c0_i32 = arith.constant 0 : i32
    %c0_i32_0 = arith.constant 0 : i32
    %c0_i32_1 = arith.constant 0 : i32
    return %c0_i32, %c0_i32_0 : i32, i32
  }
  func.func @transform_4(%arg0: i32) -> (i32, i32) {
    %c0_i32 = arith.constant 0 : i32
    %c0_i32_0 = arith.constant 0 : i32
    %c0_i32_1 = arith.constant 0 : i32
    return %c0_i32, %c0_i32_0 : i32, i32
  }
  func.func @transform_5(%arg0: i32) -> (i32, i32) {
    %c0_i32 = arith.constant 0 : i32
    %c0_i32_0 = arith.constant 0 : i32
    %c0_i32_1 = arith.constant 0 : i32
    return %c0_i32, %c0_i32_0 : i32, i32
  }
  func.func @transform_6(%arg0: i32) -> (i32, i32) {
    %c0_i32 = arith.constant 0 : i32
    %c0_i32_0 = arith.constant 0 : i32
    %c0_i32_1 = arith.constant 0 : i32
    return %c0_i32, %c0_i32_0 : i32, i32
  }
  func.func @transform_7(%arg0: i32) -> (i32, i32) {
    %c0_i32 = arith.constant 0 : i32
    %c0_i32_0 = arith.constant 0 : i32
    %c0_i32_1 = arith.constant 0 : i32
    return %c0_i32, %c0_i32_0 : i32, i32
  }
  func.func @transform_8(%arg0: i32) -> (i32, i32) {
    %c0_i32 = arith.constant 0 : i32
    %c0_i32_0 = arith.constant 0 : i32
    %c0_i32_1 = arith.constant 0 : i32
    return %c0_i32, %c0_i32_0 : i32, i32
  }
  func.func @transform_9(%arg0: i32) -> (i32, i32) {
    %c0_i32 = arith.constant 0 : i32
    %c0_i32_0 = arith.constant 0 : i32
    %c0_i32_1 = arith.constant 0 : i32
    return %c0_i32, %c0_i32_0 : i32, i32
  }
  func.func @transform_10(%arg0: i32) -> (i32, i32) {
    %c0_i32 = arith.constant 0 : i32
    %c0_i32_0 = arith.constant 0 : i32
    return %arg0, %c0_i32 : i32, i32
  }
}

</mosaic_0001>

<bundles_post_ra>
// kernel: _lambda_.1
= control target key start
LH: loop header
LB: loop body
LE: loop exit
PB: predicated region body
PF: predicated region fallthrough
CT: control target
= control target key end

     0   :  { %s13096_s0 = inlined_call_operand.vmem [shape: bf16[2,1024,100], index: 0, kind: input, shape index: {}]   ;;  %s13097_s1 = inlined_call_operand.vmem [shape: bf16[100,32], index: 1, kind: input, shape index: {}]   ;;  %s13098_s2 = inlined_call_operand.vmem [shape: f32[3,32], index: 2, kind: input, shape index: {}]   ;;  %s13099_s3 = inlined_call_operand.vmem [shape: bf16[512,256], index: 3, kind: input, shape index: {}]   ;;  %s13100_s4 = inlined_call_operand.vmem [shape: f32[3,256], index: 4, kind: input, shape index: {}]   ;;  %s13101_s5 = inlined_call_operand.vmem [shape: bf16[256,256], index: 5, kind: input, shape index: {}]   ;;  %s13102_s6 = inlined_call_operand.vmem [shape: bf16[64,800], index: 6, kind: input, shape index: {}]   ;;  %s13103_s7 = inlined_call_operand.vmem [shape: f32[1,800], index: 7, kind: input, shape index: {}]   ;;  %s13104_s8 = inlined_call_operand.vmem [shape: bf16[800,512], index: 8, kind: input, shape index: {}]   ;;  %s13105_s9 = inlined_call_operand.vmem [shape: f32[1,512], index: 9, kind: input, shape index: {}]   ;;  %s13106_s10 = inlined_call_operand.hbm [shape: f32[32,512], index: 10, kind: output, shape index: {}]  }
   0x1   :  { %13351 = sst [smem:[#allocation155_spill]] %s13096_s0 }
   0x2   :  { %15 = vsyncpa [#allocation4], 0 }
   0x3   :  { %17 = vsyncpa [#allocation4 + $0x1], 0  ;;  %s8667_s13 = smov 0   ;;  %s8669_s14 = smov 0  }
   0x4   :  { %s8671_s15 = smov 0   ;;  %s8673_s16 = smov 0  }
   0x5 LB: > { %s8688_s17 = sadd.s32 4294967295, %s8590_s16   ;;  %s6991_s18 = sadd.s32 4294967294, %s8590_s16   ;;  %s8590_s16 = sphi %s8673_s16, %s13954_s16   ;;  %s8586_s15 = sphi %s8671_s15, %s13953_s15   ;;  %s8582_s14 = sphi %s8669_s14, %s13952_s14   ;;  %s8578_s13 = sphi %s8667_s13, %s13951_s13  }
   0x6   : > { %s8692_s19 = sadd.s32 1, %s8590_s16   ;;  %s245_s20 = sadd.s32 1, %s8586_s15 }
   0x7   : > { %s242_s21 = ssub.s32 %s8590_s16, %s8692_s19  ;;  %p255_p0 = scmp.ne.s32.totalorder %s8586_s15, %s8582_s14 }
   0x8   : > { %p243_p1 = scmp.eq.s32.totalorder %s242_s21, 0  ;;  %p256_p2 = scmp.eq.s32.totalorder %s8688_s17, 1 }
   0x9   : > { %p261_p3 = scmp.ne.s32.totalorder %s8582_s14, %s8578_s13  ;;  %p262_p4 = scmp.eq.s32.totalorder %s6991_s18, 1 }
   0xa   : > { %s8703_s22 = scalar_select %p243_p1, %s8586_s15, %s245_s20  }
   0xb   : > { %p8705_p5 = por %p256_p2, %p255_p0  ;;  %p8709_p6 = por %p262_p4, %p261_p3 }
   0xc   : > { %p6994_p7 = scmp.ge.s32.totalorder %s8590_s16, 1  ;;  %p315_p8 = scmp.lt.s32.totalorder %s8590_s16, 3 }
   0xe   : > { %p316_p9 = pnand %p6994_p7, %p315_p8 }
  0x10   : > { %319 = sbr.rel (%p316_p9) target bundleno = 2308 (0x904), region = 60 }
  0x17   : > { %v8718_v0 = vld [vmem:[%s13097_s1] sm:$0xff]   ;;  %v8723_v1 = vld [vmem:[%s13097_s1 + $0x8] sm:$0xff]   ;;  %p353_p10 = scmp.lt.s32.totalorder %s8688_s17, 1  ;;  %v8736_v2 = vld [vmem:[%s13097_s1 + $0x10] sm:$0xff]   ;;  %s13354_s0 = sld [smem:[#allocation155_spill]]  ;;  %vm480_vm0 = vcmask 818176  }
  0x18   : > { %7602 = vmatprep.subr.bf16.mxu0 %v8718_v0  ;;  %7632 = vmatprep.subr.bf16.mxu1 %v8718_v0  ;;  %v8741_v3 = vld [vmem:[%s13097_s1 + $0x18] sm:$0xff]   ;;  %v8763_v6 = vld [vmem:[%s13097_s1 + $0x20] sm:$0xff]   ;;  %v8772_v7 = vld [vmem:[%s13097_s1 + $0x28] sm:$0xff]   ;;  %vm505_vm1 = vcmask 1041408   ;;  %s13311_s28 = smov 120   ;;  %s13313_s21 = smov 112  }
  0x19   : > { %7603 = vmatpush3.bf16.msra.mxu0 %v8718_v0  ;;  %7633 = vmatpush3.bf16.msra.mxu1 %v8718_v0  ;;  %s354_s29 = scalar_select %p353_p10, %s8688_s17, 1  ;;  %v8777_v8 = vld [vmem:[%s13097_s1 + $0x30] ss:$0 sps:$4 sm:$0x33]   ;;  %vm682_vm2 = vcmask 64512   ;;  %vm713_vm3 = vcmask 130112  }
  0x1a   : > { %7604 = vmatprep.subr.bf16.mxu0 %v8723_v1  ;;  %7634 = vmatprep.subr.bf16.mxu1 %v8723_v1  ;;  %v8791_v9 = vsel %vm505_vm1, %v8777_v8, 0  ;;  %s8594_s25 = smov 8   ;;  %s13319_s27 = smov 64   ;;  %vm744_vm4 = vcmask 195712   ;;  %vm775_vm5 = vcmask 261312   ;;  %vm806_vm6 = vcmask 326912  }
  0x1b   : > { %s7474_s12 = sshll.u32 %s354_s29, 9  ;;  %s13327_s29 = smov 24   ;;  %vm837_vm7 = vcmask 392512   ;;  %vm868_vm8 = vcmask 458112   ;;  %vm899_vm9 = vcmask 523712   ;;  %vm1155_vm10 = vcmask 589312  }
  0x1c   : > { %s13315_s30 = smov 88   ;;  %s8599_s11 = smov 16   ;;  %vm1186_vm11 = vcmask 654912   ;;  %vm1217_vm12 = vcmask 720512   ;;  %vm1248_vm13 = vcmask 786112   ;;  %vm1279_vm14 = vcmask 851712  }
  0x1d   : > { %s8746_s26 = scalar_lea.vmem %s13354_s0, %s7474_s12  ;;  %7605 = vmatpush3.bf16.msra.mxu0 %v8723_v1  ;;  %7635 = vmatpush3.bf16.msra.mxu1 %v8723_v1  ;;  %s13321_s12 = smov 80   ;;  %vm1310_vm15 = vcmask 917312  }
  0x1e   : > { %v7977_v4 = vld [vmem:[%s8746_s26] sm:$0xff]   ;;  %7606 = vmatprep.subr.bf16.mxu0 %v8736_v2  ;;  %7636 = vmatprep.subr.bf16.mxu1 %v8736_v2  ;;  %v7979_v10 = vld [vmem:[%s8746_s26 + $0x8] sm:$0xff]   ;;  %v7981_v12 = vld [vmem:[%s8746_s26 + $0x10] sm:$0xff]   ;;  %s13323_s18 = smov 40   ;;  %s13325_s20 = smov 32  }
  0x1f   : > { %v7978_v5 = vld [vmem:[%s8746_s26 + $0x40] sm:$0xff]   ;;  %7616 = vmatprep.mubr.msk.bf16.mxu0 %vm480_vm0, %v7977_v4  ;;  %v7980_v11 = vld [vmem:[%s8746_s26 + $0x48] sm:$0xff]   ;;  %v7983_v13 = vld [vmem:[%s8746_s26 + $0x50] sm:$0xff]  }
  0x20   : > { %7646 = vmatprep.mubr.msk.bf16.mxu1 %vm480_vm0, %v7978_v5  ;;  %v7982_v14 = vld [vmem:[%s8746_s26 + $0x18] sm:$0xff]   ;;  %v7985_v16 = vld [vmem:[%s8746_s26 + $0x20] sm:$0xff]   ;;  %v7986_v18 = vld [vmem:[%s8746_s26 + $0x28] sm:$0xff]  }
  0x21   : > { %7607 = vmatpush3.bf16.msra.mxu0 %v8736_v2  ;;  %7637 = vmatpush3.bf16.msra.mxu1 %v8736_v2  ;;  %v7984_v15 = vld [vmem:[%s8746_s26 + $0x58] sm:$0xff]   ;;  %v7987_v17 = vld [vmem:[%s8746_s26 + $0x60] sm:$0xff]   ;;  %v7988_v19 = vld [vmem:[%s8746_s26 + $0x68] sm:$0xff]  }
  0x22   : > { %7608 = vmatprep.subr.bf16.mxu0 %v8741_v3  ;;  %7638 = vmatprep.subr.bf16.mxu1 %v8741_v3  ;;  %v7989_v20 = vld [vmem:[%s8746_s26 + $0x30] sm:$0xff]   ;;  %v7990_v22 = vld [vmem:[%s8746_s26 + $0x38] sm:$0xff]   ;;  %v7993_v24 = vld [vmem:[%s8746_s26 + $0x80] sm:$0xff]  }
  0x23   : > { %v7991_v21 = vld [vmem:[%s8746_s26 + $0x70] sm:$0xff]   ;;  %v7992_v23 = vld [vmem:[%s8746_s26 + $0x78] sm:$0xff]   ;;  %v7995_v25 = vld [vmem:[%s8746_s26 + $0xc0] sm:$0xff]  }
  0x24   : > { %v7994_v26 = vld [vmem:[%s8746_s26 + $0x88] sm:$0xff]   ;;  %v7997_v28 = vld [vmem:[%s8746_s26 + $0x90] sm:$0xff]   ;;  %v7998_v30 = vld [vmem:[%s8746_s26 + $0x98] sm:$0xff]  }
  0x25   : > { %7609 = vmatpush3.bf16.msra.mxu0 %v8741_v3  ;;  %7639 = vmatpush3.bf16.msra.mxu1 %v8741_v3  ;;  %v7996_v27 = vld [vmem:[%s8746_s26 + $0xc8] sm:$0xff]   ;;  %v7999_v29 = vld [vmem:[%s8746_s26 + $0xd0] sm:$0xff]   ;;  %v8000_v31 = vld [vmem:[%s8746_s26 + $0xd8] sm:$0xff]  }
  0x26   : > { %7610 = vmatprep.subr.bf16.mxu0 %v8763_v6  ;;  %7640 = vmatprep.subr.bf16.mxu1 %v8763_v6  ;;  %v8001_v32 = vld [vmem:[%s8746_s26 + $0xa0] sm:$0xff]   ;;  %v8002_v34 = vld [vmem:[%s8746_s26 + $0xa8] sm:$0xff]   ;;  %v8005_v36 = vld [vmem:[%s8746_s26 + $0xb0] sm:$0xff]  }
  0x27   : > { %v8003_v33 = vld [vmem:[%s8746_s26 + $0xe0] sm:$0xff]   ;;  %v8004_v35 = vld [vmem:[%s8746_s26 + $0xe8] sm:$0xff]   ;;  %v8007_v37 = vld [vmem:[%s8746_s26 + $0xf0] sm:$0xff]  }
  0x28   : > { %v8006_v38 = vld [vmem:[%s8746_s26 + $0xb8] sm:$0xff]   ;;  %v8009_v40 = vld [vmem:[%s8746_s26 + $0x100] sm:$0xff]   ;;  %v8010_v42 = vld [vmem:[%s8746_s26 + $0x108] sm:$0xff]  }
  0x29   : > { %7611 = vmatpush3.bf16.msra.mxu0 %v8763_v6  ;;  %7641 = vmatpush3.bf16.msra.mxu1 %v8763_v6  ;;  %v8008_v39 = vld [vmem:[%s8746_s26 + $0xf8] sm:$0xff]   ;;  %v8011_v41 = vld [vmem:[%s8746_s26 + $0x140] sm:$0xff]   ;;  %v8012_v43 = vld [vmem:[%s8746_s26 + $0x148] sm:$0xff]  }
  0x2a   : > { %7612 = vmatprep.subr.bf16.mxu0 %v8772_v7  ;;  %7642 = vmatprep.subr.bf16.mxu1 %v8772_v7  ;;  %v8013_v44 = vld [vmem:[%s8746_s26 + $0x110] sm:$0xff]   ;;  %v8014_v46 = vld [vmem:[%s8746_s26 + $0x118] sm:$0xff]   ;;  %v8017_v48 = vld [vmem:[%s8746_s26 + $0x120] sm:$0xff]  }
  0x2b   : > { %v8015_v45 = vld [vmem:[%s8746_s26 + $0x150] sm:$0xff]   ;;  %v8016_v47 = vld [vmem:[%s8746_s26 + $0x158] sm:$0xff]   ;;  %v8019_v49 = vld [vmem:[%s8746_s26 + $0x160] sm:$0xff]  }
  0x2c   : > { %v8018_v50 = vld [vmem:[%s8746_s26 + $0x128] sm:$0xff]   ;;  %v8021_v52 = vld [vmem:[%s8746_s26 + $0x130] sm:$0xff]   ;;  %v8022_v54 = vld [vmem:[%s8746_s26 + $0x138] sm:$0xff]  }
  0x2d   : > { %7613 = vmatpush3.bf16.msra.mxu0 %v8772_v7  ;;  %7643 = vmatpush3.bf16.msra.mxu1 %v8772_v7  ;;  %v8020_v51 = vld [vmem:[%s8746_s26 + $0x168] sm:$0xff]   ;;  %v8023_v53 = vld [vmem:[%s8746_s26 + $0x170] sm:$0xff]   ;;  %v8024_v55 = vld [vmem:[%s8746_s26 + $0x178] sm:$0xff]  }
  0x2e   : > { %7894 = vmatprep.subr.msk.bf16.mxu0 %vm505_vm1, %v8777_v8  ;;  %7895 = vmatprep.subr.msk.bf16.mxu1 %vm505_vm1, %v8777_v8  ;;  %v8025_v56 = vld [vmem:[%s8746_s26 + $0x180] sm:$0xff]   ;;  %v8026_v58 = vld [vmem:[%s8746_s26 + $0x188] sm:$0xff]   ;;  %v8029_v60 = vld [vmem:[%s8746_s26 + $0x190] sm:$0xff]  }
  0x2f   : > { %v8027_v57 = vld [vmem:[%s8746_s26 + $0x1c0] sm:$0xff]   ;;  %v8028_v59 = vld [vmem:[%s8746_s26 + $0x1c8] sm:$0xff]   ;;  %v8031_v61 = vld [vmem:[%s8746_s26 + $0x1d0] sm:$0xff]  }
  0x30   : > { %v8030_v62 = vld [vmem:[%s8746_s26 + $0x198] sm:$0xff]   ;;  %v8037_v4 = vld [vmem:[%s8746_s26 + $0x1b0] sm:$0xff]  }
  0x31   : > { %7615 = vmatpush3.bf16.msra.mxu0 %v8791_v9  ;;  %7645 = vmatpush3.bf16.msra.mxu1 %v8791_v9  ;;  %v8032_v63 = vld [vmem:[%s8746_s26 + $0x1d8] sm:$0xff]  }
  0x32   : > { %7662 = vmatprep.subr.bf16.mxu0 %v8718_v0  ;;  %7692 = vmatprep.subr.bf16.mxu1 %v8718_v0  ;;  %v8038_v5 = vld [vmem:[%s8746_s26 + $0x1b8] sm:$0xff]  }
  0x34   : > { %7617 = vmatmul.mubr.msk.bf16.vlgmr.msra.gmra.mrb[0].mxu0 %vm480_vm0, %v7979_v10  ;;  %7647 = vmatmul.mubr.msk.bf16.vlgmr.msra.gmra.mrb[0].mxu1 %vm480_vm0, %v7980_v11 }
  0x35   : > { %7620 = vmatprep.mubr.msk.bf16.mxu0 %vm480_vm0, %v7981_v12  ;;  %7650 = vmatprep.mubr.msk.bf16.mxu1 %vm480_vm0, %v7983_v13 }
  0x36   : > { %7663 = vmatpush3.bf16.msra.mxu0 %v8718_v0  ;;  %7693 = vmatpush3.bf16.msra.mxu1 %v8718_v0 }
  0x37   : > { %7664 = vmatprep.subr.bf16.mxu0 %v8723_v1  ;;  %7694 = vmatprep.subr.bf16.mxu1 %v8723_v1 }
  0x3a   : > { %7665 = vmatpush3.bf16.msra.mxu0 %v8723_v1  ;;  %7695 = vmatpush3.bf16.msra.mxu1 %v8723_v1 }
  0x3b   : > { %7666 = vmatprep.subr.bf16.mxu0 %v8736_v2  ;;  %7696 = vmatprep.subr.bf16.mxu1 %v8736_v2 }
  0x3c   : > { %7621 = vmatmul.mubr.msk.bf16.gmra.mrb[4].mxu0 %vm480_vm0, %v7982_v14  ;;  %7651 = vmatmul.mubr.msk.bf16.gmra.mrb[4].mxu1 %vm480_vm0, %v7984_v15  ;;  %v9019_v15 = vld [vmem:[%s13098_s2 + $0x1] ss:$0 sm:$0xff] }
  0x3d   : > { %7624 = vmatprep.mubr.msk.bf16.mxu0 %vm480_vm0, %v7985_v16  ;;  %7654 = vmatprep.mubr.msk.bf16.mxu1 %vm480_vm0, %v7987_v17 }
  0x3e   : > { %7667 = vmatpush3.bf16.msra.mxu0 %v8736_v2  ;;  %7697 = vmatpush3.bf16.msra.mxu1 %v8736_v2 }
  0x3f   : > { %7668 = vmatprep.subr.bf16.mxu0 %v8741_v3  ;;  %7698 = vmatprep.subr.bf16.mxu1 %v8741_v3 }
  0x42   : > { %7669 = vmatpush3.bf16.msra.mxu0 %v8741_v3  ;;  %7699 = vmatpush3.bf16.msra.mxu1 %v8741_v3 }
  0x43   : > { %7670 = vmatprep.subr.bf16.mxu0 %v8763_v6  ;;  %7700 = vmatprep.subr.bf16.mxu1 %v8763_v6 }
  0x44   : > { %7625 = vmatmul.mubr.msk.bf16.gmra.mrb[8].mxu0 %vm480_vm0, %v7986_v18  ;;  %7655 = vmatmul.mubr.msk.bf16.gmra.mrb[8].mxu1 %vm480_vm0, %v7988_v19 }
  0x45   : > { %7628 = vmatprep.mubr.msk.bf16.mxu0 %vm480_vm0, %v7989_v20  ;;  %7658 = vmatprep.mubr.msk.bf16.mxu1 %vm480_vm0, %v7991_v21 }
  0x46   : > { %7671 = vmatpush3.bf16.msra.mxu0 %v8763_v6  ;;  %7701 = vmatpush3.bf16.msra.mxu1 %v8763_v6 }
  0x47   : > { %7672 = vmatprep.subr.bf16.mxu0 %v8772_v7  ;;  %7702 = vmatprep.subr.bf16.mxu1 %v8772_v7 }
  0x4a   : > { %7673 = vmatpush3.bf16.msra.mxu0 %v8772_v7  ;;  %7703 = vmatpush3.bf16.msra.mxu1 %v8772_v7 }
  0x4b   : > { %7896 = vmatprep.subr.msk.bf16.mxu0 %vm505_vm1, %v8777_v8  ;;  %7897 = vmatprep.subr.msk.bf16.mxu1 %vm505_vm1, %v8777_v8 }
  0x4c   : > { %7629 = vmatmul.mubr.msk.bf16.gmra.mrb[12].mxu0 %vm480_vm0, %v7990_v22  ;;  %7659 = vmatmul.mubr.msk.bf16.gmra.mrb[12].mxu1 %vm480_vm0, %v7992_v23 }
  0x4d   : > { %7676 = vmatprep.mubr.msk.bf16.mxu0 %vm480_vm0, %v7993_v24  ;;  %7706 = vmatprep.mubr.msk.bf16.mxu1 %vm480_vm0, %v7995_v25 }
  0x4e   : > { %7675 = vmatpush3.bf16.msra.mxu0 %v8791_v9  ;;  %7705 = vmatpush3.bf16.msra.mxu1 %v8791_v9 }
  0x4f   : > { %7722 = vmatprep.subr.bf16.mxu0 %v8718_v0  ;;  %7752 = vmatprep.subr.bf16.mxu1 %v8718_v0 }
  0x54   : > { %7677 = vmatmul.mubr.msk.bf16.vlgmr.msra.gmra.mrb[16].mxu0 %vm480_vm0, %v7994_v26  ;;  %7707 = vmatmul.mubr.msk.bf16.vlgmr.msra.gmra.mrb[16].mxu1 %vm480_vm0, %v7996_v27  ;;  %v9028_v27 = vld [vmem:[%s13098_s2 + $0x2] ss:$0 sm:$0xff] }
  0x55   : > { %7680 = vmatprep.mubr.msk.bf16.mxu0 %vm480_vm0, %v7997_v28  ;;  %7710 = vmatprep.mubr.msk.bf16.mxu1 %vm480_vm0, %v7999_v29 }
  0x56   : > { %7723 = vmatpush3.bf16.msra.mxu0 %v8718_v0  ;;  %7753 = vmatpush3.bf16.msra.mxu1 %v8718_v0 }
  0x57   : > { %7724 = vmatprep.subr.bf16.mxu0 %v8723_v1  ;;  %7754 = vmatprep.subr.bf16.mxu1 %v8723_v1 }
  0x5a   : > { %7725 = vmatpush3.bf16.msra.mxu0 %v8723_v1  ;;  %7755 = vmatpush3.bf16.msra.mxu1 %v8723_v1 }
  0x5b   : > { %7726 = vmatprep.subr.bf16.mxu0 %v8736_v2  ;;  %7756 = vmatprep.subr.bf16.mxu1 %v8736_v2 }
  0x5c   : > { %7681 = vmatmul.mubr.msk.bf16.gmra.mrb[20].mxu0 %vm480_vm0, %v7998_v30  ;;  %7711 = vmatmul.mubr.msk.bf16.gmra.mrb[20].mxu1 %vm480_vm0, %v8000_v31 }
  0x5d   : > { %7684 = vmatprep.mubr.msk.bf16.mxu0 %vm480_vm0, %v8001_v32  ;;  %7714 = vmatprep.mubr.msk.bf16.mxu1 %vm480_vm0, %v8003_v33 }
  0x5e   : > { %7727 = vmatpush3.bf16.msra.mxu0 %v8736_v2  ;;  %7757 = vmatpush3.bf16.msra.mxu1 %v8736_v2 }
  0x5f   : > { %7728 = vmatprep.subr.bf16.mxu0 %v8741_v3  ;;  %7758 = vmatprep.subr.bf16.mxu1 %v8741_v3 }
  0x62   : > { %7729 = vmatpush3.bf16.msra.mxu0 %v8741_v3  ;;  %7759 = vmatpush3.bf16.msra.mxu1 %v8741_v3 }
  0x63   : > { %7730 = vmatprep.subr.bf16.mxu0 %v8763_v6  ;;  %7760 = vmatprep.subr.bf16.mxu1 %v8763_v6 }
  0x64   : > { %7685 = vmatmul.mubr.msk.bf16.gmra.mrb[24].mxu0 %vm480_vm0, %v8002_v34  ;;  %7715 = vmatmul.mubr.msk.bf16.gmra.mrb[24].mxu1 %vm480_vm0, %v8004_v35 }
  0x65   : > { %7688 = vmatprep.mubr.msk.bf16.mxu0 %vm480_vm0, %v8005_v36  ;;  %7718 = vmatprep.mubr.msk.bf16.mxu1 %vm480_vm0, %v8007_v37 }
  0x66   : > { %7731 = vmatpush3.bf16.msra.mxu0 %v8763_v6  ;;  %7761 = vmatpush3.bf16.msra.mxu1 %v8763_v6 }
  0x67   : > { %7732 = vmatprep.subr.bf16.mxu0 %v8772_v7  ;;  %7762 = vmatprep.subr.bf16.mxu1 %v8772_v7 }
  0x6a   : > { %7733 = vmatpush3.bf16.msra.mxu0 %v8772_v7  ;;  %7763 = vmatpush3.bf16.msra.mxu1 %v8772_v7 }
  0x6b   : > { %7898 = vmatprep.subr.msk.bf16.mxu0 %vm505_vm1, %v8777_v8  ;;  %7899 = vmatprep.subr.msk.bf16.mxu1 %vm505_vm1, %v8777_v8 }
  0x6c   : > { %7689 = vmatmul.mubr.msk.bf16.gmra.mrb[28].mxu0 %vm480_vm0, %v8006_v38  ;;  %7719 = vmatmul.mubr.msk.bf16.gmra.mrb[28].mxu1 %vm480_vm0, %v8008_v39 }
  0x6d   : > { %7736 = vmatprep.mubr.msk.bf16.mxu0 %vm480_vm0, %v8009_v40  ;;  %7766 = vmatprep.mubr.msk.bf16.mxu1 %vm480_vm0, %v8011_v41 }
  0x6e   : > { %7735 = vmatpush3.bf16.msra.mxu0 %v8791_v9  ;;  %7765 = vmatpush3.bf16.msra.mxu1 %v8791_v9 }
  0x6f   : > { %7782 = vmatprep.subr.bf16.mxu0 %v8718_v0  ;;  %7812 = vmatprep.subr.bf16.mxu1 %v8718_v0 }
  0x74   : > { %7737 = vmatmul.mubr.msk.bf16.vlgmr.msra.gmra.mrb[32].mxu0 %vm480_vm0, %v8010_v42  ;;  %7767 = vmatmul.mubr.msk.bf16.vlgmr.msra.gmra.mrb[32].mxu1 %vm480_vm0, %v8012_v43 }
  0x75   : > { %7740 = vmatprep.mubr.msk.bf16.mxu0 %vm480_vm0, %v8013_v44  ;;  %7770 = vmatprep.mubr.msk.bf16.mxu1 %vm480_vm0, %v8015_v45 }
  0x76   : > { %7783 = vmatpush3.bf16.msra.mxu0 %v8718_v0  ;;  %7813 = vmatpush3.bf16.msra.mxu1 %v8718_v0  ;;  %v8033_v0 = vld [vmem:[%s8746_s26 + $0x1a0] sm:$0xff]  }
  0x77   : > { %7784 = vmatprep.subr.bf16.mxu0 %v8723_v1  ;;  %7814 = vmatprep.subr.bf16.mxu1 %v8723_v1 }
  0x7a   : > { %7785 = vmatpush3.bf16.msra.mxu0 %v8723_v1  ;;  %7815 = vmatpush3.bf16.msra.mxu1 %v8723_v1  ;;  %v8035_v1 = vld [vmem:[%s8746_s26 + $0x1e0] sm:$0xff]  }
  0x7b   : > { %7786 = vmatprep.subr.bf16.mxu0 %v8736_v2  ;;  %7816 = vmatprep.subr.bf16.mxu1 %v8736_v2 }
  0x7c   : > { %7741 = vmatmul.mubr.msk.bf16.gmra.mrb[36].mxu0 %vm480_vm0, %v8014_v46  ;;  %7771 = vmatmul.mubr.msk.bf16.gmra.mrb[36].mxu1 %vm480_vm0, %v8016_v47 }
  0x7d   : > { %7744 = vmatprep.mubr.msk.bf16.mxu0 %vm480_vm0, %v8017_v48  ;;  %7774 = vmatprep.mubr.msk.bf16.mxu1 %vm480_vm0, %v8019_v49 }
  0x7e   : > { %7787 = vmatpush3.bf16.msra.mxu0 %v8736_v2  ;;  %7817 = vmatpush3.bf16.msra.mxu1 %v8736_v2  ;;  %v8034_v2 = vld [vmem:[%s8746_s26 + $0x1a8] sm:$0xff]  }
  0x7f   : > { %7788 = vmatprep.subr.bf16.mxu0 %v8741_v3  ;;  %7818 = vmatprep.subr.bf16.mxu1 %v8741_v3 }
  0x82   : > { %7789 = vmatpush3.bf16.msra.mxu0 %v8741_v3  ;;  %7819 = vmatpush3.bf16.msra.mxu1 %v8741_v3  ;;  %v8036_v3 = vld [vmem:[%s8746_s26 + $0x1e8] sm:$0xff]  }
  0x83   : > { %7790 = vmatprep.subr.bf16.mxu0 %v8763_v6  ;;  %7820 = vmatprep.subr.bf16.mxu1 %v8763_v6 }
  0x84   : > { %7745 = vmatmul.mubr.msk.bf16.gmra.mrb[40].mxu0 %vm480_vm0, %v8018_v50  ;;  %7775 = vmatmul.mubr.msk.bf16.gmra.mrb[40].mxu1 %vm480_vm0, %v8020_v51 }
  0x85   : > { %7748 = vmatprep.mubr.msk.bf16.mxu0 %vm480_vm0, %v8021_v52  ;;  %7778 = vmatprep.mubr.msk.bf16.mxu1 %vm480_vm0, %v8023_v53 }
  0x86   : > { %7791 = vmatpush3.bf16.msra.mxu0 %v8763_v6  ;;  %7821 = vmatpush3.bf16.msra.mxu1 %v8763_v6  ;;  %v8039_v6 = vld [vmem:[%s8746_s26 + $0x1f0] sm:$0xff]  }
  0x87   : > { %7792 = vmatprep.subr.bf16.mxu0 %v8772_v7  ;;  %7822 = vmatprep.subr.bf16.mxu1 %v8772_v7 }
  0x8a   : > { %7793 = vmatpush3.bf16.msra.mxu0 %v8772_v7  ;;  %7823 = vmatpush3.bf16.msra.mxu1 %v8772_v7  ;;  %v8040_v7 = vld [vmem:[%s8746_s26 + $0x1f8] sm:$0xff]   ;;  %s13317_s26 = smov 72  }
  0x8b   : > { %7900 = vmatprep.subr.msk.bf16.mxu0 %vm505_vm1, %v8777_v8  ;;  %7901 = vmatprep.subr.msk.bf16.mxu1 %vm505_vm1, %v8777_v8  ;;  %v9012_v8 = vld [vmem:[%s13098_s2] ss:$0 sm:$0xff]  ;;  %vm1372_vm1 = vcmask 1048512  }
  0x8c   : > { %7749 = vmatmul.mubr.msk.bf16.gmra.mrb[44].mxu0 %vm480_vm0, %v8022_v54  ;;  %7779 = vmatmul.mubr.msk.bf16.gmra.mrb[44].mxu1 %vm480_vm0, %v8024_v55 }
  0x8d   : > { %7796 = vmatprep.mubr.msk.bf16.mxu0 %vm480_vm0, %v8025_v56  ;;  %7826 = vmatprep.mubr.msk.bf16.mxu1 %vm480_vm0, %v8027_v57 }
  0x8e   : > { %7795 = vmatpush3.bf16.msra.mxu0 %v8791_v9  ;;  %7825 = vmatpush3.bf16.msra.mxu1 %v8791_v9 }
  0x94   : > { %7797 = vmatmul.mubr.msk.bf16.vlgmr.msra.gmra.mrb[48].mxu0 %vm480_vm0, %v8026_v58  ;;  %7827 = vmatmul.mubr.msk.bf16.vlgmr.msra.gmra.mrb[48].mxu1 %vm480_vm0, %v8028_v59 }
  0x95   : > { %7800 = vmatprep.mubr.msk.bf16.mxu0 %vm480_vm0, %v8029_v60  ;;  %7830 = vmatprep.mubr.msk.bf16.mxu1 %vm480_vm0, %v8031_v61 }
  0x9c   : > { %7801 = vmatmul.mubr.msk.bf16.gmra.mrb[52].mxu0 %vm480_vm0, %v8030_v62  ;;  %7831 = vmatmul.mubr.msk.bf16.gmra.mrb[52].mxu1 %vm480_vm0, %v8032_v63 }
  0x9d   : > { %7804 = vmatprep.mubr.msk.bf16.mxu0 %vm480_vm0, %v8033_v0  ;;  %7834 = vmatprep.mubr.msk.bf16.mxu1 %vm480_vm0, %v8035_v1 }
  0xa4   : > { %7805 = vmatmul.mubr.msk.bf16.gmra.mrb[56].mxu0 %vm480_vm0, %v8034_v2  ;;  %7835 = vmatmul.mubr.msk.bf16.gmra.mrb[56].mxu1 %vm480_vm0, %v8036_v3 }
  0xa5   : > { %7808 = vmatprep.mubr.msk.bf16.mxu0 %vm480_vm0, %v8037_v4  ;;  %7838 = vmatprep.mubr.msk.bf16.mxu1 %vm480_vm0, %v8039_v6 }
  0xac   : > { %7809 = vmatmul.mubr.msk.bf16.gmra.mrb[60].mxu0 %vm480_vm0, %v8038_v5  ;;  %7839 = vmatmul.mubr.msk.bf16.gmra.mrb[60].mxu1 %vm480_vm0, %v8040_v7  ;;  %vm1341_vm0 = vcmask 982912  }
 0x107   : > { %v7618_v9 = vpop.f32.mrb[0].mxu0  ;;  %v7648_v10 = vpop.f32.mrb[0].mxu1 }
 0x108   : > { %v552_v11 = vadd.f32 %v7618_v9, %v9012_v8  ;;  %v1025_v12 = vadd.f32 %v7648_v10, %v9012_v8  ;;  %v543_v13 = vpop.f32.mrb[1].mxu0  ;;  %v1016_v14 = vpop.f32.mrb[1].mxu1 }
 0x109   : > { %v544_v16 = vadd.f32 %v9012_v8, %v543_v13  ;;  %v1017_v17 = vadd.f32 %v9012_v8, %v1016_v14  ;;  %v7619_v18 = vpop.f32.mrb[2].mxu0  ;;  %v7649_v19 = vpop.f32.mrb[2].mxu1 }
 0x10a   : > { %v608_v20 = vmax.f32 %v552_v11, 0.0  ;;  %v1081_v21 = vmax.f32 %v1025_v12, 0.0  ;;  %v555_v22 = vadd.f32 %v7619_v18, %v9012_v8  ;;  %v1028_v23 = vadd.f32 %v7649_v19, %v9012_v8  ;;  %v546_v24 = vpop.f32.mrb[3].mxu0  ;;  %v1019_v25 = vpop.f32.mrb[3].mxu1 }
 0x10b   : > { %v1079_v26 = vmax.f32 %v1017_v17, 0.0  ;;  %v606_v31 = vmax.f32 %v544_v16, 0.0  ;;  %v1020_v33 = vadd.f32 %v9012_v8, %v1019_v25  ;;  %v547_v45 = vadd.f32 %v9012_v8, %v546_v24 }
 0x10c   : > { %v628_v28 = vmul.f32 %v9019_v15, %v608_v20  ;;  %v1097_v29 = vmul.f32 %v9019_v15, %v1081_v21  ;;  %v609_v30 = vmax.f32 %v555_v22, 0.0  ;;  %v1082_v32 = vmax.f32 %v1028_v23, 0.0 }
 0x10d   : > { %v1095_v34 = vmul.f32 %v9019_v15, %v1079_v26  ;;  %v626_v44 = vmul.f32 %v9019_v15, %v606_v31  ;;  %v1080_v46 = vmax.f32 %v1020_v33, 0.0  ;;  %v607_v57 = vmax.f32 %v547_v45, 0.0 }
 0x10e   : > { %v629_v35 = vmul.f32 %v9019_v15, %v609_v30  ;;  %v9036_v36 = vadd.f32 %v9028_v27, %v1097_v29  ;;  %v9039_v37 = vadd.f32 %v9028_v27, %v628_v28  ;;  %v1098_v49 = vmul.f32 %v9019_v15, %v1082_v32 }
 0x10f   : > { %v7622_v38 = vpop.f32.mrb[4].mxu0  ;;  %v7652_v39 = vpop.f32.mrb[4].mxu1  ;;  %v9051_v52 = vadd.f32 %v9028_v27, %v1095_v34  ;;  %v1096_v58 = vmul.f32 %v9019_v15, %v1080_v46  ;;  %v9068_v62 = vadd.f32 %v9028_v27, %v626_v44  ;;  %v627_v5 = vmul.f32 %v9019_v15, %v607_v57 }
 0x110   : > { %13355 = vst [vmem:[#allocation6_spill] sm:$0xff] %v9036_v36  ;;  %13356 = vst [vmem:[#allocation7_spill] sm:$0xff] %v9039_v37  ;;  %1160 = vrot.lane.b32.xlu0 %v9036_v36, %s13311_s28  ;;  %687 = vrot.lane.b32.xlu1 %v9039_v37, %s13311_s28  ;;  %v568_v40 = vadd.f32 %v7622_v38, %v9012_v8  ;;  %v559_v41 = vpop.f32.mrb[5].mxu0  ;;  %v1041_v42 = vadd.f32 %v7652_v39, %v9012_v8  ;;  %v1032_v43 = vpop.f32.mrb[5].mxu1 }
 0x111   : > { %v7623_v47 = vpop.f32.mrb[6].mxu0  ;;  %v7653_v48 = vpop.f32.mrb[6].mxu1  ;;  %13357 = vst [vmem:[#allocation8_spill] sm:$0xff] %v9051_v52  ;;  %v9054_v53 = vadd.f32 %v9028_v27, %v629_v35  ;;  %v560_v59 = vadd.f32 %v9012_v8, %v559_v41  ;;  %v9065_v61 = vadd.f32 %v9028_v27, %v1098_v49  ;;  %13360 = vst [vmem:[#allocation11_spill] sm:$0xff] %v9068_v62 }
 0x112   : > { %v612_v50 = vmax.f32 %v568_v40, 0.0  ;;  %v562_v51 = vpop.f32.mrb[7].mxu0  ;;  %v1035_v54 = vpop.f32.mrb[7].mxu1  ;;  %v1085_v56 = vmax.f32 %v1041_v42, 0.0  ;;  %v571_v60 = vadd.f32 %v7623_v47, %v9012_v8  ;;  %v1033_v6 = vadd.f32 %v9012_v8, %v1032_v43 }
 0x113   : > { %13358 = vst [vmem:[#allocation9_spill] sm:$0xff] %v9054_v53  ;;  %13359 = vst [vmem:[#allocation10_spill] sm:$0xff] %v9065_v61  ;;  %v610_v10 = vmax.f32 %v560_v59, 0.0  ;;  %v1044_v12 = vadd.f32 %v7653_v48, %v9012_v8  ;;  %v9082_v13 = vadd.f32 %v9028_v27, %v1096_v58  ;;  %v563_v19 = vadd.f32 %v9012_v8, %v562_v51 }
 0x114   : > { %v632_v55 = vmul.f32 %v9019_v15, %v612_v50  ;;  %1129 = vrot.lane.b32.xlu0 %v9051_v52, %s13311_s28  ;;  %689 = vrot.lane.b32.xlu1 %v9054_v53, %s13311_s28  ;;  %v1101_v1 = vmul.f32 %v9019_v15, %v1085_v56  ;;  %v613_v11 = vmax.f32 %v571_v60, 0.0  ;;  %v1083_v20 = vmax.f32 %v1033_v6, 0.0 }
 0x115   : > { %13362 = vst [vmem:[#allocation13_spill] sm:$0xff] %v9082_v13  ;;  %v630_v21 = vmul.f32 %v9019_v15, %v610_v10  ;;  %v1086_v23 = vmax.f32 %v1044_v12, 0.0  ;;  %v9098_v24 = vadd.f32 %v9028_v27, %v627_v5  ;;  %v611_v32 = vmax.f32 %v563_v19, 0.0 }
 0x116   : > { %v9076_v2 = vadd.f32 %v9028_v27, %v632_v55  ;;  %v9092_v18 = vadd.f32 %v9028_v27, %v1101_v1  ;;  %v633_v22 = vmul.f32 %v9019_v15, %v613_v11  ;;  %v1036_v33 = vadd.f32 %v9012_v8, %v1035_v54 }
 0x117   : > { %v7626_v63 = vpop.f32.mrb[8].mxu0  ;;  %v7656_v0 = vpop.f32.mrb[8].mxu1  ;;  %13364 = vst [vmem:[#allocation15_spill] sm:$0xff] %v9098_v24  ;;  %v1099_v38 = vmul.f32 %v9019_v15, %v1083_v20  ;;  %v1102_v39 = vmul.f32 %v9019_v15, %v1086_v23  ;;  %v9120_v41 = vadd.f32 %v9028_v27, %v630_v21  ;;  %v631_v46 = vmul.f32 %v9019_v15, %v611_v32 }
 0x118   : > { %1162 = vrot.lane.b32.xlu1 %v9065_v61, %s13311_s28  ;;  %664 = vrot.lane.b32.xlu0 %v9068_v62, %s13311_s28  ;;  %13361 = vst [vmem:[#allocation12_spill] sm:$0xff] %v9076_v2  ;;  %v575_v3 = vpop.f32.mrb[9].mxu0  ;;  %v1048_v4 = vpop.f32.mrb[9].mxu1  ;;  %v584_v17 = vadd.f32 %v7626_v63, %v9012_v8  ;;  %13363 = vst [vmem:[#allocation14_spill] sm:$0xff] %v9092_v18  ;;  %v1057_v29 = vadd.f32 %v7656_v0, %v9012_v8  ;;  %v1084_v47 = vmax.f32 %v1036_v33, 0.0 }
 0x119   : > { %v7627_v7 = vpop.f32.mrb[10].mxu0  ;;  %v7657_v9 = vpop.f32.mrb[10].mxu1  ;;  %v9117_v40 = vadd.f32 %v9028_v27, %v633_v22  ;;  %13366 = vst [vmem:[#allocation17_spill] sm:$0xff] %v9120_v41  ;;  %v576_v48 = vadd.f32 %v9012_v8, %v575_v3  ;;  %v9135_v50 = vadd.f32 %v9028_v27, %v1102_v39  ;;  %v9138_v51 = vadd.f32 %v9028_v27, %v1099_v38 }
 0x11a   : > { %v578_v14 = vpop.f32.mrb[11].mxu0  ;;  %v9084_v16 = vpop.f32.mrb[11].mxu1  ;;  %v616_v28 = vmax.f32 %v584_v17, 0.0  ;;  %v1089_v45 = vmax.f32 %v1057_v29, 0.0  ;;  %v587_v49 = vadd.f32 %v7627_v7, %v9012_v8  ;;  %v1100_v60 = vmul.f32 %v9019_v15, %v1084_v47 }
 0x11b   : > { %13365 = vst [vmem:[#allocation16_spill] sm:$0xff] %v9117_v40  ;;  %13367 = vst [vmem:[#allocation18_spill] sm:$0xff] %v9135_v50  ;;  %v1049_v63 = vadd.f32 %v9012_v8, %v1048_v4  ;;  %v614_v3 = vmax.f32 %v576_v48, 0.0  ;;  %v1060_v6 = vadd.f32 %v7657_v9, %v9012_v8  ;;  %v9164_v7 = vadd.f32 %v9028_v27, %v631_v46 }
 0x11c   : > { %1131 = vrot.lane.b32.xlu1 %v9082_v13, %s13311_s28  ;;  %749 = vrot.lane.b32.xlu0 %v9076_v2, %s13311_s28  ;;  %v636_v44 = vmul.f32 %v9019_v15, %v616_v28  ;;  %13368 = vst [vmem:[#allocation19_spill] sm:$0xff] %v9138_v51  ;;  %v1105_v56 = vmul.f32 %v9019_v15, %v1089_v45  ;;  %v617_v5 = vmax.f32 %v587_v49, 0.0 }
 0x11d   : > { %13370 = vst [vmem:[#allocation21_spill] sm:$0xff] %v9164_v7  ;;  %v579_v9 = vadd.f32 %v9012_v8, %v578_v14  ;;  %v1087_v17 = vmax.f32 %v1049_v63, 0.0  ;;  %v634_v19 = vmul.f32 %v9019_v15, %v614_v3  ;;  %v1090_v21 = vmax.f32 %v1060_v6, 0.0 }
 0x11e   : > { %v9150_v57 = vadd.f32 %v9028_v27, %v636_v44  ;;  %v9176_v12 = vadd.f32 %v9028_v27, %v1105_v56  ;;  %v637_v20 = vmul.f32 %v9019_v15, %v617_v5  ;;  %v9182_v22 = vadd.f32 %v9028_v27, %v1100_v60 }
 0x11f   : > { %v7630_v25 = vpop.f32.mrb[12].mxu0  ;;  %v7660_v26 = vpop.f32.mrb[12].mxu1  ;;  %v615_v33 = vmax.f32 %v579_v9, 0.0  ;;  %v1052_v38 = vadd.f32 %v9012_v8, %v9084_v16  ;;  %v1103_v45 = vmul.f32 %v9019_v15, %v1087_v17  ;;  %v1106_v46 = vmul.f32 %v9019_v15, %v1090_v21 }
 0x120   : > { %666 = vrot.lane.b32.xlu1 %v9098_v24, %s13311_s28  ;;  %1222 = vrot.lane.b32.xlu0 %v9092_v18, %s13311_s28  ;;  %v9105_v30 = vpop.f32.mrb[13].mxu0  ;;  %v9107_v31 = vpop.f32.mrb[13].mxu1  ;;  %13369 = vst [vmem:[#allocation20_spill] sm:$0xff] %v9150_v57  ;;  %v600_v4 = vadd.f32 %v7630_v25, %v9012_v8  ;;  %13371 = vst [vmem:[#allocation22_spill] sm:$0xff] %v9176_v12  ;;  %v1073_v14 = vadd.f32 %v7660_v26, %v9012_v8 }
 0x121   : > { %v9110_v34 = vpop.f32.mrb[14].mxu0  ;;  %v9112_v35 = vpop.f32.mrb[14].mxu1  ;;  %13372 = vst [vmem:[#allocation23_spill] sm:$0xff] %v9182_v22  ;;  %v9206_v47 = vadd.f32 %v9028_v27, %v637_v20  ;;  %v9209_v26 = vadd.f32 %v9028_v27, %v634_v19  ;;  %v635_v60 = vmul.f32 %v9019_v15, %v615_v33  ;;  %v1088_v63 = vmax.f32 %v1052_v38, 0.0 }
 0x122   : > { %v9122_v42 = vpop.f32.mrb[15].mxu0  ;;  %v9124_v43 = vpop.f32.mrb[15].mxu1  ;;  %v620_v29 = vmax.f32 %v600_v4, 0.0  ;;  %v1093_v56 = vmax.f32 %v1073_v14, 0.0  ;;  %v592_v3 = vadd.f32 %v9012_v8, %v9105_v30  ;;  %v603_v5 = vadd.f32 %v9110_v34, %v9012_v8 }
 0x123   : > { %13373 = vst [vmem:[#allocation24_spill] sm:$0xff] %v9206_v47  ;;  %13374 = vst [vmem:[#allocation25_spill] sm:$0xff] %v9209_v26  ;;  %v9226_v6 = vadd.f32 %v9028_v27, %v1106_v46  ;;  %v9229_v4 = vadd.f32 %v9028_v27, %v1103_v45  ;;  %v1104_v21 = vmul.f32 %v9019_v15, %v1088_v63 }
 0x124   : > { %751 = vrot.lane.b32.xlu1 %v9117_v40, %s13311_s28  ;;  %718 = vrot.lane.b32.xlu0 %v9120_v41, %s13311_s28  ;;  %v640_v16 = vmul.f32 %v9019_v15, %v620_v29  ;;  %v1109_v19 = vmul.f32 %v9019_v15, %v1093_v56  ;;  %v1065_v29 = vadd.f32 %v9012_v8, %v9107_v31  ;;  %v618_v38 = vmax.f32 %v592_v3, 0.0 }
 0x125   : > { %13375 = vst [vmem:[#allocation26_spill] sm:$0xff] %v9226_v6  ;;  %13376 = vst [vmem:[#allocation27_spill] sm:$0xff] %v9229_v4  ;;  %v621_v45 = vmax.f32 %v603_v5, 0.0  ;;  %v1076_v46 = vadd.f32 %v9112_v35, %v9012_v8  ;;  %v595_v35 = vadd.f32 %v9012_v8, %v9122_v42 }
 0x126   : > { %v9241_v30 = vadd.f32 %v9028_v27, %v640_v16  ;;  %v9257_v16 = vadd.f32 %v9028_v27, %v635_v60  ;;  %v9270_v63 = vadd.f32 %v9028_v27, %v1109_v19  ;;  %v1091_v60 = vmax.f32 %v1065_v29, 0.0 }
 0x127   : > { %v9140_v54 = vpop.f32.mrb[16].mxu0  ;;  %v9142_v55 = vpop.f32.mrb[16].mxu1  ;;  %v638_v3 = vmul.f32 %v9019_v15, %v618_v38  ;;  %v641_v5 = vmul.f32 %v9019_v15, %v621_v45  ;;  %v1068_v38 = vadd.f32 %v9012_v8, %v9124_v43 }
 0x128   : > { %1224 = vrot.lane.b32.xlu1 %v9135_v50, %s13311_s28  ;;  %1191 = vrot.lane.b32.xlu0 %v9138_v51, %s13311_s28  ;;  %v9152_v58 = vpop.f32.mrb[17].mxu0  ;;  %v9154_v59 = vpop.f32.mrb[17].mxu1  ;;  %13377 = vst [vmem:[#allocation28_spill] sm:$0xff] %v9241_v30  ;;  %13378 = vst [vmem:[#allocation29_spill] sm:$0xff] %v9257_v16  ;;  %v1498_v31 = vadd.f32 %v9140_v54, %v9012_v8  ;;  %v1955_v42 = vadd.f32 %v9142_v55, %v9012_v8 }
 0x129   : > { %v9158_v0 = vpop.f32.mrb[18].mxu0  ;;  %v9160_v1 = vpop.f32.mrb[18].mxu1  ;;  %13379 = vst [vmem:[#allocation30_spill] sm:$0xff] %v9270_v63  ;;  %v9305_v55 = vadd.f32 %v9028_v27, %v638_v3  ;;  %v1947_v3 = vadd.f32 %v9012_v8, %v9154_v59 }
 0x12a   : > { %v9166_v10 = vpop.f32.mrb[19].mxu0  ;;  %v9168_v11 = vpop.f32.mrb[19].mxu1  ;;  %v1554_v54 = vmax.f32 %v1498_v31, 0.0  ;;  %v1107_v31 = vmul.f32 %v9019_v15, %v1091_v60  ;;  %v1092_v60 = vmax.f32 %v1068_v38, 0.0  ;;  %v1490_v38 = vadd.f32 %v9012_v8, %v9152_v58 }
 0x12b   : > { %13382 = vst [vmem:[#allocation33_spill] sm:$0xff] %v9305_v55 }
 0x12c   : > { %720 = vrot.lane.b32.xlu1 %v9164_v7, %s13311_s28  ;;  %811 = vrot.lane.b32.xlu0 %v9150_v57, %s13311_s28  ;;  %v1570_v43 = vmul.f32 %v9019_v15, %v1554_v54  ;;  %v9325_v54 = vadd.f32 %v9028_v27, %v1107_v31 }
 0x12e   : > { %13384 = vst [vmem:[#allocation35_spill] sm:$0xff] %v9325_v54  ;;  %v9337_v59 = vadd.f32 %v9028_v27, %v1570_v43 }
 0x12f   : > { %v9184_v23 = vpop.f32.mrb[20].mxu0  ;;  %v9186_v28 = vpop.f32.mrb[20].mxu1 }
 0x130   : > { %1193 = vrot.lane.b32.xlu1 %v9182_v22, %s13311_s28  ;;  %1284 = vrot.lane.b32.xlu0 %v9176_v12, %s13311_s28  ;;  %v9193_v25 = vpop.f32.mrb[21].mxu0  ;;  %v9195_v32 = vpop.f32.mrb[21].mxu1  ;;  %13385 = vst [vmem:[#allocation36_spill] sm:$0xff] %v9337_v59 }
 0x131   : > { %v9199_v39 = vpop.f32.mrb[22].mxu0  ;;  %v9201_v44 = vpop.f32.mrb[22].mxu1 }
 0x132   : > { %v9211_v48 = vpop.f32.mrb[23].mxu0  ;;  %v9213_v49 = vpop.f32.mrb[23].mxu1 }
 0x134   : > { %813 = vrot.lane.b32.xlu1 %v9206_v47, %s13311_s28  ;;  %780 = vrot.lane.b32.xlu0 %v9209_v26, %s13311_s28  ;;  %v1094_v26 = vmax.f32 %v1076_v46, 0.0  ;;  %v2011_v47 = vmax.f32 %v1955_v42, 0.0 }
 0x137   : > { %v9231_v9 = vpop.f32.mrb[24].mxu0  ;;  %v9233_v17 = vpop.f32.mrb[24].mxu1 }
 0x138   : > { %1286 = vrot.lane.b32.xlu1 %v9226_v6, %s13311_s28  ;;  %1253 = vrot.lane.b32.xlu0 %v9229_v4, %s13311_s28  ;;  %v9243_v34 = vpop.f32.mrb[25].mxu0  ;;  %v9245_v20 = vpop.f32.mrb[25].mxu1 }
 0x139   : > { %v9250_v14 = vpop.f32.mrb[26].mxu0  ;;  %v9252_v33 = vpop.f32.mrb[26].mxu1 }
 0x13a   : > { %v9259_v56 = vpop.f32.mrb[27].mxu0  ;;  %v9261_v4 = vpop.f32.mrb[27].mxu1 }
 0x13c   : > { %782 = vrot.lane.b32.xlu1 %v9257_v16, %s13311_s28  ;;  %873 = vrot.lane.b32.xlu0 %v9241_v30, %s13311_s28  ;;  %v9277_v16 = vadd.f32 %v9028_v27, %v1104_v21  ;;  %v619_v21 = vmax.f32 %v595_v35, 0.0 }
 0x13e   : > { %13380 = vst [vmem:[#allocation31_spill] sm:$0xff] %v9277_v16 }
 0x13f   : > { %v9279_v6 = vpop.f32.mrb[28].mxu0  ;;  %v9281_v30 = vpop.f32.mrb[28].mxu1 }
 0x140   : > { %1255 = vrot.lane.b32.xlu1 %v9277_v16, %s13311_s28  ;;  %1346 = vrot.lane.b32.xlu0 %v9270_v63, %s13311_s28  ;;  %v9289_v19 = vpop.f32.mrb[29].mxu0  ;;  %v9291_v29 = vpop.f32.mrb[29].mxu1  ;;  %v1110_v16 = vmul.f32 %v9019_v15, %v1094_v26  ;;  %v9302_v63 = vadd.f32 %v9028_v27, %v641_v5  ;;  %v639_v26 = vmul.f32 %v9019_v15, %v619_v21 }
 0x141   : > { %v9295_v45 = vpop.f32.mrb[30].mxu0  ;;  %v9297_v46 = vpop.f32.mrb[30].mxu1  ;;  %v1958_v5 = vadd.f32 %v9160_v1, %v9012_v8  ;;  %v1108_v21 = vmul.f32 %v9019_v15, %v1092_v60  ;;  %v1552_v60 = vmax.f32 %v1490_v38, 0.0 }
 0x142   : > { %13381 = vst [vmem:[#allocation32_spill] sm:$0xff] %v9302_v63  ;;  %v9307_v12 = vpop.f32.mrb[31].mxu0  ;;  %v9309_v35 = vpop.f32.mrb[31].mxu1  ;;  %v9322_v57 = vadd.f32 %v9028_v27, %v1110_v16  ;;  %v9353_v43 = vadd.f32 %v9028_v27, %v639_v26  ;;  %v1493_v26 = vadd.f32 %v9012_v8, %v9166_v10 }
 0x143   : > { %v2012_v22 = vmax.f32 %v1958_v5, 0.0 }
 0x144   : > { %875 = vrot.lane.b32.xlu1 %v9302_v63, %s13311_s28  ;;  %842 = vrot.lane.b32.xlu0 %v9305_v55, %s13311_s28  ;;  %13383 = vst [vmem:[#allocation34_spill] sm:$0xff] %v9322_v57  ;;  %v2027_v55 = vmul.f32 %v9019_v15, %v2011_v47  ;;  %13386 = vst [vmem:[#allocation37_spill] sm:$0xff] %v9353_v43 }
 0x145   : > { %v2028_v5 = vmul.f32 %v9019_v15, %v2012_v22 }
 0x146   : > { %v9364_v58 = vadd.f32 %v9028_v27, %v2027_v55  ;;  %v1553_v55 = vmax.f32 %v1493_v26, 0.0  ;;  %v1971_v26 = vadd.f32 %v9186_v28, %v9012_v8 }
 0x147   : > { %v9327_v42 = vpop.f32.mrb[32].mxu0  ;;  %v9329_v63 = vpop.f32.mrb[32].mxu1  ;;  %v9398_v18 = vadd.f32 %v9028_v27, %v2028_v5  ;;  %v1974_v5 = vadd.f32 %v9201_v44, %v9012_v8 }
 0x148   : > { %1348 = vrot.lane.b32.xlu1 %v9322_v57, %s13311_s28  ;;  %1315 = vrot.lane.b32.xlu0 %v9325_v54, %s13311_s28  ;;  %v9339_v1 = vpop.f32.mrb[33].mxu0  ;;  %v9341_v16 = vpop.f32.mrb[33].mxu1  ;;  %v2009_v57 = vmax.f32 %v1947_v3, 0.0  ;;  %v1950_v54 = vadd.f32 %v9012_v8, %v9168_v11  ;;  %13387 = vst [vmem:[#allocation38_spill] sm:$0xff] %v9364_v58  ;;  %v1501_v11 = vadd.f32 %v9158_v0, %v9012_v8 }
 0x149   : > { %v9346_v31 = vpop.f32.mrb[34].mxu0  ;;  %v9348_v47 = vpop.f32.mrb[34].mxu1  ;;  %13389 = vst [vmem:[#allocation40_spill] sm:$0xff] %v9398_v18 }
 0x14a   : > { %v9355_v51 = vpop.f32.mrb[35].mxu0  ;;  %v9357_v7 = vpop.f32.mrb[35].mxu1  ;;  %v2025_v3 = vmul.f32 %v9019_v15, %v2009_v57  ;;  %v2010_v41 = vmax.f32 %v1950_v54, 0.0  ;;  %v1568_v57 = vmul.f32 %v9019_v15, %v1552_v60  ;;  %v1555_v22 = vmax.f32 %v1501_v11, 0.0 }
 0x14b   : > { %v1514_v54 = vadd.f32 %v9184_v23, %v9012_v8  ;;  %v1569_v23 = vmul.f32 %v9019_v15, %v1553_v55 }
 0x14c   : > { %844 = vrot.lane.b32.xlu1 %v9353_v43, %s13311_s28  ;;  %1624 = vrot.lane.b32.xlu0 %v9337_v59, %s13311_s28  ;;  %v9373_v43 = vadd.f32 %v9028_v27, %v1108_v21  ;;  %v9401_v40 = vadd.f32 %v9028_v27, %v2025_v3 }
 0x14d   : > { %v9446_v62 = vadd.f32 %v9028_v27, %v1569_v23  ;;  %v1966_v23 = vadd.f32 %v9012_v8, %v9213_v49 }
 0x14e   : > { %13388 = vst [vmem:[#allocation39_spill] sm:$0xff] %v9373_v43  ;;  %13390 = vst [vmem:[#allocation41_spill] sm:$0xff] %v9401_v40 }
 0x14f   : > { %v9375_v50 = vpop.f32.mrb[36].mxu0  ;;  %v9377_v59 = vpop.f32.mrb[36].mxu1  ;;  %13393 = vst [vmem:[#allocation44_spill] sm:$0xff] %v9446_v62 }
 0x150   : > { %1317 = vrot.lane.b32.xlu1 %v9373_v43, %s13311_s28  ;;  %2089 = vrot.lane.b32.xlu0 %v9364_v58, %s13311_s28  ;;  %v9383_v0 = vpop.f32.mrb[37].mxu0  ;;  %v9385_v10 = vpop.f32.mrb[37].mxu1  ;;  %v2026_v43 = vmul.f32 %v9019_v15, %v2010_v41  ;;  %v1517_v58 = vadd.f32 %v9199_v39, %v9012_v8  ;;  %v1571_v41 = vmul.f32 %v9019_v15, %v1555_v22  ;;  %v1558_v39 = vmax.f32 %v1514_v54, 0.0 }
 0x151   : > { %v9390_v21 = vpop.f32.mrb[38].mxu0  ;;  %v9392_v38 = vpop.f32.mrb[38].mxu1  ;;  %v2015_v22 = vmax.f32 %v1971_v26, 0.0 }
 0x152   : > { %v9403_v60 = vpop.f32.mrb[39].mxu0  ;;  %v9405_v11 = vpop.f32.mrb[39].mxu1  ;;  %v1559_v3 = vmax.f32 %v1517_v58, 0.0  ;;  %v9418_v2 = vadd.f32 %v9028_v27, %v2026_v43  ;;  %v1574_v44 = vmul.f32 %v9019_v15, %v1558_v39  ;;  %v1506_v43 = vadd.f32 %v9012_v8, %v9193_v25 }
 0x153   : > { %v9449_v13 = vadd.f32 %v9028_v27, %v1571_v41  ;;  %v2031_v41 = vmul.f32 %v9019_v15, %v2015_v22 }
 0x154   : > { %2091 = vrot.lane.b32.xlu1 %v9398_v18, %s13311_s28  ;;  %2059 = vrot.lane.b32.xlu0 %v9401_v40, %s13311_s28  ;;  %13391 = vst [vmem:[#allocation42_spill] sm:$0xff] %v9418_v2  ;;  %v9421_v18 = vadd.f32 %v9028_v27, %v1568_v57  ;;  %v1509_v57 = vadd.f32 %v9012_v8, %v9211_v48  ;;  %v1556_v48 = vmax.f32 %v1506_v43, 0.0 }
 0x155   : > { %13394 = vst [vmem:[#allocation45_spill] sm:$0xff] %v9449_v13  ;;  %v9497_v53 = vadd.f32 %v9028_v27, %v2031_v41 }
 0x156   : > { %13392 = vst [vmem:[#allocation43_spill] sm:$0xff] %v9421_v18  ;;  %v1557_v26 = vmax.f32 %v1509_v57, 0.0  ;;  %v2014_v57 = vmax.f32 %v1966_v23, 0.0  ;;  %v1987_v23 = vadd.f32 %v9233_v17, %v9012_v8 }
 0x157   : > { %v9423_v24 = vpop.f32.mrb[40].mxu0  ;;  %v9425_v40 = vpop.f32.mrb[40].mxu1  ;;  %13398 = vst [vmem:[#allocation49_spill] sm:$0xff] %v9497_v53 }
 0x158   : > { %2061 = vrot.lane.b32.xlu1 %v9418_v2, %s13311_s28  ;;  %1602 = vrot.lane.b32.xlu0 %v9421_v18, %s13311_s28  ;;  %v9431_v28 = vpop.f32.mrb[41].mxu0  ;;  %v9433_v58 = vpop.f32.mrb[41].mxu1  ;;  %v1575_v2 = vmul.f32 %v9019_v15, %v1559_v3  ;;  %v2016_v18 = vmax.f32 %v1974_v5, 0.0  ;;  %v1963_v3 = vadd.f32 %v9012_v8, %v9195_v32 }
 0x159   : > { %v9440_v55 = vpop.f32.mrb[42].mxu0  ;;  %v9442_v54 = vpop.f32.mrb[42].mxu1 }
 0x15a   : > { %v9451_v39 = vpop.f32.mrb[43].mxu0  ;;  %v9453_v25 = vpop.f32.mrb[43].mxu1  ;;  %v2032_v5 = vmul.f32 %v9019_v15, %v2016_v18  ;;  %v9466_v52 = vadd.f32 %v9028_v27, %v1575_v2  ;;  %v1572_v2 = vmul.f32 %v9019_v15, %v1556_v48  ;;  %v2013_v18 = vmax.f32 %v1963_v3, 0.0 }
 0x15c   : > { %1604 = vrot.lane.b32.xlu1 %v9446_v62, %s13311_s28  ;;  %1626 = vrot.lane.b32.xlu0 %v9449_v13, %s13311_s28  ;;  %13395 = vst [vmem:[#allocation46_spill] sm:$0xff] %v9466_v52  ;;  %v9469_v62 = vadd.f32 %v9028_v27, %v1574_v44  ;;  %v1530_v44 = vadd.f32 %v9231_v9, %v9012_v8 }
 0x15d   : > { %v9494_v36 = vadd.f32 %v9028_v27, %v2032_v5  ;;  %v2029_v9 = vmul.f32 %v9019_v15, %v2013_v18  ;;  %v1990_v5 = vadd.f32 %v9252_v33, %v9012_v8  ;;  %v1522_v33 = vadd.f32 %v9012_v8, %v9243_v34 }
 0x15e   : > { %13396 = vst [vmem:[#allocation47_spill] sm:$0xff] %v9469_v62  ;;  %v2019_v18 = vmax.f32 %v1987_v23, 0.0 }
 0x15f   : > { %v9471_v61 = vpop.f32.mrb[44].mxu0  ;;  %v9473_v43 = vpop.f32.mrb[44].mxu1  ;;  %13397 = vst [vmem:[#allocation48_spill] sm:$0xff] %v9494_v36 }
 0x160   : > { %1686 = vrot.lane.b32.xlu1 %v9466_v52, %s13311_s28  ;;  %1684 = vrot.lane.b32.xlu0 %v9469_v62, %s13311_s28  ;;  %v9479_v32 = vpop.f32.mrb[45].mxu0  ;;  %v9481_v49 = vpop.f32.mrb[45].mxu1  ;;  %v1573_v52 = vmul.f32 %v9019_v15, %v1557_v26  ;;  %v1533_v62 = vadd.f32 %v9250_v14, %v9012_v8  ;;  %v2030_v14 = vmul.f32 %v9019_v15, %v2014_v57  ;;  %v1562_v26 = vmax.f32 %v1530_v44, 0.0 }
 0x161   : > { %v9486_v22 = vpop.f32.mrb[46].mxu0  ;;  %v9488_v13 = vpop.f32.mrb[46].mxu1 }
 0x162   : > { %v9499_v48 = vpop.f32.mrb[47].mxu0  ;;  %v9501_v3 = vpop.f32.mrb[47].mxu1  ;;  %v1563_v41 = vmax.f32 %v1533_v62, 0.0  ;;  %v9514_v37 = vadd.f32 %v9028_v27, %v1573_v52  ;;  %v1578_v52 = vmul.f32 %v9019_v15, %v1562_v26 }
 0x163   : > { %13399 = vst [vmem:[#allocation50_spill] sm:$0xff] %v9501_v3 }
 0x164   : > { %2151 = vrot.lane.b32.xlu1 %v9494_v36, %s13311_s28  ;;  %2149 = vrot.lane.b32.xlu0 %v9497_v53, %s13311_s28  ;;  %13400 = vst [vmem:[#allocation51_spill] sm:$0xff] %v9514_v37  ;;  %v9517_v36 = vadd.f32 %v9028_v27, %v1572_v2  ;;  %v1525_v2 = vadd.f32 %v9012_v8, %v9259_v56  ;;  %v1560_v56 = vmax.f32 %v1522_v33, 0.0 }
 0x166   : > { %13401 = vst [vmem:[#allocation52_spill] sm:$0xff] %v9517_v36  ;;  %v1561_v23 = vmax.f32 %v1525_v2, 0.0 }
 0x167   : > { %v9519_v3 = vpop.f32.mrb[48].mxu0  ;;  %v9521_v53 = vpop.f32.mrb[48].mxu1 }
 0x168   : > { %1656 = vrot.lane.b32.xlu1 %v9514_v37, %s13311_s28  ;;  %1654 = vrot.lane.b32.xlu0 %v9517_v36, %s13311_s28  ;;  %v9527_v62 = vpop.f32.mrb[49].mxu0  ;;  %v9529_v17 = vpop.f32.mrb[49].mxu1  ;;  %v1579_v37 = vmul.f32 %v9019_v15, %v1563_v41  ;;  %v2020_v36 = vmax.f32 %v1990_v5, 0.0  ;;  %v1979_v41 = vadd.f32 %v9012_v8, %v9245_v20 }
 0x169   : > { %13402 = vst [vmem:[#allocation53_spill] sm:$0xff] %v9527_v62  ;;  %13403 = vst [vmem:[#allocation54_spill] sm:$0xff] %v9529_v17  ;;  %v9536_v57 = vpop.f32.mrb[50].mxu0  ;;  %v9538_v44 = vpop.f32.mrb[50].mxu1  ;;  %v9542_v62 = vadd.f32 %v9028_v27, %v2030_v14  ;;  %v9545_v17 = vadd.f32 %v9028_v27, %v2029_v9  ;;  %v1982_v14 = vadd.f32 %v9012_v8, %v9261_v4 }
 0x16a   : > { %v9547_v26 = vpop.f32.mrb[51].mxu0  ;;  %v9549_v34 = vpop.f32.mrb[51].mxu1  ;;  %v2035_v9 = vmul.f32 %v9019_v15, %v2019_v18  ;;  %v2036_v5 = vmul.f32 %v9019_v15, %v2020_v36  ;;  %v1576_v36 = vmul.f32 %v9019_v15, %v1560_v56 }
 0x16b   : > { %13404 = vst [vmem:[#allocation55_spill] sm:$0xff] %v9542_v62  ;;  %13405 = vst [vmem:[#allocation56_spill] sm:$0xff] %v9545_v17  ;;  %v2018_v2 = vmax.f32 %v1982_v14, 0.0  ;;  %v2003_v14 = vadd.f32 %v9281_v30, %v9012_v8 }
 0x16c   : > { %13406 = vst [vmem:[#allocation57_spill] sm:$0xff] %v9547_v26  ;;  %13407 = vst [vmem:[#allocation58_spill] sm:$0xff] %v9549_v34  ;;  %2121 = vrot.lane.b32.xlu1 %v9542_v62, %s13311_s28  ;;  %2119 = vrot.lane.b32.xlu0 %v9545_v17, %s13311_s28  ;;  %v9562_v26 = vadd.f32 %v9028_v27, %v1579_v37  ;;  %v9565_v62 = vadd.f32 %v9028_v27, %v1578_v52  ;;  %v2017_v37 = vmax.f32 %v1979_v41, 0.0 }
 0x16d   : > { %v1546_v52 = vadd.f32 %v9279_v6, %v9012_v8 }
 0x16e   : > { %13408 = vst [vmem:[#allocation59_spill] sm:$0xff] %v9562_v26  ;;  %13409 = vst [vmem:[#allocation60_spill] sm:$0xff] %v9565_v62  ;;  %v2033_v6 = vmul.f32 %v9019_v15, %v2017_v37  ;;  %v2023_v37 = vmax.f32 %v2003_v14, 0.0 }
 0x16f   : > { %v9567_v34 = vpop.f32.mrb[52].mxu0  ;;  %v9569_v33 = vpop.f32.mrb[52].mxu1 }
 0x170   : > { %1746 = vrot.lane.b32.xlu1 %v9562_v26, %s13311_s28  ;;  %1744 = vrot.lane.b32.xlu0 %v9565_v62, %s13311_s28  ;;  %v9575_v4 = vpop.f32.mrb[53].mxu0  ;;  %v9577_v20 = vpop.f32.mrb[53].mxu1  ;;  %v1577_v26 = vmul.f32 %v9019_v15, %v1561_v23  ;;  %v1549_v62 = vadd.f32 %v9295_v45, %v9012_v8  ;;  %v2034_v45 = vmul.f32 %v9019_v15, %v2018_v2  ;;  %v1566_v23 = vmax.f32 %v1546_v52, 0.0 }
 0x171   : > { %13410 = vst [vmem:[#allocation61_spill] sm:$0xff] %v9575_v4  ;;  %13411 = vst [vmem:[#allocation62_spill] sm:$0xff] %v9577_v20  ;;  %v9582_v18 = vpop.f32.mrb[54].mxu0  ;;  %v9584_v17 = vpop.f32.mrb[54].mxu1  ;;  %v9590_v4 = vadd.f32 %v9028_v27, %v2036_v5  ;;  %v9593_v20 = vadd.f32 %v9028_v27, %v2035_v9  ;;  %v2006_v5 = vadd.f32 %v9297_v46, %v9012_v8 }
 0x172   : > { %v9595_v56 = vpop.f32.mrb[55].mxu0  ;;  %v9597_v41 = vpop.f32.mrb[55].mxu1  ;;  %v1567_v9 = vmax.f32 %v1549_v62, 0.0  ;;  %v1582_v46 = vmul.f32 %v9019_v15, %v1566_v23 }
 0x173   : > { %13412 = vst [vmem:[#allocation63_spill] sm:$0xff] %v9590_v4  ;;  %13413 = vst [vmem:[#allocation64_spill] sm:$0xff] %v9593_v20 }
 0x174   : > { %13414 = vst [vmem:[#allocation65_spill] sm:$0xff] %v9595_v56  ;;  %13415 = vst [vmem:[#allocation66_spill] sm:$0xff] %v9597_v41  ;;  %2211 = vrot.lane.b32.xlu1 %v9590_v4, %s13311_s28  ;;  %2209 = vrot.lane.b32.xlu0 %v9593_v20, %s13311_s28  ;;  %v9610_v41 = vadd.f32 %v9028_v27, %v1577_v26  ;;  %v9613_v4 = vadd.f32 %v9028_v27, %v1576_v36 }
 0x175   : > { %v1538_v26 = vadd.f32 %v9012_v8, %v9289_v19  ;;  %v1541_v36 = vadd.f32 %v9012_v8, %v9307_v12 }
 0x176   : > { %13416 = vst [vmem:[#allocation67_spill] sm:$0xff] %v9610_v41  ;;  %13417 = vst [vmem:[#allocation68_spill] sm:$0xff] %v9613_v4 }
 0x177   : > { %v9615_v56 = vpop.f32.mrb[56].mxu0  ;;  %v9617_v20 = vpop.f32.mrb[56].mxu1  ;;  %v1564_v12 = vmax.f32 %v1538_v26, 0.0  ;;  %v1565_v14 = vmax.f32 %v1541_v36, 0.0 }
 0x178   : > { %1716 = vrot.lane.b32.xlu1 %v9610_v41, %s13311_s28  ;;  %1714 = vrot.lane.b32.xlu0 %v9613_v4, %s13311_s28  ;;  %v9623_v30 = vpop.f32.mrb[57].mxu0  ;;  %v9625_v62 = vpop.f32.mrb[57].mxu1  ;;  %v1583_v41 = vmul.f32 %v9019_v15, %v1567_v9  ;;  %v2024_v4 = vmax.f32 %v2006_v5, 0.0  ;;  %v2039_v9 = vmul.f32 %v9019_v15, %v2023_v37  ;;  %v1998_v5 = vadd.f32 %v9012_v8, %v9309_v35 }
 0x179   : > { %13418 = vst [vmem:[#allocation69_spill] sm:$0xff] %v9623_v30  ;;  %13419 = vst [vmem:[#allocation70_spill] sm:$0xff] %v9625_v62  ;;  %v9632_v2 = vpop.f32.mrb[58].mxu0  ;;  %v9634_v52 = vpop.f32.mrb[58].mxu1  ;;  %v9638_v30 = vadd.f32 %v9028_v27, %v2034_v45  ;;  %v9641_v62 = vadd.f32 %v9028_v27, %v2033_v6  ;;  %v1995_v45 = vadd.f32 %v9012_v8, %v9291_v29 }
 0x17a   : > { %v9643_v23 = vpop.f32.mrb[59].mxu0  ;;  %v9645_v19 = vpop.f32.mrb[59].mxu1  ;;  %v2040_v6 = vmul.f32 %v9019_v15, %v2024_v4  ;;  %v1580_v26 = vmul.f32 %v9019_v15, %v1564_v12  ;;  %v1581_v29 = vmul.f32 %v9019_v15, %v1565_v14  ;;  %v2420_v35 = vadd.f32 %v9327_v42, %v9012_v8 }
 0x17b   : > { %13420 = vst [vmem:[#allocation71_spill] sm:$0xff] %v9638_v30  ;;  %13421 = vst [vmem:[#allocation72_spill] sm:$0xff] %v9641_v62  ;;  %v2021_v4 = vmax.f32 %v1995_v45, 0.0  ;;  %v2022_v36 = vmax.f32 %v1998_v5, 0.0 }
 0x17c   : > { %13422 = vst [vmem:[#allocation73_spill] sm:$0xff] %v9645_v19  ;;  %2181 = vrot.lane.b32.xlu1 %v9638_v30, %s13311_s28  ;;  %2179 = vrot.lane.b32.xlu0 %v9641_v62, %s13311_s28  ;;  %v9658_v19 = vadd.f32 %v9028_v27, %v1583_v41  ;;  %v9661_v30 = vadd.f32 %v9028_v27, %v1582_v46  ;;  %v2476_v45 = vmax.f32 %v2420_v35, 0.0 }
 0x17d   : > { %v2423_v46 = vadd.f32 %v9346_v31, %v9012_v8  ;;  %v2037_v14 = vmul.f32 %v9019_v15, %v2021_v4  ;;  %v2877_v31 = vadd.f32 %v9329_v63, %v9012_v8  ;;  %v2038_v5 = vmul.f32 %v9019_v15, %v2022_v36 }
 0x17e   : > { %13423 = vst [vmem:[#allocation74_spill] sm:$0xff] %v9658_v19  ;;  %13424 = vst [vmem:[#allocation75_spill] sm:$0xff] %v9661_v30  ;;  %v9707_v4 = vadd.f32 %v9028_v27, %v1580_v26  ;;  %v2492_v36 = vmul.f32 %v9019_v15, %v2476_v45 }
 0x17f   : > { %v9683_v12 = vpop.f32.mrb[60].mxu0  ;;  %v2477_v62 = vmax.f32 %v2423_v46, 0.0  ;;  %v9711_v63 = vpop.f32.mrb[60].mxu1  ;;  %v2933_v46 = vmax.f32 %v2877_v31, 0.0  ;;  %v9735_v45 = vadd.f32 %v9028_v27, %v2037_v14 }
 0x180   : > { %1806 = vrot.lane.b32.xlu1 %v9658_v19, %s13311_s28  ;;  %1804 = vrot.lane.b32.xlu0 %v9661_v30, %s13311_s28  ;;  %v9678_v19 = vadd.f32 %v9028_v27, %v2040_v6  ;;  %v9681_v30 = vadd.f32 %v9028_v27, %v2039_v9  ;;  %v9689_v42 = vpop.f32.mrb[61].mxu0  ;;  %v2880_v9 = vadd.f32 %v9348_v47, %v9012_v8  ;;  %v9717_v47 = vpop.f32.mrb[61].mxu1 }
 0x181   : > { %13428 = vst [vmem:[#allocation79_spill] sm:$0xff] %v9689_v42  ;;  %v9696_v6 = vpop.f32.mrb[62].mxu0  ;;  %13431 = vst [vmem:[#allocation82_spill] sm:$0xff] %v9707_v4  ;;  %v9722_v42 = vpop.f32.mrb[62].mxu1 }
 0x182   : > { %v9671_v41 = vpop.permute.xlu0 %1160  ;;  %v9673_v37 = vpop.permute.xlu1 %687  ;;  %13426 = vst [vmem:[#allocation77_spill] sm:$0xff] %v9678_v19  ;;  %13427 = vst [vmem:[#allocation78_spill] sm:$0xff] %v9681_v30  ;;  %v2934_v26 = vmax.f32 %v2880_v9, 0.0 }
 0x183   : > { %13425 = vst [vmem:[#allocation76_spill] sm:$0xff] %v9671_v41  ;;  %v9709_v35 = vpop.f32.mrb[63].mxu0  ;;  %13433 = vst [vmem:[#allocation84_spill] sm:$0xff] %v9711_v63  ;;  %v2872_v63 = vadd.f32 %v9012_v8, %v9357_v7  ;;  %v9737_v31 = vpop.f32.mrb[63].mxu1  ;;  %v2412_v7 = vadd.f32 %v9012_v8, %v9339_v1 }
 0x184   : > { %2271 = vrot.lane.b32.xlu1 %v9678_v19, %s13311_s28  ;;  %2269 = vrot.lane.b32.xlu0 %v9681_v30, %s13311_s28  ;;  %v9704_v30 = vadd.f32 %v9028_v27, %v1581_v29  ;;  %13432 = vst [vmem:[#allocation83_spill] sm:$0xff] %v9709_v35  ;;  %13434 = vst [vmem:[#allocation85_spill] sm:$0xff] %v9717_v47  ;;  %v2869_v29 = vadd.f32 %v9012_v8, %v9341_v16 }
 0x185   : > { %v2493_v35 = vmul.f32 %v9019_v15, %v2477_v62  ;;  %13436 = vst [vmem:[#allocation87_spill] sm:$0xff] %v9735_v45  ;;  %13437 = vst [vmem:[#allocation88_spill] sm:$0xff] %v9737_v31  ;;  %v2415_v16 = vadd.f32 %v9012_v8, %v9355_v51  ;;  %v2949_v62 = vmul.f32 %v9019_v15, %v2933_v46  ;;  %v2474_v51 = vmax.f32 %v2412_v7, 0.0 }
 0x186   : > { %v9699_v19 = vpop.permute.xlu0 %1129  ;;  %v9701_v41 = vpop.permute.xlu1 %689  ;;  %13430 = vst [vmem:[#allocation81_spill] sm:$0xff] %v9704_v30  ;;  %v2931_v9 = vmax.f32 %v2869_v29, 0.0  ;;  %v2950_v14 = vmul.f32 %v9019_v15, %v2934_v26  ;;  %v2436_v46 = vadd.f32 %v9375_v50, %v9012_v8 }
 0x187   : > { %13429 = vst [vmem:[#allocation80_spill] sm:$0xff] %v9699_v19  ;;  %v2475_v1 = vmax.f32 %v2415_v16, 0.0  ;;  %v9777_v7 = vadd.f32 %v9028_v27, %v2949_v62  ;;  %v2490_v50 = vmul.f32 %v9019_v15, %v2474_v51  ;;  %v2896_v62 = vadd.f32 %v9392_v38, %v9012_v8 }
 0x188   : > { %1776 = vrot.lane.b32.xlu1 %v9704_v30, %s13311_s28  ;;  %1774 = vrot.lane.b32.xlu0 %v9707_v4, %s13311_s28  ;;  %v9732_v4 = vadd.f32 %v9028_v27, %v2038_v5  ;;  %v2932_v5 = vmax.f32 %v2872_v63, 0.0  ;;  %v2947_v63 = vmul.f32 %v9019_v15, %v2931_v9  ;;  %v2480_v9 = vmax.f32 %v2436_v46, 0.0 }
 0x189   : > { %13441 = vst [vmem:[#allocation92_spill] sm:$0xff] %v9777_v7  ;;  %v2491_v16 = vmul.f32 %v9019_v15, %v2475_v1  ;;  %v2428_v51 = vadd.f32 %v9012_v8, %v9383_v0  ;;  %v2431_v38 = vadd.f32 %v9012_v8, %v9403_v60 }
 0x18a   : > { %v9727_v30 = vpop.permute.xlu1 %1162  ;;  %v9729_v19 = vpop.permute.xlu0 %664  ;;  %13435 = vst [vmem:[#allocation86_spill] sm:$0xff] %v9732_v4  ;;  %v2948_v29 = vmul.f32 %v9019_v15, %v2932_v5 }
 0x18b   : > { %v2479_v0 = vmax.f32 %v2431_v38, 0.0 }
 0x18c   : > { %2241 = vrot.lane.b32.xlu1 %v9732_v4, %s13311_s28  ;;  %2239 = vrot.lane.b32.xlu0 %v9735_v45, %s13311_s28  ;;  %v9754_v4 = vadd.f32 %v9028_v27, %v2493_v35  ;;  %v9757_v45 = vadd.f32 %v9028_v27, %v2492_v36  ;;  %v2439_v36 = vadd.f32 %v9390_v21, %v9012_v8 }
 0x18d   : > { %v2893_v21 = vadd.f32 %v9377_v59, %v9012_v8  ;;  %v2496_v59 = vmul.f32 %v9019_v15, %v2480_v9  ;;  %v2478_v8 = vmax.f32 %v2428_v51, 0.0 }
 0x18e   : > { %v9749_v47 = vpop.permute.xlu1 %1131  ;;  %v9751_v31 = vpop.permute.xlu0 %749  ;;  %13438 = vst [vmem:[#allocation89_spill] sm:$0xff] %v9754_v4  ;;  %13439 = vst [vmem:[#allocation90_spill] sm:$0xff] %v9757_v45  ;;  %v2481_v5 = vmax.f32 %v2439_v36, 0.0 }
 0x18f   : > { %v2937_v1 = vmax.f32 %v2893_v21, 0.0 }
 0x190   : > { %2548 = vrot.lane.b32.xlu1 %v9754_v4, %s13311_s28  ;;  %2546 = vrot.lane.b32.xlu0 %v9757_v45, %s13311_s28  ;;  %v9774_v4 = vadd.f32 %v9028_v27, %v2950_v14  ;;  %v2497_v46 = vmul.f32 %v9019_v15, %v2481_v5  ;;  %v9826_v15 = vld [vmem:[%s13098_s2] ss:$0 sm:$0xff] }
 0x191   : > { %v2885_v60 = vadd.f32 %v9826_v15, %v9385_v10  ;;  %v9847_v10 = vadd.f32 %v9028_v27, %v2496_v59  ;;  %v9866_v59 = vld [vmem:[%s13098_s2 + $0x2] ss:$0 sm:$0xff] }
 0x192   : > { %v9767_v35 = vpop.permute.xlu1 %666  ;;  %v9769_v26 = vpop.permute.xlu0 %1222  ;;  %13440 = vst [vmem:[#allocation91_spill] sm:$0xff] %v9774_v4  ;;  %v9844_v51 = vadd.f32 %v9028_v27, %v2497_v46 }
 0x193   : > { %13447 = vst [vmem:[#allocation98_spill] sm:$0xff] %v9847_v10  ;;  %v2935_v38 = vmax.f32 %v2885_v60, 0.0 }
 0x194   : > { %3013 = vrot.lane.b32.xlu1 %v9774_v4, %s13311_s28  ;;  %3011 = vrot.lane.b32.xlu0 %v9777_v7, %s13311_s28  ;;  %v9794_v4 = vadd.f32 %v9028_v27, %v2948_v29  ;;  %v9797_v7 = vadd.f32 %v9028_v27, %v2947_v63  ;;  %v2938_v29 = vmax.f32 %v2896_v62, 0.0  ;;  %13446 = vst [vmem:[#allocation97_spill] sm:$0xff] %v9844_v51 }
 0x196   : > { %v9787_v14 = vpop.permute.xlu1 %751  ;;  %v9789_v45 = vpop.permute.xlu0 %718  ;;  %13442 = vst [vmem:[#allocation93_spill] sm:$0xff] %v9794_v4  ;;  %13443 = vst [vmem:[#allocation94_spill] sm:$0xff] %v9797_v7 }
 0x198   : > { %2983 = vrot.lane.b32.xlu1 %v9794_v4, %s13311_s28  ;;  %2981 = vrot.lane.b32.xlu0 %v9797_v7, %s13311_s28  ;;  %v9814_v4 = vadd.f32 %v9028_v27, %v2491_v16  ;;  %v9817_v7 = vadd.f32 %v9028_v27, %v2490_v50  ;;  %v2888_v50 = vadd.f32 %v9826_v15, %v9405_v11  ;;  %v9835_v16 = vld [vmem:[%s13098_s2 + $0x1] ss:$0 sm:$0xff] }
 0x199   : > { %v2953_v9 = vmul.f32 %v9835_v16, %v2937_v1  ;;  %v2954_v21 = vmul.f32 %v9835_v16, %v2938_v29  ;;  %v2494_v11 = vmul.f32 %v9835_v16, %v2478_v8  ;;  %v2452_v29 = vadd.f32 %v9826_v15, %v9423_v24 }
 0x19a   : > { %v9809_v63 = vpop.permute.xlu1 %1224  ;;  %v9811_v36 = vpop.permute.xlu0 %1191  ;;  %13444 = vst [vmem:[#allocation95_spill] sm:$0xff] %v9814_v4  ;;  %13445 = vst [vmem:[#allocation96_spill] sm:$0xff] %v9817_v7  ;;  %v2936_v1 = vmax.f32 %v2888_v50, 0.0  ;;  %v2455_v27 = vadd.f32 %v9826_v15, %v9440_v55  ;;  %v2951_v24 = vmul.f32 %v9835_v16, %v2935_v38  ;;  %v2909_v50 = vadd.f32 %v9826_v15, %v9425_v40 }
 0x19b   : > { %v9869_v8 = vadd.f32 %v9866_v59, %v2954_v21  ;;  %v9872_v60 = vadd.f32 %v9866_v59, %v2953_v9  ;;  %v2912_v9 = vadd.f32 %v9826_v15, %v9442_v54  ;;  %v2444_v38 = vadd.f32 %v9826_v15, %v9431_v28 }
 0x19c   : > { %2526 = vrot.lane.b32.xlu1 %v9814_v4, %s13311_s28  ;;  %2524 = vrot.lane.b32.xlu0 %v9817_v7, %s13311_s28  ;;  %v2495_v7 = vmul.f32 %v9835_v16, %v2479_v0  ;;  %v2952_v55 = vmul.f32 %v9835_v16, %v2936_v1  ;;  %v2484_v0 = vmax.f32 %v2452_v29, 0.0  ;;  %v2447_v54 = vadd.f32 %v9826_v15, %v9451_v39 }
 0x19d   : > { %13448 = vst [vmem:[#allocation99_spill] sm:$0xff] %v9869_v8  ;;  %13449 = vst [vmem:[#allocation100_spill] sm:$0xff] %v9872_v60  ;;  %v2941_v1 = vmax.f32 %v2909_v50, 0.0  ;;  %v2942_v29 = vmax.f32 %v2912_v9, 0.0  ;;  %v2482_v28 = vmax.f32 %v2444_v38, 0.0 }
 0x19e   : > { %v9839_v5 = vpop.permute.xlu1 %720  ;;  %v9841_v62 = vpop.permute.xlu0 %811  ;;  %v2500_v40 = vmul.f32 %v9835_v16, %v2484_v0  ;;  %v2483_v39 = vmax.f32 %v2447_v54, 0.0  ;;  %v2904_v0 = vadd.f32 %v9826_v15, %v9453_v25 }
 0x19f   : > { %v2958_v50 = vmul.f32 %v9835_v16, %v2942_v29 }
 0x1a0   : > { %2608 = vrot.lane.b32.xlu1 %v9844_v51, %s13311_s28  ;;  %2606 = vrot.lane.b32.xlu0 %v9847_v10, %s13311_s28  ;;  %v2485_v10 = vmax.f32 %v2455_v27, 0.0  ;;  %v9932_v38 = vadd.f32 %v9866_v59, %v2500_v40  ;;  %v2940_v54 = vmax.f32 %v2904_v0, 0.0  ;;  %v2499_v29 = vmul.f32 %v9835_v16, %v2483_v39 }
 0x1a1   : > { %v2471_v40 = vadd.f32 %v9826_v15, %v9486_v22  ;;  %v2925_v22 = vadd.f32 %v9826_v15, %v9473_v43 }
 0x1a2   : > { %v9857_v46 = vpop.permute.xlu1 %1193  ;;  %v9859_v4 = vpop.permute.xlu0 %1284  ;;  %13455 = vst [vmem:[#allocation106_spill] sm:$0xff] %v9932_v38 }
 0x1a4   : > { %3073 = vrot.lane.b32.xlu1 %v9869_v8, %s13311_s28  ;;  %3071 = vrot.lane.b32.xlu0 %v9872_v60, %s13311_s28  ;;  %v9889_v8 = vadd.f32 %v9866_v59, %v2495_v7  ;;  %v9892_v60 = vadd.f32 %v9866_v59, %v2494_v11  ;;  %v2501_v7 = vmul.f32 %v9835_v16, %v2485_v10 }
 0x1a5   : > { %v2901_v10 = vadd.f32 %v9826_v15, %v9433_v58  ;;  %v2498_v58 = vmul.f32 %v9835_v16, %v2482_v28  ;;  %v2956_v28 = vmul.f32 %v9835_v16, %v2940_v54  ;;  %v2945_v54 = vmax.f32 %v2925_v22, 0.0 }
 0x1a6   : > { %v9882_v21 = vpop.permute.xlu1 %813  ;;  %v9884_v51 = vpop.permute.xlu0 %780  ;;  %13450 = vst [vmem:[#allocation101_spill] sm:$0xff] %v9889_v8  ;;  %13451 = vst [vmem:[#allocation102_spill] sm:$0xff] %v9892_v60  ;;  %v2917_v22 = vadd.f32 %v9826_v15, %v9481_v49 }
 0x1a7   : > { %v2939_v25 = vmax.f32 %v2901_v10, 0.0  ;;  %v2489_v10 = vmax.f32 %v2471_v40, 0.0 }
 0x1a8   : > { %2578 = vrot.lane.b32.xlu1 %v9889_v8, %s13311_s28  ;;  %2576 = vrot.lane.b32.xlu0 %v9892_v60, %s13311_s28  ;;  %v9909_v8 = vadd.f32 %v9866_v59, %v2952_v55  ;;  %v9912_v60 = vadd.f32 %v9866_v59, %v2951_v24  ;;  %v2957_v55 = vmul.f32 %v9835_v16, %v2941_v1 }
 0x1a9   : > { %v2468_v1 = vadd.f32 %v9826_v15, %v9471_v61  ;;  %v2955_v61 = vmul.f32 %v9835_v16, %v2939_v25  ;;  %v2460_v25 = vadd.f32 %v9826_v15, %v9479_v32 }
 0x1aa   : > { %v9904_v11 = vpop.permute.xlu1 %1286  ;;  %v9906_v27 = vpop.permute.xlu0 %1253  ;;  %13452 = vst [vmem:[#allocation103_spill] sm:$0xff] %v9909_v8  ;;  %13453 = vst [vmem:[#allocation104_spill] sm:$0xff] %v9912_v60 }
 0x1ab   : > { %v2488_v39 = vmax.f32 %v2468_v1, 0.0  ;;  %v2505_v1 = vmul.f32 %v9835_v16, %v2489_v10  ;;  %v2486_v32 = vmax.f32 %v2460_v25, 0.0 }
 0x1ac   : > { %3043 = vrot.lane.b32.xlu1 %v9909_v8, %s13311_s28  ;;  %3041 = vrot.lane.b32.xlu0 %v9912_v60, %s13311_s28  ;;  %v9929_v8 = vadd.f32 %v9866_v59, %v2501_v7 }
 0x1ad   : > { %v2504_v43 = vmul.f32 %v9835_v16, %v2488_v39  ;;  %v2961_v39 = vmul.f32 %v9835_v16, %v2945_v54  ;;  %v2502_v49 = vmul.f32 %v9835_v16, %v2486_v32  ;;  %v2943_v54 = vmax.f32 %v2917_v22, 0.0 }
 0x1ae   : > { %v9924_v24 = vpop.permute.xlu1 %782  ;;  %v9926_v9 = vpop.permute.xlu0 %873  ;;  %13454 = vst [vmem:[#allocation105_spill] sm:$0xff] %v9929_v8 }
 0x1af   : > { %v10012_v25 = vadd.f32 %v9866_v59, %v2504_v43  ;;  %v3345_v43 = vadd.f32 %v9826_v15, %v9536_v57  ;;  %v3802_v57 = vadd.f32 %v9826_v15, %v9538_v44 }
 0x1b0   : > { %2668 = vrot.lane.b32.xlu1 %v9929_v8, %s13311_s28  ;;  %2666 = vrot.lane.b32.xlu0 %v9932_v38, %s13311_s28  ;;  %v9949_v8 = vadd.f32 %v9866_v59, %v2958_v50  ;;  %v9952_v38 = vadd.f32 %v9866_v59, %v2957_v55  ;;  %v2928_v55 = vadd.f32 %v9826_v15, %v9488_v13 }
 0x1b1   : > { %v2463_v13 = vadd.f32 %v9826_v15, %v9499_v48  ;;  %13465 = vst [vmem:[#allocation114_spill] sm:$0xff] %v10012_v25 }
 0x1b2   : > { %v9942_v7 = vpop.permute.xlu1 %1255  ;;  %v9944_v60 = vpop.permute.xlu0 %1346  ;;  %13456 = vst [vmem:[#allocation107_spill] sm:$0xff] %v9949_v8  ;;  %13457 = vst [vmem:[#allocation108_spill] sm:$0xff] %v9952_v38 }
 0x1b3   : > { %v2487_v48 = vmax.f32 %v2463_v13, 0.0 }
 0x1b4   : > { %3133 = vrot.lane.b32.xlu1 %v9949_v8, %s13311_s28  ;;  %3131 = vrot.lane.b32.xlu0 %v9952_v38, %s13311_s28  ;;  %v9969_v8 = vadd.f32 %v9866_v59, %v2499_v29  ;;  %v9972_v38 = vadd.f32 %v9866_v59, %v2498_v58  ;;  %v2946_v29 = vmax.f32 %v2928_v55, 0.0 }
 0x1b5   : > { %v2503_v13 = vmul.f32 %v9835_v16, %v2487_v48  ;;  %v3799_v48 = vadd.f32 %v9826_v15, %v9521_v53 }
 0x1b6   : > { %v9962_v0 = vpop.permute.xlu1 %875  ;;  %v9964_v50 = vpop.permute.xlu0 %842  ;;  %13458 = vst [vmem:[#allocation109_spill] sm:$0xff] %v9969_v8  ;;  %13459 = vst [vmem:[#allocation110_spill] sm:$0xff] %v9972_v38  ;;  %v2962_v10 = vmul.f32 %v9835_v16, %v2946_v29  ;;  %v3342_v29 = vadd.f32 %v9826_v15, %v9519_v3  ;;  %v2959_v3 = vmul.f32 %v9835_v16, %v2943_v54  ;;  %v13472_v54 = vld [vmem:[#allocation54_spill] sm:$0xff] }
 0x1b7   : > { %v3855_v44 = vmax.f32 %v3799_v48, 0.0 }
 0x1b8   : > { %2638 = vrot.lane.b32.xlu1 %v9969_v8, %s13311_s28  ;;  %2636 = vrot.lane.b32.xlu0 %v9972_v38, %s13311_s28  ;;  %v9989_v8 = vadd.f32 %v9866_v59, %v2956_v28  ;;  %v9992_v38 = vadd.f32 %v9866_v59, %v2955_v61  ;;  %v13463_v28 = vld [vmem:[#allocation50_spill] sm:$0xff]  ;;  %v3398_v32 = vmax.f32 %v3342_v29, 0.0  ;;  %v3791_v29 = vadd.f32 %v9826_v15, %v13472_v54 }
 0x1b9   : > { %v2920_v55 = vadd.f32 %v9826_v15, %v13463_v28  ;;  %v3871_v54 = vmul.f32 %v9835_v16, %v3855_v44 }
 0x1ba   : > { %v9984_v58 = vpop.permute.xlu1 %1348  ;;  %v9986_v40 = vpop.permute.xlu0 %1315  ;;  %13461 = vst [vmem:[#allocation112_spill] sm:$0xff] %v9989_v8  ;;  %13462 = vst [vmem:[#allocation113_spill] sm:$0xff] %v9992_v38  ;;  %v3414_v53 = vmul.f32 %v9835_v16, %v3398_v32  ;;  %v13478_v32 = vld [vmem:[#allocation53_spill] sm:$0xff] }
 0x1bb   : > { %13460 = vst [vmem:[#allocation111_spill] sm:$0xff] %v9986_v40  ;;  %v2944_v28 = vmax.f32 %v2920_v55, 0.0  ;;  %v3334_v48 = vadd.f32 %v9826_v15, %v13478_v32 }
 0x1bc   : > { %3103 = vrot.lane.b32.xlu1 %v9989_v8, %s13311_s28  ;;  %3101 = vrot.lane.b32.xlu0 %v9992_v38, %s13311_s28  ;;  %v10009_v8 = vadd.f32 %v9866_v59, %v2505_v1 }
 0x1bd   : > { %v2960_v22 = vmul.f32 %v9835_v16, %v2944_v28  ;;  %v3856_v28 = vmax.f32 %v3802_v57, 0.0  ;;  %v13479_v57 = vld [vmem:[#allocation57_spill] sm:$0xff]  ;;  %v3396_v44 = vmax.f32 %v3334_v48, 0.0  ;;  %v3361_v48 = vadd.f32 %v9826_v15, %v9582_v18 }
 0x1be   : > { %v10004_v61 = vpop.permute.xlu1 %844  ;;  %v10006_v40 = vpop.permute.xlu0 %1624  ;;  %13464 = vst [vmem:[#allocation50_spill] sm:$0xff] %v10009_v8 }
 0x1c0   : > { %2728 = vrot.lane.b32.xlu1 %v10009_v8, %s13311_s28  ;;  %2726 = vrot.lane.b32.xlu0 %v10012_v25, %s13311_s28  ;;  %v10029_v8 = vadd.f32 %v9866_v59, %v2962_v10  ;;  %v10032_v25 = vadd.f32 %v9866_v59, %v2961_v39  ;;  %v3399_v10 = vmax.f32 %v3345_v43, 0.0 }
 0x1c2   : > { %v10022_v1 = vpop.permute.xlu1 %1317  ;;  %v10024_v38 = vpop.permute.xlu0 %2089  ;;  %13466 = vst [vmem:[#allocation115_spill] sm:$0xff] %v10029_v8  ;;  %13467 = vst [vmem:[#allocation116_spill] sm:$0xff] %v10032_v25  ;;  %v3415_v43 = vmul.f32 %v9835_v16, %v3399_v10  ;;  %v3337_v10 = vadd.f32 %v9826_v15, %v13479_v57 }
 0x1c4   : > { %3193 = vrot.lane.b32.xlu1 %v10029_v8, %s13311_s28  ;;  %3191 = vrot.lane.b32.xlu0 %v10032_v25, %s13311_s28  ;;  %v10049_v8 = vadd.f32 %v9866_v59, %v2503_v13  ;;  %v10052_v25 = vadd.f32 %v9866_v59, %v2502_v49  ;;  %v13473_v13 = vld [vmem:[#allocation58_spill] sm:$0xff] }
 0x1c6   : > { %v10044_v39 = vpop.permute.xlu1 %2091  ;;  %v10046_v55 = vpop.permute.xlu0 %2059  ;;  %13470 = vst [vmem:[#allocation119_spill] sm:$0xff] %v10049_v8  ;;  %13471 = vst [vmem:[#allocation120_spill] sm:$0xff] %v10052_v25 }
 0x1c7   : > { %13468 = vst [vmem:[#allocation117_spill] sm:$0xff] %v10044_v39  ;;  %13469 = vst [vmem:[#allocation118_spill] sm:$0xff] %v10046_v55  ;;  %v3794_v55 = vadd.f32 %v9826_v15, %v13473_v13  ;;  %v3853_v13 = vmax.f32 %v3791_v29, 0.0  ;;  %v3397_v29 = vmax.f32 %v3337_v10, 0.0  ;;  %v3412_v10 = vmul.f32 %v9835_v16, %v3396_v44 }
 0x1c8   : > { %2698 = vrot.lane.b32.xlu1 %v10049_v8, %s13311_s28  ;;  %2696 = vrot.lane.b32.xlu0 %v10052_v25, %s13311_s28  ;;  %v10069_v8 = vadd.f32 %v9866_v59, %v2960_v22  ;;  %v10072_v25 = vadd.f32 %v9866_v59, %v2959_v3  ;;  %v3872_v22 = vmul.f32 %v9835_v16, %v3856_v28 }
 0x1c9   : > { %v3869_v28 = vmul.f32 %v9835_v16, %v3853_v13  ;;  %v3818_v44 = vadd.f32 %v9826_v15, %v9584_v17 }
 0x1ca   : > { %v10064_v49 = vpop.permute.xlu1 %2061  ;;  %v10066_v39 = vpop.permute.xlu0 %1602  ;;  %13476 = vst [vmem:[#allocation121_spill] sm:$0xff] %v10069_v8  ;;  %13477 = vst [vmem:[#allocation122_spill] sm:$0xff] %v10072_v25  ;;  %v10103_v32 = vadd.f32 %v9866_v59, %v3872_v22  ;;  %v3403_v22 = vmax.f32 %v3361_v48, 0.0 }
 0x1cb   : > { %13474 = vst [vmem:[#allocation54_spill] sm:$0xff] %v10064_v49  ;;  %13475 = vst [vmem:[#allocation58_spill] sm:$0xff] %v10066_v39  ;;  %v3854_v39 = vmax.f32 %v3794_v55, 0.0  ;;  %v10099_v55 = vadd.f32 %v9866_v59, %v3871_v54  ;;  %v10121_v54 = vadd.f32 %v9866_v59, %v3869_v28 }
 0x1cc   : > { %3163 = vrot.lane.b32.xlu1 %v10069_v8, %s13311_s28  ;;  %3161 = vrot.lane.b32.xlu0 %v10072_v25, %s13311_s28  ;;  %v10089_v8 = vadd.f32 %v9866_v59, %v3415_v43  ;;  %v10092_v25 = vadd.f32 %v9866_v59, %v3414_v53  ;;  %13483 = vst [vmem:[#allocation124_spill] sm:$0xff] %v10103_v32 }
 0x1cd   : > { %13482 = vst [vmem:[#allocation123_spill] sm:$0xff] %v10099_v55  ;;  %v3870_v43 = vmul.f32 %v9835_v16, %v3854_v39  ;;  %v3358_v53 = vadd.f32 %v9826_v15, %v9567_v34  ;;  %v3413_v39 = vmul.f32 %v9835_v16, %v3397_v29  ;;  %13484 = vst [vmem:[#allocation125_spill] sm:$0xff] %v10121_v54  ;;  %v13489_v29 = vld [vmem:[#allocation61_spill] sm:$0xff] }
 0x1ce   : > { %v10084_v3 = vpop.permute.xlu1 %1604  ;;  %v10086_v49 = vpop.permute.xlu0 %1626  ;;  %13480 = vst [vmem:[#allocation53_spill] sm:$0xff] %v10089_v8  ;;  %13481 = vst [vmem:[#allocation57_spill] sm:$0xff] %v10092_v25  ;;  %v3815_v34 = vadd.f32 %v9826_v15, %v9569_v33  ;;  %v10139_v33 = vadd.f32 %v9866_v59, %v3412_v10  ;;  %v3350_v28 = vadd.f32 %v9826_v15, %v13489_v29  ;;  %v13494_v29 = vld [vmem:[#allocation62_spill] sm:$0xff] }
 0x1cf   : > { %v10126_v13 = vadd.f32 %v9866_v59, %v3870_v43  ;;  %v3402_v18 = vmax.f32 %v3358_v53, 0.0  ;;  %v13490_v43 = vld [vmem:[#allocation65_spill] sm:$0xff] }
 0x1d0   : > { %3470 = vrot.lane.b32.xlu1 %v10089_v8, %s13311_s28  ;;  %3468 = vrot.lane.b32.xlu0 %v10092_v25, %s13311_s28  ;;  %13488 = vst [vmem:[#allocation129_spill] sm:$0xff] %v10139_v33  ;;  %v3353_v53 = vadd.f32 %v9826_v15, %v13490_v43  ;;  %v3859_v48 = vmax.f32 %v3815_v34, 0.0  ;;  %v3400_v10 = vmax.f32 %v3350_v28, 0.0 }
 0x1d1   : > { %13485 = vst [vmem:[#allocation126_spill] sm:$0xff] %v10126_v13  ;;  %v3418_v17 = vmul.f32 %v9835_v16, %v3402_v18  ;;  %v3807_v18 = vadd.f32 %v9826_v15, %v13494_v29  ;;  %v3374_v29 = vadd.f32 %v9826_v15, %v9615_v56 }
 0x1d2   : > { %v10108_v57 = vpop.permute.xlu1 %1686  ;;  %v10110_v8 = vpop.permute.xlu0 %1684  ;;  %v3401_v34 = vmax.f32 %v3353_v53, 0.0  ;;  %v3416_v53 = vmul.f32 %v9835_v16, %v3400_v10  ;;  %v3377_v10 = vadd.f32 %v9826_v15, %v9632_v2 }
 0x1d3   : > { %v3406_v2 = vmax.f32 %v3374_v29, 0.0 }
 0x1d4   : > { %3935 = vrot.lane.b32.xlu1 %v10103_v32, %s13311_s28  ;;  %3933 = vrot.lane.b32.xlu0 %v10099_v55, %s13311_s28  ;;  %v10146_v55 = vadd.f32 %v9866_v59, %v3413_v39  ;;  %v3875_v39 = vmul.f32 %v9835_v16, %v3859_v48 }
 0x1d6   : > { %v10128_v25 = vpop.permute.xlu1 %2151  ;;  %v10130_v32 = vpop.permute.xlu0 %2149  ;;  %13491 = vst [vmem:[#allocation61_spill] sm:$0xff] %v10146_v55  ;;  %v10181_v48 = vadd.f32 %v9866_v59, %v3875_v39  ;;  %v3831_v39 = vadd.f32 %v9826_v15, %v9617_v20  ;;  %v13504_v20 = vld [vmem:[#allocation69_spill] sm:$0xff] }
 0x1d7   : > { %13486 = vst [vmem:[#allocation127_spill] sm:$0xff] %v10128_v25  ;;  %13487 = vst [vmem:[#allocation128_spill] sm:$0xff] %v10130_v32  ;;  %v3860_v32 = vmax.f32 %v3818_v44, 0.0 }
 0x1d8   : > { %3905 = vrot.lane.b32.xlu1 %v10126_v13, %s13311_s28  ;;  %3903 = vrot.lane.b32.xlu0 %v10121_v54, %s13311_s28  ;;  %v3419_v13 = vmul.f32 %v9835_v16, %v3403_v22  ;;  %v10162_v22 = vadd.f32 %v9866_v59, %v3418_v17  ;;  %v3863_v29 = vmax.f32 %v3831_v39, 0.0 }
 0x1d9   : > { %v3876_v43 = vmul.f32 %v9835_v16, %v3860_v32  ;;  %v3857_v32 = vmax.f32 %v3807_v18, 0.0 }
 0x1da   : > { %v10150_v25 = vpop.permute.xlu1 %1656  ;;  %v10152_v54 = vpop.permute.xlu0 %1654  ;;  %13495 = vst [vmem:[#allocation62_spill] sm:$0xff] %v10162_v22  ;;  %v10165_v44 = vadd.f32 %v9866_v59, %v3419_v13  ;;  %v3417_v13 = vmul.f32 %v9835_v16, %v3401_v34  ;;  %v10199_v34 = vadd.f32 %v9866_v59, %v3416_v53  ;;  %v3834_v53 = vadd.f32 %v9826_v15, %v9634_v52 }
 0x1db   : > { %13492 = vst [vmem:[#allocation65_spill] sm:$0xff] %v10150_v25  ;;  %13493 = vst [vmem:[#allocation130_spill] sm:$0xff] %v10152_v54  ;;  %v13497_v54 = vld [vmem:[#allocation66_spill] sm:$0xff]  ;;  %v3873_v56 = vmul.f32 %v9835_v16, %v3857_v32  ;;  %v3366_v32 = vadd.f32 %v9826_v15, %v13504_v20  ;;  %v3422_v52 = vmul.f32 %v9835_v16, %v3406_v2 }
 0x1dc   : > { %3448 = vrot.lane.b32.xlu1 %v10146_v55, %s13311_s28  ;;  %3446 = vrot.lane.b32.xlu0 %v10139_v33, %s13311_s28  ;;  %13496 = vst [vmem:[#allocation131_spill] sm:$0xff] %v10165_v44  ;;  %v3810_v55 = vadd.f32 %v9826_v15, %v13497_v54  ;;  %13498 = vst [vmem:[#allocation66_spill] sm:$0xff] %v10181_v48  ;;  %v10184_v54 = vadd.f32 %v9866_v59, %v3876_v43  ;;  %v3407_v43 = vmax.f32 %v3377_v10, 0.0 }
 0x1dd   : > { %13500 = vst [vmem:[#allocation133_spill] sm:$0xff] %v10199_v34  ;;  %v3879_v39 = vmul.f32 %v9835_v16, %v3863_v29 }
 0x1de   : > { %v10170_v25 = vpop.permute.xlu1 %2121  ;;  %v10172_v28 = vpop.permute.xlu0 %2119  ;;  %13499 = vst [vmem:[#allocation132_spill] sm:$0xff] %v10184_v54  ;;  %v3858_v17 = vmax.f32 %v3810_v55, 0.0  ;;  %v10202_v55 = vadd.f32 %v9866_v59, %v3417_v13  ;;  %v10219_v13 = vadd.f32 %v9866_v59, %v3873_v56 }
 0x1e0   : > { %3530 = vrot.lane.b32.xlu1 %v10165_v44, %s13311_s28  ;;  %3528 = vrot.lane.b32.xlu0 %v10162_v22, %s13311_s28  ;;  %13501 = vst [vmem:[#allocation134_spill] sm:$0xff] %v10202_v55  ;;  %v3874_v18 = vmul.f32 %v9835_v16, %v3858_v17  ;;  %13503 = vst [vmem:[#allocation136_spill] sm:$0xff] %v10219_v13  ;;  %v3369_v17 = vadd.f32 %v9826_v15, %v9643_v23  ;;  %v3404_v23 = vmax.f32 %v3366_v32, 0.0 }
 0x1e2   : > { %v10188_v33 = vpop.permute.xlu1 %1746  ;;  %v10190_v44 = vpop.permute.xlu0 %1744  ;;  %v10226_v10 = vadd.f32 %v9866_v59, %v3874_v18  ;;  %v3405_v56 = vmax.f32 %v3369_v17, 0.0  ;;  %v13508_v18 = vld [vmem:[#allocation70_spill] sm:$0xff]  ;;  %v3420_v17 = vmul.f32 %v9835_v16, %v3404_v23 }
 0x1e3   : > { %v3823_v2 = vadd.f32 %v9826_v15, %v13508_v18 }
 0x1e4   : > { %3995 = vrot.lane.b32.xlu1 %v10184_v54, %s13311_s28  ;;  %3993 = vrot.lane.b32.xlu0 %v10181_v48, %s13311_s28  ;;  %13505 = vst [vmem:[#allocation69_spill] sm:$0xff] %v10226_v10  ;;  %v3423_v48 = vmul.f32 %v9835_v16, %v3407_v43  ;;  %v10242_v43 = vadd.f32 %v9866_v59, %v3422_v52 }
 0x1e5   : > { %v3861_v29 = vmax.f32 %v3823_v2, 0.0  ;;  %v10275_v23 = vadd.f32 %v9866_v59, %v3420_v17 }
 0x1e6   : > { %v10208_v22 = vpop.permute.xlu1 %2211  ;;  %v10210_v54 = vpop.permute.xlu0 %2209  ;;  %13509 = vst [vmem:[#allocation70_spill] sm:$0xff] %v10242_v43 }
 0x1e7   : > { %13502 = vst [vmem:[#allocation135_spill] sm:$0xff] %v10210_v54  ;;  %13514 = vst [vmem:[#allocation141_spill] sm:$0xff] %v10275_v23 }
 0x1e8   : > { %3500 = vrot.lane.b32.xlu1 %v10202_v55, %s13311_s28  ;;  %3498 = vrot.lane.b32.xlu0 %v10199_v34, %s13311_s28  ;;  %v3864_v55 = vmax.f32 %v3834_v53, 0.0  ;;  %v10245_v53 = vadd.f32 %v9866_v59, %v3423_v48  ;;  %v3421_v48 = vmul.f32 %v9835_v16, %v3405_v56 }
 0x1ea   : > { %v10230_v54 = vpop.permute.xlu1 %1716  ;;  %v10232_v34 = vpop.permute.xlu0 %1714  ;;  %13510 = vst [vmem:[#allocation139_spill] sm:$0xff] %v10245_v53  ;;  %v3880_v20 = vmul.f32 %v9835_v16, %v3864_v55  ;;  %v10261_v55 = vadd.f32 %v9866_v59, %v3879_v39  ;;  %v10278_v56 = vadd.f32 %v9866_v59, %v3421_v48  ;;  %v3877_v39 = vmul.f32 %v9835_v16, %v3861_v29 }
 0x1eb   : > { %13506 = vst [vmem:[#allocation137_spill] sm:$0xff] %v10230_v54  ;;  %13507 = vst [vmem:[#allocation138_spill] sm:$0xff] %v10232_v34  ;;  %v13511_v34 = vld [vmem:[#allocation73_spill] sm:$0xff] }
 0x1ec   : > { %3965 = vrot.lane.b32.xlu1 %v10226_v10, %s13311_s28  ;;  %3963 = vrot.lane.b32.xlu0 %v10219_v13, %s13311_s28  ;;  %v3826_v10 = vadd.f32 %v9826_v15, %v13511_v34  ;;  %13512 = vst [vmem:[#allocation73_spill] sm:$0xff] %v10261_v55  ;;  %v10264_v34 = vadd.f32 %v9866_v59, %v3880_v20  ;;  %13515 = vst [vmem:[#allocation142_spill] sm:$0xff] %v10278_v56 }
 0x1ed   : > { %v10291_v17 = vadd.f32 %v9866_v59, %v3877_v39  ;;  %v13521_v39 = vld [vmem:[#allocation9_spill] sm:$0xff] }
 0x1ee   : > { %v10250_v54 = vpop.permute.xlu1 %2181  ;;  %v10252_v32 = vpop.permute.xlu0 %2179  ;;  %13513 = vst [vmem:[#allocation140_spill] sm:$0xff] %v10264_v34  ;;  %v3862_v52 = vmax.f32 %v3826_v10, 0.0 }
 0x1ef   : > { %13516 = vst [vmem:[#allocation143_spill] sm:$0xff] %v10291_v17 }
 0x1f0   : > { %3590 = vrot.lane.b32.xlu1 %v10245_v53, %s13311_s28  ;;  %3588 = vrot.lane.b32.xlu0 %v10242_v43, %s13311_s28  ;;  %v3878_v10 = vmul.f32 %v9835_v16, %v3862_v52  ;;  %v13519_v52 = vld [vmem:[#allocation7_spill] sm:$0xff] }
 0x1f2   : > { %v10266_v18 = vpop.permute.xlu1 %1806  ;;  %v10268_v13 = vpop.permute.xlu0 %1804  ;;  %v10294_v48 = vadd.f32 %v9866_v59, %v3878_v10 }
 0x1f4   : > { %4055 = vrot.lane.b32.xlu1 %v10264_v34, %s13311_s28  ;;  %4053 = vrot.lane.b32.xlu0 %v10261_v55, %s13311_s28  ;;  %13517 = vst [vmem:[#allocation144_spill] sm:$0xff] %v10294_v48  ;;  %v10306_v34 = vmax.f32 %v13519_v52, %v9673_v37  ;;  %v3393_v37 = vadd.f32 %v9826_v15, %v9696_v6  ;;  %v13525_v52 = vld [vmem:[#allocation76_spill] sm:$0xff] }
 0x1f6   : > { %v10282_v2 = vpop.permute.xlu1 %2271  ;;  %v10284_v20 = vpop.permute.xlu0 %2269  ;;  %13520 = vst [vmem:[#allocation7_spill] sm:$0xff] %v10306_v34  ;;  %v3411_v6 = vmax.f32 %v3393_v37, 0.0  ;;  %v13541_v37 = vld [vmem:[#allocation83_spill] sm:$0xff] }
 0x1f8   : > { %3560 = vrot.lane.b32.xlu1 %v10278_v56, %s13311_s28  ;;  %3558 = vrot.lane.b32.xlu0 %v10275_v23, %s13311_s28  ;;  %v10310_v23 = vmax.f32 %v13521_v39, %v9701_v41  ;;  %v13526_v41 = vld [vmem:[#allocation6_spill] sm:$0xff] }
 0x1f9   : > { %v10326_v39 = vmax.f32 %v13526_v41, %v13525_v52  ;;  %v13535_v41 = vld [vmem:[#allocation13_spill] sm:$0xff] }
 0x1fa   : > { %v10296_v55 = vpop.permute.xlu1 %1776  ;;  %v10298_v29 = vpop.permute.xlu0 %1774  ;;  %13522 = vst [vmem:[#allocation9_spill] sm:$0xff] %v10310_v23 }
 0x1fb   : > { %13518 = vst [vmem:[#allocation145_spill] sm:$0xff] %v10298_v29  ;;  %13527 = vst [vmem:[#allocation76_spill] sm:$0xff] %v10326_v39 }
 0x1fc   : > { %4025 = vrot.lane.b32.xlu1 %v10294_v48, %s13311_s28  ;;  %4023 = vrot.lane.b32.xlu0 %v10291_v17, %s13311_s28  ;;  %v3390_v17 = vadd.f32 %v9826_v15, %v9683_v12  ;;  %v13528_v48 = vld [vmem:[#allocation10_spill] sm:$0xff] }
 0x1fd   : > { %v10330_v43 = vmax.f32 %v13528_v48, %v9727_v30  ;;  %v10346_v30 = vmax.f32 %v13535_v41, %v9749_v47  ;;  %v13537_v48 = vld [vmem:[#allocation84_spill] sm:$0xff]  ;;  %v13540_v47 = vld [vmem:[#allocation79_spill] sm:$0xff]  ;;  %v3385_v41 = vadd.f32 %v9826_v15, %v13541_v37  ;;  %v13546_v37 = vld [vmem:[#allocation85_spill] sm:$0xff] }
 0x1fe   : > { %v10312_v10 = vpop.permute.xlu1 %2241  ;;  %v10314_v56 = vpop.permute.xlu0 %2239  ;;  %v3410_v12 = vmax.f32 %v3390_v17, 0.0  ;;  %v3427_v17 = vmul.f32 %v9835_v16, %v3411_v6 }
 0x1ff   : > { %13523 = vst [vmem:[#allocation146_spill] sm:$0xff] %v10312_v10  ;;  %13524 = vst [vmem:[#allocation147_spill] sm:$0xff] %v10314_v56  ;;  %v13533_v56 = vld [vmem:[#allocation8_spill] sm:$0xff] }
 0x200   : > { %699 = vrot.lane.b32.xlu1 %v10310_v23, %s13313_s21  ;;  %697 = vrot.lane.b32.xlu0 %v10306_v34, %s13313_s21  ;;  %13529 = vst [vmem:[#allocation6_spill] sm:$0xff] %v10330_v43  ;;  %v13532_v34 = vld [vmem:[#allocation80_spill] sm:$0xff]  ;;  %13536 = vst [vmem:[#allocation8_spill] sm:$0xff] %v10346_v30 }
 0x201   : > { %v10342_v52 = vmax.f32 %v13533_v56, %v13532_v34  ;;  %v3426_v34 = vmul.f32 %v9835_v16, %v3410_v12  ;;  %v3382_v56 = vadd.f32 %v9826_v15, %v13540_v47  ;;  %v3409_v47 = vmax.f32 %v3385_v41, 0.0 }
 0x202   : > { %v10332_v53 = vpop.permute.xlu1 %2548  ;;  %v10334_v23 = vpop.permute.xlu0 %2546 }
 0x203   : > { %13530 = vst [vmem:[#allocation10_spill] sm:$0xff] %v10332_v53  ;;  %13531 = vst [vmem:[#allocation148_spill] sm:$0xff] %v10334_v23  ;;  %v3847_v53 = vadd.f32 %v9826_v15, %v13537_v48  ;;  %v13542_v48 = vld [vmem:[#allocation11_spill] sm:$0xff]  ;;  %v10383_v6 = vadd.f32 %v9866_v59, %v3426_v34 }
 0x204   : > { %1172 = vrot.lane.b32.xlu1 %v10330_v43, %s13313_s21  ;;  %1170 = vrot.lane.b32.xlu0 %v10326_v39, %s13313_s21  ;;  %13534 = vst [vmem:[#allocation80_spill] sm:$0xff] %v10342_v52  ;;  %v3850_v39 = vadd.f32 %v9826_v15, %v9722_v42  ;;  %v13543_v42 = vld [vmem:[#allocation15_spill] sm:$0xff] }
 0x206   : > { %v10350_v23 = vpop.permute.xlu1 %3013  ;;  %v10352_v10 = vpop.permute.xlu0 %3011 }
 0x207   : > { %13538 = vst [vmem:[#allocation13_spill] sm:$0xff] %v10350_v23  ;;  %13539 = vst [vmem:[#allocation84_spill] sm:$0xff] %v10352_v10  ;;  %v10368_v10 = vmax.f32 %v13542_v48, %v9729_v19  ;;  %v10372_v23 = vmax.f32 %v13543_v42, %v9767_v35  ;;  %v3408_v19 = vmax.f32 %v3382_v56, 0.0  ;;  %v3839_v35 = vadd.f32 %v9826_v15, %v13546_v37  ;;  %v13547_v42 = vld [vmem:[#allocation88_spill] sm:$0xff] }
 0x208   : > { %1141 = vrot.lane.b32.xlu1 %v10346_v30, %s13313_s21  ;;  %1139 = vrot.lane.b32.xlu0 %v10342_v52, %s13313_s21  ;;  %v3867_v30 = vmax.f32 %v3847_v53, 0.0  ;;  %v3868_v52 = vmax.f32 %v3850_v39, 0.0  ;;  %v10388_v53 = vadd.f32 %v9866_v59, %v3427_v17 }
 0x209   : > { %v3424_v34 = vmul.f32 %v9835_v16, %v3408_v19  ;;  %v3865_v56 = vmax.f32 %v3839_v35, 0.0 }
 0x20a   : > { %v10374_v43 = vpop.permute.xlu1 %2983  ;;  %v10376_v12 = vpop.permute.xlu0 %2981  ;;  %v3883_v39 = vmul.f32 %v9835_v16, %v3867_v30  ;;  %v3884_v48 = vmul.f32 %v9835_v16, %v3868_v52  ;;  %v3425_v30 = vmul.f32 %v9835_v16, %v3409_v47 }
 0x20b   : > { %13544 = vst [vmem:[#allocation79_spill] sm:$0xff] %v10374_v43  ;;  %13545 = vst [vmem:[#allocation83_spill] sm:$0xff] %v10376_v12  ;;  %v3842_v12 = vadd.f32 %v9826_v15, %v13547_v42  ;;  %v10419_v19 = vadd.f32 %v9866_v59, %v3424_v34  ;;  %v3881_v35 = vmul.f32 %v9835_v16, %v3865_v56 }
 0x20c   : > { %676 = vrot.lane.b32.xlu1 %v10372_v23, %s13313_s21  ;;  %674 = vrot.lane.b32.xlu0 %v10368_v10, %s13313_s21  ;;  %v10405_v52 = vadd.f32 %v9866_v59, %v3883_v39  ;;  %v10408_v15 = vadd.f32 %v9866_v59, %v3884_v48  ;;  %v10422_v47 = vadd.f32 %v9866_v59, %v3425_v30 }
 0x20d   : > { %v3866_v17 = vmax.f32 %v3842_v12, 0.0  ;;  %v10435_v42 = vadd.f32 %v9866_v59, %v3881_v35  ;;  %v13557_v35 = vld [vmem:[#allocation16_spill] sm:$0xff] }
 0x20e   : > { %v10394_v43 = vpop.permute.xlu1 %2526  ;;  %v10396_v29 = vpop.permute.xlu0 %2524  ;;  %13550 = vst [vmem:[#allocation85_spill] sm:$0xff] %v10405_v52  ;;  %13551 = vst [vmem:[#allocation88_spill] sm:$0xff] %v10408_v15 }
 0x20f   : > { %13548 = vst [vmem:[#allocation11_spill] sm:$0xff] %v10394_v43  ;;  %13549 = vst [vmem:[#allocation15_spill] sm:$0xff] %v10396_v29  ;;  %v3882_v12 = vmul.f32 %v9835_v16, %v3866_v17  ;;  %v13556_v16 = vld [vmem:[#allocation12_spill] sm:$0xff]  ;;  %v10454_v29 = vmax.f32 %v13557_v35, %v9787_v14  ;;  %v13560_v43 = vld [vmem:[#allocation14_spill] sm:$0xff] }
 0x210   : > { %3650 = vrot.lane.b32.xlu1 %v10388_v53, %s13311_s28  ;;  %3648 = vrot.lane.b32.xlu0 %v10383_v6, %s13311_s28  ;;  %13554 = vst [vmem:[#allocation151_spill] sm:$0xff] %v10435_v42  ;;  %v10450_v17 = vmax.f32 %v13556_v16, %v9751_v31  ;;  %v13561_v31 = vld [vmem:[#allocation18_spill] sm:$0xff] }
 0x211   : > { %v10438_v34 = vadd.f32 %v9866_v59, %v3882_v12  ;;  %v10470_v16 = vmax.f32 %v13561_v31, %v9809_v63 }
 0x212   : > { %v10410_v41 = vpop.permute.xlu1 %2608  ;;  %v10412_v37 = vpop.permute.xlu0 %2606 }
 0x213   : > { %13555 = vst [vmem:[#allocation152_spill] sm:$0xff] %v10438_v34 }
 0x214   : > { %4115 = vrot.lane.b32.xlu1 %v10408_v15, %s13311_s28  ;;  %4113 = vrot.lane.b32.xlu0 %v10405_v52, %s13311_s28  ;;  %v10466_v52 = vmax.f32 %v13560_v43, %v9769_v26  ;;  %v13562_v15 = vld [vmem:[#allocation17_spill] sm:$0xff] }
 0x215   : > { %v13563_v26 = vld [vmem:[#allocation21_spill] sm:$0xff] }
 0x216   : > { %v10426_v39 = vpop.permute.xlu1 %3073  ;;  %v10428_v48 = vpop.permute.xlu0 %3071  ;;  %v10486_v43 = vmax.f32 %v13563_v26, %v9839_v5 }
 0x217   : > { %13552 = vst [vmem:[#allocation149_spill] sm:$0xff] %v10426_v39  ;;  %13553 = vst [vmem:[#allocation150_spill] sm:$0xff] %v10428_v48  ;;  %v13573_v39 = vld [vmem:[#allocation22_spill] sm:$0xff] }
 0x218   : > { %3620 = vrot.lane.b32.xlu1 %v10422_v47, %s13311_s28  ;;  %3618 = vrot.lane.b32.xlu0 %v10419_v19, %s13311_s28 }
 0x21a   : > { %v10440_v30 = vpop.permute.xlu1 %2578  ;;  %v10442_v56 = vpop.permute.xlu0 %2576 }
 0x21c   : > { %4085 = vrot.lane.b32.xlu1 %v10438_v34, %s13311_s28  ;;  %4083 = vrot.lane.b32.xlu0 %v10435_v42, %s13311_s28  ;;  %v10482_v42 = vmax.f32 %v13562_v15, %v9789_v45  ;;  %v13566_v34 = vld [vmem:[#allocation19_spill] sm:$0xff]  ;;  %s8603_s28 = smov 56  }
 0x21d   : > { %v10498_v48 = vmax.f32 %v13566_v34, %v9811_v36  ;;  %v13567_v45 = vld [vmem:[#allocation23_spill] sm:$0xff]  ;;  %v13570_v36 = vld [vmem:[#allocation24_spill] sm:$0xff] }
 0x21e   : > { %v10456_v59 = vpop.permute.xlu1 %3043  ;;  %v10458_v12 = vpop.permute.xlu0 %3041  ;;  %v10502_v15 = vmax.f32 %v13567_v45, %v9857_v46  ;;  %v10518_v34 = vmax.f32 %v13570_v36, %v9882_v21 }
 0x21f   : > { %13558 = vst [vmem:[#allocation12_spill] sm:$0xff] %v10456_v59  ;;  %13559 = vst [vmem:[#allocation16_spill] sm:$0xff] %v10458_v12  ;;  %v10530_v12 = vmax.f32 %v13573_v39, %v9859_v4  ;;  %v13579_v4 = vld [vmem:[#allocation29_spill] sm:$0xff]  ;;  %v13583_v59 = vld [vmem:[#allocation27_spill] sm:$0xff] }
 0x220   : > { %761 = vrot.lane.b32.xlu1 %v10454_v29, %s13313_s21  ;;  %759 = vrot.lane.b32.xlu0 %v10450_v17, %s13313_s21  ;;  %v10550_v39 = vmax.f32 %v13579_v4, %v9924_v24 }
 0x221   : > { %13574 = vst [vmem:[#allocation23_spill] sm:$0xff] %v10530_v12 }
 0x222   : > { %v10472_v14 = vpop.permute.xlu1 %2668  ;;  %v10474_v35 = vpop.permute.xlu0 %2666  ;;  %13580 = vst [vmem:[#allocation22_spill] sm:$0xff] %v10550_v39 }
 0x224   : > { %1234 = vrot.lane.b32.xlu1 %v10470_v16, %s13313_s21  ;;  %1232 = vrot.lane.b32.xlu0 %v10466_v52, %s13313_s21 }
 0x226   : > { %v10488_v63 = vpop.permute.xlu1 %3133  ;;  %v10490_v31 = vpop.permute.xlu0 %3131 }
 0x227   : > { %13564 = vst [vmem:[#allocation14_spill] sm:$0xff] %v10488_v63  ;;  %13565 = vst [vmem:[#allocation18_spill] sm:$0xff] %v10490_v31  ;;  %v13568_v31 = vld [vmem:[#allocation20_spill] sm:$0xff] }
 0x228   : > { %730 = vrot.lane.b32.xlu1 %v10486_v43, %s13313_s21  ;;  %728 = vrot.lane.b32.xlu0 %v10482_v42, %s13313_s21  ;;  %v10514_v63 = vmax.f32 %v13568_v31, %v9841_v62  ;;  %v13575_v62 = vld [vmem:[#allocation26_spill] sm:$0xff] }
 0x229   : > { %v10534_v31 = vmax.f32 %v13575_v62, %v9904_v11 }
 0x22a   : > { %v10504_v5 = vpop.permute.xlu1 %2638  ;;  %v10506_v26 = vpop.permute.xlu0 %2636  ;;  %13569 = vst [vmem:[#allocation17_spill] sm:$0xff] %v10514_v63 }
 0x22b   : > { %13576 = vst [vmem:[#allocation20_spill] sm:$0xff] %v10534_v31 }
 0x22c   : > { %1203 = vrot.lane.b32.xlu1 %v10502_v15, %s13313_s21  ;;  %1201 = vrot.lane.b32.xlu0 %v10498_v48, %s13313_s21 }
 0x22e   : > { %v10520_v46 = vpop.permute.xlu1 %3103  ;;  %v10522_v45 = vpop.permute.xlu0 %3101 }
 0x22f   : > { %13571 = vst [vmem:[#allocation21_spill] sm:$0xff] %v10520_v46  ;;  %13572 = vst [vmem:[#allocation19_spill] sm:$0xff] %v10522_v45  ;;  %v13577_v45 = vld [vmem:[#allocation25_spill] sm:$0xff] }
 0x230   : > { %823 = vrot.lane.b32.xlu1 %v10518_v34, %s13313_s21  ;;  %821 = vrot.lane.b32.xlu0 %v10514_v63, %s13313_s21  ;;  %v10546_v46 = vmax.f32 %v13577_v45, %v9884_v51  ;;  %v13585_v51 = vld [vmem:[#allocation31_spill] sm:$0xff] }
 0x231   : > { %v10566_v45 = vmax.f32 %v13585_v51, %v9942_v7 }
 0x232   : > { %v10536_v21 = vpop.permute.xlu1 %2728  ;;  %v10538_v36 = vpop.permute.xlu0 %2726  ;;  %13578 = vst [vmem:[#allocation24_spill] sm:$0xff] %v10546_v46 }
 0x233   : > { %13586 = vst [vmem:[#allocation27_spill] sm:$0xff] %v10566_v45 }
 0x234   : > { %1296 = vrot.lane.b32.xlu1 %v10534_v31, %s13313_s21  ;;  %1294 = vrot.lane.b32.xlu0 %v10530_v12, %s13313_s21  ;;  %v10562_v12 = vmax.f32 %v13583_v59, %v9906_v27  ;;  %v13589_v27 = vld [vmem:[#allocation32_spill] sm:$0xff]  ;;  %v13593_v31 = vld [vmem:[#allocation30_spill] sm:$0xff] }
 0x235   : > { %v10582_v59 = vmax.f32 %v13589_v27, %v9962_v0 }
 0x236   : > { %v10552_v11 = vpop.permute.xlu1 %3193  ;;  %v10554_v62 = vpop.permute.xlu0 %3191  ;;  %13584 = vst [vmem:[#allocation29_spill] sm:$0xff] %v10562_v12 }
 0x237   : > { %13581 = vst [vmem:[#allocation26_spill] sm:$0xff] %v10552_v11  ;;  %13582 = vst [vmem:[#allocation25_spill] sm:$0xff] %v10554_v62  ;;  %v13587_v62 = vld [vmem:[#allocation28_spill] sm:$0xff] }
 0x238   : > { %792 = vrot.lane.b32.xlu1 %v10550_v39, %s13313_s21  ;;  %790 = vrot.lane.b32.xlu0 %v10546_v46, %s13313_s21  ;;  %v10578_v11 = vmax.f32 %v13587_v62, %v9926_v9  ;;  %13590 = vst [vmem:[#allocation28_spill] sm:$0xff] %v10582_v59  ;;  %v13595_v9 = vld [vmem:[#allocation34_spill] sm:$0xff] }
 0x239   : > { %v10598_v62 = vmax.f32 %v13595_v9, %v9984_v58 }
 0x23a   : > { %v10568_v24 = vpop.permute.xlu1 %2698  ;;  %v10570_v4 = vpop.permute.xlu0 %2696  ;;  %13588 = vst [vmem:[#allocation31_spill] sm:$0xff] %v10578_v11 }
 0x23b   : > { %13596 = vst [vmem:[#allocation34_spill] sm:$0xff] %v10598_v62 }
 0x23c   : > { %1265 = vrot.lane.b32.xlu1 %v10566_v45, %s13313_s21  ;;  %1263 = vrot.lane.b32.xlu0 %v10562_v12, %s13313_s21  ;;  %v10594_v12 = vmax.f32 %v13593_v31, %v9944_v60  ;;  %v13599_v60 = vld [vmem:[#allocation37_spill] sm:$0xff] }
 0x23d   : > { %v10614_v31 = vmax.f32 %v13599_v60, %v10004_v61 }
 0x23e   : > { %v10584_v7 = vpop.permute.xlu1 %3163  ;;  %v10586_v51 = vpop.permute.xlu0 %3161  ;;  %13594 = vst [vmem:[#allocation30_spill] sm:$0xff] %v10594_v12 }
 0x23f   : > { %13591 = vst [vmem:[#allocation32_spill] sm:$0xff] %v10584_v7  ;;  %13592 = vst [vmem:[#allocation153_spill] sm:$0xff] %v10586_v51  ;;  %v13597_v51 = vld [vmem:[#allocation33_spill] sm:$0xff] }
 0x240   : > { %885 = vrot.lane.b32.xlu1 %v10582_v59, %s13313_s21  ;;  %883 = vrot.lane.b32.xlu0 %v10578_v11, %s13313_s21  ;;  %v10610_v7 = vmax.f32 %v13597_v51, %v9964_v50  ;;  %13600 = vst [vmem:[#allocation37_spill] sm:$0xff] %v10614_v31  ;;  %v13604_v50 = vld [vmem:[#allocation39_spill] sm:$0xff] }
 0x241   : > { %v10630_v51 = vmax.f32 %v13604_v50, %v10022_v1 }
 0x242   : > { %v10600_v0 = vpop.permute.xlu1 %3470  ;;  %v10602_v27 = vpop.permute.xlu0 %3468  ;;  %13598 = vst [vmem:[#allocation33_spill] sm:$0xff] %v10610_v7 }
 0x244   : > { %1358 = vrot.lane.b32.xlu1 %v10598_v62, %s13313_s21  ;;  %1356 = vrot.lane.b32.xlu0 %v10594_v12, %s13313_s21  ;;  %v13601_v62 = vld [vmem:[#allocation111_spill] sm:$0xff] }
 0x245   : > { %v13602_v12 = vld [vmem:[#allocation35_spill] sm:$0xff] }
 0x246   : > { %v10616_v58 = vpop.permute.xlu1 %3935  ;;  %v10618_v9 = vpop.permute.xlu0 %3933  ;;  %v10626_v45 = vmax.f32 %v13602_v12, %v13601_v62  ;;  %13605 = vst [vmem:[#allocation35_spill] sm:$0xff] %v10630_v51  ;;  %v13608_v12 = vld [vmem:[#allocation45_spill] sm:$0xff] }
 0x247   : > { %v10646_v62 = vmax.f32 %v13608_v12, %v10086_v49 }
 0x248   : > { %854 = vrot.lane.b32.xlu1 %v10614_v31, %s13313_s21  ;;  %852 = vrot.lane.b32.xlu0 %v10610_v7, %s13313_s21  ;;  %13603 = vst [vmem:[#allocation111_spill] sm:$0xff] %v10626_v45  ;;  %v13606_v7 = vld [vmem:[#allocation36_spill] sm:$0xff] }
 0x249   : > { %v10642_v31 = vmax.f32 %v13606_v7, %v10006_v40  ;;  %13609 = vst [vmem:[#allocation36_spill] sm:$0xff] %v10646_v62  ;;  %v13614_v40 = vld [vmem:[#allocation117_spill] sm:$0xff]  ;;  %v13615_v7 = vld [vmem:[#allocation40_spill] sm:$0xff] }
 0x24a   : > { %v10632_v61 = vpop.permute.xlu1 %3905  ;;  %v10634_v60 = vpop.permute.xlu0 %3903  ;;  %v10662_v11 = vmax.f32 %v13615_v7, %v13614_v40 }
 0x24b   : > { %13607 = vst [vmem:[#allocation39_spill] sm:$0xff] %v10642_v31 }
 0x24c   : > { %1327 = vrot.lane.b32.xlu1 %v10630_v51, %s13313_s21  ;;  %1325 = vrot.lane.b32.xlu0 %v10626_v45, %s13313_s21  ;;  %v13612_v45 = vld [vmem:[#allocation38_spill] sm:$0xff]  ;;  %13616 = vst [vmem:[#allocation117_spill] sm:$0xff] %v10662_v11 }
 0x24d   : > { %v10658_v51 = vmax.f32 %v13612_v45, %v10024_v38  ;;  %v13620_v38 = vld [vmem:[#allocation54_spill] sm:$0xff] }
 0x24e   : > { %v10648_v1 = vpop.permute.xlu1 %3448  ;;  %v10650_v50 = vpop.permute.xlu0 %3446  ;;  %v13621_v45 = vld [vmem:[#allocation42_spill] sm:$0xff] }
 0x24f   : > { %13610 = vst [vmem:[#allocation45_spill] sm:$0xff] %v10648_v1  ;;  %13611 = vst [vmem:[#allocation154_spill] sm:$0xff] %v10650_v50  ;;  %v13617_v50 = vld [vmem:[#allocation118_spill] sm:$0xff]  ;;  %v13618_v1 = vld [vmem:[#allocation41_spill] sm:$0xff] }
 0x250   : > { %1636 = vrot.lane.b32.xlu1 %v10646_v62, %s13313_s21  ;;  %1634 = vrot.lane.b32.xlu0 %v10642_v31, %s13313_s21  ;;  %13613 = vst [vmem:[#allocation38_spill] sm:$0xff] %v10658_v51  ;;  %v10674_v31 = vmax.f32 %v13618_v1, %v13617_v50  ;;  %v10678_v62 = vmax.f32 %v13621_v45, %v13620_v38  ;;  %v13627_v1 = vld [vmem:[#allocation44_spill] sm:$0xff] }
 0x251   : > { %v10694_v50 = vmax.f32 %v13627_v1, %v10084_v3 }
 0x252   : > { %v10664_v49 = vpop.permute.xlu1 %3530  ;;  %v10666_v12 = vpop.permute.xlu0 %3528  ;;  %13619 = vst [vmem:[#allocation40_spill] sm:$0xff] %v10674_v31  ;;  %13622 = vst [vmem:[#allocation118_spill] sm:$0xff] %v10678_v62 }
 0x254   : > { %2101 = vrot.lane.b32.xlu1 %v10662_v11, %s13313_s21  ;;  %2099 = vrot.lane.b32.xlu0 %v10658_v51, %s13313_s21  ;;  %v13625_v11 = vld [vmem:[#allocation58_spill] sm:$0xff]  ;;  %v13626_v51 = vld [vmem:[#allocation43_spill] sm:$0xff] }
 0x255   : > { %v10690_v59 = vmax.f32 %v13626_v51, %v13625_v11  ;;  %v13630_v11 = vld [vmem:[#allocation47_spill] sm:$0xff] }
 0x256   : > { %v10680_v40 = vpop.permute.xlu1 %3995  ;;  %v10682_v7 = vpop.permute.xlu0 %3993  ;;  %v10710_v51 = vmax.f32 %v13630_v11, %v10110_v8 }
 0x257   : > { %13623 = vst [vmem:[#allocation41_spill] sm:$0xff] %v10680_v40  ;;  %13624 = vst [vmem:[#allocation54_spill] sm:$0xff] %v10682_v7  ;;  %v13628_v7 = vld [vmem:[#allocation46_spill] sm:$0xff] }
 0x258   : > { %2071 = vrot.lane.b32.xlu1 %v10678_v62, %s13313_s21  ;;  %2069 = vrot.lane.b32.xlu0 %v10674_v31, %s13313_s21  ;;  %v10706_v40 = vmax.f32 %v13628_v7, %v10108_v57  ;;  %13631 = vst [vmem:[#allocation58_spill] sm:$0xff] %v10710_v51  ;;  %v13634_v31 = vld [vmem:[#allocation127_spill] sm:$0xff]  ;;  %v13635_v62 = vld [vmem:[#allocation48_spill] sm:$0xff]  ;;  %v13638_v7 = vld [vmem:[#allocation49_spill] sm:$0xff] }
 0x259   : > { %v10722_v46 = vmax.f32 %v13635_v62, %v13634_v31  ;;  %v13637_v57 = vld [vmem:[#allocation128_spill] sm:$0xff]  ;;  %v13643_v31 = vld [vmem:[#allocation130_spill] sm:$0xff] }
 0x25a   : > { %v10696_v38 = vpop.permute.xlu1 %3500  ;;  %v10698_v45 = vpop.permute.xlu0 %3498  ;;  %13629 = vst [vmem:[#allocation42_spill] sm:$0xff] %v10706_v40  ;;  %v10726_v39 = vmax.f32 %v13638_v7, %v13637_v57  ;;  %v13644_v62 = vld [vmem:[#allocation52_spill] sm:$0xff] }
 0x25b   : > { %13636 = vst [vmem:[#allocation46_spill] sm:$0xff] %v10722_v46 }
 0x25c   : > { %1614 = vrot.lane.b32.xlu1 %v10694_v50, %s13313_s21  ;;  %1612 = vrot.lane.b32.xlu0 %v10690_v59, %s13313_s21  ;;  %13639 = vst [vmem:[#allocation47_spill] sm:$0xff] %v10726_v39 }
 0x25e   : > { %v10712_v3 = vpop.permute.xlu1 %3965  ;;  %v10714_v1 = vpop.permute.xlu0 %3963 }
 0x25f   : > { %13632 = vst [vmem:[#allocation43_spill] sm:$0xff] %v10712_v3  ;;  %13633 = vst [vmem:[#allocation44_spill] sm:$0xff] %v10714_v1  ;;  %v13640_v1 = vld [vmem:[#allocation65_spill] sm:$0xff]  ;;  %v13641_v3 = vld [vmem:[#allocation51_spill] sm:$0xff] }
 0x260   : > { %1696 = vrot.lane.b32.xlu1 %v10706_v40, %s13313_s21  ;;  %1694 = vrot.lane.b32.xlu0 %v10710_v51, %s13313_s21  ;;  %v10738_v51 = vmax.f32 %v13641_v3, %v13640_v1  ;;  %v10742_v40 = vmax.f32 %v13644_v62, %v13643_v31  ;;  %v13650_v3 = vld [vmem:[#allocation56_spill] sm:$0xff] }
 0x261   : > { %v10758_v1 = vmax.f32 %v13650_v3, %v10172_v28 }
 0x262   : > { %v10728_v8 = vpop.permute.xlu1 %3590  ;;  %v10730_v11 = vpop.permute.xlu0 %3588  ;;  %13642 = vst [vmem:[#allocation127_spill] sm:$0xff] %v10738_v51  ;;  %13645 = vst [vmem:[#allocation48_spill] sm:$0xff] %v10742_v40 }
 0x263   : > { %13651 = vst [vmem:[#allocation51_spill] sm:$0xff] %v10758_v1 }
 0x264   : > { %2161 = vrot.lane.b32.xlu1 %v10722_v46, %s13313_s21  ;;  %2159 = vrot.lane.b32.xlu0 %v10726_v39, %s13313_s21  ;;  %v13648_v39 = vld [vmem:[#allocation55_spill] sm:$0xff] }
 0x265   : > { %v10754_v46 = vmax.f32 %v13648_v39, %v10170_v25  ;;  %v13654_v25 = vld [vmem:[#allocation60_spill] sm:$0xff] }
 0x266   : > { %v10744_v57 = vpop.permute.xlu1 %4055  ;;  %v10746_v7 = vpop.permute.xlu0 %4053  ;;  %v10774_v39 = vmax.f32 %v13654_v25, %v10190_v44 }
 0x267   : > { %13646 = vst [vmem:[#allocation128_spill] sm:$0xff] %v10744_v57  ;;  %13647 = vst [vmem:[#allocation49_spill] sm:$0xff] %v10746_v7  ;;  %v13652_v7 = vld [vmem:[#allocation59_spill] sm:$0xff] }
 0x268   : > { %1666 = vrot.lane.b32.xlu1 %v10738_v51, %s13313_s21  ;;  %1664 = vrot.lane.b32.xlu0 %v10742_v40, %s13313_s21  ;;  %13649 = vst [vmem:[#allocation65_spill] sm:$0xff] %v10754_v46  ;;  %v10770_v57 = vmax.f32 %v13652_v7, %v10188_v33  ;;  %13655 = vst [vmem:[#allocation52_spill] sm:$0xff] %v10774_v39  ;;  %v13660_v33 = vld [vmem:[#allocation135_spill] sm:$0xff]  ;;  %v13661_v7 = vld [vmem:[#allocation64_spill] sm:$0xff] }
 0x269   : > { %v10790_v40 = vmax.f32 %v13661_v7, %v13660_v33 }
 0x26a   : > { %v10760_v31 = vpop.permute.xlu1 %3560  ;;  %v10762_v62 = vpop.permute.xlu0 %3558  ;;  %13653 = vst [vmem:[#allocation130_spill] sm:$0xff] %v10770_v57 }
 0x26b   : > { %13662 = vst [vmem:[#allocation60_spill] sm:$0xff] %v10790_v40 }
 0x26c   : > { %2131 = vrot.lane.b32.xlu1 %v10754_v46, %s13313_s21  ;;  %2129 = vrot.lane.b32.xlu0 %v10758_v1, %s13313_s21  ;;  %v13658_v1 = vld [vmem:[#allocation63_spill] sm:$0xff] }
 0x26d   : > { %v10786_v46 = vmax.f32 %v13658_v1, %v10208_v22  ;;  %v13666_v22 = vld [vmem:[#allocation138_spill] sm:$0xff]  ;;  %v13667_v1 = vld [vmem:[#allocation68_spill] sm:$0xff] }
 0x26e   : > { %v10776_v28 = vpop.permute.xlu1 %4025  ;;  %v10778_v3 = vpop.permute.xlu0 %4023 }
 0x26f   : > { %13656 = vst [vmem:[#allocation55_spill] sm:$0xff] %v10776_v28  ;;  %13657 = vst [vmem:[#allocation56_spill] sm:$0xff] %v10778_v3  ;;  %v13663_v3 = vld [vmem:[#allocation137_spill] sm:$0xff]  ;;  %v13664_v28 = vld [vmem:[#allocation67_spill] sm:$0xff] }
 0x270   : > { %1756 = vrot.lane.b32.xlu1 %v10770_v57, %s13313_s21  ;;  %1754 = vrot.lane.b32.xlu0 %v10774_v39, %s13313_s21  ;;  %13659 = vst [vmem:[#allocation59_spill] sm:$0xff] %v10786_v46  ;;  %v10802_v39 = vmax.f32 %v13664_v28, %v13663_v3  ;;  %v10806_v57 = vmax.f32 %v13667_v1, %v13666_v22  ;;  %v13670_v28 = vld [vmem:[#allocation72_spill] sm:$0xff] }
 0x271   : > { %v10822_v3 = vmax.f32 %v13670_v28, %v10252_v32 }
 0x272   : > { %v10792_v44 = vpop.permute.xlu1 %699  ;;  %v10794_v25 = vpop.permute.xlu0 %697  ;;  %13665 = vst [vmem:[#allocation63_spill] sm:$0xff] %v10802_v39  ;;  %13668 = vst [vmem:[#allocation135_spill] sm:$0xff] %v10806_v57 }
 0x273   : > { %13671 = vst [vmem:[#allocation64_spill] sm:$0xff] %v10822_v3 }
 0x274   : > { %2221 = vrot.lane.b32.xlu1 %v10786_v46, %s13313_s21  ;;  %2219 = vrot.lane.b32.xlu0 %v10790_v40, %s13313_s21  ;;  %v13669_v40 = vld [vmem:[#allocation71_spill] sm:$0xff] }
 0x275   : > { %v10818_v46 = vmax.f32 %v13669_v40, %v10250_v54  ;;  %v13674_v54 = vld [vmem:[#allocation75_spill] sm:$0xff] }
 0x276   : > { %v10808_v33 = vpop.permute.xlu1 %1172  ;;  %v10810_v7 = vpop.permute.xlu0 %1170  ;;  %v10838_v40 = vmax.f32 %v13674_v54, %v10268_v13  ;;  %v13676_v13 = vld [vmem:[#allocation77_spill] sm:$0xff] }
 0x278   : > { %1726 = vrot.lane.b32.xlu1 %v10802_v39, %s13313_s21  ;;  %1724 = vrot.lane.b32.xlu0 %v10806_v57, %s13313_s21  ;;  %v13672_v57 = vld [vmem:[#allocation74_spill] sm:$0xff]  ;;  %13675 = vst [vmem:[#allocation67_spill] sm:$0xff] %v10838_v40 }
 0x279   : > { %v10834_v39 = vmax.f32 %v13672_v57, %v10266_v18  ;;  %v10850_v18 = vmax.f32 %v13676_v13, %v10282_v2  ;;  %v13678_v57 = vld [vmem:[#allocation78_spill] sm:$0xff]  ;;  %v13682_v2 = vld [vmem:[#allocation145_spill] sm:$0xff] }
 0x27a   : > { %v10824_v22 = vpop.permute.xlu1 %1141  ;;  %v10826_v1 = vpop.permute.xlu0 %1139  ;;  %v10854_v54 = vmax.f32 %v13678_v57, %v10284_v20  ;;  %v13687_v57 = vld [vmem:[#allocation146_spill] sm:$0xff] }
 0x27b   : > { %13673 = vst [vmem:[#allocation137_spill] sm:$0xff] %v10834_v39  ;;  %13677 = vst [vmem:[#allocation138_spill] sm:$0xff] %v10850_v18 }
 0x27c   : > { %2191 = vrot.lane.b32.xlu1 %v10818_v46, %s13313_s21  ;;  %2189 = vrot.lane.b32.xlu0 %v10822_v3, %s13313_s21  ;;  %13679 = vst [vmem:[#allocation68_spill] sm:$0xff] %v10854_v54 }
 0x27e   : > { %v677_v32 = vpop.permute.xlu1 %676  ;;  %v675_v28 = vpop.permute.xlu0 %674 }
 0x27f   : > { %v681_v51 = vmax.f32 %v10372_v23, %v677_v32  ;;  %v680_v63 = vmax.f32 %v10368_v10, %v675_v28  ;;  %v13683_v32 = vld [vmem:[#allocation82_spill] sm:$0xff] }
 0x280   : > { %1816 = vrot.lane.b32.xlu1 %v10834_v39, %s13313_s21  ;;  %1814 = vrot.lane.b32.xlu0 %v10838_v40, %s13313_s21  ;;  %v10870_v28 = vmax.f32 %v13683_v32, %v13682_v2 }
 0x281   : > { %684 = vst.msk [vmem:[#allocation2 + $0x20] sm:$0xff] %vm682_vm2, %v681_v51  ;;  %683 = vst.msk [vmem:[#allocation2] sm:$0xff] %vm682_vm2, %v680_v63  ;;  %v13680_v63 = vld [vmem:[#allocation81_spill] sm:$0xff] }
 0x282   : > { %v10856_v23 = vpop.permute.xlu1 %3650  ;;  %v10858_v10 = vpop.permute.xlu0 %3648  ;;  %v10866_v51 = vmax.f32 %v13680_v63, %v10296_v55  ;;  %13684 = vst [vmem:[#allocation72_spill] sm:$0xff] %v10870_v28  ;;  %v13690_v55 = vld [vmem:[#allocation147_spill] sm:$0xff] }
 0x283   : > { %v13691_v63 = vld [vmem:[#allocation87_spill] sm:$0xff] }
 0x284   : > { %2281 = vrot.lane.b32.xlu1 %v10850_v18, %s13313_s21  ;;  %2279 = vrot.lane.b32.xlu0 %v10854_v54, %s13313_s21  ;;  %13681 = vst [vmem:[#allocation71_spill] sm:$0xff] %v10866_v51  ;;  %v13688_v54 = vld [vmem:[#allocation86_spill] sm:$0xff]  ;;  %v10886_v39 = vmax.f32 %v13691_v63, %v13690_v55 }
 0x285   : > { %v10882_v18 = vmax.f32 %v13688_v54, %v13687_v57  ;;  %v13696_v54 = vld [vmem:[#allocation148_spill] sm:$0xff]  ;;  %v13697_v57 = vld [vmem:[#allocation90_spill] sm:$0xff] }
 0x286   : > { %v10872_v20 = vpop.permute.xlu1 %4115  ;;  %v10874_v13 = vpop.permute.xlu0 %4113  ;;  %13692 = vst [vmem:[#allocation78_spill] sm:$0xff] %v10886_v39 }
 0x287   : > { %13685 = vst [vmem:[#allocation74_spill] sm:$0xff] %v10872_v20  ;;  %13686 = vst [vmem:[#allocation75_spill] sm:$0xff] %v10874_v13  ;;  %v13693_v13 = vld [vmem:[#allocation10_spill] sm:$0xff]  ;;  %v13694_v20 = vld [vmem:[#allocation89_spill] sm:$0xff] }
 0x288   : > { %1786 = vrot.lane.b32.xlu1 %v10866_v51, %s13313_s21  ;;  %1784 = vrot.lane.b32.xlu0 %v10870_v28, %s13313_s21  ;;  %13689 = vst [vmem:[#allocation77_spill] sm:$0xff] %v10882_v18  ;;  %v10898_v51 = vmax.f32 %v13694_v20, %v13693_v13  ;;  %v10902_v28 = vmax.f32 %v13697_v57, %v13696_v54  ;;  %v13704_v20 = vld [vmem:[#allocation83_spill] sm:$0xff]  ;;  %v13705_v13 = vld [vmem:[#allocation94_spill] sm:$0xff] }
 0x289   : > { %v10918_v3 = vmax.f32 %v13705_v13, %v13704_v20 }
 0x28a   : > { %v10888_v2 = vpop.permute.xlu1 %3620  ;;  %v10890_v32 = vpop.permute.xlu0 %3618  ;;  %13695 = vst [vmem:[#allocation81_spill] sm:$0xff] %v10898_v51  ;;  %13698 = vst [vmem:[#allocation145_spill] sm:$0xff] %v10902_v28 }
 0x28b   : > { %13706 = vst [vmem:[#allocation147_spill] sm:$0xff] %v10918_v3 }
 0x28c   : > { %2251 = vrot.lane.b32.xlu1 %v10882_v18, %s13313_s21  ;;  %2249 = vrot.lane.b32.xlu0 %v10886_v39, %s13313_s21  ;;  %v13701_v18 = vld [vmem:[#allocation79_spill] sm:$0xff]  ;;  %v13702_v39 = vld [vmem:[#allocation93_spill] sm:$0xff] }
 0x28d   : > { %v10914_v40 = vmax.f32 %v13702_v39, %v13701_v18  ;;  %v13709_v39 = vld [vmem:[#allocation98_spill] sm:$0xff] }
 0x28e   : > { %v10904_v55 = vpop.permute.xlu1 %4085  ;;  %v10906_v63 = vpop.permute.xlu0 %4083  ;;  %v10934_v18 = vmax.f32 %v13709_v39, %v10412_v37 }
 0x28f   : > { %13699 = vst [vmem:[#allocation82_spill] sm:$0xff] %v10904_v55  ;;  %13700 = vst [vmem:[#allocation146_spill] sm:$0xff] %v10906_v63 }
 0x290   : > { %2558 = vrot.lane.b32.xlu1 %v10898_v51, %s13313_s21  ;;  %2556 = vrot.lane.b32.xlu0 %v10902_v28, %s13313_s21  ;;  %13703 = vst [vmem:[#allocation86_spill] sm:$0xff] %v10914_v40  ;;  %v13707_v28 = vld [vmem:[#allocation97_spill] sm:$0xff]  ;;  %13710 = vst [vmem:[#allocation10_spill] sm:$0xff] %v10934_v18 }
 0x291   : > { %v10930_v51 = vmax.f32 %v13707_v28, %v10410_v41  ;;  %v13713_v41 = vld [vmem:[#allocation102_spill] sm:$0xff] }
 0x292   : > { %v10920_v54 = vpop.permute.xlu1 %761  ;;  %v10922_v57 = vpop.permute.xlu0 %759  ;;  %v10950_v28 = vmax.f32 %v13713_v41, %v10442_v56 }
 0x293   : > { %13708 = vst [vmem:[#allocation87_spill] sm:$0xff] %v10930_v51 }
 0x294   : > { %2993 = vrot.lane.b32.xlu1 %v10914_v40, %s13313_s21  ;;  %2991 = vrot.lane.b32.xlu0 %v10918_v3, %s13313_s21  ;;  %v13711_v3 = vld [vmem:[#allocation101_spill] sm:$0xff]  ;;  %13714 = vst [vmem:[#allocation148_spill] sm:$0xff] %v10950_v28 }
 0x295   : > { %v10946_v40 = vmax.f32 %v13711_v3, %v10440_v30  ;;  %v13717_v30 = vld [vmem:[#allocation106_spill] sm:$0xff] }
 0x296   : > { %v10936_v20 = vpop.permute.xlu1 %1234  ;;  %v10938_v13 = vpop.permute.xlu0 %1232  ;;  %v10966_v3 = vmax.f32 %v13717_v30, %v10474_v35 }
 0x297   : > { %13712 = vst [vmem:[#allocation89_spill] sm:$0xff] %v10946_v40 }
 0x298   : > { %2618 = vrot.lane.b32.xlu1 %v10930_v51, %s13313_s21  ;;  %2616 = vrot.lane.b32.xlu0 %v10934_v18, %s13313_s21  ;;  %v13715_v18 = vld [vmem:[#allocation105_spill] sm:$0xff]  ;;  %13718 = vst [vmem:[#allocation79_spill] sm:$0xff] %v10966_v3 }
 0x299   : > { %v10962_v51 = vmax.f32 %v13715_v18, %v10472_v14  ;;  %v13721_v14 = vld [vmem:[#allocation110_spill] sm:$0xff] }
 0x29a   : > { %v10952_v37 = vpop.permute.xlu1 %730  ;;  %v10954_v39 = vpop.permute.xlu0 %728  ;;  %v10982_v18 = vmax.f32 %v13721_v14, %v10506_v26 }
 0x29b   : > { %13716 = vst [vmem:[#allocation90_spill] sm:$0xff] %v10962_v51 }
 0x29c   : > { %2588 = vrot.lane.b32.xlu1 %v10946_v40, %s13313_s21  ;;  %2586 = vrot.lane.b32.xlu0 %v10950_v28, %s13313_s21  ;;  %v13719_v28 = vld [vmem:[#allocation109_spill] sm:$0xff]  ;;  %13722 = vst [vmem:[#allocation83_spill] sm:$0xff] %v10982_v18 }
 0x29d   : > { %v10978_v40 = vmax.f32 %v13719_v28, %v10504_v5  ;;  %v13725_v5 = vld [vmem:[#allocation114_spill] sm:$0xff] }
 0x29e   : > { %v10968_v56 = vpop.permute.xlu1 %1203  ;;  %v10970_v41 = vpop.permute.xlu0 %1201  ;;  %v10998_v28 = vmax.f32 %v13725_v5, %v10538_v36 }
 0x29f   : > { %13720 = vst [vmem:[#allocation93_spill] sm:$0xff] %v10978_v40 }
 0x2a0   : > { %2678 = vrot.lane.b32.xlu1 %v10962_v51, %s13313_s21  ;;  %2676 = vrot.lane.b32.xlu0 %v10966_v3, %s13313_s21  ;;  %v13723_v3 = vld [vmem:[#allocation50_spill] sm:$0xff]  ;;  %13726 = vst [vmem:[#allocation97_spill] sm:$0xff] %v10998_v28 }
 0x2a1   : > { %v10994_v51 = vmax.f32 %v13723_v3, %v10536_v21  ;;  %v13729_v21 = vld [vmem:[#allocation120_spill] sm:$0xff] }
 0x2a2   : > { %v10984_v35 = vpop.permute.xlu1 %823  ;;  %v10986_v30 = vpop.permute.xlu0 %821  ;;  %v11014_v3 = vmax.f32 %v13729_v21, %v10570_v4 }
 0x2a3   : > { %13724 = vst [vmem:[#allocation94_spill] sm:$0xff] %v10994_v51 }
 0x2a4   : > { %2648 = vrot.lane.b32.xlu1 %v10978_v40, %s13313_s21  ;;  %2646 = vrot.lane.b32.xlu0 %v10982_v18, %s13313_s21  ;;  %v13727_v18 = vld [vmem:[#allocation119_spill] sm:$0xff]  ;;  %13730 = vst [vmem:[#allocation101_spill] sm:$0xff] %v11014_v3 }
 0x2a5   : > { %v11010_v40 = vmax.f32 %v13727_v18, %v10568_v24  ;;  %v13733_v24 = vld [vmem:[#allocation57_spill] sm:$0xff] }
 0x2a6   : > { %v11000_v26 = vpop.permute.xlu1 %1296  ;;  %v11002_v14 = vpop.permute.xlu0 %1294  ;;  %v11030_v18 = vmax.f32 %v13733_v24, %v10602_v27 }
 0x2a7   : > { %13728 = vst [vmem:[#allocation98_spill] sm:$0xff] %v11010_v40 }
 0x2a8   : > { %2738 = vrot.lane.b32.xlu1 %v10994_v51, %s13313_s21  ;;  %2736 = vrot.lane.b32.xlu0 %v10998_v28, %s13313_s21  ;;  %v13731_v28 = vld [vmem:[#allocation53_spill] sm:$0xff]  ;;  %13734 = vst [vmem:[#allocation105_spill] sm:$0xff] %v11030_v18 }
 0x2a9   : > { %v11026_v51 = vmax.f32 %v13731_v28, %v10600_v0  ;;  %v13737_v0 = vld [vmem:[#allocation123_spill] sm:$0xff] }
 0x2aa   : > { %v11016_v36 = vpop.permute.xlu1 %792  ;;  %v11018_v5 = vpop.permute.xlu0 %790  ;;  %v11046_v28 = vmax.f32 %v13737_v0, %v10618_v9 }
 0x2ab   : > { %13732 = vst [vmem:[#allocation102_spill] sm:$0xff] %v11026_v51 }
 0x2ac   : > { %2708 = vrot.lane.b32.xlu1 %v11010_v40, %s13313_s21  ;;  %2706 = vrot.lane.b32.xlu0 %v11014_v3, %s13313_s21  ;;  %v13735_v3 = vld [vmem:[#allocation124_spill] sm:$0xff]  ;;  %13738 = vst [vmem:[#allocation109_spill] sm:$0xff] %v11046_v28 }
 0x2ad   : > { %v11042_v40 = vmax.f32 %v13735_v3, %v10616_v58  ;;  %v13741_v58 = vld [vmem:[#allocation125_spill] sm:$0xff] }
 0x2ae   : > { %v11032_v4 = vpop.permute.xlu1 %1265  ;;  %v11034_v21 = vpop.permute.xlu0 %1263  ;;  %v11062_v3 = vmax.f32 %v13741_v58, %v10634_v60 }
 0x2af   : > { %13736 = vst [vmem:[#allocation106_spill] sm:$0xff] %v11042_v40 }
 0x2b0   : > { %3480 = vrot.lane.b32.xlu1 %v11026_v51, %s13313_s21  ;;  %3478 = vrot.lane.b32.xlu0 %v11030_v18, %s13313_s21  ;;  %v13739_v18 = vld [vmem:[#allocation126_spill] sm:$0xff]  ;;  %13742 = vst [vmem:[#allocation50_spill] sm:$0xff] %v11062_v3 }
 0x2b1   : > { %v11058_v51 = vmax.f32 %v13739_v18, %v10632_v61  ;;  %v13746_v61 = vld [vmem:[#allocation62_spill] sm:$0xff] }
 0x2b2   : > { %v11048_v27 = vpop.permute.xlu1 %885  ;;  %v11050_v24 = vpop.permute.xlu0 %883  ;;  %v11078_v18 = vmax.f32 %v13746_v61, %v10666_v12 }
 0x2b3   : > { %13740 = vst [vmem:[#allocation110_spill] sm:$0xff] %v11058_v51 }
 0x2b4   : > { %3945 = vrot.lane.b32.xlu1 %v11042_v40, %s13313_s21  ;;  %3943 = vrot.lane.b32.xlu0 %v11046_v28, %s13313_s21  ;;  %v13744_v28 = vld [vmem:[#allocation131_spill] sm:$0xff]  ;;  %13747 = vst [vmem:[#allocation120_spill] sm:$0xff] %v11078_v18 }
 0x2b5   : > { %v11074_v40 = vmax.f32 %v13744_v28, %v10664_v49  ;;  %v13750_v49 = vld [vmem:[#allocation133_spill] sm:$0xff] }
 0x2b6   : > { %v11064_v9 = vpop.permute.xlu1 %1358  ;;  %v11066_v0 = vpop.permute.xlu0 %1356  ;;  %v11094_v28 = vmax.f32 %v13750_v49, %v10698_v45 }
 0x2b7   : > { %13743 = vst [vmem:[#allocation114_spill] sm:$0xff] %v11066_v0  ;;  %13745 = vst [vmem:[#allocation119_spill] sm:$0xff] %v11074_v40 }
 0x2b8   : > { %3915 = vrot.lane.b32.xlu1 %v11058_v51, %s13313_s21  ;;  %3913 = vrot.lane.b32.xlu0 %v11062_v3, %s13313_s21  ;;  %v13748_v3 = vld [vmem:[#allocation134_spill] sm:$0xff]  ;;  %13751 = vst [vmem:[#allocation57_spill] sm:$0xff] %v11094_v28 }
 0x2b9   : > { %v11090_v51 = vmax.f32 %v13748_v3, %v10696_v38  ;;  %v13754_v38 = vld [vmem:[#allocation70_spill] sm:$0xff] }
 0x2ba   : > { %v11080_v60 = vpop.permute.xlu1 %854  ;;  %v11082_v58 = vpop.permute.xlu0 %852  ;;  %v11110_v3 = vmax.f32 %v13754_v38, %v10730_v11 }
 0x2bb   : > { %13749 = vst [vmem:[#allocation53_spill] sm:$0xff] %v11090_v51 }
 0x2bc   : > { %3540 = vrot.lane.b32.xlu1 %v11074_v40, %s13313_s21  ;;  %3538 = vrot.lane.b32.xlu0 %v11078_v18, %s13313_s21  ;;  %v13752_v18 = vld [vmem:[#allocation139_spill] sm:$0xff]  ;;  %13755 = vst [vmem:[#allocation123_spill] sm:$0xff] %v11110_v3 }
 0x2bd   : > { %v11106_v40 = vmax.f32 %v13752_v18, %v10728_v8  ;;  %v13758_v8 = vld [vmem:[#allocation141_spill] sm:$0xff] }
 0x2be   : > { %v11096_v12 = vpop.permute.xlu1 %1327  ;;  %v11098_v61 = vpop.permute.xlu0 %1325  ;;  %v11126_v18 = vmax.f32 %v13758_v8, %v10762_v62  ;;  %v13762_v8 = vld [vmem:[#allocation6_spill] sm:$0xff] }
 0x2bf   : > { %13753 = vst [vmem:[#allocation124_spill] sm:$0xff] %v11106_v40 }
 0x2c0   : > { %3510 = vrot.lane.b32.xlu1 %v11090_v51, %s13313_s21  ;;  %3508 = vrot.lane.b32.xlu0 %v11094_v28, %s13313_s21  ;;  %v13756_v28 = vld [vmem:[#allocation142_spill] sm:$0xff]  ;;  %13759 = vst [vmem:[#allocation125_spill] sm:$0xff] %v11126_v18 }
 0x2c1   : > { %v11122_v51 = vmax.f32 %v13756_v28, %v10760_v31  ;;  %v13761_v31 = vld [vmem:[#allocation7_spill] sm:$0xff] }
 0x2c2   : > { %v11112_v45 = vpop.permute.xlu1 %1636  ;;  %v11114_v49 = vpop.permute.xlu0 %1634  ;;  %v703_v28 = vmax.f32 %v13761_v31, %v10794_v25 }
 0x2c3   : > { %13757 = vst [vmem:[#allocation126_spill] sm:$0xff] %v11122_v51 }
 0x2c4   : > { %3600 = vrot.lane.b32.xlu1 %v11106_v40, %s13313_s21  ;;  %3598 = vrot.lane.b32.xlu0 %v11110_v3, %s13313_s21  ;;  %v13760_v3 = vld [vmem:[#allocation9_spill] sm:$0xff] }
 0x2c5   : > { %v704_v40 = vmax.f32 %v13760_v3, %v10792_v44 }
 0x2c6   : > { %v11128_v11 = vpop.permute.xlu1 %2101  ;;  %v11130_v38 = vpop.permute.xlu0 %2099 }
 0x2c8   : > { %3570 = vrot.lane.b32.xlu1 %v11122_v51, %s13313_s21  ;;  %3568 = vrot.lane.b32.xlu0 %v11126_v18, %s13313_s21  ;;  %v1177_v51 = vmax.f32 %v13762_v8, %v10808_v33  ;;  %v13763_v18 = vld [vmem:[#allocation76_spill] sm:$0xff] }
 0x2c9   : > { %v1176_v55 = vmax.f32 %v13763_v18, %v10810_v7  ;;  %v13764_v33 = vld [vmem:[#allocation8_spill] sm:$0xff] }
 0x2ca   : > { %v11140_v63 = vpop.permute.xlu1 %2071  ;;  %v11142_v62 = vpop.permute.xlu0 %2069  ;;  %v13765_v7 = vld [vmem:[#allocation80_spill] sm:$0xff] }
 0x2cb   : > { %v1145_v18 = vmax.f32 %v13765_v7, %v10826_v1 }
 0x2cc   : > { %709 = vrot.lane.b32.xlu1 %v704_v40, %s8594_s25  ;;  %707 = vrot.lane.b32.xlu0 %v703_v28, %s8594_s25  ;;  %v1146_v40 = vmax.f32 %v13764_v33, %v10824_v22 }
 0x2ce   : > { %v1615_v0 = vpop.permute.xlu1 %1614  ;;  %v1613_v44 = vpop.permute.xlu0 %1612 }
 0x2cf   : > { %v1619_v3 = vmax.f32 %v10694_v50, %v1615_v0  ;;  %v1618_v25 = vmax.f32 %v10690_v59, %v1613_v44  ;;  %v11168_v59 = vmax.f32 %v10388_v53, %v10856_v23  ;;  %v11188_v53 = vmax.f32 %v10419_v19, %v10890_v32 }
 0x2d0   : > { %1182 = vrot.lane.b32.xlu1 %v1177_v51, %s13317_s26  ;;  %1180 = vrot.lane.b32.xlu0 %v1176_v55, %s13317_s26  ;;  %v11172_v51 = vmax.f32 %v10383_v6, %v10858_v10  ;;  %v11184_v55 = vmax.f32 %v10422_v47, %v10888_v2  ;;  %v766_v10 = vmax.f32 %v10454_v29, %v10920_v54 }
 0x2d1   : > { %1621 = vst.msk [vmem:[#allocation2 + $0x28] sm:$0xff] %vm682_vm2, %v1619_v3  ;;  %1620 = vst.msk [vmem:[#allocation2 + $0x8] sm:$0xff] %vm682_vm2, %v1618_v25  ;;  %v765_v47 = vmax.f32 %v10450_v17, %v10922_v57  ;;  %v1239_v32 = vmax.f32 %v10470_v16, %v10936_v20  ;;  %v1238_v0 = vmax.f32 %v10466_v52, %v10938_v13  ;;  %v13770_v25 = vld [vmem:[#allocation31_spill] sm:$0xff] }
 0x2d2   : > { %v11160_v31 = vpop.permute.xlu1 %1696  ;;  %v11162_v50 = vpop.permute.xlu0 %1694  ;;  %v735_v17 = vmax.f32 %v10486_v43, %v10952_v37  ;;  %v734_v54 = vmax.f32 %v10482_v42, %v10954_v39  ;;  %v1208_v52 = vmax.f32 %v10502_v15, %v10968_v56  ;;  %v1207_v20 = vmax.f32 %v10498_v48, %v10970_v41  ;;  %v13766_v37 = vld [vmem:[#allocation17_spill] sm:$0xff]  ;;  %v13767_v48 = vld [vmem:[#allocation22_spill] sm:$0xff]  ;;  %v13768_v41 = vld [vmem:[#allocation24_spill] sm:$0xff] }
 0x2d3   : > { %v828_v42 = vmax.f32 %v10518_v34, %v10984_v35  ;;  %v827_v39 = vmax.f32 %v13766_v37, %v10986_v30  ;;  %v797_v56 = vmax.f32 %v13767_v48, %v11016_v36  ;;  %v796_v44 = vmax.f32 %v13768_v41, %v11018_v5  ;;  %v13769_v35 = vld [vmem:[#allocation28_spill] sm:$0xff]  ;;  %v13771_v5 = vld [vmem:[#allocation37_spill] sm:$0xff] }
 0x2d4   : > { %1151 = vrot.lane.b32.xlu1 %v1146_v40, %s13319_s27  ;;  %1149 = vrot.lane.b32.xlu0 %v1145_v18, %s13319_s27  ;;  %v890_v30 = vmax.f32 %v13769_v35, %v11048_v27  ;;  %v889_v33 = vmax.f32 %v13770_v25, %v11050_v24  ;;  %v859_v7 = vmax.f32 %v13771_v5, %v11080_v60  ;;  %v13772_v18 = vld [vmem:[#allocation33_spill] sm:$0xff]  ;;  %v13773_v24 = vld [vmem:[#allocation36_spill] sm:$0xff]  ;;  %v13780_v35 = vld [vmem:[#allocation58_spill] sm:$0xff] }
 0x2d5   : > { %v13778_v48 = vld [vmem:[#allocation40_spill] sm:$0xff]  ;;  %v13782_v5 = vld [vmem:[#allocation47_spill] sm:$0xff] }
 0x2d6   : > { %v11174_v22 = vpop.permute.xlu1 %2161  ;;  %v11176_v1 = vpop.permute.xlu0 %2159 }
 0x2d8   : > { %3660 = vrot.lane.b32.xlu1 %v11168_v59, %s13313_s21  ;;  %3658 = vrot.lane.b32.xlu0 %v11172_v51, %s13313_s21 }
 0x2da   : > { %v11190_v6 = vpop.permute.xlu1 %1666  ;;  %v11192_v23 = vpop.permute.xlu0 %1664 }
 0x2dc   : > { %3630 = vrot.lane.b32.xlu1 %v11184_v55, %s13313_s21  ;;  %3628 = vrot.lane.b32.xlu0 %v11188_v53, %s13313_s21  ;;  %s8604_s21 = smov 48  }
 0x2de   : > { %v11202_v2 = vpop.permute.xlu1 %2131  ;;  %v11204_v19 = vpop.permute.xlu0 %2129 }
 0x2e0   : > { %771 = vrot.lane.b32.xlu1 %v766_v10, %s13327_s29  ;;  %769 = vrot.lane.b32.xlu0 %v765_v47, %s13327_s29  ;;  %v858_v10 = vmax.f32 %v13772_v18, %v11082_v58  ;;  %v13775_v58 = vld [vmem:[#allocation117_spill] sm:$0xff] }
 0x2e2   : > { %v11212_v28 = vpop.permute.xlu1 %1756  ;;  %v11214_v29 = vpop.permute.xlu0 %1754 }
 0x2e4   : > { %1244 = vrot.lane.b32.xlu1 %v1239_v32, %s13315_s30  ;;  %1242 = vrot.lane.b32.xlu0 %v1238_v0, %s13315_s30  ;;  %v1641_v32 = vmax.f32 %v13773_v24, %v11112_v45  ;;  %v13774_v0 = vld [vmem:[#allocation39_spill] sm:$0xff]  ;;  %v13784_v24 = vld [vmem:[#allocation48_spill] sm:$0xff] }
 0x2e6   : > { %v11222_v57 = vpop.permute.xlu1 %2221  ;;  %v11224_v16 = vpop.permute.xlu0 %2219 }
 0x2e8   : > { %740 = vrot.lane.b32.xlu1 %v735_v17, %s8599_s11  ;;  %738 = vrot.lane.b32.xlu0 %v734_v54, %s8599_s11  ;;  %v1640_v17 = vmax.f32 %v13774_v0, %v11114_v49  ;;  %v13777_v49 = vld [vmem:[#allocation118_spill] sm:$0xff] }
 0x2ea   : > { %v11232_v13 = vpop.permute.xlu1 %1726  ;;  %v11234_v43 = vpop.permute.xlu0 %1724 }
 0x2ec   : > { %1213 = vrot.lane.b32.xlu1 %v1208_v52, %s13321_s12  ;;  %1211 = vrot.lane.b32.xlu0 %v1207_v20, %s13321_s12  ;;  %v2106_v52 = vmax.f32 %v13775_v58, %v11128_v11  ;;  %v13776_v20 = vld [vmem:[#allocation38_spill] sm:$0xff]  ;;  %v13786_v58 = vld [vmem:[#allocation51_spill] sm:$0xff] }
 0x2ee   : > { %v11242_v8 = vpop.permute.xlu1 %2191  ;;  %v11244_v15 = vpop.permute.xlu0 %2189 }
 0x2f0   : > { %833 = vrot.lane.b32.xlu1 %v828_v42, %s13323_s18  ;;  %831 = vrot.lane.b32.xlu0 %v827_v39, %s13323_s18  ;;  %v2105_v42 = vmax.f32 %v13776_v20, %v11130_v38  ;;  %v2076_v39 = vmax.f32 %v13777_v49, %v11140_v63  ;;  %v13779_v38 = vld [vmem:[#allocation42_spill] sm:$0xff]  ;;  %v13788_v49 = vld [vmem:[#allocation52_spill] sm:$0xff] }
 0x2f2   : > { %v11252_v3 = vpop.permute.xlu1 %1816  ;;  %v11254_v34 = vpop.permute.xlu0 %1814 }
 0x2f4   : > { %802 = vrot.lane.b32.xlu1 %v797_v56, %s13325_s20  ;;  %800 = vrot.lane.b32.xlu0 %v796_v44, %s13325_s20  ;;  %v2075_v56 = vmax.f32 %v13778_v48, %v11142_v62  ;;  %v1701_v44 = vmax.f32 %v13779_v38, %v11160_v31  ;;  %v13781_v62 = vld [vmem:[#allocation46_spill] sm:$0xff] }
 0x2f6   : > { %v11262_v40 = vpop.permute.xlu1 %2281  ;;  %v11264_v36 = vpop.permute.xlu0 %2279 }
 0x2f8   : > { %895 = vrot.lane.b32.xlu1 %v890_v30, %s8603_s28  ;;  %893 = vrot.lane.b32.xlu0 %v889_v33, %s8603_s28  ;;  %v1700_v30 = vmax.f32 %v13780_v35, %v11162_v50  ;;  %v2166_v33 = vmax.f32 %v13781_v62, %v11174_v22  ;;  %v13783_v50 = vld [vmem:[#allocation127_spill] sm:$0xff]  ;;  %v2196_v62 = vmax.f32 %v10818_v46, %v11242_v8  ;;  %v8044_v46 = vld [vmem:[%s13099_s3 + $0x10] ss:$8 sps:$4 sm:$0xff]  }
 0x2f9   : > { %v13792_v8 = vld [vmem:[#allocation27_spill] sm:$0xff] }
 0x2fa   : > { %v11272_v47 = vpop.permute.xlu1 %1786  ;;  %v11274_v27 = vpop.permute.xlu0 %1784 }
 0x2fc   : > { %864 = vrot.lane.b32.xlu1 %v859_v7, %s8604_s21  ;;  %862 = vrot.lane.b32.xlu0 %v858_v10, %s8604_s21  ;;  %v2165_v7 = vmax.f32 %v13782_v5, %v11176_v1  ;;  %v1671_v10 = vmax.f32 %v13783_v50, %v11190_v6  ;;  %v13785_v1 = vld [vmem:[#allocation65_spill] sm:$0xff]  ;;  %v13793_v50 = vld [vmem:[#allocation67_spill] sm:$0xff] }
 0x2fe   : > { %v11282_v54 = vpop.permute.xlu1 %2251  ;;  %v11284_v60 = vpop.permute.xlu0 %2249 }
 0x300   : > { %1646 = vrot.lane.b32.xlu1 %v1641_v32, %s8594_s25  ;;  %1644 = vrot.lane.b32.xlu0 %v1640_v17, %s8594_s25  ;;  %v1670_v32 = vmax.f32 %v13784_v24, %v11192_v23  ;;  %v2136_v17 = vmax.f32 %v13785_v1, %v11202_v2  ;;  %v13787_v23 = vld [vmem:[#allocation130_spill] sm:$0xff] }
 0x301   : > { %v8049_v1 = vld [vmem:[%s13099_s3 + $0x24] ss:$8 sps:$4 sm:$0xff]  }
 0x302   : > { %v11292_v37 = vpop.permute.xlu1 %2558  ;;  %v11294_v45 = vpop.permute.xlu0 %2556 }
 0x304   : > { %2111 = vrot.lane.b32.xlu1 %v2106_v52, %s13317_s26  ;;  %2109 = vrot.lane.b32.xlu0 %v2105_v42, %s13317_s26  ;;  %v2135_v52 = vmax.f32 %v13786_v58, %v11204_v19  ;;  %v1761_v42 = vmax.f32 %v13787_v23, %v11212_v28  ;;  %v8041_v19 = vld [vmem:[%s13099_s3] ss:$8 sps:$4 sm:$0xff]   ;;  %s8605_s26 = smov 96   ;;  %v13795_v58 = vld [vmem:[#allocation72_spill] sm:$0xff] }
 0x305   : > { %v13789_v28 = vld [vmem:[#allocation63_spill] sm:$0xff] }
 0x306   : > { %v11302_v41 = vpop.permute.xlu1 %2993  ;;  %v11304_v11 = vpop.permute.xlu0 %2991  ;;  %v1731_v38 = vmax.f32 %v13789_v28, %v11232_v13 }
 0x308   : > { %2081 = vrot.lane.b32.xlu1 %v2076_v39, %s13319_s27  ;;  %2079 = vrot.lane.b32.xlu0 %v2075_v56, %s13319_s27  ;;  %v1760_v39 = vmax.f32 %v13788_v49, %v11214_v29  ;;  %v8043_v56 = vld [vmem:[%s13099_s3 + $0x4] ss:$8 sps:$4 sm:$0xff]   ;;  %v8052_v49 = vld [vmem:[%s13099_s3 + $0x34] ss:$8 sps:$4 sm:$0xff]  }
 0x309   : > { %v13790_v29 = vld [vmem:[#allocation135_spill] sm:$0xff]  ;;  %4548 = vmatprep.subr.bf16.mxu0 %v8043_v56 }
 0x30a   : > { %v11312_v25 = vpop.permute.xlu1 %2618  ;;  %v11314_v63 = vpop.permute.xlu0 %2616  ;;  %4549 = vmatpush1.bf16.msra.mxu0 %v8041_v19  ;;  %v13797_v56 = vld [vmem:[#allocation71_spill] sm:$0xff] }
 0x30b   : > { %v1791_v28 = vmax.f32 %v13797_v56, %v11272_v47  ;;  %v13798_v47 = vld [vmem:[#allocation59_spill] sm:$0xff] }
 0x30c   : > { %1706 = vrot.lane.b32.xlu1 %v1701_v44, %s13327_s29  ;;  %1704 = vrot.lane.b32.xlu0 %v1700_v30, %s13327_s29  ;;  %v1730_v44 = vmax.f32 %v13790_v29, %v11234_v43  ;;  %v8046_v43 = vld [vmem:[%s13099_s3 + $0x14] ss:$8 sps:$4 sm:$0xff]   ;;  %s13329_s29 = smov 104  }
 0x30d   : > { %4550 = vmatprep.subr.bf16.mxu0 %v8046_v43 }
 0x30e   : > { %v11322_v18 = vpop.permute.xlu1 %2588  ;;  %v11324_v31 = vpop.permute.xlu0 %2586  ;;  %4551 = vmatpush1.bf16.msra.mxu0 %v8044_v46 }
 0x30f   : > { %4552 = vmatprep.subr.bf16.mxu0 %v8049_v1  ;;  %v13803_v1 = vld [vmem:[#allocation92_spill] sm:$0xff] }
 0x310   : > { %2171 = vrot.lane.b32.xlu1 %v2166_v33, %s13315_s30  ;;  %2169 = vrot.lane.b32.xlu0 %v2165_v7, %s13315_s30  ;;  %v13791_v33 = vld [vmem:[#allocation64_spill] sm:$0xff]  ;;  %s7476_s30 = sshll.u32 %s8688_s17, 10 }
 0x311   : > { %v2195_v5 = vmax.f32 %v13791_v33, %v11244_v15  ;;  %v1270_v15 = vmax.f32 %v13792_v8, %v11032_v4  ;;  %v8047_v4 = vld [vmem:[%s13099_s3 + $0x20] ss:$8 sps:$4 sm:$0xff]   ;;  %v13799_v33 = vld [vmem:[#allocation60_spill] sm:$0xff] }
 0x312   : > { %v11332_v0 = vpop.permute.xlu1 %2678  ;;  %v11334_v22 = vpop.permute.xlu0 %2676  ;;  %4553 = vmatpush1.bf16.msra.mxu0 %v8047_v4  ;;  %v8056_v8 = vld [vmem:[%s13099_s3 + $0x50] ss:$8 sps:$4 sm:$0xff]  }
 0x313   : > { %4554 = vmatprep.subr.bf16.mxu0 %v8052_v49  ;;  %v13805_v49 = vld [vmem:[#allocation43_spill] sm:$0xff] }
 0x314   : > { %1676 = vrot.lane.b32.xlu1 %v1671_v10, %s8599_s11  ;;  %1674 = vrot.lane.b32.xlu0 %v1670_v32, %s8599_s11  ;;  %v1820_v10 = vmax.f32 %v13793_v50, %v11254_v34  ;;  %v13794_v34 = vld [vmem:[#allocation137_spill] sm:$0xff] }
 0x316   : > { %v11342_v20 = vpop.permute.xlu1 %2648  ;;  %v11344_v6 = vpop.permute.xlu0 %2646 }
 0x318   : > { %2141 = vrot.lane.b32.xlu1 %v2136_v17, %s13321_s12  ;;  %2139 = vrot.lane.b32.xlu0 %v2135_v52, %s13321_s12  ;;  %v1821_v17 = vmax.f32 %v13794_v34, %v11252_v3  ;;  %v1790_v52 = vmax.f32 %v13795_v58, %v11274_v27  ;;  %v8055_v3 = vld [vmem:[%s13099_s3 + $0x44] ss:$8 sps:$4 sm:$0xff]   ;;  %v13796_v27 = vld [vmem:[#allocation29_spill] sm:$0xff]  ;;  %v8059_v58 = vld [vmem:[%s13099_s3 + $0x60] ss:$8 sps:$4 sm:$0xff]   ;;  %s13804_s12 = smov 112  }
 0x319   : > { %v1269_v19 = vmax.f32 %v13796_v27, %v11034_v21  ;;  %v8058_v21 = vld [vmem:[%s13099_s3 + $0x54] ss:$8 sps:$4 sm:$0xff]  }
 0x31a   : > { %v11352_v48 = vpop.permute.xlu1 %2738  ;;  %v11354_v2 = vpop.permute.xlu0 %2736  ;;  %v13807_v27 = vld [vmem:[#allocation44_spill] sm:$0xff] }
 0x31c   : > { %1766 = vrot.lane.b32.xlu1 %v1761_v42, %s13323_s18  ;;  %1764 = vrot.lane.b32.xlu0 %v1760_v39, %s13323_s18  ;;  %v8050_v39 = vld [vmem:[%s13099_s3 + $0x30] ss:$8 sps:$4 sm:$0xff]   ;;  %s13928_s18 = smov 80  }
 0x31d   : > { %4555 = vmatpush1.bf16.msra.mxu0 %v8050_v39  ;;  %v13806_v39 = vld [vmem:[#allocation69_spill] sm:$0xff] }
 0x31e   : > { %v11368_v35 = vpop.permute.xlu1 %2708  ;;  %v11370_v30 = vpop.permute.xlu0 %2706  ;;  %4556 = vmatprep.subr.bf16.mxu0 %v8055_v3  ;;  %v11481_v3 = vmax.f32 %v13806_v39, %v13805_v49  ;;  %v8068_v39 = vld [vmem:[%s13099_s3 + $0x90] ss:$8 sps:$4 sm:$0xff]  }
 0x320   : > { %1736 = vrot.lane.b32.xlu1 %v1731_v38, %s13325_s20  ;;  %1734 = vrot.lane.b32.xlu0 %v1730_v44, %s13325_s20  ;;  %v8053_v44 = vld [vmem:[%s13099_s3 + $0x40] ss:$8 sps:$4 sm:$0xff]   ;;  %s13913_s20 = smov 40  }
 0x321   : > { %4557 = vmatpush1.bf16.msra.mxu0 %v8053_v44 }
 0x322   : > { %v11378_v13 = vpop.permute.xlu1 %3480  ;;  %v11380_v7 = vpop.permute.xlu0 %3478  ;;  %4558 = vmatprep.subr.bf16.mxu0 %v8058_v21  ;;  %v8062_v21 = vld [vmem:[%s13099_s3 + $0x70] ss:$8 sps:$4 sm:$0xff]  }
 0x324   : > { %2201 = vrot.lane.b32.xlu1 %v2196_v62, %s8605_s26  ;;  %2199 = vrot.lane.b32.xlu0 %v2195_v5, %s8605_s26  ;;  %v2226_v62 = vmax.f32 %v13798_v47, %v11222_v57  ;;  %v2225_v5 = vmax.f32 %v13799_v33, %v11224_v16  ;;  %v8061_v57 = vld [vmem:[%s13099_s3 + $0x64] ss:$8 sps:$4 sm:$0xff]   ;;  %v13800_v16 = vld [vmem:[#allocation13_spill] sm:$0xff] }
 0x325   : > { %4559 = vmatpush1.bf16.msra.mxu0 %v8056_v8  ;;  %v8067_v47 = vld [vmem:[%s13099_s3 + $0x84] ss:$8 sps:$4 sm:$0xff]  }
 0x326   : > { %v11394_v24 = vpop.permute.xlu1 %3945  ;;  %v11396_v32 = vpop.permute.xlu0 %3943  ;;  %4560 = vmatprep.subr.bf16.mxu0 %v8061_v57 }
 0x328   : > { %1275 = vrot.lane.b32.xlu1 %v1270_v15, %s8605_s26  ;;  %1824 = vrot.lane.b32.xlu0 %v1820_v10, %s8603_s28  ;;  %v13801_v15 = vld [vmem:[#allocation91_spill] sm:$0xff]  ;;  %v13802_v10 = vld [vmem:[#allocation84_spill] sm:$0xff] }
 0x329   : > { %v11459_v50 = vmax.f32 %v13801_v15, %v13800_v16  ;;  %v11463_v4 = vmax.f32 %v13803_v1, %v13802_v10  ;;  %4561 = vmatpush1.bf16.msra.mxu0 %v8059_v58  ;;  %v8065_v15 = vld [vmem:[%s13099_s3 + $0x80] ss:$8 sps:$4 sm:$0xff]  }
 0x32a   : > { %v11410_v23 = vpop.permute.xlu1 %3915  ;;  %v11412_v42 = vpop.permute.xlu0 %3913  ;;  %v13812_v1 = vld [vmem:[#allocation78_spill] sm:$0xff] }
 0x32b   : > { %v2255_v58 = vmax.f32 %v13812_v1, %v11284_v60  ;;  %v13814_v60 = vld [vmem:[#allocation103_spill] sm:$0xff] }
 0x32c   : > { %1826 = vrot.lane.b32.xlu1 %v1821_v17, %s8603_s28  ;;  %1794 = vrot.lane.b32.xlu0 %v1790_v52, %s8604_s21  ;;  %v8064_v52 = vld [vmem:[%s13099_s3 + $0x74] ss:$8 sps:$4 sm:$0xff]  }
 0x32d   : > { %4562 = vmatprep.subr.bf16.mxu0 %v8064_v52 }
 0x32e   : > { %v11429_v38 = vpop.permute.xlu1 %3540  ;;  %v11431_v29 = vpop.permute.xlu0 %3538  ;;  %4563 = vmatpush1.bf16.msra.mxu0 %v8062_v21  ;;  %v13816_v21 = vld [vmem:[#allocation16_spill] sm:$0xff] }
 0x32f   : > { %4564 = vmatprep.subr.bf16.mxu0 %v8067_v47  ;;  %v13817_v47 = vld [vmem:[#allocation104_spill] sm:$0xff] }
 0x330   : > { %1796 = vrot.lane.b32.xlu1 %v1791_v28, %s8604_s21  ;;  %1273 = vrot.lane.b32.xlu0 %v1269_v19, %s8605_s26  ;;  %v13808_v19 = vld [vmem:[#allocation136_spill] sm:$0xff] }
 0x331   : > { %v11485_v56 = vmax.f32 %v13808_v19, %v13807_v27  ;;  %v13813_v27 = vld [vmem:[#allocation12_spill] sm:$0xff] }
 0x332   : > { %v11445_v43 = vpop.permute.xlu1 %3510  ;;  %v11447_v46 = vpop.permute.xlu0 %3508  ;;  %4565 = vmatpush1.bf16.msra.mxu0 %v8065_v15  ;;  %v11533_v19 = vmax.f32 %v13814_v60, %v13813_v27  ;;  %v13820_v15 = vld [vmem:[#allocation132_spill] sm:$0xff]  ;;  %v8079_v27 = vld [vmem:[%s13099_s3 + $0xc4] ss:$8 sps:$4 sm:$0xff]  }
 0x333   : > { %v13825_v60 = vld [vmem:[#allocation35_spill] sm:$0xff] }
 0x334   : > { %2231 = vrot.lane.b32.xlu1 %v2226_v62, %s13329_s29  ;;  %2229 = vrot.lane.b32.xlu0 %v2225_v5, %s13329_s29  ;;  %v13809_v62 = vld [vmem:[#allocation20_spill] sm:$0xff]  ;;  %v13810_v5 = vld [vmem:[#allocation23_spill] sm:$0xff]  ;;  %13815 = vst [vmem:[#allocation131_spill] sm:$0xff] %v11533_v19 }
 0x335   : > { %v1301_v33 = vmax.f32 %v13809_v62, %v11000_v26  ;;  %v1300_v8 = vmax.f32 %v13810_v5, %v11002_v14  ;;  %v8070_v26 = vld [vmem:[%s13099_s3 + $0x94] ss:$8 sps:$4 sm:$0xff]   ;;  %v11537_v62 = vmax.f32 %v13817_v47, %v13816_v21  ;;  %v1332_v21 = vmax.f32 %v13825_v60, %v11096_v12  ;;  %v13826_v47 = vld [vmem:[#allocation111_spill] sm:$0xff] }
 0x336   : > { %v11465_v34 = vpop.permute.xlu1 %3600  ;;  %v11467_v17 = vpop.permute.xlu0 %3598  ;;  %v13811_v14 = vld [vmem:[#allocation77_spill] sm:$0xff]  ;;  %4566 = vmatprep.subr.bf16.mxu0 %v8070_v26 }
 0x337   : > { %v2256_v10 = vmax.f32 %v13811_v14, %v11282_v54  ;;  %v8073_v54 = vld [vmem:[%s13099_s3 + $0xa4] ss:$8 sps:$4 sm:$0xff]   ;;  %13818 = vst [vmem:[#allocation62_spill] sm:$0xff] %v11537_v62  ;;  %4567 = vmatpush1.bf16.msra.mxu0 %v8068_v39  ;;  %v8082_v12 = vld [vmem:[%s13099_s3 + $0xd4] ss:$8 sps:$4 sm:$0xff]  }
 0x338   : > { %3023 = vrot.lane.b32.xlu1 %v11459_v50, %s13804_s12  ;;  %3021 = vrot.lane.b32.xlu0 %v11463_v4, %s13804_s12  ;;  %v13822_v14 = vld [vmem:[#allocation54_spill] sm:$0xff] }
 0x339   : > { %4568 = vmatprep.subr.bf16.mxu0 %v8073_v54  ;;  %v8074_v54 = vld [vmem:[%s13099_s3 + $0xb0] ss:$8 sps:$4 sm:$0xff]  }
 0x33a   : > { %v11487_v28 = vpop.permute.xlu1 %3570  ;;  %v11489_v44 = vpop.permute.xlu0 %3568 }
 0x33c   : > { %3975 = vrot.lane.b32.xlu1 %v11481_v3, %s13804_s12  ;;  %3973 = vrot.lane.b32.xlu0 %v11485_v56, %s13804_s12 }
 0x33e   : > { %v710_v57 = vpop.permute.xlu1 %709  ;;  %v708_v16 = vpop.permute.xlu0 %707 }
 0x33f   : > { %715 = vst.msk [vmem:[#allocation2 + $0x20] sm:$0xff] %vm713_vm3, %v710_v57  ;;  %714 = vst.msk [vmem:[#allocation2] sm:$0xff] %vm713_vm3, %v708_v16  ;;  %v8076_v57 = vld [vmem:[%s13099_s3 + $0xb4] ss:$8 sps:$4 sm:$0xff]  }
 0x340   : > { %1306 = vrot.lane.b32.xlu1 %v1301_v33, %s13329_s29  ;;  %1304 = vrot.lane.b32.xlu0 %v1300_v8, %s13329_s29  ;;  %v8071_v8 = vld [vmem:[%s13099_s3 + $0xa0] ss:$8 sps:$4 sm:$0xff]   ;;  %v13819_v16 = vld [vmem:[#allocation41_spill] sm:$0xff]  ;;  %s13829_s29 = smov 120  }
 0x341   : > { %v11555_v26 = vmax.f32 %v13820_v15, %v13819_v16  ;;  %4569 = vmatpush1.bf16.msra.mxu0 %v8071_v8  ;;  %v1331_v8 = vmax.f32 %v13826_v47, %v11098_v61  ;;  %v13827_v61 = vld [vmem:[#allocation138_spill] sm:$0xff] }
 0x342   : > { %v11519_v52 = vpop.permute.xlu1 %1182  ;;  %v11521_v49 = vpop.permute.xlu0 %1180  ;;  %4570 = vmatprep.subr.bf16.mxu0 %v8076_v57  ;;  %v2286_v57 = vmax.f32 %v13827_v61, %v11262_v40  ;;  %v13830_v40 = vld [vmem:[#allocation149_spill] sm:$0xff] }
 0x343   : > { %13821 = vst [vmem:[#allocation134_spill] sm:$0xff] %v11555_v26 }
 0x344   : > { %2261 = vrot.lane.b32.xlu1 %v2256_v10, %s13804_s12  ;;  %2259 = vrot.lane.b32.xlu0 %v2255_v58, %s13804_s12  ;;  %v13823_v10 = vld [vmem:[#allocation66_spill] sm:$0xff] }
 0x345   : > { %v11559_v1 = vmax.f32 %v13823_v10, %v13822_v14  ;;  %4571 = vmatpush1.bf16.msra.mxu0 %v8074_v54  ;;  %v8077_v14 = vld [vmem:[%s13099_s3 + $0xc0] ss:$8 sps:$4 sm:$0xff]   ;;  %v13828_v10 = vld [vmem:[#allocation68_spill] sm:$0xff] }
 0x346   : > { %v11539_v33 = vpop.permute.xlu1 %1151  ;;  %v11541_v5 = vpop.permute.xlu0 %1149  ;;  %4572 = vmatprep.subr.bf16.mxu0 %v8079_v27  ;;  %v2285_v60 = vmax.f32 %v13828_v10, %v11264_v36  ;;  %v8085_v27 = vld [vmem:[%s13099_s3 + $0xe4] ss:$8 sps:$4 sm:$0xff]   ;;  %v13834_v10 = vld [vmem:[#allocation100_spill] sm:$0xff] }
 0x347   : > { %13824 = vst [vmem:[#allocation133_spill] sm:$0xff] %v11559_v1  ;;  %v13833_v36 = vld [vmem:[#allocation150_spill] sm:$0xff] }
 0x348   : > { %3053 = vrot.lane.b32.xlu1 %v11533_v19, %s13804_s12  ;;  %3051 = vrot.lane.b32.xlu0 %v11537_v62, %s13804_s12 }
 0x349   : > { %4573 = vmatpush1.bf16.msra.mxu0 %v8077_v14  ;;  %v11609_v14 = vmax.f32 %v13834_v10, %v13833_v36  ;;  %v13840_v36 = vld [vmem:[#allocation143_spill] sm:$0xff] }
 0x34a   : > { %v11561_v58 = vpop.permute.xlu1 %3660  ;;  %v11563_v39 = vpop.permute.xlu0 %3658  ;;  %4574 = vmatprep.subr.bf16.mxu0 %v8082_v12  ;;  %v8083_v12 = vld [vmem:[%s13099_s3 + $0xe0] ss:$8 sps:$4 sm:$0xff]  }
 0x34b   : > { %13835 = vst [vmem:[#allocation70_spill] sm:$0xff] %v11609_v14 }
 0x34c   : > { %4005 = vrot.lane.b32.xlu1 %v11555_v26, %s13804_s12  ;;  %4003 = vrot.lane.b32.xlu0 %v11559_v1, %s13804_s12 }
 0x34e   : > { %v11579_v16 = vpop.permute.xlu1 %3630  ;;  %v11581_v15 = vpop.permute.xlu0 %3628 }
 0x350   : > { %1337 = vrot.lane.b32.xlu1 %v1332_v21, %s13804_s12  ;;  %1335 = vrot.lane.b32.xlu0 %v1331_v8, %s13804_s12  ;;  %v8080_v21 = vld [vmem:[%s13099_s3 + $0xd0] ss:$8 sps:$4 sm:$0xff]   ;;  %v13831_v8 = vld [vmem:[#allocation99_spill] sm:$0xff] }
 0x351   : > { %v11605_v61 = vmax.f32 %v13831_v8, %v13830_v40  ;;  %4575 = vmatpush1.bf16.msra.mxu0 %v8080_v21  ;;  %v13837_v40 = vld [vmem:[#allocation144_spill] sm:$0xff] }
 0x352   : > { %v772_v54 = vpop.permute.xlu1 %771  ;;  %v770_v47 = vpop.permute.xlu0 %769  ;;  %4576 = vmatprep.subr.bf16.mxu0 %v8085_v27  ;;  %v13839_v8 = vld [vmem:[#allocation56_spill] sm:$0xff] }
 0x353   : > { %13832 = vst [vmem:[#allocation139_spill] sm:$0xff] %v11605_v61  ;;  %v11631_v10 = vmax.f32 %v13840_v36, %v13839_v8  ;;  %v8086_v27 = vld [vmem:[%s13099_s3 + $0xf0] ss:$8 sps:$4 sm:$0xff]  }
 0x354   : > { %2291 = vrot.lane.b32.xlu1 %v2286_v57, %s13829_s29  ;;  %2289 = vrot.lane.b32.xlu0 %v2285_v60, %s13829_s29  ;;  %v8088_v57 = vld [vmem:[%s13099_s3 + $0xf4] ss:$8 sps:$4 sm:$0xff]   ;;  %v13836_v60 = vld [vmem:[#allocation55_spill] sm:$0xff] }
 0x355   : > { %v11627_v21 = vmax.f32 %v13837_v40, %v13836_v60  ;;  %13841 = vst [vmem:[#allocation141_spill] sm:$0xff] %v11631_v10  ;;  %4577 = vmatpush1.bf16.msra.mxu0 %v8083_v12  ;;  %v13844_v12 = vld [vmem:[#allocation30_spill] sm:$0xff] }
 0x356   : > { %v11611_v1 = vpop.permute.xlu1 %1244  ;;  %v11613_v26 = vpop.permute.xlu0 %1242  ;;  %4578 = vmatprep.subr.bf16.mxu0 %v8088_v57 }
 0x357   : > { %13838 = vst [vmem:[#allocation142_spill] sm:$0xff] %v11627_v21 }
 0x358   : > { %3083 = vrot.lane.b32.xlu1 %v11605_v61, %s13804_s12  ;;  %3081 = vrot.lane.b32.xlu0 %v11609_v14, %s13804_s12 }
 0x359   : > { %4579 = vmatpush1.bf16.msra.mxu0 %v8086_v27  ;;  %v13849_v27 = vld [vmem:[#allocation128_spill] sm:$0xff] }
 0x35a   : > { %v741_v62 = vpop.permute.xlu1 %740  ;;  %v739_v61 = vpop.permute.xlu0 %738 }
 0x35b   : > { %746 = vst.msk [vmem:[#allocation2 + $0x20] sm:$0xff] %vm744_vm4, %v741_v62  ;;  %745 = vst.msk [vmem:[#allocation2] sm:$0xff] %vm744_vm4, %v739_v61  ;;  %v13842_v62 = vld [vmem:[#allocation34_spill] sm:$0xff] }
 0x35c   : > { %4035 = vrot.lane.b32.xlu1 %v11627_v21, %s13804_s12  ;;  %4033 = vrot.lane.b32.xlu0 %v11631_v10, %s13804_s12  ;;  %777 = vst.msk [vmem:[#allocation2 + $0x20] sm:$0xff] %vm775_vm5, %v772_v54  ;;  %776 = vst.msk [vmem:[#allocation2] sm:$0xff] %vm775_vm5, %v770_v47  ;;  %v1363_v60 = vmax.f32 %v13842_v62, %v11064_v9  ;;  %v13843_v61 = vld [vmem:[#allocation114_spill] sm:$0xff]  ;;  %v13845_v21 = vld [vmem:[#allocation21_spill] sm:$0xff] }
 0x35d   : > { %v1362_v40 = vmax.f32 %v13844_v12, %v13843_v61  ;;  %v13846_v10 = vld [vmem:[#allocation112_spill] sm:$0xff]  ;;  %v13847_v54 = vld [vmem:[#allocation19_spill] sm:$0xff]  ;;  %v13848_v47 = vld [vmem:[#allocation113_spill] sm:$0xff] }
 0x35e   : > { %v1214_v8 = vpop.permute.xlu1 %1213  ;;  %v1212_v36 = vpop.permute.xlu0 %1211  ;;  %v11652_v14 = vmax.f32 %v13846_v10, %v13845_v21  ;;  %v11656_v57 = vmax.f32 %v13848_v47, %v13847_v54  ;;  %v13850_v62 = vld [vmem:[#allocation140_spill] sm:$0xff]  ;;  %v13852_v21 = vld [vmem:[#allocation49_spill] sm:$0xff]  ;;  %v13855_v54 = vld [vmem:[#allocation14_spill] sm:$0xff] }
 0x35f   : > { %v13853_v10 = vld [vmem:[#allocation73_spill] sm:$0xff]  ;;  %v13856_v47 = vld [vmem:[#allocation107_spill] sm:$0xff] }
 0x360   : > { %1368 = vrot.lane.b32.xlu1 %v1363_v60, %s13829_s29  ;;  %1366 = vrot.lane.b32.xlu0 %v1362_v40, %s13829_s29  ;;  %v11664_v60 = vmax.f32 %v13850_v62, %v13849_v27  ;;  %v11668_v61 = vmax.f32 %v13853_v10, %v13852_v21  ;;  %v11680_v27 = vmax.f32 %v13856_v47, %v13855_v54  ;;  %v13857_v62 = vld [vmem:[#allocation18_spill] sm:$0xff]  ;;  %v13858_v21 = vld [vmem:[#allocation108_spill] sm:$0xff]  ;;  %v13863_v47 = vld [vmem:[#allocation151_spill] sm:$0xff] }
 0x361   : > { %v11684_v10 = vmax.f32 %v13858_v21, %v13857_v62  ;;  %v13862_v54 = vld [vmem:[#allocation146_spill] sm:$0xff] }
 0x362   : > { %v834_v19 = vpop.permute.xlu1 %833  ;;  %v832_v9 = vpop.permute.xlu0 %831  ;;  %13851 = vst [vmem:[#allocation9_spill] sm:$0xff] %v11664_v60  ;;  %13854 = vst [vmem:[#allocation7_spill] sm:$0xff] %v11668_v61 }
 0x364   : > { %3113 = vrot.lane.b32.xlu1 %v11652_v14, %s13804_s12  ;;  %3111 = vrot.lane.b32.xlu0 %v11656_v57, %s13804_s12 }
 0x366   : > { %v803_v12 = vpop.permute.xlu1 %802  ;;  %v801_v40 = vpop.permute.xlu0 %800 }
 0x367   : > { %808 = vst.msk [vmem:[#allocation2 + $0x20] sm:$0xff] %vm806_vm6, %v803_v12  ;;  %807 = vst.msk [vmem:[#allocation2] sm:$0xff] %vm806_vm6, %v801_v40 }
 0x368   : > { %4065 = vrot.lane.b32.xlu1 %v11664_v60, %s13804_s12  ;;  %4063 = vrot.lane.b32.xlu0 %v11668_v61, %s13804_s12  ;;  %839 = vst.msk [vmem:[#allocation2 + $0x20] sm:$0xff] %vm837_vm7, %v834_v19  ;;  %838 = vst.msk [vmem:[#allocation2] sm:$0xff] %vm837_vm7, %v832_v9  ;;  %v13859_v19 = vld [vmem:[#allocation82_spill] sm:$0xff]  ;;  %v13860_v9 = vld [vmem:[#allocation152_spill] sm:$0xff]  ;;  %v11696_v60 = vmax.f32 %v13863_v47, %v13862_v54 }
 0x369   : > { %v11692_v61 = vmax.f32 %v13860_v9, %v13859_v19  ;;  %v13865_v19 = vld [vmem:[#allocation32_spill] sm:$0xff]  ;;  %v13866_v9 = vld [vmem:[#allocation121_spill] sm:$0xff] }
 0x36a   : > { %v896_v12 = vpop.permute.xlu1 %895  ;;  %v894_v40 = vpop.permute.xlu0 %893  ;;  %13864 = vst [vmem:[#allocation76_spill] sm:$0xff] %v11696_v60  ;;  %v11712_v54 = vmax.f32 %v13866_v9, %v13865_v19 }
 0x36b   : > { %13861 = vst [vmem:[#allocation6_spill] sm:$0xff] %v11692_v61 }
 0x36c   : > { %3143 = vrot.lane.b32.xlu1 %v11680_v27, %s13804_s12  ;;  %3141 = vrot.lane.b32.xlu0 %v11684_v10, %s13804_s12  ;;  %13867 = vst [vmem:[#allocation8_spill] sm:$0xff] %v11712_v54 }
 0x36e   : > { %v865_v62 = vpop.permute.xlu1 %864  ;;  %v863_v21 = vpop.permute.xlu0 %862 }
 0x36f   : > { %870 = vst.msk [vmem:[#allocation2 + $0x20] sm:$0xff] %vm868_vm8, %v865_v62  ;;  %869 = vst.msk [vmem:[#allocation2] sm:$0xff] %vm868_vm8, %v863_v21 }
 0x370   : > { %901 = vst.msk [vmem:[#allocation2 + $0x20] sm:$0xff] %vm899_vm9, %v896_v12  ;;  %900 = vst.msk [vmem:[#allocation2] sm:$0xff] %vm899_vm9, %v894_v40  ;;  %4095 = vrot.lane.b32.xlu1 %v11692_v61, %s13804_s12  ;;  %4093 = vrot.lane.b32.xlu0 %v11696_v60, %s13804_s12  ;;  %v13868_v12 = vld [vmem:[#allocation153_spill] sm:$0xff]  ;;  %v13869_v40 = vld [vmem:[#allocation122_spill] sm:$0xff] }
 0x371   : > { %1157 = vst.msk [vmem:[#allocation2 + $0x20] sm:$0xff] %vm1155_vm10, %v11539_v33  ;;  %1156 = vst.msk [vmem:[#allocation2] sm:$0xff] %vm1155_vm10, %v11541_v5  ;;  %v11716_v47 = vmax.f32 %v13869_v40, %v13868_v12  ;;  %v13874_v5 = vld [vmem:[#allocation75_spill] sm:$0xff]  ;;  %v13880_v40 = vld [vmem:[#allocation25_spill] sm:$0xff] }
 0x372   : > { %v1647_v62 = vpop.permute.xlu1 %1646  ;;  %v1645_v21 = vpop.permute.xlu0 %1644  ;;  %1188 = vst.msk [vmem:[#allocation2 + $0x20] sm:$0xff] %vm1186_vm11, %v11519_v52  ;;  %1187 = vst.msk [vmem:[#allocation2] sm:$0xff] %vm1186_vm11, %v11521_v49  ;;  %v13871_v52 = vld [vmem:[#allocation74_spill] sm:$0xff]  ;;  %v13872_v49 = vld [vmem:[#allocation88_spill] sm:$0xff] }
 0x373   : > { %13870 = vst [vmem:[#allocation80_spill] sm:$0xff] %v11716_v47  ;;  %1651 = vst.msk [vmem:[#allocation2 + $0x28] sm:$0xff] %vm713_vm3, %v1647_v62  ;;  %v11736_v33 = vmax.f32 %v13872_v49, %v13871_v52  ;;  %v13881_v62 = vld [vmem:[#allocation116_spill] sm:$0xff] }
 0x374   : > { %1650 = vst.msk [vmem:[#allocation2 + $0x8] sm:$0xff] %vm713_vm3, %v1645_v21  ;;  %3173 = vrot.lane.b32.xlu1 %v11712_v54, %s13804_s12  ;;  %3171 = vrot.lane.b32.xlu0 %v11716_v47, %s13804_s12  ;;  %v11756_v21 = vmax.f32 %v13881_v62, %v13880_v40  ;;  %v13890_v47 = vld [vmem:[#allocation95_spill] sm:$0xff]  ;;  %v13892_v60 = vld [vmem:[#allocation96_spill] sm:$0xff] }
 0x375   : > { %1219 = vst.msk [vmem:[#allocation2 + $0x20] sm:$0xff] %vm1217_vm12, %v1214_v8  ;;  %1218 = vst.msk [vmem:[#allocation2] sm:$0xff] %vm1217_vm12, %v1212_v36  ;;  %v13875_v8 = vld [vmem:[#allocation85_spill] sm:$0xff] }
 0x376   : > { %1250 = vst.msk [vmem:[#allocation2 + $0x20] sm:$0xff] %vm1248_vm13, %v11611_v1  ;;  %1249 = vst.msk [vmem:[#allocation2] sm:$0xff] %vm1248_vm13, %v11613_v26  ;;  %v11740_v19 = vmax.f32 %v13875_v8, %v13874_v5  ;;  %v11742_v36 = vpop.permute.xlu1 %2111  ;;  %v11744_v9 = vpop.permute.xlu0 %2109  ;;  %v13877_v1 = vld [vmem:[#allocation26_spill] sm:$0xff]  ;;  %v13878_v26 = vld [vmem:[#allocation115_spill] sm:$0xff] }
 0x377   : > { %13873 = vst [vmem:[#allocation17_spill] sm:$0xff] %v11736_v33  ;;  %v11752_v12 = vmax.f32 %v13878_v26, %v13877_v1  ;;  %13882 = vst [vmem:[#allocation28_spill] sm:$0xff] %v11756_v21  ;;  %v13883_v5 = vld [vmem:[#allocation45_spill] sm:$0xff]  ;;  %v13886_v1 = vld [vmem:[#allocation154_spill] sm:$0xff] }
 0x378   : > { %13876 = vst [vmem:[#allocation22_spill] sm:$0xff] %v11740_v19  ;;  %4125 = vrot.lane.b32.xlu1 %v11736_v33, %s13804_s12  ;;  %4123 = vrot.lane.b32.xlu0 %v11740_v19, %s13804_s12  ;;  %v13884_v8 = vld [vmem:[#allocation61_spill] sm:$0xff] }
 0x379   : > { %13879 = vst [vmem:[#allocation24_spill] sm:$0xff] %v11752_v12  ;;  %v11768_v19 = vmax.f32 %v13884_v8, %v13883_v5  ;;  %v13887_v26 = vld [vmem:[#allocation129_spill] sm:$0xff] }
 0x37a   : > { %v11758_v52 = vpop.permute.xlu1 %2081  ;;  %v11760_v49 = vpop.permute.xlu0 %2079  ;;  %v11772_v33 = vmax.f32 %v13887_v26, %v13886_v1  ;;  %v13893_v26 = vld [vmem:[#allocation102_spill] sm:$0xff] }
 0x37b   : > { %13885 = vst [vmem:[#allocation31_spill] sm:$0xff] %v11768_v19 }
 0x37c   : > { %3203 = vrot.lane.b32.xlu1 %v11752_v12, %s13804_s12  ;;  %3201 = vrot.lane.b32.xlu0 %v11756_v21, %s13804_s12  ;;  %13888 = vst [vmem:[#allocation37_spill] sm:$0xff] %v11772_v33  ;;  %v13889_v12 = vld [vmem:[#allocation11_spill] sm:$0xff] }
 0x37d   : > { %v11780_v54 = vmax.f32 %v13890_v47, %v13889_v12  ;;  %v13891_v21 = vld [vmem:[#allocation15_spill] sm:$0xff]  ;;  %v13894_v47 = vld [vmem:[#allocation105_spill] sm:$0xff] }
 0x37e   : > { %v1707_v40 = vpop.permute.xlu1 %1706  ;;  %v1705_v62 = vpop.permute.xlu0 %1704  ;;  %v11784_v5 = vmax.f32 %v13892_v60, %v13891_v21  ;;  %v3484_v12 = vmax.f32 %v13894_v47, %v11380_v7  ;;  %v13895_v60 = vld [vmem:[#allocation81_spill] sm:$0xff] }
 0x37f   : > { %v13896_v21 = vld [vmem:[#allocation145_spill] sm:$0xff] }
 0x380   : > { %3458 = vrot.lane.b32.xlu1 %v11768_v19, %s13804_s12  ;;  %3456 = vrot.lane.b32.xlu0 %v11772_v33, %s13804_s12  ;;  %v3485_v33 = vmax.f32 %v13893_v26, %v11378_v13  ;;  %v2563_v13 = vmax.f32 %v13895_v60, %v11292_v37  ;;  %v2562_v7 = vmax.f32 %v13896_v21, %v11294_v45  ;;  %v13899_v37 = vld [vmem:[#allocation89_spill] sm:$0xff]  ;;  %v13900_v60 = vld [vmem:[#allocation148_spill] sm:$0xff] }
 0x381   : > { %v2593_v45 = vmax.f32 %v13899_v37, %v11322_v18 }
 0x382   : > { %v11786_v8 = vpop.permute.xlu1 %2171  ;;  %v11788_v1 = vpop.permute.xlu0 %2169 }
 0x384   : > { %2536 = vrot.lane.b32.xlu1 %v11780_v54, %s13804_s12  ;;  %2534 = vrot.lane.b32.xlu0 %v11784_v5, %s13804_s12 }
 0x386   : > { %v1677_v19 = vpop.permute.xlu1 %1676  ;;  %v1675_v61 = vpop.permute.xlu0 %1674 }
 0x387   : > { %1681 = vst.msk [vmem:[#allocation2 + $0x28] sm:$0xff] %vm744_vm4, %v1677_v19  ;;  %1680 = vst.msk [vmem:[#allocation2 + $0x8] sm:$0xff] %vm744_vm4, %v1675_v61  ;;  %v13897_v61 = vld [vmem:[#allocation53_spill] sm:$0xff] }
 0x388   : > { %1711 = vst.msk [vmem:[#allocation2 + $0x28] sm:$0xff] %vm775_vm5, %v1707_v40  ;;  %1710 = vst.msk [vmem:[#allocation2 + $0x8] sm:$0xff] %vm775_vm5, %v1705_v62  ;;  %3490 = vrot.lane.b32.xlu1 %v3485_v33, %s8594_s25  ;;  %3488 = vrot.lane.b32.xlu0 %v3484_v12, %s8594_s25  ;;  %v3515_v19 = vmax.f32 %v13897_v61, %v11445_v43  ;;  %v13898_v33 = vld [vmem:[#allocation57_spill] sm:$0xff]  ;;  %v13901_v43 = vld [vmem:[#allocation119_spill] sm:$0xff] }
 0x389   : > { %v3514_v40 = vmax.f32 %v13898_v33, %v11447_v46  ;;  %v3545_v18 = vmax.f32 %v13901_v43, %v11429_v38  ;;  %v13902_v46 = vld [vmem:[#allocation120_spill] sm:$0xff]  ;;  %v13904_v33 = vld [vmem:[#allocation87_spill] sm:$0xff]  ;;  %v13906_v38 = vld [vmem:[#allocation126_spill] sm:$0xff] }
 0x38a   : > { %v11808_v26 = vpop.permute.xlu1 %2141  ;;  %v2140_v47 = vpop.permute.xlu0 %2139 }
 0x38c   : > { %2568 = vrot.lane.b32.xlu1 %v2563_v13, %s8594_s25  ;;  %2566 = vrot.lane.b32.xlu0 %v2562_v7, %s8594_s25  ;;  %v2592_v13 = vmax.f32 %v13900_v60, %v11324_v31  ;;  %v3544_v31 = vmax.f32 %v13902_v46, %v11431_v29  ;;  %s13903_s25 = smov 24   ;;  %v3575_v29 = vmax.f32 %v13906_v38, %v11487_v28  ;;  %v13907_v60 = vld [vmem:[#allocation125_spill] sm:$0xff]  ;;  %v13910_v28 = vld [vmem:[#allocation83_spill] sm:$0xff] }
 0x38d   : > { %v2652_v43 = vmax.f32 %v13910_v28, %v11344_v6 }
 0x38e   : > { %v1767_v62 = vpop.permute.xlu1 %1766  ;;  %v1765_v12 = vpop.permute.xlu0 %1764 }
 0x390   : > { %3520 = vrot.lane.b32.xlu1 %v3515_v19, %s8599_s11  ;;  %3518 = vrot.lane.b32.xlu0 %v3514_v40, %s8599_s11  ;;  %v2623_v40 = vmax.f32 %v13904_v33, %v11312_v25  ;;  %v13909_v25 = vld [vmem:[#allocation93_spill] sm:$0xff] }
 0x391   : > { %v13917_v33 = vld [vmem:[#allocation101_spill] sm:$0xff] }
 0x392   : > { %v1737_v21 = vpop.permute.xlu1 %1736  ;;  %v1735_v7 = vpop.permute.xlu0 %1734 }
 0x393   : > { %1741 = vst.msk [vmem:[#allocation2 + $0x28] sm:$0xff] %vm806_vm6, %v1737_v21  ;;  %1740 = vst.msk [vmem:[#allocation2 + $0x8] sm:$0xff] %vm806_vm6, %v1735_v7 }
 0x394   : > { %1771 = vst.msk [vmem:[#allocation2 + $0x28] sm:$0xff] %vm837_vm7, %v1767_v62  ;;  %1770 = vst.msk [vmem:[#allocation2 + $0x8] sm:$0xff] %vm837_vm7, %v1765_v12  ;;  %2598 = vrot.lane.b32.xlu1 %v2593_v45, %s8599_s11  ;;  %2596 = vrot.lane.b32.xlu0 %v2592_v13, %s8599_s11  ;;  %v13905_v62 = vld [vmem:[#allocation10_spill] sm:$0xff]  ;;  %v3574_v13 = vmax.f32 %v13907_v60, %v11489_v44  ;;  %s13908_s11 = smov 32  }
 0x395   : > { %v2622_v12 = vmax.f32 %v13905_v62, %v11314_v63  ;;  %v2653_v63 = vmax.f32 %v13909_v25, %v11342_v20  ;;  %v13911_v20 = vld [vmem:[#allocation124_spill] sm:$0xff] }
 0x396   : > { %v2202_v61 = vpop.permute.xlu1 %2201  ;;  %v2200_v19 = vpop.permute.xlu0 %2199  ;;  %v3605_v6 = vmax.f32 %v13911_v20, %v11465_v34  ;;  %v13914_v34 = vld [vmem:[#allocation90_spill] sm:$0xff] }
 0x398   : > { %3550 = vrot.lane.b32.xlu1 %v3545_v18, %s13903_s25  ;;  %3548 = vrot.lane.b32.xlu0 %v3544_v31, %s13903_s25  ;;  %v3634_v31 = vmax.f32 %v11188_v53, %v11581_v15  ;;  %v3664_v53 = vmax.f32 %v11172_v51, %v11563_v39  ;;  %v13919_v51 = vld [vmem:[#allocation97_spill] sm:$0xff] }
 0x399   : > { %v2742_v39 = vmax.f32 %v13919_v51, %v11354_v2  ;;  %v13937_v51 = vld [vmem:[#allocation141_spill] sm:$0xff] }
 0x39a   : > { %v1276_v37 = vpop.permute.xlu1 %1275  ;;  %v1825_v45 = vpop.permute.xlu0 %1824 }
 0x39b   : > { %1281 = vst.msk [vmem:[#allocation2 + $0x20] sm:$0xff] %vm1279_vm14, %v1276_v37 }
 0x39c   : > { %2628 = vrot.lane.b32.xlu1 %v2623_v40, %s13903_s25  ;;  %2626 = vrot.lane.b32.xlu0 %v2622_v12, %s13903_s25  ;;  %v2712_v40 = vmax.f32 %v13917_v33, %v11370_v30  ;;  %v8091_v30 = vld [vmem:[%s13099_s3 + $0x104] ss:$8 sps:$4 sm:$0xff]   ;;  %s13933_s25 = smov 88  }
 0x39d   : > { %4591 = vmatprep.subr.bf16.mxu0 %v8091_v30  ;;  %v13935_v33 = vld [vmem:[#allocation70_spill] sm:$0xff]  ;;  %v8094_v30 = vld [vmem:[%s13099_s3 + $0x114] ss:$8 sps:$4 sm:$0xff]  }
 0x39e   : > { %v1827_v21 = vpop.permute.xlu1 %1826  ;;  %v1795_v7 = vpop.permute.xlu0 %1794 }
 0x39f   : > { %1800 = vst.msk [vmem:[#allocation2 + $0x8] sm:$0xff] %vm868_vm8, %v1795_v7  ;;  %v13924_v7 = vld [vmem:[#allocation147_spill] sm:$0xff] }
 0x3a0   : > { %1830 = vst.msk [vmem:[#allocation2 + $0x8] sm:$0xff] %vm899_vm9, %v1825_v45  ;;  %3580 = vrot.lane.b32.xlu1 %v3575_v29, %s13908_s11  ;;  %3578 = vrot.lane.b32.xlu0 %v3574_v13, %s13908_s11  ;;  %v13920_v45 = vld [vmem:[#allocation110_spill] sm:$0xff]  ;;  %v2997_v25 = vmax.f32 %v13924_v7, %v11304_v11  ;;  %v13938_v7 = vld [vmem:[#allocation9_spill] sm:$0xff] }
 0x3a1   : > { %2085 = vst.msk [vmem:[#allocation2 + $0x8] sm:$0xff] %vm1155_vm10, %v11760_v49  ;;  %v3920_v38 = vmax.f32 %v13920_v45, %v11410_v23  ;;  %v13921_v29 = vld [vmem:[#allocation50_spill] sm:$0xff]  ;;  %v8092_v45 = vld [vmem:[%s13099_s3 + $0x110] ss:$8 sps:$4 sm:$0xff]  }
 0x3a2   : > { %2115 = vst.msk [vmem:[#allocation2 + $0x8] sm:$0xff] %vm1186_vm11, %v11744_v9  ;;  %v1797_v44 = vpop.permute.xlu1 %1796  ;;  %v1274_v18 = vpop.permute.xlu0 %1273  ;;  %v13912_v9 = vld [vmem:[#allocation123_spill] sm:$0xff]  ;;  %v3919_v60 = vmax.f32 %v13921_v29, %v11412_v42  ;;  %v13925_v23 = vld [vmem:[#allocation106_spill] sm:$0xff] }
 0x3a3   : > { %2145 = vst.msk [vmem:[#allocation2 + $0x8] sm:$0xff] %vm1217_vm12, %v2140_v47  ;;  %v3604_v49 = vmax.f32 %v13912_v9, %v11467_v17  ;;  %v2683_v17 = vmax.f32 %v13914_v34, %v11332_v0  ;;  %v3950_v42 = vmax.f32 %v13925_v23, %v11394_v24  ;;  %v8098_v23 = vld [vmem:[%s13099_s3 + $0x130] ss:$8 sps:$4 sm:$0xff]  }
 0x3a4   : > { %1801 = vst.msk [vmem:[#allocation2 + $0x28] sm:$0xff] %vm868_vm8, %v1797_v44  ;;  %2658 = vrot.lane.b32.xlu1 %v2653_v63, %s13908_s11  ;;  %2656 = vrot.lane.b32.xlu0 %v2652_v43, %s13908_s11  ;;  %v13926_v43 = vld [vmem:[#allocation109_spill] sm:$0xff] }
 0x3a5   : > { %1280 = vst.msk [vmem:[#allocation2] sm:$0xff] %vm1279_vm14, %v1274_v18 }
 0x3a6   : > { %2175 = vst.msk [vmem:[#allocation2 + $0x8] sm:$0xff] %vm1248_vm13, %v11788_v1  ;;  %v2232_v1 = vpop.permute.xlu1 %2231  ;;  %v2230_v47 = vpop.permute.xlu0 %2229 }
 0x3a7   : > { %1831 = vst.msk [vmem:[#allocation2 + $0x28] sm:$0xff] %vm899_vm9, %v1827_v21 }
 0x3a8   : > { %2205 = vst.msk [vmem:[#allocation2 + $0x8] sm:$0xff] %vm1279_vm14, %v2200_v19  ;;  %3610 = vrot.lane.b32.xlu1 %v3605_v6, %s13913_s20  ;;  %3608 = vrot.lane.b32.xlu0 %v3604_v49, %s13913_s20 }
 0x3a9   : > { %2086 = vst.msk [vmem:[#allocation2 + $0x28] sm:$0xff] %vm1155_vm10, %v11758_v52 }
 0x3aa   : > { %2116 = vst.msk [vmem:[#allocation2 + $0x28] sm:$0xff] %vm1186_vm11, %v11742_v36  ;;  %v13915_v36 = vld [vmem:[#allocation79_spill] sm:$0xff]  ;;  %v3022_v46 = vpop.permute.xlu0 %3021 }
 0x3ab   : > { %2146 = vst.msk [vmem:[#allocation2 + $0x28] sm:$0xff] %vm1217_vm12, %v11808_v26  ;;  %v2682_v52 = vmax.f32 %v13915_v36, %v11334_v22  ;;  %v3024_v26 = vpop.permute.xlu1 %3023  ;;  %v13916_v22 = vld [vmem:[#allocation98_spill] sm:$0xff]  ;;  %v3027_v20 = vmax.f32 %v11463_v4, %v3022_v46 }
 0x3ac   : > { %2235 = vst.msk [vmem:[#allocation2 + $0x8] sm:$0xff] %vm1310_vm15, %v2230_v47  ;;  %2688 = vrot.lane.b32.xlu1 %v2683_v17, %s13913_s20  ;;  %v2713_v19 = vmax.f32 %v13916_v22, %v11368_v35  ;;  %v3028_v11 = vmax.f32 %v11459_v50, %v3024_v26  ;;  %v13929_v50 = vld [vmem:[#allocation131_spill] sm:$0xff]  ;;  %v13930_v36 = vld [vmem:[#allocation62_spill] sm:$0xff] }
 0x3ad   : > { %2176 = vst.msk [vmem:[#allocation2 + $0x28] sm:$0xff] %vm1248_vm13, %v11786_v8  ;;  %2686 = vrot.lane.b32.xlu0 %v2682_v52, %s13913_s20  ;;  %v3635_v8 = vmax.f32 %v11184_v55, %v11579_v16  ;;  %v3665_v55 = vmax.f32 %v11168_v59, %v11561_v58  ;;  %v13918_v59 = vld [vmem:[#allocation94_spill] sm:$0xff]  ;;  %v13934_v22 = vld [vmem:[#allocation139_spill] sm:$0xff]  ;;  %s350_s20 = sand.u32 1, %s8582_s14  }
 0x3ae   : > { %2206 = vst.msk [vmem:[#allocation2 + $0x28] sm:$0xff] %vm1279_vm14, %v2202_v61  ;;  %v11895_v0 = vpop.permute.xlu0 %3973  ;;  %v2743_v58 = vmax.f32 %v13918_v59, %v11352_v48  ;;  %v13923_v48 = vld [vmem:[#allocation86_spill] sm:$0xff]  ;;  %s6995_s27 = sshll.u32 %s350_s20, 6  ;;  %s13054_s0 = scalar_lea.sflag [#allocation4], %s350_s20 }
 0x3af   : > { %2236 = vst.msk [vmem:[#allocation2 + $0x28] sm:$0xff] %vm1310_vm15, %v2232_v1  ;;  %v11893_v61 = vpop.permute.xlu1 %3975  ;;  %v2998_v2 = vmax.f32 %v13923_v48, %v11302_v41  ;;  %v3949_v41 = vmax.f32 %v13926_v43, %v11396_v32  ;;  %v3979_v32 = vmax.f32 %v11485_v56, %v11895_v0  ;;  %v13936_v59 = vld [vmem:[#allocation142_spill] sm:$0xff] }
 0x3b0   : > { %3640 = vrot.lane.b32.xlu1 %v3635_v8, %s8604_s21  ;;  %v3980_v24 = vmax.f32 %v11481_v3, %v11893_v61  ;;  %v13931_v3 = vld [vmem:[#allocation134_spill] sm:$0xff]  ;;  %v13932_v8 = vld [vmem:[#allocation133_spill] sm:$0xff] }
 0x3b1   : > { %3638 = vrot.lane.b32.xlu0 %v3634_v31, %s8604_s21  ;;  %v8095_v48 = vld [vmem:[%s13099_s3 + $0x120] ss:$8 sps:$4 sm:$0xff]  }
 0x3b2   : > { %v1305_v12 = vpop.permute.xlu0 %1304 }
 0x3b3   : > { %v1307_v62 = vpop.permute.xlu1 %1306  ;;  %1311 = vst.msk [vmem:[#allocation2] sm:$0xff] %vm1310_vm15, %v1305_v12 }
 0x3b4   : > { %1312 = vst.msk [vmem:[#allocation2 + $0x20] sm:$0xff] %vm1310_vm15, %v1307_v62  ;;  %2718 = vrot.lane.b32.xlu1 %v2713_v19, %s8604_s21 }
 0x3b5   : > { %2716 = vrot.lane.b32.xlu0 %v2712_v40, %s8604_s21  ;;  %s13922_s21 = smov 64  }
 0x3b6   : > { %v2260_v16 = vpop.permute.xlu0 %2259 }
 0x3b7   : > { %v2262_v35 = vpop.permute.xlu1 %2261  ;;  %2265 = vst.msk [vmem:[#allocation2 + $0x8] sm:$0xff] %vm1341_vm0, %v2260_v16 }
 0x3b8   : > { %2266 = vst.msk [vmem:[#allocation2 + $0x28] sm:$0xff] %vm1341_vm0, %v2262_v35  ;;  %3670 = vrot.lane.b32.xlu1 %v3665_v55, %s8603_s28  ;;  %v8089_v35 = vld [vmem:[%s13099_s3 + $0x100] ss:$8 sps:$4 sm:$0xff]  }
 0x3b9   : > { %3668 = vrot.lane.b32.xlu0 %v3664_v53, %s8603_s28 }
 0x3ba   : > { %v3052_v37 = vpop.permute.xlu0 %3051 }
 0x3bb   : > { %v3054_v15 = vpop.permute.xlu1 %3053  ;;  %v3057_v52 = vmax.f32 %v13930_v36, %v3052_v37 }
 0x3bc   : > { %2748 = vrot.lane.b32.xlu1 %v2743_v58, %s8603_s28  ;;  %v3058_v4 = vmax.f32 %v13929_v50, %v3054_v15 }
 0x3bd   : > { %2746 = vrot.lane.b32.xlu0 %v2742_v39, %s8603_s28  ;;  %s13927_s28 = smov 72  }
 0x3be   : > { %v4004_v21 = vpop.permute.xlu0 %4003 }
 0x3bf   : > { %v4006_v13 = vpop.permute.xlu1 %4005  ;;  %v4009_v31 = vmax.f32 %v13932_v8, %v4004_v21  ;;  %v8112_v8 = vld [vmem:[%s13099_s3 + $0x174] ss:$8 sps:$4 sm:$0xff]  }
 0x3c0   : > { %3925 = vrot.lane.b32.xlu1 %v3920_v38, %s13922_s21  ;;  %v4010_v56 = vmax.f32 %v13931_v3, %v4006_v13  ;;  %v8097_v38 = vld [vmem:[%s13099_s3 + $0x124] ss:$8 sps:$4 sm:$0xff]   ;;  %v13946_v3 = vld [vmem:[#allocation37_spill] sm:$0xff] }
 0x3c1   : > { %3923 = vrot.lane.b32.xlu0 %v3919_v60, %s13922_s21 }
 0x3c2   : > { %v1336_v28 = vpop.permute.xlu0 %1335 }
 0x3c3   : > { %v1338_v63 = vpop.permute.xlu1 %1337  ;;  %1342 = vst.msk [vmem:[#allocation2] sm:$0xff] %vm1341_vm0, %v1336_v28 }
 0x3c4   : > { %1343 = vst.msk [vmem:[#allocation2 + $0x20] sm:$0xff] %vm1341_vm0, %v1338_v63  ;;  %3003 = vrot.lane.b32.xlu1 %v2998_v2, %s13922_s21  ;;  %v8100_v2 = vld [vmem:[%s13099_s3 + $0x134] ss:$8 sps:$4 sm:$0xff]  }
 0x3c5   : > { %3001 = vrot.lane.b32.xlu0 %v2997_v25, %s13922_s21  ;;  %v13939_v25 = vld [vmem:[#allocation7_spill] sm:$0xff] }
 0x3c6   : > { %v2290_v18 = vpop.permute.xlu0 %2289 }
 0x3c7   : > { %v2292_v44 = vpop.permute.xlu1 %2291  ;;  %2295 = vst.msk [vmem:[#allocation2 + $0x8] sm:$0xff] %vm1372_vm1, %v2290_v18 }
 0x3c8   : > { %2296 = vst.msk [vmem:[#allocation2 + $0x28] sm:$0xff] %vm1372_vm1, %v2292_v44  ;;  %3955 = vrot.lane.b32.xlu1 %v3950_v42, %s13927_s28  ;;  %v8103_v42 = vld [vmem:[%s13099_s3 + $0x144] ss:$8 sps:$4 sm:$0xff]  }
 0x3c9   : > { %3953 = vrot.lane.b32.xlu0 %v3949_v41, %s13927_s28 }
 0x3ca   : > { %v3082_v9 = vpop.permute.xlu0 %3081 }
 0x3cb   : > { %v3084_v6 = vpop.permute.xlu1 %3083  ;;  %v3087_v40 = vmax.f32 %v13935_v33, %v3082_v9  ;;  %v13942_v9 = vld [vmem:[#allocation76_spill] sm:$0xff] }
 0x3cc   : > { %3033 = vrot.lane.b32.xlu1 %v3028_v11, %s13927_s28  ;;  %v3088_v19 = vmax.f32 %v13934_v22, %v3084_v6  ;;  %v8101_v11 = vld [vmem:[%s13099_s3 + $0x140] ss:$8 sps:$4 sm:$0xff]  }
 0x3cd   : > { %3031 = vrot.lane.b32.xlu0 %v3027_v20, %s13927_s28  ;;  %v8106_v20 = vld [vmem:[%s13099_s3 + $0x154] ss:$8 sps:$4 sm:$0xff]   ;;  %v13941_v6 = vld [vmem:[#allocation6_spill] sm:$0xff] }
 0x3ce   : > { %v4034_v1 = vpop.permute.xlu0 %4033  ;;  %v4142_v47 = vld [vmem:[#allocation2 + $0x8] sm:$0xff] }
 0x3cf   : > { %v4036_v49 = vpop.permute.xlu1 %4035  ;;  %v4146_v34 = vld [vmem:[#allocation2 + $0x28] sm:$0xff]  ;;  %v4039_v39 = vmax.f32 %v13937_v51, %v4034_v1 }
 0x3d0   : > { %v4150_v17 = vpack.c.bf16 %v4146_v34, %v4142_v47  ;;  %3985 = vrot.lane.b32.xlu1 %v3980_v24, %s13928_s18  ;;  %v4040_v58 = vmax.f32 %v13936_v59, %v4036_v49  ;;  %v8104_v49 = vld [vmem:[%s13099_s3 + $0x150] ss:$8 sps:$4 sm:$0xff]   ;;  %v8109_v1 = vld [vmem:[%s13099_s3 + $0x164] ss:$8 sps:$4 sm:$0xff]   ;;  %v8113_v51 = vld [vmem:[%s13099_s3 + $0x180] ss:$8 sps:$4 sm:$0xff]  }
 0x3d1   : > { %3983 = vrot.lane.b32.xlu0 %v3979_v32, %s13928_s18  ;;  %v13943_v47 = vld [vmem:[#allocation8_spill] sm:$0xff] }
 0x3d2   : > { %4580 = vmatprep.mubr.bf16.mxu0 %v4150_v17  ;;  %v1367_v46 = vpop.permute.xlu0 %1366  ;;  %v13944_v17 = vld [vmem:[#allocation80_spill] sm:$0xff] }
 0x3d3   : > { %v1369_v26 = vpop.permute.xlu1 %1368  ;;  %1373 = vst.msk [vmem:[#allocation2] sm:$0xff] %vm1372_vm1, %v1367_v46 }
 0x3d4   : > { %1374 = vst.msk [vmem:[#allocation2 + $0x20] sm:$0xff] %vm1372_vm1, %v1369_v26  ;;  %3063 = vrot.lane.b32.xlu1 %v3058_v4, %s13928_s18  ;;  %v13945_v26 = vld [vmem:[#allocation31_spill] sm:$0xff] }
 0x3d5   : > { %3061 = vrot.lane.b32.xlu0 %v3057_v52, %s13928_s18  ;;  %s13940_s18 = smov 104   ;;  %v8107_v52 = vld [vmem:[%s13099_s3 + $0x160] ss:$8 sps:$4 sm:$0xff]  }
 0x3d6   : > { %v3112_v0 = vpop.permute.xlu0 %3111 }
 0x3d7   : > { %v3114_v61 = vpop.permute.xlu1 %3113  ;;  %v3117_v60 = vmax.f32 %v11656_v57, %v3112_v0  ;;  %v13948_v0 = vld [vmem:[#allocation22_spill] sm:$0xff] }
 0x3d8   : > { %4015 = vrot.lane.b32.xlu1 %v4010_v56, %s13933_s25  ;;  %v3118_v29 = vmax.f32 %v11652_v14, %v3114_v61 }
 0x3d9   : > { %4013 = vrot.lane.b32.xlu0 %v4009_v31, %s13933_s25  ;;  %v13947_v31 = vld [vmem:[#allocation17_spill] sm:$0xff] }
 0x3da   : > { %v4064_v12 = vpop.permute.xlu0 %4063  ;;  %v4141_v55 = vld [vmem:[#allocation2] sm:$0xff] }
 0x3db   : > { %v4066_v62 = vpop.permute.xlu1 %4065  ;;  %v4145_v53 = vld [vmem:[#allocation2 + $0x20] sm:$0xff]  ;;  %v4069_v57 = vmax.f32 %v13939_v25, %v4064_v12  ;;  %v8124_v25 = vld [vmem:[%s13099_s3 + $0x1b4] ss:$8 sps:$4 sm:$0xff]  }
 0x3dc   : > { %v4149_v16 = vpack.c.bf16 %v4145_v53, %v4141_v55  ;;  %3093 = vrot.lane.b32.xlu1 %v3088_v19, %s13933_s25  ;;  %v4070_v14 = vmax.f32 %v13938_v7, %v4066_v62  ;;  %v8115_v55 = vld [vmem:[%s13099_s3 + $0x184] ss:$8 sps:$4 sm:$0xff]   ;;  %v8137_v53 = vld [vmem:[%s13101_s5] ss:$8 sps:$4 sm:$0xff]  }
 0x3dd   : > { %3091 = vrot.lane.b32.xlu0 %v3087_v40, %s13933_s25  ;;  %v8110_v40 = vld [vmem:[%s13099_s3 + $0x170] ss:$8 sps:$4 sm:$0xff]   ;;  %v8119_v7 = vld [vmem:[%s13099_s3 + $0x1a0] ss:$8 sps:$4 sm:$0xff]   ;;  %s352_s25 = scalar_lea.vmem [#allocation3], %s6995_s27 }
 0x3de   : > { %4581 = vmatmul.mubr.bf16.vlgmr.msra.gmra.mrb[64].mxu0 %v4149_v16  ;;  %v3142_v37 = vpop.permute.xlu0 %3141  ;;  %v13950_v16 = vld [vmem:[#allocation28_spill] sm:$0xff]  ;;  %s6929_s28 = sshll.u32 %s352_s25, 4  ;;  %s13050_s28 = int_to_ptr.vmem [resolvable:$true] %s6929_s28 }
 0x3df   : > { %v3144_v15 = vpop.permute.xlu1 %3143  ;;  %4592 = vmatpush1.bf16.msra.mxu0 %v8089_v35  ;;  %v3147_v41 = vmax.f32 %v11684_v10, %v3142_v37  ;;  %v8140_v37 = vld [vmem:[%s13101_s5 + $0x10] ss:$8 sps:$4 sm:$0xff]  }
 0x3e0   : > { %4593 = vmatprep.subr.bf16.mxu0 %v8094_v30  ;;  %4045 = vrot.lane.b32.xlu1 %v4040_v58, %s8605_s26  ;;  %v3148_v43 = vmax.f32 %v11680_v27, %v3144_v15  ;;  %v8118_v15 = vld [vmem:[%s13099_s3 + $0x194] ss:$8 sps:$4 sm:$0xff]  }
 0x3e1   : > { %4043 = vrot.lane.b32.xlu0 %v4039_v39, %s8605_s26  ;;  %v8142_v39 = vld [vmem:[%s13101_s5 + $0x14] ss:$8 sps:$4 sm:$0xff]  }
 0x3e2   : > { %v4094_v21 = vpop.permute.xlu0 %4093 }
 0x3e3   : > { %v4096_v13 = vpop.permute.xlu1 %4095  ;;  %4594 = vmatpush1.bf16.msra.mxu0 %v8092_v45  ;;  %v4099_v10 = vmax.f32 %v13942_v9, %v4094_v21  ;;  %v8143_v21 = vld [vmem:[%s13101_s5 + $0x20] ss:$8 sps:$4 sm:$0xff]  }
 0x3e4   : > { %4595 = vmatprep.subr.bf16.mxu0 %v8097_v38  ;;  %3123 = vrot.lane.b32.xlu1 %v3118_v29, %s8605_s26  ;;  %v4100_v27 = vmax.f32 %v13941_v6, %v4096_v13  ;;  %v8116_v29 = vld [vmem:[%s13099_s3 + $0x190] ss:$8 sps:$4 sm:$0xff]   ;;  %v8121_v13 = vld [vmem:[%s13099_s3 + $0x1a4] ss:$8 sps:$4 sm:$0xff]   ;;  %v8130_v6 = vld [vmem:[%s13099_s3 + $0x1d4] ss:$8 sps:$4 sm:$0xff]  }
 0x3e5   : > { %3121 = vrot.lane.b32.xlu0 %v3117_v60, %s8605_s26  ;;  %v8145_v60 = vld [vmem:[%s13101_s5 + $0x24] ss:$8 sps:$4 sm:$0xff]  }
 0x3e6   : > { %v3172_v28 = vpop.permute.xlu0 %3171 }
 0x3e7   : > { %v3174_v63 = vpop.permute.xlu1 %3173  ;;  %4596 = vmatpush1.bf16.msra.mxu0 %v8095_v48  ;;  %v3177_v50 = vmax.f32 %v13944_v17, %v3172_v28  ;;  %v8131_v17 = vld [vmem:[%s13099_s3 + $0x1e0] ss:$8 sps:$4 sm:$0xff]  }
 0x3e8   : > { %4597 = vmatprep.subr.bf16.mxu0 %v8100_v2  ;;  %4075 = vrot.lane.b32.xlu1 %v4070_v14, %s13940_s18  ;;  %v3178_v34 = vmax.f32 %v13943_v47, %v3174_v63  ;;  %v8148_v14 = vld [vmem:[%s13101_s5 + $0x34] ss:$8 sps:$4 sm:$0xff]  }
 0x3e9   : > { %4073 = vrot.lane.b32.xlu0 %v4069_v57, %s13940_s18  ;;  %v8146_v57 = vld [vmem:[%s13101_s5 + $0x30] ss:$8 sps:$4 sm:$0xff]  }
 0x3ea   : > { %v4124_v18 = vpop.permute.xlu0 %4123 }
 0x3eb   : > { %v4126_v44 = vpop.permute.xlu1 %4125  ;;  %4598 = vmatpush1.bf16.msra.mxu0 %v8098_v23  ;;  %v4129_v22 = vmax.f32 %v13948_v0, %v4124_v18  ;;  %v8122_v23 = vld [vmem:[%s13099_s3 + $0x1b0] ss:$8 sps:$4 sm:$0xff]  }
 0x3ec   : > { %4599 = vmatprep.subr.bf16.mxu0 %v8103_v42  ;;  %3153 = vrot.lane.b32.xlu1 %v3148_v43, %s13940_s18  ;;  %v4130_v61 = vmax.f32 %v13947_v31, %v4126_v44  ;;  %v8151_v42 = vld [vmem:[%s13101_s5 + $0x44] ss:$8 sps:$4 sm:$0xff]   ;;  %v8164_v0 = vld [vmem:[%s13101_s5 + $0x90] ss:$8 sps:$4 sm:$0xff]  }
 0x3ed   : > { %3151 = vrot.lane.b32.xlu0 %v3147_v41, %s13940_s18  ;;  %v8127_v43 = vld [vmem:[%s13099_s3 + $0x1c4] ss:$8 sps:$4 sm:$0xff]   ;;  %v8149_v41 = vld [vmem:[%s13101_s5 + $0x40] ss:$8 sps:$4 sm:$0xff]  }
 0x3ee   : > { %v3202_v32 = vpop.permute.xlu0 %3201 }
 0x3ef   : > { %v3204_v24 = vpop.permute.xlu1 %3203  ;;  %4600 = vmatpush1.bf16.msra.mxu0 %v8101_v11  ;;  %v3207_v30 = vmax.f32 %v13950_v16, %v3202_v32  ;;  %v8125_v11 = vld [vmem:[%s13099_s3 + $0x1c0] ss:$8 sps:$4 sm:$0xff]   ;;  %v8157_v32 = vld [vmem:[%s13101_s5 + $0x64] ss:$8 sps:$4 sm:$0xff]  }
 0x3f0   : > { %4601 = vmatprep.subr.bf16.mxu0 %v8106_v20  ;;  %4105 = vrot.lane.b32.xlu1 %v4100_v27, %s13804_s12  ;;  %v8154_v20 = vld [vmem:[%s13101_s5 + $0x54] ss:$8 sps:$4 sm:$0xff]   ;;  %v8152_v27 = vld [vmem:[%s13101_s5 + $0x50] ss:$8 sps:$4 sm:$0xff]   ;;  %v8173_v16 = vld [vmem:[%s13101_s5 + $0xc0] ss:$8 sps:$4 sm:$0xff]  }
 0x3f1   : > { %4103 = vrot.lane.b32.xlu0 %v4099_v10, %s13804_s12 }
 0x3f2   : > { %v3457_v36 = vpop.permute.xlu0 %3456 }
 0x3f3   : > { %v3459_v4 = vpop.permute.xlu1 %3458  ;;  %4602 = vmatpush1.bf16.msra.mxu0 %v8104_v49  ;;  %v3462_v56 = vmax.f32 %v13946_v3, %v3457_v36  ;;  %v8133_v49 = vld [vmem:[%s13099_s3 + $0x1e4] ss:$8 sps:$4 sm:$0xff]   ;;  %v8158_v36 = vld [vmem:[%s13101_s5 + $0x70] ss:$8 sps:$4 sm:$0xff]  }
 0x3f4   : > { %v3463_v46 = vmax.f32 %v13945_v26, %v3459_v4  ;;  %4603 = vmatprep.subr.bf16.mxu0 %v8109_v1  ;;  %3183 = vrot.lane.b32.xlu1 %v3178_v34, %s13804_s12  ;;  %v8155_v1 = vld [vmem:[%s13101_s5 + $0x60] ss:$8 sps:$4 sm:$0xff]   ;;  %v8136_v4 = vld [vmem:[%s13099_s3 + $0x1f4] ss:$8 sps:$4 sm:$0xff]   ;;  %v8163_v3 = vld [vmem:[%s13101_s5 + $0x84] ss:$8 sps:$4 sm:$0xff]  }
 0x3f5   : > { %3181 = vrot.lane.b32.xlu0 %v3177_v50, %s13804_s12  ;;  %3464 = vst.msk [vmem:[#allocation2 + $0x18] sm:$0xff] %vm682_vm2, %v3462_v56  ;;  %v8160_v50 = vld [vmem:[%s13101_s5 + $0x74] ss:$8 sps:$4 sm:$0xff]   ;;  %v8161_v56 = vld [vmem:[%s13101_s5 + $0x80] ss:$8 sps:$4 sm:$0xff]   ;;  %s8528_s12 = scalar_lea.vmem %s13050_s28, 1024 }
 0x3f6   : > { %3465 = vst.msk [vmem:[#allocation2 + $0x38] sm:$0xff] %vm682_vm2, %v3463_v46  ;;  %v2535_v33 = vpop.permute.xlu0 %2534  ;;  %v8134_v46 = vld [vmem:[%s13099_s3 + $0x1f0] ss:$8 sps:$4 sm:$0xff]   ;;  %p8529_p11 = scmp.ne.s32.totalorder %s13050_s28, %s8528_s12 }
 0x3f7   : > { %v2537_v19 = vpop.permute.xlu1 %2536  ;;  %4604 = vmatpush1.bf16.msra.mxu0 %v8107_v52  ;;  %v2540_v12 = vmax.f32 %v11784_v5, %v2535_v33  ;;  %v13949_v5 = vld [vmem:[#allocation24_spill] sm:$0xff]  ;;  %v8169_v33 = vld [vmem:[%s13101_s5 + $0xa4] ss:$8 sps:$4 sm:$0xff]  }
 0x3f8   : > { %v2541_v62 = vmax.f32 %v11780_v54, %v2537_v19  ;;  %4605 = vmatprep.subr.bf16.mxu0 %v8112_v8  ;;  %4135 = vrot.lane.b32.xlu1 %v4130_v61, %s13829_s29  ;;  %v8139_v54 = vld [vmem:[%s13101_s5 + $0x4] ss:$8 sps:$4 sm:$0xff]   ;;  %v3208_v35 = vmax.f32 %v13949_v5, %v3204_v24  ;;  %v8128_v24 = vld [vmem:[%s13099_s3 + $0x1d0] ss:$8 sps:$4 sm:$0xff]   ;;  %v8166_v61 = vld [vmem:[%s13101_s5 + $0x94] ss:$8 sps:$4 sm:$0xff]   ;;  %p8530_p12 = pnand %p8529_p11, %p8705_p5 }
 0x3f9   : > { %4133 = vrot.lane.b32.xlu0 %v4129_v22, %s13829_s29  ;;  %2542 = vst.msk [vmem:[#allocation2 + $0x10] sm:$0xff] %vm682_vm2, %v2540_v12  ;;  %4862 = vmatprep.subr.bf16.mxu1 %v8139_v54 }
 0x3fa   : > { %2543 = vst.msk [vmem:[#allocation2 + $0x30] sm:$0xff] %vm682_vm2, %v2541_v62  ;;  %v3489_v58 = vpop.permute.xlu0 %3488  ;;  %4863 = vmatpush1.bf16.msra.mxu1 %v8137_v53  ;;  %v8170_v53 = vld [vmem:[%s13101_s5 + $0xb0] ss:$8 sps:$4 sm:$0xff]   ;;  %vm5141_vm2 = vcmask 523264   ;;  %p8531_p13 = pneg %p8530_p12 }
 0x3fb   : > { %v3491_v59 = vpop.permute.xlu1 %3490  ;;  %4606 = vmatpush1.bf16.msra.mxu0 %v8110_v40  ;;  %3494 = vst.msk [vmem:[#allocation2 + $0x18] sm:$0xff] %vm713_vm3, %v3489_v58  ;;  %4864 = vmatprep.subr.bf16.mxu1 %v8142_v39  ;;  %v8167_v40 = vld [vmem:[%s13101_s5 + $0xa0] ss:$8 sps:$4 sm:$0xff]  }
 0x3fc   : > { %3495 = vst.msk [vmem:[#allocation2 + $0x38] sm:$0xff] %vm713_vm3, %v3491_v59  ;;  %4607 = vmatprep.subr.bf16.mxu0 %v8115_v55  ;;  %3213 = vrot.lane.b32.xlu1 %v3208_v35, %s13829_s29  ;;  %v8172_v55 = vld [vmem:[%s13101_s5 + $0xb4] ss:$8 sps:$4 sm:$0xff]   ;;  %v8175_v35 = vld [vmem:[%s13101_s5 + $0xc4] ss:$8 sps:$4 sm:$0xff]  }
 0x3fd   : > { %3211 = vrot.lane.b32.xlu0 %v3207_v30, %s13829_s29  ;;  %s8610_s29 = smov [#allocation3]  }
 0x3fe   : > { %v2567_v38 = vpop.permute.xlu0 %2566  ;;  %4865 = vmatpush1.bf16.msra.mxu1 %v8140_v37  ;;  %s8532_s18 = sshll.u32 %s8610_s29, 4  ;;  %s8533_s18 = int_to_ptr.vmem [resolvable:$false] %s8532_s18 }
 0x3ff   : > { %v2569_v45 = vpop.permute.xlu1 %2568  ;;  %4608 = vmatpush1.bf16.msra.mxu0 %v8113_v51  ;;  %2572 = vst.msk [vmem:[#allocation2 + $0x10] sm:$0xff] %vm713_vm3, %v2567_v38  ;;  %4866 = vmatprep.subr.bf16.mxu1 %v8145_v60  ;;  %s8534_s27 = scalar_lea.vmem %s8533_s18, 2048  ;;  %p8535_p0 = scmp.lt.s32.totalorder %s13050_s28, %s8533_s18 }
 0x400   : > { %2573 = vst.msk [vmem:[#allocation2 + $0x30] sm:$0xff] %vm713_vm3, %v2569_v45  ;;  %4609 = vmatprep.subr.bf16.mxu0 %v8118_v15  ;;  %vm8609_vm3 = vmmov 0   ;;  %p8536_p1 = scmp.lt.s32.totalorder %s8534_s27, %s8528_s12 }
 0x402   : > { %v3519_v2 = vpop.permute.xlu0 %3518  ;;  %4867 = vmatpush1.bf16.msra.mxu1 %v8143_v21  ;;  %p8537_p2 = por %p8536_p1, %p8535_p0 }
 0x403   : > { %v3521_v48 = vpop.permute.xlu1 %3520  ;;  %4610 = vmatpush1.bf16.msra.mxu0 %v8116_v29  ;;  %3524 = vst.msk [vmem:[#allocation2 + $0x18] sm:$0xff] %vm744_vm4, %v3519_v2  ;;  %4868 = vmatprep.subr.bf16.mxu1 %v8148_v14 }
 0x404   : > { %3525 = vst.msk [vmem:[#allocation2 + $0x38] sm:$0xff] %vm744_vm4, %v3521_v48  ;;  %4611 = vmatprep.subr.bf16.mxu0 %v8121_v13  ;;  %p8538_p3 = pnand %p8537_p2, %p8531_p13 }
 0x406   : > { %v2597_v28 = vpop.permute.xlu0 %2596  ;;  %4869 = vmatpush1.bf16.msra.mxu1 %v8146_v57 }
 0x407   : > { %v2599_v63 = vpop.permute.xlu1 %2598  ;;  %4612 = vmatpush1.bf16.msra.mxu0 %v8119_v7  ;;  %2602 = vst.msk [vmem:[#allocation2 + $0x10] sm:$0xff] %vm744_vm4, %v2597_v28  ;;  %4870 = vmatprep.subr.bf16.mxu1 %v8151_v42 }
 0x408   : > { %2603 = vst.msk [vmem:[#allocation2 + $0x30] sm:$0xff] %vm744_vm4, %v2599_v63  ;;  %4613 = vmatprep.subr.bf16.mxu0 %v8124_v25  ;;  %vm6558_vm4 = vcmask 261120  }
 0x40a   : > { %v3549_v18 = vpop.permute.xlu0 %3548  ;;  %4871 = vmatpush1.bf16.msra.mxu1 %v8149_v41 }
 0x40b   : > { %v3551_v44 = vpop.permute.xlu1 %3550  ;;  %4614 = vmatpush1.bf16.msra.mxu0 %v8122_v23  ;;  %3554 = vst.msk [vmem:[#allocation2 + $0x18] sm:$0xff] %vm775_vm5, %v3549_v18  ;;  %4872 = vmatprep.subr.bf16.mxu1 %v8154_v20 }
 0x40c   : > { %3555 = vst.msk [vmem:[#allocation2 + $0x38] sm:$0xff] %vm775_vm5, %v3551_v44  ;;  %4615 = vmatprep.subr.bf16.mxu0 %v8127_v43 }
 0x40e   : > { %v2627_v10 = vpop.permute.xlu0 %2626  ;;  %4873 = vmatpush1.bf16.msra.mxu1 %v8152_v27 }
 0x40f   : > { %v2629_v9 = vpop.permute.xlu1 %2628  ;;  %4616 = vmatpush1.bf16.msra.mxu0 %v8125_v11  ;;  %2632 = vst.msk [vmem:[#allocation2 + $0x10] sm:$0xff] %vm775_vm5, %v2627_v10  ;;  %4874 = vmatprep.subr.bf16.mxu1 %v8157_v32 }
 0x410   : > { %2633 = vst.msk [vmem:[#allocation2 + $0x30] sm:$0xff] %vm775_vm5, %v2629_v9  ;;  %4617 = vmatprep.subr.bf16.mxu0 %v8130_v6 }
 0x412   : > { %v3579_v34 = vpop.permute.xlu0 %3578  ;;  %4875 = vmatpush1.bf16.msra.mxu1 %v8155_v1 }
 0x413   : > { %v3581_v47 = vpop.permute.xlu1 %3580  ;;  %4618 = vmatpush1.bf16.msra.mxu0 %v8128_v24  ;;  %3584 = vst.msk [vmem:[#allocation2 + $0x18] sm:$0xff] %vm806_vm6, %v3579_v34  ;;  %4876 = vmatprep.subr.bf16.mxu1 %v8160_v50 }
 0x414   : > { %3585 = vst.msk [vmem:[#allocation2 + $0x38] sm:$0xff] %vm806_vm6, %v3581_v47  ;;  %4619 = vmatprep.subr.bf16.mxu0 %v8133_v49 }
 0x416   : > { %v2657_v26 = vpop.permute.xlu0 %2656  ;;  %4877 = vmatpush1.bf16.msra.mxu1 %v8158_v36  ;;  %v8178_v36 = vld [vmem:[%s13101_s5 + $0xd4] ss:$8 sps:$4 sm:$0xff]  }
 0x417   : > { %v2659_v52 = vpop.permute.xlu1 %2658  ;;  %4620 = vmatpush1.bf16.msra.mxu0 %v8131_v17  ;;  %2662 = vst.msk [vmem:[#allocation2 + $0x10] sm:$0xff] %vm806_vm6, %v2657_v26  ;;  %4878 = vmatprep.subr.bf16.mxu1 %v8163_v3  ;;  %v8181_v26 = vld [vmem:[%s13101_s5 + $0xe4] ss:$8 sps:$4 sm:$0xff]   ;;  %v8184_v3 = vld [vmem:[%s13101_s5 + $0xf4] ss:$8 sps:$4 sm:$0xff]  }
 0x418   : > { %2663 = vst.msk [vmem:[#allocation2 + $0x30] sm:$0xff] %vm806_vm6, %v2659_v52  ;;  %4621 = vmatprep.subr.bf16.mxu0 %v8136_v4  ;;  %v8176_v52 = vld [vmem:[%s13101_s5 + $0xd0] ss:$8 sps:$4 sm:$0xff]  }
 0x41a   : > { %v3609_v31 = vpop.permute.xlu0 %3608  ;;  %4879 = vmatpush1.bf16.msra.mxu1 %v8161_v56  ;;  %v8182_v56 = vld [vmem:[%s13101_s5 + $0xf0] ss:$8 sps:$4 sm:$0xff]  }
 0x41b   : > { %v3611_v8 = vpop.permute.xlu1 %3610  ;;  %4622 = vmatpush1.bf16.msra.mxu0 %v8134_v46  ;;  %3614 = vst.msk [vmem:[#allocation2 + $0x18] sm:$0xff] %vm837_vm7, %v3609_v31  ;;  %4880 = vmatprep.subr.bf16.mxu1 %v8166_v61  ;;  %v8179_v46 = vld [vmem:[%s13101_s5 + $0xe0] ss:$8 sps:$4 sm:$0xff]  }
 0x41c   : > { %3615 = vst.msk [vmem:[#allocation2 + $0x38] sm:$0xff] %vm837_vm7, %v3611_v8  ;;  %v4218_v8 = vlaneseq }
 0x41e   : > { %4881 = vmatpush1.bf16.msra.mxu1 %v8164_v0  ;;  %v12259_v31 = vshrl.u32 %v4218_v8, 7  ;;  %v363_v0 = vld [vmem:[%s13100_s4] ss:$4 sm:$0x3] }
 0x41f   : > { %v2689_v22 = vpop.permute.xlu1 %2688  ;;  %v2687_v19 = vpop.permute.xlu0 %2686  ;;  %4882 = vmatprep.subr.bf16.mxu1 %v8169_v33  ;;  %v6998_v33 = vld [vmem:[%s13100_s4 + $0x1] ss:$4 sm:$0x3] }
 0x420   : > { %2693 = vst.msk [vmem:[#allocation2 + $0x30] sm:$0xff] %vm837_vm7, %v2689_v22  ;;  %2692 = vst.msk [vmem:[#allocation2 + $0x10] sm:$0xff] %vm837_vm7, %v2687_v19  ;;  %v12262_v61 = vsub.s32 0, %v12259_v31  ;;  %v12268_v22 = vsub.s32 1, %v12259_v31  ;;  %v8261_v8 = vld [vmem:[%s13104_s8 + $0xc0] ss:$16 sps:$4 sm:$0xff]  }
 0x422   : > { %4883 = vmatpush1.bf16.msra.mxu1 %v8167_v40  ;;  %v4221_v19 = vrot.slane %v363_v0, %v12262_v61  ;;  %v4225_v40 = vrot.slane %v363_v0, %v12268_v22  ;;  %v8269_v0 = vld [vmem:[%s13104_s8 + $0xe4] ss:$16 sps:$4 sm:$0xff]  }
 0x423   : > { %v3641_v62 = vpop.permute.xlu1 %3640  ;;  %v3639_v12 = vpop.permute.xlu0 %3638  ;;  %4884 = vmatprep.subr.bf16.mxu1 %v8172_v55  ;;  %v4642_v55 = vrot.slane %v6998_v33, %v12262_v61 }
 0x424   : > { %3645 = vst.msk [vmem:[#allocation2 + $0x38] sm:$0xff] %vm868_vm8, %v3641_v62  ;;  %3644 = vst.msk [vmem:[#allocation2 + $0x18] sm:$0xff] %vm868_vm8, %v3639_v12 }
 0x426   : > { %4885 = vmatpush1.bf16.msra.mxu1 %v8170_v53 }
 0x427   : > { %v2719_v54 = vpop.permute.xlu1 %2718  ;;  %v2717_v5 = vpop.permute.xlu0 %2716  ;;  %4886 = vmatprep.subr.bf16.mxu1 %v8175_v35  ;;  %v4646_v35 = vrot.slane %v6998_v33, %v12268_v22  ;;  %v8275_v33 = vld [vmem:[%s13104_s8 + $0x104] ss:$16 sps:$4 sm:$0xff]  }
 0x428   : > { %2723 = vst.msk [vmem:[#allocation2 + $0x30] sm:$0xff] %vm868_vm8, %v2719_v54  ;;  %2722 = vst.msk [vmem:[#allocation2 + $0x10] sm:$0xff] %vm868_vm8, %v2717_v5  ;;  %v6999_v54 = vld [vmem:[%s13100_s4 + $0x2] ss:$4 sm:$0x3] }
 0x42a   : > { %4887 = vmatpush1.bf16.msra.mxu1 %v8173_v16 }
 0x42b   : > { %v3671_v30 = vpop.permute.xlu1 %3670  ;;  %v3669_v59 = vpop.permute.xlu0 %3668  ;;  %4888 = vmatprep.subr.bf16.mxu1 %v8178_v36  ;;  %v8243_v36 = vld [vmem:[%s13104_s8 + $0x60] ss:$16 sps:$4 sm:$0xff]  }
 0x42c   : > { %3675 = vst.msk [vmem:[#allocation2 + $0x38] sm:$0xff] %vm899_vm9, %v3671_v30  ;;  %3674 = vst.msk [vmem:[#allocation2 + $0x18] sm:$0xff] %vm899_vm9, %v3669_v59 }
 0x42e   : > { %4889 = vmatpush1.bf16.msra.mxu1 %v8176_v52  ;;  %v8251_v52 = vld [vmem:[%s13104_s8 + $0x84] ss:$16 sps:$4 sm:$0xff]  }
 0x42f   : > { %v2749_v58 = vpop.permute.xlu1 %2748  ;;  %v2747_v51 = vpop.permute.xlu0 %2746  ;;  %4890 = vmatprep.subr.bf16.mxu1 %v8181_v26  ;;  %v8249_v26 = vld [vmem:[%s13104_s8 + $0x80] ss:$16 sps:$4 sm:$0xff]  }
 0x430   : > { %2753 = vst.msk [vmem:[#allocation2 + $0x30] sm:$0xff] %vm899_vm9, %v2749_v58  ;;  %2752 = vst.msk [vmem:[#allocation2 + $0x10] sm:$0xff] %vm899_vm9, %v2747_v51 }
 0x432   : > { %4891 = vmatpush1.bf16.msra.mxu1 %v8179_v46  ;;  %v8257_v46 = vld [vmem:[%s13104_s8 + $0xa4] ss:$16 sps:$4 sm:$0xff]  }
 0x433   : > { %v3926_v39 = vpop.permute.xlu1 %3925  ;;  %v3924_v15 = vpop.permute.xlu0 %3923  ;;  %4892 = vmatprep.subr.bf16.mxu1 %v8184_v3  ;;  %v8255_v3 = vld [vmem:[%s13104_s8 + $0xa0] ss:$16 sps:$4 sm:$0xff]  }
 0x434   : > { %3930 = vst.msk [vmem:[#allocation2 + $0x38] sm:$0xff] %vm1155_vm10, %v3926_v39  ;;  %3929 = vst.msk [vmem:[#allocation2 + $0x18] sm:$0xff] %vm1155_vm10, %v3924_v15 }
 0x436   : > { %4893 = vmatpush1.bf16.msra.mxu1 %v8182_v56  ;;  %v8263_v56 = vld [vmem:[%s13104_s8 + $0xc4] ss:$16 sps:$4 sm:$0xff]  }
 0x437   : > { %v3004_v37 = vpop.permute.xlu1 %3003  ;;  %v3002_v45 = vpop.permute.xlu0 %3001 }
 0x438   : > { %3008 = vst.msk [vmem:[#allocation2 + $0x30] sm:$0xff] %vm1155_vm10, %v3004_v37  ;;  %3007 = vst.msk [vmem:[#allocation2 + $0x10] sm:$0xff] %vm1155_vm10, %v3002_v45  ;;  %v4657_v37 = vrot.slane %v6999_v54, %v12262_v61 }
 0x43b   : > { %v3956_v38 = vpop.permute.xlu1 %3955  ;;  %v3954_v29 = vpop.permute.xlu0 %3953 }
 0x43c   : > { %3960 = vst.msk [vmem:[#allocation2 + $0x38] sm:$0xff] %vm1186_vm11, %v3956_v38  ;;  %3959 = vst.msk [vmem:[#allocation2 + $0x18] sm:$0xff] %vm1186_vm11, %v3954_v29  ;;  %v4661_v29 = vrot.slane %v6999_v54, %v12268_v22  ;;  %v8293_v54 = vld [vmem:[%s13104_s8 + $0x164] ss:$16 sps:$4 sm:$0xff]  }
 0x43f   : > { %v3034_v60 = vpop.permute.xlu1 %3033  ;;  %v3032_v13 = vpop.permute.xlu0 %3031 }
 0x440   : > { %3038 = vst.msk [vmem:[#allocation2 + $0x30] sm:$0xff] %vm1186_vm11, %v3034_v60  ;;  %3037 = vst.msk [vmem:[#allocation2 + $0x10] sm:$0xff] %vm1186_vm11, %v3032_v13 }
 0x443   : > { %v3986_v21 = vpop.permute.xlu1 %3985  ;;  %v3984_v48 = vpop.permute.xlu0 %3983 }
 0x444   : > { %3990 = vst.msk [vmem:[#allocation2 + $0x38] sm:$0xff] %vm1217_vm12, %v3986_v21  ;;  %3989 = vst.msk [vmem:[#allocation2 + $0x18] sm:$0xff] %vm1217_vm12, %v3984_v48 }
 0x447   : > { %v3064_v2 = vpop.permute.xlu1 %3063  ;;  %v3062_v7 = vpop.permute.xlu0 %3061 }
 0x448   : > { %3068 = vst.msk [vmem:[#allocation2 + $0x30] sm:$0xff] %vm1217_vm12, %v3064_v2  ;;  %3067 = vst.msk [vmem:[#allocation2 + $0x10] sm:$0xff] %vm1217_vm12, %v3062_v7 }
 0x44b   : > { %v4016_v14 = vpop.permute.xlu1 %4015  ;;  %v4014_v25 = vpop.permute.xlu0 %4013 }
 0x44c   : > { %4020 = vst.msk [vmem:[#allocation2 + $0x38] sm:$0xff] %vm1248_vm13, %v4016_v14  ;;  %4019 = vst.msk [vmem:[#allocation2 + $0x18] sm:$0xff] %vm1248_vm13, %v4014_v25 }
 0x44f   : > { %v3094_v57 = vpop.permute.xlu1 %3093  ;;  %v3092_v63 = vpop.permute.xlu0 %3091 }
 0x450   : > { %3098 = vst.msk [vmem:[#allocation2 + $0x30] sm:$0xff] %vm1248_vm13, %v3094_v57  ;;  %3097 = vst.msk [vmem:[#allocation2 + $0x10] sm:$0xff] %vm1248_vm13, %v3092_v63  ;;  %v8185_v63 = vld [vmem:[%s13102_s6] ss:$28 sps:$4 sm:$0xff]  }
 0x453   : > { %v4046_v28 = vpop.permute.xlu1 %4045  ;;  %v4044_v23 = vpop.permute.xlu0 %4043 }
 0x454   : > { %4050 = vst.msk [vmem:[#allocation2 + $0x38] sm:$0xff] %vm1279_vm14, %v4046_v28  ;;  %4049 = vst.msk [vmem:[#allocation2 + $0x18] sm:$0xff] %vm1279_vm14, %v4044_v23  ;;  %v8187_v28 = vld [vmem:[%s13102_s6 + $0x4] ss:$28 sps:$4 sm:$0xff]   ;;  %v8190_v23 = vld [vmem:[%s13102_s6 + $0x3c] ss:$28 sps:$4 sm:$0xff]  }
 0x455   : > { %5145 = vmatprep.subr.bf16.mxu1 %v8187_v28  ;;  %v8208_v28 = vld [vmem:[%s13102_s6 + $0xb4] ss:$28 sps:$4 sm:$0xff]  }
 0x457   : > { %v3124_v42 = vpop.permute.xlu1 %3123  ;;  %v3122_v43 = vpop.permute.xlu0 %3121 }
 0x458   : > { %3128 = vst.msk [vmem:[#allocation2 + $0x30] sm:$0xff] %vm1279_vm14, %v3124_v42  ;;  %3127 = vst.msk [vmem:[#allocation2 + $0x10] sm:$0xff] %vm1279_vm14, %v3122_v43  ;;  %v8188_v42 = vld [vmem:[%s13102_s6 + $0x38] ss:$28 sps:$4 sm:$0xff]   ;;  %v8191_v43 = vld [vmem:[%s13102_s6 + $0x70] ss:$28 sps:$4 sm:$0xff]  }
 0x45b   : > { %v4076_v41 = vpop.permute.xlu1 %4075  ;;  %v4074_v44 = vpop.permute.xlu0 %4073 }
 0x45c   : > { %4080 = vst.msk [vmem:[#allocation2 + $0x38] sm:$0xff] %vm1310_vm15, %v4076_v41  ;;  %4079 = vst.msk [vmem:[#allocation2 + $0x18] sm:$0xff] %vm1310_vm15, %v4074_v44  ;;  %v8193_v41 = vld [vmem:[%s13102_s6 + $0x74] ss:$28 sps:$4 sm:$0xff]   ;;  %v8194_v44 = vld [vmem:[%s13102_s6 + $0xa8] ss:$28 sps:$4 sm:$0xff]  }
 0x45f   : > { %v3154_v18 = vpop.permute.xlu1 %3153  ;;  %v3152_v11 = vpop.permute.xlu0 %3151 }
 0x460   : > { %3158 = vst.msk [vmem:[#allocation2 + $0x30] sm:$0xff] %vm1310_vm15, %v3154_v18  ;;  %3157 = vst.msk [vmem:[#allocation2 + $0x10] sm:$0xff] %vm1310_vm15, %v3152_v11  ;;  %v8196_v18 = vld [vmem:[%s13102_s6 + $0xac] ss:$28 sps:$4 sm:$0xff]  }
 0x463   : > { %v4106_v20 = vpop.permute.xlu1 %4105  ;;  %v4104_v6 = vpop.permute.xlu0 %4103 }
 0x464   : > { %4110 = vst.msk [vmem:[#allocation2 + $0x38] sm:$0xff] %vm1341_vm0, %v4106_v20  ;;  %4109 = vst.msk [vmem:[#allocation2 + $0x18] sm:$0xff] %vm1341_vm0, %v4104_v6  ;;  %v8607_v20 = vmov 0   ;;  %v8199_v6 = vld [vmem:[%s13102_s6 + $0xc] ss:$28 sps:$4 sm:$0xff]  }
 0x467   : > { %v3184_v27 = vpop.permute.xlu1 %3183  ;;  %v3182_v9 = vpop.permute.xlu0 %3181 }
 0x468   : > { %3188 = vst.msk [vmem:[#allocation2 + $0x30] sm:$0xff] %vm1341_vm0, %v3184_v27  ;;  %3187 = vst.msk [vmem:[#allocation2 + $0x10] sm:$0xff] %vm1341_vm0, %v3182_v9 }
 0x46b   : > { %v4136_v10 = vpop.permute.xlu1 %4135  ;;  %v4134_v24 = vpop.permute.xlu0 %4133 }
 0x46c   : > { %4140 = vst.msk [vmem:[#allocation2 + $0x38] sm:$0xff] %vm1372_vm1, %v4136_v10  ;;  %4139 = vst.msk [vmem:[#allocation2 + $0x18] sm:$0xff] %vm1372_vm1, %v4134_v24 }
 0x46f   : > { %v3214_v32 = vpop.permute.xlu1 %3213  ;;  %v3212_v49 = vpop.permute.xlu0 %3211 }
 0x470   : > { %3218 = vst.msk [vmem:[#allocation2 + $0x30] sm:$0xff] %vm1372_vm1, %v3214_v32  ;;  %3217 = vst.msk [vmem:[#allocation2 + $0x10] sm:$0xff] %vm1372_vm1, %v3212_v49  ;;  %v8225_v49 = vld [vmem:[%s13104_s8] ss:$16 sps:$4 sm:$0xff]  }
 0x473   : > { %v4144_v1 = vld [vmem:[#allocation2 + $0x18] sm:$0xff] }
 0x474   : > { %v4148_v47 = vld [vmem:[#allocation2 + $0x38] sm:$0xff] }
 0x475   : > { %v4152_v34 = vpack.c.bf16 %v4148_v47, %v4144_v1  ;;  %v8227_v1 = vld [vmem:[%s13104_s8 + $0x4] ss:$16 sps:$4 sm:$0xff]  }
 0x476   : > { %v8233_v47 = vld [vmem:[%s13104_s8 + $0x24] ss:$16 sps:$4 sm:$0xff]   ;;  %6562 = vmatprep.subr.bf16.mxu0 %v8227_v1  ;;  %v8230_v1 = vld [vmem:[%s13104_s8 + $0xc] ss:$16 sps:$4 sm:$0xff]  }
 0x477   : > { %4623 = vmatprep.mubr.bf16.mxu0 %v4152_v34  ;;  %v4143_v17 = vld [vmem:[#allocation2 + $0x10] sm:$0xff] }
 0x478   : > { %v4147_v50 = vld [vmem:[#allocation2 + $0x30] sm:$0xff] }
 0x479   : > { %v4151_v4 = vpack.c.bf16 %v4147_v50, %v4143_v17  ;;  %v8231_v34 = vld [vmem:[%s13104_s8 + $0x20] ss:$16 sps:$4 sm:$0xff]   ;;  %v8239_v17 = vld [vmem:[%s13104_s8 + $0x44] ss:$16 sps:$4 sm:$0xff]  }
 0x47a   : > { %v8237_v50 = vld [vmem:[%s13104_s8 + $0x40] ss:$16 sps:$4 sm:$0xff]  }
 0x47b   : > { %4624 = vmatmul.mubr.bf16.vlgmr.msra.gmra.mrb[64].mxu0 %v4151_v4  ;;  %v8245_v4 = vld [vmem:[%s13104_s8 + $0x64] ss:$16 sps:$4 sm:$0xff]  }
 0x47c   : > { %6563 = vmatpush1.bf16.msra.mxu0 %v8225_v49  ;;  %v8224_v49 = vld [vmem:[%s13102_s6 + $0xc0] ss:$28 sps:$4 sm:$0xff]  }
 0x47d   : > { %6564 = vmatprep.subr.bf16.mxu0 %v8233_v47  ;;  %v8228_v47 = vld [vmem:[%s13104_s8 + $0x8] ss:$16 sps:$4 sm:$0xff]  }
 0x480   : > { %6565 = vmatpush1.bf16.msra.mxu0 %v8231_v34  ;;  %v8236_v34 = vld [vmem:[%s13104_s8 + $0x2c] ss:$16 sps:$4 sm:$0xff]  }
 0x481   : > { %6566 = vmatprep.subr.bf16.mxu0 %v8239_v17  ;;  %v8234_v17 = vld [vmem:[%s13104_s8 + $0x28] ss:$16 sps:$4 sm:$0xff]  }
 0x484   : > { %6567 = vmatpush1.bf16.msra.mxu0 %v8237_v50  ;;  %v8242_v50 = vld [vmem:[%s13104_s8 + $0x4c] ss:$16 sps:$4 sm:$0xff]  }
 0x485   : > { %6568 = vmatprep.subr.bf16.mxu0 %v8245_v4  ;;  %v8240_v4 = vld [vmem:[%s13104_s8 + $0x48] ss:$16 sps:$4 sm:$0xff]  }
 0x488   : > { %6569 = vmatpush1.bf16.msra.mxu0 %v8243_v36  ;;  %v8248_v36 = vld [vmem:[%s13104_s8 + $0x6c] ss:$16 sps:$4 sm:$0xff]  }
 0x489   : > { %6570 = vmatprep.subr.bf16.mxu0 %v8251_v52  ;;  %v8246_v52 = vld [vmem:[%s13104_s8 + $0x68] ss:$16 sps:$4 sm:$0xff]  }
 0x48c   : > { %6571 = vmatpush1.bf16.msra.mxu0 %v8249_v26  ;;  %v8254_v26 = vld [vmem:[%s13104_s8 + $0x8c] ss:$16 sps:$4 sm:$0xff]  }
 0x48d   : > { %6572 = vmatprep.subr.bf16.mxu0 %v8257_v46  ;;  %v8252_v46 = vld [vmem:[%s13104_s8 + $0x88] ss:$16 sps:$4 sm:$0xff]  }
 0x490   : > { %6573 = vmatpush1.bf16.msra.mxu0 %v8255_v3  ;;  %v8260_v3 = vld [vmem:[%s13104_s8 + $0xac] ss:$16 sps:$4 sm:$0xff]  }
 0x491   : > { %6574 = vmatprep.subr.bf16.mxu0 %v8263_v56  ;;  %v8258_v56 = vld [vmem:[%s13104_s8 + $0xa8] ss:$16 sps:$4 sm:$0xff]  }
 0x494   : > { %6575 = vmatpush1.bf16.msra.mxu0 %v8261_v8  ;;  %v8266_v8 = vld [vmem:[%s13104_s8 + $0xcc] ss:$16 sps:$4 sm:$0xff]  }
 0x495   : > { %6576 = vmatprep.subr.bf16.mxu0 %v8269_v0  ;;  %v8264_v0 = vld [vmem:[%s13104_s8 + $0xc8] ss:$16 sps:$4 sm:$0xff]  }
 0x54e   : > { %v4625_v62 = vpop.f32.mrb[64].mxu0 }
 0x54f   : > { %v7854_v12 = vadd.f32 %v4625_v62, %v4221_v19  ;;  %v4627_v53 = vpop.f32.mrb[65].mxu0  ;;  %v8281_v62 = vld [vmem:[%s13104_s8 + $0x124] ss:$16 sps:$4 sm:$0xff]  }
 0x550   : > { %v7855_v5 = vadd.f32 %v4627_v53, %v4225_v40  ;;  %v4629_v16 = vpop.f32.mrb[66].mxu0  ;;  %v8285_v53 = vld [vmem:[%s13104_s8 + $0x140] ss:$16 sps:$4 sm:$0xff]  }
 0x551   : > { %v4634_v30 = vmax.f32 %v7854_v12, 0.0  ;;  %v7856_v59 = vadd.f32 %v4629_v16, %v4221_v19  ;;  %v4631_v58 = vpop.f32.mrb[67].mxu0  ;;  %v8267_v19 = vld [vmem:[%s13104_s8 + $0xe0] ss:$16 sps:$4 sm:$0xff]  }
 0x552   : > { %v4635_v51 = vmax.f32 %v7855_v5, 0.0  ;;  %v7857_v39 = vadd.f32 %v4631_v58, %v4225_v40  ;;  %6577 = vmatpush1.bf16.msra.mxu0 %v8267_v19  ;;  %v8273_v40 = vld [vmem:[%s13104_s8 + $0x100] ss:$16 sps:$4 sm:$0xff]   ;;  %v8272_v19 = vld [vmem:[%s13104_s8 + $0xec] ss:$16 sps:$4 sm:$0xff]  }
 0x553   : > { %v4649_v15 = vmul.f32 %v4642_v55, %v4634_v30  ;;  %v4636_v45 = vmax.f32 %v7856_v59, 0.0  ;;  %6578 = vmatprep.subr.bf16.mxu0 %v8275_v33  ;;  %v8279_v12 = vld [vmem:[%s13104_s8 + $0x120] ss:$16 sps:$4 sm:$0xff]   ;;  %v8305_v30 = vld [vmem:[%s13104_s8 + $0x1a4] ss:$16 sps:$4 sm:$0xff]  }
 0x554   : > { %v4650_v38 = vmul.f32 %v4646_v35, %v4635_v51  ;;  %v4637_v60 = vmax.f32 %v7857_v39, 0.0  ;;  %v8291_v5 = vld [vmem:[%s13104_s8 + $0x160] ss:$16 sps:$4 sm:$0xff]   ;;  %v8270_v33 = vld [vmem:[%s13104_s8 + $0xe8] ss:$16 sps:$4 sm:$0xff]  }
 0x555   : > { %v4651_v13 = vmul.f32 %v4642_v55, %v4636_v45  ;;  %v4664_v48 = vadd.f32 %v4657_v37, %v4649_v15  ;;  %v8287_v55 = vld [vmem:[%s13104_s8 + $0x144] ss:$16 sps:$4 sm:$0xff]   ;;  %v8297_v16 = vld [vmem:[%s13104_s8 + $0x180] ss:$16 sps:$4 sm:$0xff]  }
 0x556   : > { %v4652_v21 = vmul.f32 %v4646_v35, %v4637_v60  ;;  %v4665_v7 = vadd.f32 %v4661_v29, %v4650_v38  ;;  %6579 = vmatpush1.bf16.msra.mxu0 %v8273_v40  ;;  %v8299_v35 = vld [vmem:[%s13104_s8 + $0x184] ss:$16 sps:$4 sm:$0xff]   ;;  %v8303_v59 = vld [vmem:[%s13104_s8 + $0x1a0] ss:$16 sps:$4 sm:$0xff]   ;;  %v8278_v40 = vld [vmem:[%s13104_s8 + $0x10c] ss:$16 sps:$4 sm:$0xff]  }
 0x557   : > { %v4666_v2 = vadd.f32 %v4657_v37, %v4651_v13  ;;  %6580 = vmatprep.subr.bf16.mxu0 %v8281_v62  ;;  %v8276_v62 = vld [vmem:[%s13104_s8 + $0x108] ss:$16 sps:$4 sm:$0xff]  }
 0x558   : > { %v4667_v14 = vadd.f32 %v4661_v29, %v4652_v21 }
 0x559   : > { %v4668_v25 = vpack.c.bf16 %v4666_v2, %v4664_v48  ;;  %v8197_v2 = vld [vmem:[%s13102_s6 + $0x8] ss:$28 sps:$4 sm:$0xff]  }
 0x55a   : > { %v4669_v57 = vpack.c.bf16 %v4667_v14, %v4665_v7  ;;  %6581 = vmatpush1.bf16.msra.mxu0 %v8279_v12  ;;  %v8202_v14 = vld [vmem:[%s13102_s6 + $0x44] ss:$28 sps:$4 sm:$0xff]   ;;  %v8284_v12 = vld [vmem:[%s13104_s8 + $0x12c] ss:$16 sps:$4 sm:$0xff]  }
 0x55b   : > { %6582 = vmatprep.subr.bf16.mxu0 %v8287_v55  ;;  %v8282_v55 = vld [vmem:[%s13104_s8 + $0x128] ss:$16 sps:$4 sm:$0xff]  }
 0x55c   : > { %4894 = vmatprep.mubr.bf16.mxu1 %v4669_v57  ;;  %v8205_v57 = vld [vmem:[%s13102_s6 + $0x7c] ss:$28 sps:$4 sm:$0xff]  }
 0x55d   : > { %4895 = vmatmul.mubr.bf16.vlgmr.msra.gmra.mrb[64].mxu1 %v4668_v25  ;;  %v8200_v25 = vld [vmem:[%s13102_s6 + $0x40] ss:$28 sps:$4 sm:$0xff]  }
 0x55e   : > { %5146 = vmatpush1.bf16.msra.mxu1 %v8185_v63  ;;  %5177 = vmatprep.mubr.bf16.mxu1 %v8607_v20  ;;  %v8203_v63 = vld [vmem:[%s13102_s6 + $0x78] ss:$28 sps:$4 sm:$0xff]  }
 0x55f   : > { %5147 = vmatprep.subr.bf16.mxu1 %v8190_v23  ;;  %6583 = vmatpush1.bf16.msra.mxu0 %v8285_v53  ;;  %v8206_v23 = vld [vmem:[%s13102_s6 + $0xb0] ss:$28 sps:$4 sm:$0xff]  }
 0x560   : > { %6584 = vmatprep.subr.bf16.mxu0 %v8293_v54  ;;  %v8290_v53 = vld [vmem:[%s13104_s8 + $0x14c] ss:$16 sps:$4 sm:$0xff]   ;;  %v8288_v54 = vld [vmem:[%s13104_s8 + $0x148] ss:$16 sps:$4 sm:$0xff]  }
 0x562   : > { %5148 = vmatpush1.bf16.msra.mxu1 %v8188_v42  ;;  %v8211_v42 = vld [vmem:[%s13102_s6 + $0x14] ss:$28 sps:$4 sm:$0xff]  }
 0x563   : > { %5149 = vmatprep.subr.bf16.mxu1 %v8193_v41  ;;  %6585 = vmatpush1.bf16.msra.mxu0 %v8291_v5  ;;  %v8214_v41 = vld [vmem:[%s13102_s6 + $0x4c] ss:$28 sps:$4 sm:$0xff]  }
 0x564   : > { %6586 = vmatprep.subr.bf16.mxu0 %v8299_v35  ;;  %v8296_v5 = vld [vmem:[%s13104_s8 + $0x16c] ss:$16 sps:$4 sm:$0xff]   ;;  %v8311_v35 = vld [vmem:[%s13104_s8 + $0x1c4] ss:$16 sps:$4 sm:$0xff]  }
 0x566   : > { %5150 = vmatpush1.bf16.msra.mxu1 %v8191_v43  ;;  %v8209_v43 = vld [vmem:[%s13102_s6 + $0x10] ss:$28 sps:$4 sm:$0xff]  }
 0x567   : > { %5151 = vmatprep.subr.bf16.mxu1 %v8196_v18  ;;  %6587 = vmatpush1.bf16.msra.mxu0 %v8297_v16  ;;  %v8217_v18 = vld [vmem:[%s13102_s6 + $0x84] ss:$28 sps:$4 sm:$0xff]   ;;  %v8294_v16 = vld [vmem:[%s13104_s8 + $0x168] ss:$16 sps:$4 sm:$0xff]  }
 0x568   : > { %6588 = vmatprep.subr.bf16.mxu0 %v8305_v30  ;;  %v8309_v30 = vld [vmem:[%s13104_s8 + $0x1c0] ss:$16 sps:$4 sm:$0xff]  }
 0x56a   : > { %5152 = vmatpush1.bf16.msra.mxu1 %v8194_v44  ;;  %v8212_v44 = vld [vmem:[%s13102_s6 + $0x48] ss:$28 sps:$4 sm:$0xff]  }
 0x56b   : > { %5188 = vmatprep.subr.bf16.mxu1 %v8199_v6  ;;  %6589 = vmatpush1.bf16.msra.mxu0 %v8303_v59  ;;  %v8220_v6 = vld [vmem:[%s13102_s6 + $0xbc] ss:$28 sps:$4 sm:$0xff]  }
 0x56c   : > { %v8302_v59 = vld [vmem:[%s13104_s8 + $0x18c] ss:$16 sps:$4 sm:$0xff]   ;;  %6590 = vmatprep.subr.bf16.mxu0 %v8311_v35  ;;  %v8347_v35 = vld [vmem:[%s13104_s8 + $0x284] ss:$16 sps:$4 sm:$0xff]  }
 0x56f   : > { %6591 = vmatpush1.bf16.msra.mxu0 %v8309_v30 }
 0x630   : > { %v12306_v11 = vpop.f32.mrb[64].mxu1 }
 0x631   : > { %v12312_v27 = vpop.f32.mrb[65].mxu1 }
 0x632   : > { %v12314_v9 = vpop.f32.mrb[66].mxu1 }
 0x633   : > { %v7960_v10 = vpack.i.bf16 %v12314_v9, %v12306_v11  ;;  %v12318_v24 = vpop.f32.mrb[67].mxu1 }
 0x634   : > { %v7965_v32 = vpack.i.bf16 %v12318_v24, %v12312_v27 }
 0x635   : > { %7961 = vrot.lane.b32.xlu0 %v7960_v10, %s13922_s21  ;;  %v8608_v10 = vmov 0.0  }
 0x636   : > { %7966 = vrot.lane.b32.xlu1 %v7965_v32, %s13922_s21  ;;  %v8223_v32 = vld [vmem:[%s13102_s6 + $0x88] ss:$28 sps:$4 sm:$0xff]   ;;  %s13048_s21 = scalar_lea.hbm %s13106_s10, %s7476_s30 }
 0x6a7   : > { %v7962_v58 = vpop.permute.xlu0 %7961 }
 0x6a8   : > { %v7964_v51 = vunpack.i.h.bf16 %v7962_v58  ;;  %v7963_v39 = vunpack.i.l.bf16 %v7962_v58  ;;  %v7967_v15 = vpop.permute.xlu1 %7966  ;;  %v8315_v58 = vld [vmem:[%s13104_s8 + $0x1e0] ss:$16 sps:$4 sm:$0xff]  }
 0x6a9   : > { %v7969_v37 = vunpack.i.h.bf16 %v7967_v15  ;;  %v7968_v45 = vunpack.i.l.bf16 %v7967_v15  ;;  %v8323_v15 = vld [vmem:[%s13104_s8 + $0x204] ss:$16 sps:$4 sm:$0xff]  }
 0x6aa   : > { %v4914_v38 = vmax.f32 %v12314_v9, %v7964_v51  ;;  %v4913_v29 = vmax.f32 %v12306_v11, %v7963_v39  ;;  %v8215_v11 = vld [vmem:[%s13102_s6 + $0x80] ss:$28 sps:$4 sm:$0xff]   ;;  %v8221_v9 = vld [vmem:[%s13102_s6 + $0x18] ss:$28 sps:$4 sm:$0xff]  }
 0x6ab   : > { %v4924_v60 = vmax.f32 %v12318_v24, %v7969_v37  ;;  %v4923_v13 = vmax.f32 %v12312_v27, %v7968_v45  ;;  %v8218_v27 = vld [vmem:[%s13102_s6 + $0xb8] ss:$28 sps:$4 sm:$0xff]   ;;  %v8222_v24 = vld [vmem:[%s13102_s6 + $0x50] ss:$28 sps:$4 sm:$0xff]  }
 0x6ac   : > { %v8317_v51 = vld [vmem:[%s13104_s8 + $0x1e4] ss:$16 sps:$4 sm:$0xff]   ;;  %v8300_v39 = vld [vmem:[%s13104_s8 + $0x188] ss:$16 sps:$4 sm:$0xff]   ;;  %v8308_v37 = vld [vmem:[%s13104_s8 + $0x1ac] ss:$16 sps:$4 sm:$0xff]  }
 0x6ad   : > { %v4926_v21 = vmax.f32 %v4914_v38, %v4924_v60  ;;  %v4925_v48 = vmax.f32 %v4913_v29, %v4923_v13  ;;  %6592 = vmatprep.subr.bf16.mxu0 %v8317_v51  ;;  %v8306_v45 = vld [vmem:[%s13104_s8 + $0x1a8] ss:$16 sps:$4 sm:$0xff]   ;;  %v8314_v38 = vld [vmem:[%s13104_s8 + $0x1cc] ss:$16 sps:$4 sm:$0xff]  }
 0x6ae   : > { %6593 = vmatpush1.bf16.msra.mxu0 %v8315_v58  ;;  %v8312_v29 = vld [vmem:[%s13104_s8 + $0x1c8] ss:$16 sps:$4 sm:$0xff]   ;;  %v8320_v60 = vld [vmem:[%s13104_s8 + $0x1ec] ss:$16 sps:$4 sm:$0xff]  }
 0x6af   : > { %v4927_v7 = vpack.c.bf16 %v4926_v21, %v4925_v48  ;;  %6605 = vmatprep.subr.bf16.mxu0 %v8323_v15  ;;  %v8318_v13 = vld [vmem:[%s13104_s8 + $0x1e8] ss:$16 sps:$4 sm:$0xff]   ;;  %v8326_v21 = vld [vmem:[%s13104_s8 + $0x20c] ss:$16 sps:$4 sm:$0xff]   ;;  %v12592_v48 = vld [vmem:[%s13103_s7] sm:$0x7f] }
 0x6b0   : > { %v8348_v15 = vld [vmem:[%s13104_s8 + $0x288] ss:$16 sps:$4 sm:$0xff]  }
 0x6b1   : > { %7262 = vmatmul.mubr.msk.bf16.vlgmr.msra.gmra.mrb[68].mxu1 %vm5141_vm2, %v4927_v7 }
 0x6b2   : > { %5189 = vmatpush1.bf16.msra.mxu1 %v8197_v2  ;;  %5220 = vmatprep.mubr.bf16.mxu1 %v8607_v20  ;;  %v4965_v2 = vrot.slane %v12592_v48, %v12262_v61 }
 0x6b3   : > { %5190 = vmatprep.subr.bf16.mxu1 %v8202_v14 }
 0x6b6   : > { %5191 = vmatpush1.bf16.msra.mxu1 %v8200_v25 }
 0x6b7   : > { %5192 = vmatprep.subr.bf16.mxu1 %v8205_v57 }
 0x6ba   : > { %5193 = vmatpush1.bf16.msra.mxu1 %v8203_v63 }
 0x6bb   : > { %5194 = vmatprep.subr.bf16.mxu1 %v8208_v28 }
 0x6be   : > { %5195 = vmatpush1.bf16.msra.mxu1 %v8206_v23 }
 0x6bf   : > { %5231 = vmatprep.subr.bf16.mxu1 %v8211_v42 }
 0x6c1   : > { %7263 = vmatmul.mubr.msk.bf16.vlgmr.msra.gmra.mrb[72].mxu1 %vm5141_vm2, %v4927_v7 }
 0x6c2   : > { %5232 = vmatpush1.bf16.msra.mxu1 %v8209_v43  ;;  %5263 = vmatprep.mubr.bf16.mxu1 %v8607_v20 }
 0x6c3   : > { %5233 = vmatprep.subr.bf16.mxu1 %v8214_v41 }
 0x6c6   : > { %5234 = vmatpush1.bf16.msra.mxu1 %v8212_v44 }
 0x6c7   : > { %5235 = vmatprep.subr.bf16.mxu1 %v8217_v18 }
 0x6ca   : > { %5236 = vmatpush1.bf16.msra.mxu1 %v8215_v11 }
 0x6cb   : > { %5237 = vmatprep.subr.bf16.mxu1 %v8220_v6 }
 0x6ce   : > { %5238 = vmatpush1.bf16.msra.mxu1 %v8218_v27 }
 0x6cf   : > { %7842 = vmatprep.subr.bf16.mxu1 %v8608_v10 }
 0x6d1   : > { %7264 = vmatmul.mubr.msk.bf16.vlgmr.msra.gmra.mrb[76].mxu1 %vm5141_vm2, %v4927_v7 }
 0x6d2   : > { %7843 = vmatpush3.bf16.msra.mxu1 %v8221_v9  ;;  %7850 = vmatprep.mubr.msk.bf16.mxu1 %vm8609_vm3, %v8608_v10  ;;  %v8321_v9 = vld [vmem:[%s13104_s8 + $0x200] ss:$16 sps:$4 sm:$0xff]  }
 0x6d3   : > { %7844 = vmatprep.subr.bf16.mxu1 %v8608_v10 }
 0x6d6   : > { %7845 = vmatpush3.bf16.msra.mxu1 %v8222_v24  ;;  %v8329_v24 = vld [vmem:[%s13104_s8 + $0x224] ss:$16 sps:$4 sm:$0xff]  }
 0x6d7   : > { %7846 = vmatprep.subr.bf16.mxu1 %v8608_v10 }
 0x6da   : > { %7847 = vmatpush3.bf16.msra.mxu1 %v8223_v32  ;;  %v8332_v32 = vld [vmem:[%s13104_s8 + $0x22c] ss:$16 sps:$4 sm:$0xff]  }
 0x6db   : > { %7848 = vmatprep.subr.bf16.mxu1 %v8608_v10  ;;  %v8324_v10 = vld [vmem:[%s13104_s8 + $0x208] ss:$16 sps:$4 sm:$0xff]  }
 0x6de   : > { %7849 = vmatpush3.bf16.msra.mxu1 %v8224_v49  ;;  %v4972_v49 = vsub.s32 2, %v12259_v31 }
 0x6df   : > { %6734 = vmatprep.subr.bf16.mxu1 %v8230_v1  ;;  %v4976_v1 = vsub.s32 3, %v12259_v31 }
 0x6e1   : > { %7851 = vmatmul.mubr.msk.bf16.vlgmr.msra.gmra.mrb[80].mxu1 %vm5141_vm2, %v4927_v7  ;;  %v4969_v7 = vrot.slane %v12592_v48, %v12268_v22 }
 0x6e2   : > { %6735 = vmatpush1.bf16.msra.mxu1 %v8228_v47  ;;  %v8327_v47 = vld [vmem:[%s13104_s8 + $0x220] ss:$16 sps:$4 sm:$0xff]  }
 0x6e3   : > { %6736 = vmatprep.subr.bf16.mxu1 %v8236_v34  ;;  %v8330_v34 = vld [vmem:[%s13104_s8 + $0x228] ss:$16 sps:$4 sm:$0xff]  }
 0x6e6   : > { %6737 = vmatpush1.bf16.msra.mxu1 %v8234_v17  ;;  %v4973_v17 = vrot.slane %v12592_v48, %v4972_v49 }
 0x6e7   : > { %6738 = vmatprep.subr.bf16.mxu1 %v8242_v50  ;;  %v8335_v50 = vld [vmem:[%s13104_s8 + $0x244] ss:$16 sps:$4 sm:$0xff]  }
 0x6ea   : > { %6739 = vmatpush1.bf16.msra.mxu1 %v8240_v4  ;;  %v8338_v4 = vld [vmem:[%s13104_s8 + $0x24c] ss:$16 sps:$4 sm:$0xff]  }
 0x6eb   : > { %6740 = vmatprep.subr.bf16.mxu1 %v8248_v36  ;;  %v4977_v36 = vrot.slane %v12592_v48, %v4976_v1 }
 0x6ee   : > { %6741 = vmatpush1.bf16.msra.mxu1 %v8246_v52 }
 0x6ef   : > { %6742 = vmatprep.subr.bf16.mxu1 %v8254_v26  ;;  %v8333_v26 = vld [vmem:[%s13104_s8 + $0x240] ss:$16 sps:$4 sm:$0xff]  }
 0x6f2   : > { %6743 = vmatpush1.bf16.msra.mxu1 %v8252_v46  ;;  %v8336_v46 = vld [vmem:[%s13104_s8 + $0x248] ss:$16 sps:$4 sm:$0xff]  }
 0x6f3   : > { %6744 = vmatprep.subr.bf16.mxu1 %v8260_v3 }
 0x6f6   : > { %6745 = vmatpush1.bf16.msra.mxu1 %v8258_v56 }
 0x6f7   : > { %6746 = vmatprep.subr.bf16.mxu1 %v8266_v8  ;;  %v8341_v8 = vld [vmem:[%s13104_s8 + $0x264] ss:$16 sps:$4 sm:$0xff]  }
 0x6fa   : > { %6747 = vmatpush1.bf16.msra.mxu1 %v8264_v0  ;;  %v8344_v0 = vld [vmem:[%s13104_s8 + $0x26c] ss:$16 sps:$4 sm:$0xff]  }
 0x6fb   : > { %6748 = vmatprep.subr.bf16.mxu1 %v8272_v19 }
 0x6fe   : > { %6749 = vmatpush1.bf16.msra.mxu1 %v8270_v33 }
 0x6ff   : > { %6750 = vmatprep.subr.bf16.mxu1 %v8278_v40 }
 0x702   : > { %6751 = vmatpush1.bf16.msra.mxu1 %v8276_v62 }
 0x703   : > { %6752 = vmatprep.subr.bf16.mxu1 %v8284_v12 }
 0x706   : > { %6753 = vmatpush1.bf16.msra.mxu1 %v8282_v55  ;;  %v8339_v55 = vld [vmem:[%s13104_s8 + $0x260] ss:$16 sps:$4 sm:$0xff]  }
 0x707   : > { %6754 = vmatprep.subr.bf16.mxu1 %v8290_v53  ;;  %v8342_v53 = vld [vmem:[%s13104_s8 + $0x268] ss:$16 sps:$4 sm:$0xff]  }
 0x70a   : > { %6755 = vmatpush1.bf16.msra.mxu1 %v8288_v54 }
 0x70b   : > { %6756 = vmatprep.subr.bf16.mxu1 %v8296_v5 }
 0x70e   : > { %6757 = vmatpush1.bf16.msra.mxu1 %v8294_v16  ;;  %v8350_v16 = vld [vmem:[%s13104_s8 + $0x28c] ss:$16 sps:$4 sm:$0xff]  }
 0x70f   : > { %6758 = vmatprep.subr.bf16.mxu1 %v8302_v59 }
 0x712   : > { %6759 = vmatpush1.bf16.msra.mxu1 %v8300_v39  ;;  %v8345_v39 = vld [vmem:[%s13104_s8 + $0x280] ss:$16 sps:$4 sm:$0xff]  }
 0x713   : > { %6760 = vmatprep.subr.bf16.mxu1 %v8308_v37  ;;  %v8353_v37 = vld [vmem:[%s13104_s8 + $0x2a4] ss:$16 sps:$4 sm:$0xff]  }
 0x716   : > { %6761 = vmatpush1.bf16.msra.mxu1 %v8306_v45  ;;  %v8356_v45 = vld [vmem:[%s13104_s8 + $0x2ac] ss:$16 sps:$4 sm:$0xff]  }
 0x717   : > { %6762 = vmatprep.subr.bf16.mxu1 %v8314_v38  ;;  %v4980_v38 = vsub.s32 4, %v12259_v31 }
 0x71a   : > { %6763 = vmatpush1.bf16.msra.mxu1 %v8312_v29  ;;  %v4984_v29 = vsub.s32 5, %v12259_v31 }
 0x71b   : > { %6764 = vmatprep.subr.bf16.mxu1 %v8320_v60  ;;  %v8351_v60 = vld [vmem:[%s13104_s8 + $0x2a0] ss:$16 sps:$4 sm:$0xff]  }
 0x71e   : > { %6765 = vmatpush1.bf16.msra.mxu1 %v8318_v13  ;;  %v8354_v13 = vld [vmem:[%s13104_s8 + $0x2a8] ss:$16 sps:$4 sm:$0xff]  }
 0x71f   : > { %6777 = vmatprep.subr.bf16.mxu1 %v8326_v21  ;;  %v4981_v21 = vrot.slane %v12592_v48, %v4980_v38  ;;  %v8393_v38 = vld [vmem:[%s13104_s8 + $0x380] ss:$16 sps:$4 sm:$0xff]  }
 0x784   : > { %v5179_v14 = vpop.f32.mrb[68].mxu1 }
 0x785   : > { %v5180_v25 = vadd.f32 %v5179_v14, %v4965_v2  ;;  %v5181_v57 = vpop.f32.mrb[69].mxu1  ;;  %v4985_v14 = vrot.slane %v12592_v48, %v4984_v29  ;;  %v8396_v29 = vld [vmem:[%s13104_s8 + $0x388] ss:$16 sps:$4 sm:$0xff]  }
 0x786   : > { %v5182_v63 = vadd.f32 %v5181_v57, %v4969_v7  ;;  %v5183_v28 = vpop.f32.mrb[70].mxu1  ;;  %v8357_v57 = vld [vmem:[%s13104_s8 + $0x2c0] ss:$16 sps:$4 sm:$0xff]  }
 0x787   : > { %v5184_v23 = vadd.f32 %v5183_v28, %v4965_v2  ;;  %v5185_v42 = vpop.f32.mrb[71].mxu1  ;;  %v5315_v41 = vmax.f32 %v5180_v25, 0.0  ;;  %v8359_v2 = vld [vmem:[%s13104_s8 + $0x2c4] ss:$16 sps:$4 sm:$0xff]  }
 0x788   : > { %v5186_v43 = vadd.f32 %v5185_v42, %v4969_v7  ;;  %v5316_v18 = vmax.f32 %v5182_v63, 0.0  ;;  %v8362_v7 = vld [vmem:[%s13104_s8 + $0x2cc] ss:$16 sps:$4 sm:$0xff]   ;;  %v8360_v63 = vld [vmem:[%s13104_s8 + $0x2c8] ss:$16 sps:$4 sm:$0xff]  }
 0x789   : > { %v5322_v44 = vmax.f32 %v5184_v23, 0.0  ;;  %v8365_v42 = vld [vmem:[%s13104_s8 + $0x2e4] ss:$16 sps:$4 sm:$0xff]  }
 0x78a   : > { %v5323_v11 = vmax.f32 %v5186_v43, 0.0  ;;  %v8368_v43 = vld [vmem:[%s13104_s8 + $0x2ec] ss:$16 sps:$4 sm:$0xff]  }
 0x78b   : > { %v5329_v6 = vpack.c.bf16 %v5322_v44, %v5315_v41 }
 0x78c   : > { %v5330_v27 = vpack.c.bf16 %v5323_v11, %v5316_v18 }
 0x78e   : > { %6594 = vmatprep.mubr.bf16.mxu0 %v5330_v27  ;;  %6766 = vmatprep.mubr.bf16.mxu1 %v5330_v27  ;;  %v8363_v27 = vld [vmem:[%s13104_s8 + $0x2e0] ss:$16 sps:$4 sm:$0xff]  }
 0x78f   : > { %6595 = vmatmul.mubr.bf16.vlgmr.msra.gmra.mrb[68].mxu0 %v5329_v6  ;;  %6767 = vmatmul.mubr.bf16.vlgmr.msra.gmra.mrb[84].mxu1 %v5329_v6 }
 0x790   : > { %6606 = vmatpush1.bf16.msra.mxu0 %v8321_v9  ;;  %6778 = vmatpush1.bf16.msra.mxu1 %v8324_v10  ;;  %v8366_v9 = vld [vmem:[%s13104_s8 + $0x2e8] ss:$16 sps:$4 sm:$0xff]  }
 0x791   : > { %6607 = vmatprep.subr.bf16.mxu0 %v8329_v24  ;;  %6779 = vmatprep.subr.bf16.mxu1 %v8332_v32  ;;  %v8371_v32 = vld [vmem:[%s13104_s8 + $0x304] ss:$16 sps:$4 sm:$0xff]  }
 0x794   : > { %v5222_v52 = vpop.f32.mrb[72].mxu1  ;;  %6608 = vmatpush1.bf16.msra.mxu0 %v8327_v47  ;;  %6780 = vmatpush1.bf16.msra.mxu1 %v8330_v34  ;;  %v8374_v47 = vld [vmem:[%s13104_s8 + $0x30c] ss:$16 sps:$4 sm:$0xff]  }
 0x795   : > { %v5223_v3 = vadd.f32 %v5222_v52, %v4973_v17  ;;  %v5224_v56 = vpop.f32.mrb[73].mxu1  ;;  %6609 = vmatprep.subr.bf16.mxu0 %v8335_v50  ;;  %6781 = vmatprep.subr.bf16.mxu1 %v8338_v4  ;;  %v8372_v52 = vld [vmem:[%s13104_s8 + $0x308] ss:$16 sps:$4 sm:$0xff]  }
 0x796   : > { %v5225_v19 = vadd.f32 %v5224_v56, %v4977_v36  ;;  %v5226_v33 = vpop.f32.mrb[74].mxu1  ;;  %v8375_v56 = vld [vmem:[%s13104_s8 + $0x320] ss:$16 sps:$4 sm:$0xff]  }
 0x797   : > { %v5227_v40 = vadd.f32 %v5226_v33, %v4973_v17  ;;  %v5228_v62 = vpop.f32.mrb[75].mxu1  ;;  %v5317_v54 = vmax.f32 %v5223_v3, 0.0  ;;  %v4988_v3 = vsub.s32 6, %v12259_v31  ;;  %v8386_v33 = vld [vmem:[%s13104_s8 + $0x34c] ss:$16 sps:$4 sm:$0xff]  }
 0x798   : > { %v5229_v12 = vadd.f32 %v5228_v62, %v4977_v36  ;;  %6610 = vmatpush1.bf16.msra.mxu0 %v8333_v26  ;;  %6782 = vmatpush1.bf16.msra.mxu1 %v8336_v46  ;;  %v5318_v30 = vmax.f32 %v5225_v19, 0.0  ;;  %v8369_v36 = vld [vmem:[%s13104_s8 + $0x300] ss:$16 sps:$4 sm:$0xff]   ;;  %v8377_v26 = vld [vmem:[%s13104_s8 + $0x324] ss:$16 sps:$4 sm:$0xff]  }
 0x799   : > { %v5324_v5 = vmax.f32 %v5227_v40, 0.0  ;;  %6611 = vmatprep.subr.bf16.mxu0 %v8341_v8  ;;  %6783 = vmatprep.subr.bf16.mxu1 %v8344_v0  ;;  %v8380_v46 = vld [vmem:[%s13104_s8 + $0x32c] ss:$16 sps:$4 sm:$0xff]   ;;  %v8378_v8 = vld [vmem:[%s13104_s8 + $0x328] ss:$16 sps:$4 sm:$0xff]   ;;  %v4989_v0 = vrot.slane %v12592_v48, %v4988_v3 }
 0x79a   : > { %v5325_v59 = vmax.f32 %v5229_v12, 0.0  ;;  %v8383_v19 = vld [vmem:[%s13104_s8 + $0x344] ss:$16 sps:$4 sm:$0xff]   ;;  %v8381_v62 = vld [vmem:[%s13104_s8 + $0x340] ss:$16 sps:$4 sm:$0xff]  }
 0x79b   : > { %v12654_v58 = vpack.c.bf16 %v5324_v5, %v5317_v54  ;;  %v8384_v12 = vld [vmem:[%s13104_s8 + $0x348] ss:$16 sps:$4 sm:$0xff]   ;;  %v8392_v54 = vld [vmem:[%s13104_s8 + $0x36c] ss:$16 sps:$4 sm:$0xff]   ;;  %v8449_v3 = vld [vmem:[%s13104_s8 + $0x4a4] ss:$16 sps:$4 sm:$0xff]  }
 0x79c   : > { %v5332_v51 = vpack.c.bf16 %v5325_v59, %v5318_v30  ;;  %6612 = vmatpush1.bf16.msra.mxu0 %v8339_v55  ;;  %6784 = vmatpush1.bf16.msra.mxu1 %v8342_v53  ;;  %v8389_v53 = vld [vmem:[%s13104_s8 + $0x364] ss:$16 sps:$4 sm:$0xff]   ;;  %v8387_v30 = vld [vmem:[%s13104_s8 + $0x360] ss:$16 sps:$4 sm:$0xff]   ;;  %v8390_v59 = vld [vmem:[%s13104_s8 + $0x368] ss:$16 sps:$4 sm:$0xff]  }
 0x79d   : > { %6613 = vmatprep.subr.bf16.mxu0 %v8347_v35  ;;  %6785 = vmatprep.subr.bf16.mxu1 %v8350_v16 }
 0x79e   : > { %6637 = vmatprep.mubr.bf16.mxu0 %v5332_v51  ;;  %6809 = vmatprep.mubr.bf16.mxu1 %v5332_v51 }
 0x7a0   : > { %6614 = vmatpush1.bf16.msra.mxu0 %v8345_v39  ;;  %6786 = vmatpush1.bf16.msra.mxu1 %v8348_v15  ;;  %v8395_v15 = vld [vmem:[%s13104_s8 + $0x384] ss:$16 sps:$4 sm:$0xff]  }
 0x7a1   : > { %6615 = vmatprep.subr.bf16.mxu0 %v8353_v37  ;;  %6787 = vmatprep.subr.bf16.mxu1 %v8356_v45  ;;  %v8398_v37 = vld [vmem:[%s13104_s8 + $0x38c] ss:$16 sps:$4 sm:$0xff]  }
 0x7a4   : > { %v5265_v25 = vpop.f32.mrb[76].mxu1  ;;  %6616 = vmatpush1.bf16.msra.mxu0 %v8351_v60  ;;  %6788 = vmatpush1.bf16.msra.mxu1 %v8354_v13  ;;  %v8401_v60 = vld [vmem:[%s13104_s8 + $0x3a4] ss:$16 sps:$4 sm:$0xff]   ;;  %v8404_v13 = vld [vmem:[%s13104_s8 + $0x3ac] ss:$16 sps:$4 sm:$0xff]  }
 0x7a5   : > { %v5266_v28 = vadd.f32 %v5265_v25, %v4981_v21  ;;  %v5267_v23 = vpop.f32.mrb[77].mxu1  ;;  %6617 = vmatprep.subr.bf16.mxu0 %v8359_v2  ;;  %6789 = vmatprep.subr.bf16.mxu1 %v8362_v7  ;;  %v8402_v2 = vld [vmem:[%s13104_s8 + $0x3a8] ss:$16 sps:$4 sm:$0xff]   ;;  %v8407_v7 = vld [vmem:[%s13104_s8 + $0x3c4] ss:$16 sps:$4 sm:$0xff]  }
 0x7a6   : > { %v5268_v41 = vadd.f32 %v5267_v23, %v4985_v14  ;;  %v5269_v44 = vpop.f32.mrb[78].mxu1  ;;  %v8405_v25 = vld [vmem:[%s13104_s8 + $0x3c0] ss:$16 sps:$4 sm:$0xff]  }
 0x7a7   : > { %v5270_v18 = vadd.f32 %v5269_v44, %v4981_v21  ;;  %v5271_v11 = vpop.f32.mrb[79].mxu1  ;;  %v5319_v10 = vmax.f32 %v5266_v28, 0.0  ;;  %v8399_v21 = vld [vmem:[%s13104_s8 + $0x3a0] ss:$16 sps:$4 sm:$0xff]   ;;  %v8416_v28 = vld [vmem:[%s13104_s8 + $0x3ec] ss:$16 sps:$4 sm:$0xff]  }
 0x7a8   : > { %v5272_v6 = vadd.f32 %v5271_v11, %v4985_v14  ;;  %6618 = vmatpush1.bf16.msra.mxu0 %v8357_v57  ;;  %6790 = vmatpush1.bf16.msra.mxu1 %v8360_v63  ;;  %v5320_v34 = vmax.f32 %v5268_v41, 0.0  ;;  %v8410_v14 = vld [vmem:[%s13104_s8 + $0x3cc] ss:$16 sps:$4 sm:$0xff]   ;;  %v8408_v57 = vld [vmem:[%s13104_s8 + $0x3c8] ss:$16 sps:$4 sm:$0xff]  }
 0x7a9   : > { %v5326_v24 = vmax.f32 %v5270_v18, 0.0  ;;  %6619 = vmatprep.subr.bf16.mxu0 %v8365_v42  ;;  %6791 = vmatprep.subr.bf16.mxu1 %v8368_v43  ;;  %v8413_v63 = vld [vmem:[%s13104_s8 + $0x3e4] ss:$16 sps:$4 sm:$0xff]   ;;  %v8411_v23 = vld [vmem:[%s13104_s8 + $0x3e0] ss:$16 sps:$4 sm:$0xff]  }
 0x7aa   : > { %v5327_v17 = vmax.f32 %v5272_v6, 0.0  ;;  %v8414_v42 = vld [vmem:[%s13104_s8 + $0x3e8] ss:$16 sps:$4 sm:$0xff]   ;;  %v8419_v43 = vld [vmem:[%s13104_s8 + $0x404] ss:$16 sps:$4 sm:$0xff]  }
 0x7ab   : > { %v12708_v50 = vpack.c.bf16 %v5326_v24, %v5319_v10  ;;  %v8422_v41 = vld [vmem:[%s13104_s8 + $0x40c] ss:$16 sps:$4 sm:$0xff]   ;;  %v8417_v44 = vld [vmem:[%s13104_s8 + $0x400] ss:$16 sps:$4 sm:$0xff]   ;;  %v8420_v18 = vld [vmem:[%s13104_s8 + $0x408] ss:$16 sps:$4 sm:$0xff]  }
 0x7ac   : > { %v12710_v4 = vpack.c.bf16 %v5327_v17, %v5320_v34  ;;  %6620 = vmatpush1.bf16.msra.mxu0 %v8363_v27  ;;  %6792 = vmatpush1.bf16.msra.mxu1 %v8366_v9  ;;  %v8425_v11 = vld [vmem:[%s13104_s8 + $0x424] ss:$16 sps:$4 sm:$0xff]   ;;  %v8428_v6 = vld [vmem:[%s13104_s8 + $0x42c] ss:$16 sps:$4 sm:$0xff]   ;;  %v8423_v27 = vld [vmem:[%s13104_s8 + $0x420] ss:$16 sps:$4 sm:$0xff]  }
 0x7ad   : > { %6621 = vmatprep.subr.bf16.mxu0 %v8371_v32  ;;  %6793 = vmatprep.subr.bf16.mxu1 %v8374_v47  ;;  %v8426_v9 = vld [vmem:[%s13104_s8 + $0x428] ss:$16 sps:$4 sm:$0xff]   ;;  %v8431_v10 = vld [vmem:[%s13104_s8 + $0x444] ss:$16 sps:$4 sm:$0xff]   ;;  %v8429_v24 = vld [vmem:[%s13104_s8 + $0x440] ss:$16 sps:$4 sm:$0xff]  }
 0x7ae   : > { %v8432_v32 = vld [vmem:[%s13104_s8 + $0x448] ss:$16 sps:$4 sm:$0xff]   ;;  %v8437_v47 = vld [vmem:[%s13104_s8 + $0x464] ss:$16 sps:$4 sm:$0xff]   ;;  %v8440_v34 = vld [vmem:[%s13104_s8 + $0x46c] ss:$16 sps:$4 sm:$0xff]  }
 0x7af   : > { %v8435_v17 = vld [vmem:[%s13104_s8 + $0x460] ss:$16 sps:$4 sm:$0xff]  }
 0x7b0   : > { %6622 = vmatpush1.bf16.msra.mxu0 %v8369_v36  ;;  %6794 = vmatpush1.bf16.msra.mxu1 %v8372_v52  ;;  %v8443_v36 = vld [vmem:[%s13104_s8 + $0x484] ss:$16 sps:$4 sm:$0xff]   ;;  %v8446_v52 = vld [vmem:[%s13104_s8 + $0x48c] ss:$16 sps:$4 sm:$0xff]  }
 0x7b1   : > { %6623 = vmatprep.subr.bf16.mxu0 %v8377_v26  ;;  %6795 = vmatprep.subr.bf16.mxu1 %v8380_v46  ;;  %v8441_v26 = vld [vmem:[%s13104_s8 + $0x480] ss:$16 sps:$4 sm:$0xff]   ;;  %v8444_v46 = vld [vmem:[%s13104_s8 + $0x488] ss:$16 sps:$4 sm:$0xff]  }
 0x7b4   : > { %v5308_v40 = vpop.f32.mrb[80].mxu1  ;;  %6624 = vmatpush1.bf16.msra.mxu0 %v8375_v56  ;;  %6796 = vmatpush1.bf16.msra.mxu1 %v8378_v8  ;;  %v8452_v56 = vld [vmem:[%s13104_s8 + $0x4ac] ss:$16 sps:$4 sm:$0xff]   ;;  %v8447_v8 = vld [vmem:[%s13104_s8 + $0x4a0] ss:$16 sps:$4 sm:$0xff]  }
 0x7b5   : > { %v5309_v48 = vadd.f32 %v5308_v40, %v4989_v0  ;;  %v7852_v55 = vpop.f32.mrb[81].mxu1  ;;  %6625 = vmatprep.subr.bf16.mxu0 %v8383_v19  ;;  %6797 = vmatprep.subr.bf16.mxu1 %v8386_v33  ;;  %v8455_v19 = vld [vmem:[%s13104_s8 + $0x4c4] ss:$16 sps:$4 sm:$0xff]   ;;  %v8458_v33 = vld [vmem:[%s13104_s8 + $0x4cc] ss:$16 sps:$4 sm:$0xff]  }
 0x7b6   : > { %v5311_v5 = vpop.f32.mrb[82].mxu1  ;;  %v8453_v40 = vld [vmem:[%s13104_s8 + $0x4c0] ss:$16 sps:$4 sm:$0xff]  }
 0x7b7   : > { %v5312_v35 = vadd.f32 %v5311_v5, %v4989_v0  ;;  %v7853_v16 = vpop.f32.mrb[83].mxu1  ;;  %v5321_v51 = vmax.f32 %v5309_v48, 0.0  ;;  %v8450_v0 = vld [vmem:[%s13104_s8 + $0x4a8] ss:$16 sps:$4 sm:$0xff]   ;;  %v8464_v48 = vld [vmem:[%s13104_s8 + $0x4ec] ss:$16 sps:$4 sm:$0xff]  }
 0x7b8   : > { %6626 = vmatpush1.bf16.msra.mxu0 %v8381_v62  ;;  %6798 = vmatpush1.bf16.msra.mxu1 %v8384_v12  ;;  %v8456_v62 = vld [vmem:[%s13104_s8 + $0x4c8] ss:$16 sps:$4 sm:$0xff]   ;;  %v8461_v12 = vld [vmem:[%s13104_s8 + $0x4e4] ss:$16 sps:$4 sm:$0xff]   ;;  %v8459_v55 = vld [vmem:[%s13104_s8 + $0x4e0] ss:$16 sps:$4 sm:$0xff]  }
 0x7b9   : > { %v5328_v39 = vmax.f32 %v5312_v35, 0.0  ;;  %6627 = vmatprep.subr.bf16.mxu0 %v8389_v53  ;;  %6799 = vmatprep.subr.bf16.mxu1 %v8392_v54  ;;  %v8462_v53 = vld [vmem:[%s13104_s8 + $0x4e8] ss:$16 sps:$4 sm:$0xff]   ;;  %v8467_v54 = vld [vmem:[%s13104_s8 + $0x504] ss:$16 sps:$4 sm:$0xff]  }
 0x7ba   : > { %v8470_v5 = vld [vmem:[%s13104_s8 + $0x50c] ss:$16 sps:$4 sm:$0xff]   ;;  %v8465_v35 = vld [vmem:[%s13104_s8 + $0x500] ss:$16 sps:$4 sm:$0xff]   ;;  %v8468_v16 = vld [vmem:[%s13104_s8 + $0x508] ss:$16 sps:$4 sm:$0xff]  }
 0x7bb   : > { %v12762_v45 = vpack.c.bf16 %v5328_v39, %v5321_v51  ;;  %v8471_v51 = vld [vmem:[%s13104_s8 + $0x520] ss:$16 sps:$4 sm:$0xff]   ;;  %v8474_v39 = vld [vmem:[%s13104_s8 + $0x528] ss:$16 sps:$4 sm:$0xff]  }
 0x7bc   : > { %6628 = vmatpush1.bf16.msra.mxu0 %v8387_v30  ;;  %6800 = vmatpush1.bf16.msra.mxu1 %v8390_v59  ;;  %v8473_v30 = vld [vmem:[%s13104_s8 + $0x524] ss:$16 sps:$4 sm:$0xff]   ;;  %v8476_v59 = vld [vmem:[%s13104_s8 + $0x52c] ss:$16 sps:$4 sm:$0xff]  }
 0x7bd   : > { %6629 = vmatprep.subr.bf16.mxu0 %v8395_v15  ;;  %6801 = vmatprep.subr.bf16.mxu1 %v8398_v37  ;;  %v8479_v15 = vld [vmem:[%s13104_s8 + $0x544] ss:$16 sps:$4 sm:$0xff]   ;;  %v8482_v37 = vld [vmem:[%s13104_s8 + $0x54c] ss:$16 sps:$4 sm:$0xff]  }
 0x7c0   : > { %6630 = vmatpush1.bf16.msra.mxu0 %v8393_v38  ;;  %6802 = vmatpush1.bf16.msra.mxu1 %v8396_v29  ;;  %v8477_v38 = vld [vmem:[%s13104_s8 + $0x540] ss:$16 sps:$4 sm:$0xff]   ;;  %v8480_v29 = vld [vmem:[%s13104_s8 + $0x548] ss:$16 sps:$4 sm:$0xff]  }
 0x7c1   : > { %6631 = vmatprep.subr.bf16.mxu0 %v8401_v60  ;;  %6803 = vmatprep.subr.bf16.mxu1 %v8404_v13  ;;  %v8485_v60 = vld [vmem:[%s13104_s8 + $0x564] ss:$16 sps:$4 sm:$0xff]   ;;  %v8488_v13 = vld [vmem:[%s13104_s8 + $0x56c] ss:$16 sps:$4 sm:$0xff]  }
 0x7c4   : > { %6632 = vmatpush1.bf16.msra.mxu0 %v8399_v21  ;;  %6804 = vmatpush1.bf16.msra.mxu1 %v8402_v2  ;;  %v8483_v21 = vld [vmem:[%s13104_s8 + $0x560] ss:$16 sps:$4 sm:$0xff]   ;;  %v8486_v2 = vld [vmem:[%s13104_s8 + $0x568] ss:$16 sps:$4 sm:$0xff]  }
 0x7c5   : > { %6633 = vmatprep.subr.bf16.mxu0 %v8407_v7  ;;  %6805 = vmatprep.subr.bf16.mxu1 %v8410_v14  ;;  %v8491_v7 = vld [vmem:[%s13104_s8 + $0x584] ss:$16 sps:$4 sm:$0xff]   ;;  %v8494_v14 = vld [vmem:[%s13104_s8 + $0x58c] ss:$16 sps:$4 sm:$0xff]  }
 0x7c8   : > { %6634 = vmatpush1.bf16.msra.mxu0 %v8405_v25  ;;  %6806 = vmatpush1.bf16.msra.mxu1 %v8408_v57  ;;  %v8489_v25 = vld [vmem:[%s13104_s8 + $0x580] ss:$16 sps:$4 sm:$0xff]   ;;  %v8492_v57 = vld [vmem:[%s13104_s8 + $0x588] ss:$16 sps:$4 sm:$0xff]  }
 0x7c9   : > { %6635 = vmatprep.subr.bf16.mxu0 %v8413_v63  ;;  %6807 = vmatprep.subr.bf16.mxu1 %v8416_v28  ;;  %v8497_v63 = vld [vmem:[%s13104_s8 + $0x5a4] ss:$16 sps:$4 sm:$0xff]   ;;  %v8500_v28 = vld [vmem:[%s13104_s8 + $0x5ac] ss:$16 sps:$4 sm:$0xff]  }
 0x7cc   : > { %6636 = vmatpush1.bf16.msra.mxu0 %v8411_v23  ;;  %6808 = vmatpush1.bf16.msra.mxu1 %v8414_v42  ;;  %v8495_v23 = vld [vmem:[%s13104_s8 + $0x5a0] ss:$16 sps:$4 sm:$0xff]   ;;  %v8498_v42 = vld [vmem:[%s13104_s8 + $0x5a8] ss:$16 sps:$4 sm:$0xff]  }
 0x7cd   : > { %6648 = vmatprep.subr.bf16.mxu0 %v8419_v43  ;;  %6820 = vmatprep.subr.bf16.mxu1 %v8422_v41  ;;  %v8503_v43 = vld [vmem:[%s13104_s8 + $0x5c4] ss:$16 sps:$4 sm:$0xff]   ;;  %v8506_v41 = vld [vmem:[%s13104_s8 + $0x5cc] ss:$16 sps:$4 sm:$0xff]  }
 0x7cf   : > { %6638 = vmatmul.mubr.bf16.vlgmr.msra.gmra.mrb[68].mxu0 %v12654_v58  ;;  %6810 = vmatmul.mubr.bf16.vlgmr.msra.gmra.mrb[84].mxu1 %v12654_v58  ;;  %v8434_v58 = vld [vmem:[%s13104_s8 + $0x44c] ss:$16 sps:$4 sm:$0xff]  }
 0x7d0   : > { %6649 = vmatpush1.bf16.msra.mxu0 %v8417_v44  ;;  %6680 = vmatprep.mubr.bf16.mxu0 %v12710_v4  ;;  %v8501_v44 = vld [vmem:[%s13104_s8 + $0x5c0] ss:$16 sps:$4 sm:$0xff]  }
 0x7d1   : > { %6821 = vmatpush1.bf16.msra.mxu1 %v8420_v18  ;;  %6852 = vmatprep.mubr.bf16.mxu1 %v12710_v4  ;;  %v8438_v4 = vld [vmem:[%s13104_s8 + $0x468] ss:$16 sps:$4 sm:$0xff]  }
 0x7d2   : > { %6650 = vmatprep.subr.bf16.mxu0 %v8425_v11  ;;  %6822 = vmatprep.subr.bf16.mxu1 %v8428_v6  ;;  %v8504_v18 = vld [vmem:[%s13104_s8 + $0x5c8] ss:$16 sps:$4 sm:$0xff]   ;;  %v8509_v11 = vld [vmem:[%s13104_s8 + $0x5e4] ss:$16 sps:$4 sm:$0xff]   ;;  %v8512_v6 = vld [vmem:[%s13104_s8 + $0x5ec] ss:$16 sps:$4 sm:$0xff]  }
 0x7d4   : > { %6651 = vmatpush1.bf16.msra.mxu0 %v8423_v27  ;;  %v8507_v27 = vld [vmem:[%s13104_s8 + $0x5e0] ss:$16 sps:$4 sm:$0xff]  }
 0x7d5   : > { %6823 = vmatpush1.bf16.msra.mxu1 %v8426_v9  ;;  %6652 = vmatprep.subr.bf16.mxu0 %v8431_v10  ;;  %v8510_v9 = vld [vmem:[%s13104_s8 + $0x5e8] ss:$16 sps:$4 sm:$0xff]   ;;  %v8515_v10 = vld [vmem:[%s13104_s8 + $0x604] ss:$16 sps:$4 sm:$0xff]  }
 0x7d6   : > { %6824 = vmatprep.subr.bf16.mxu1 %v8434_v58  ;;  %v8518_v58 = vld [vmem:[%s13104_s8 + $0x60c] ss:$16 sps:$4 sm:$0xff]  }
 0x7d8   : > { %6653 = vmatpush1.bf16.msra.mxu0 %v8429_v24  ;;  %v8513_v24 = vld [vmem:[%s13104_s8 + $0x600] ss:$16 sps:$4 sm:$0xff]  }
 0x7d9   : > { %6825 = vmatpush1.bf16.msra.mxu1 %v8432_v32  ;;  %6654 = vmatprep.subr.bf16.mxu0 %v8437_v47  ;;  %v8516_v32 = vld [vmem:[%s13104_s8 + $0x608] ss:$16 sps:$4 sm:$0xff]   ;;  %v8521_v47 = vld [vmem:[%s13104_s8 + $0x624] ss:$16 sps:$4 sm:$0xff]  }
 0x7da   : > { %6826 = vmatprep.subr.bf16.mxu1 %v8440_v34  ;;  %v8524_v34 = vld [vmem:[%s13104_s8 + $0x62c] ss:$16 sps:$4 sm:$0xff]  }
 0x7dc   : > { %6655 = vmatpush1.bf16.msra.mxu0 %v8435_v17  ;;  %v8519_v17 = vld [vmem:[%s13104_s8 + $0x620] ss:$16 sps:$4 sm:$0xff]  }
 0x7dd   : > { %6827 = vmatpush1.bf16.msra.mxu1 %v8438_v4  ;;  %6656 = vmatprep.subr.bf16.mxu0 %v8443_v36  ;;  %v8522_v4 = vld [vmem:[%s13104_s8 + $0x628] ss:$16 sps:$4 sm:$0xff]  }
 0x7de   : > { %6828 = vmatprep.subr.bf16.mxu1 %v8446_v52 }
 0x7e0   : > { %6657 = vmatpush1.bf16.msra.mxu0 %v8441_v26 }
 0x7e1   : > { %6829 = vmatpush1.bf16.msra.mxu1 %v8444_v46  ;;  %6658 = vmatprep.subr.bf16.mxu0 %v8449_v3 }
 0x7e2   : > { %6830 = vmatprep.subr.bf16.mxu1 %v8452_v56 }
 0x7e4   : > { %6659 = vmatpush1.bf16.msra.mxu0 %v8447_v8 }
 0x7e5   : > { %6831 = vmatpush1.bf16.msra.mxu1 %v8450_v0  ;;  %6660 = vmatprep.subr.bf16.mxu0 %v8455_v19 }
 0x7e6   : > { %6832 = vmatprep.subr.bf16.mxu1 %v8458_v33 }
 0x7e8   : > { %6661 = vmatpush1.bf16.msra.mxu0 %v8453_v40 }
 0x7e9   : > { %6833 = vmatpush1.bf16.msra.mxu1 %v8456_v62  ;;  %6662 = vmatprep.subr.bf16.mxu0 %v8461_v12 }
 0x7ea   : > { %6834 = vmatprep.subr.bf16.mxu1 %v8464_v48 }
 0x7ec   : > { %6663 = vmatpush1.bf16.msra.mxu0 %v8459_v55 }
 0x7ed   : > { %6835 = vmatpush1.bf16.msra.mxu1 %v8462_v53  ;;  %6664 = vmatprep.subr.bf16.mxu0 %v8467_v54 }
 0x7ee   : > { %6836 = vmatprep.subr.bf16.mxu1 %v8470_v5 }
 0x7f0   : > { %6665 = vmatpush1.bf16.msra.mxu0 %v8465_v35 }
 0x7f1   : > { %6837 = vmatpush1.bf16.msra.mxu1 %v8468_v16  ;;  %6666 = vmatprep.subr.bf16.mxu0 %v8473_v30 }
 0x7f2   : > { %6838 = vmatprep.subr.bf16.mxu1 %v8476_v59 }
 0x7f4   : > { %6667 = vmatpush1.bf16.msra.mxu0 %v8471_v51 }
 0x7f5   : > { %6839 = vmatpush1.bf16.msra.mxu1 %v8474_v39  ;;  %6668 = vmatprep.subr.bf16.mxu0 %v8479_v15 }
 0x7f6   : > { %6840 = vmatprep.subr.bf16.mxu1 %v8482_v37 }
 0x7f8   : > { %6669 = vmatpush1.bf16.msra.mxu0 %v8477_v38 }
 0x7f9   : > { %6841 = vmatpush1.bf16.msra.mxu1 %v8480_v29  ;;  %6670 = vmatprep.subr.bf16.mxu0 %v8485_v60 }
 0x7fa   : > { %6842 = vmatprep.subr.bf16.mxu1 %v8488_v13 }
 0x7fc   : > { %6671 = vmatpush1.bf16.msra.mxu0 %v8483_v21 }
 0x7fd   : > { %6843 = vmatpush1.bf16.msra.mxu1 %v8486_v2  ;;  %6672 = vmatprep.subr.bf16.mxu0 %v8491_v7 }
 0x7fe   : > { %6844 = vmatprep.subr.bf16.mxu1 %v8494_v14 }
 0x800   : > { %6673 = vmatpush1.bf16.msra.mxu0 %v8489_v25 }
 0x801   : > { %6845 = vmatpush1.bf16.msra.mxu1 %v8492_v57  ;;  %6674 = vmatprep.subr.bf16.mxu0 %v8497_v63 }
 0x802   : > { %6846 = vmatprep.subr.bf16.mxu1 %v8500_v28 }
 0x804   : > { %6675 = vmatpush1.bf16.msra.mxu0 %v8495_v23 }
 0x805   : > { %6847 = vmatpush1.bf16.msra.mxu1 %v8498_v42  ;;  %6676 = vmatprep.subr.bf16.mxu0 %v8503_v43 }
 0x806   : > { %6848 = vmatprep.subr.bf16.mxu1 %v8506_v41 }
 0x808   : > { %6677 = vmatpush1.bf16.msra.mxu0 %v8501_v44 }
 0x809   : > { %6849 = vmatpush1.bf16.msra.mxu1 %v8504_v18  ;;  %6678 = vmatprep.subr.bf16.mxu0 %v8509_v11 }
 0x80a   : > { %6850 = vmatprep.subr.bf16.mxu1 %v8512_v6 }
 0x80c   : > { %6679 = vmatpush1.bf16.msra.mxu0 %v8507_v27 }
 0x80d   : > { %6851 = vmatpush1.bf16.msra.mxu1 %v8510_v9  ;;  %6691 = vmatprep.subr.bf16.mxu0 %v8515_v10 }
 0x80e   : > { %6863 = vmatprep.subr.bf16.mxu1 %v8518_v58 }
 0x80f   : > { %6681 = vmatmul.mubr.bf16.vlgmr.msra.gmra.mrb[68].mxu0 %v12708_v50 }
 0x810   : > { %6853 = vmatmul.mubr.bf16.vlgmr.msra.gmra.mrb[84].mxu1 %v12708_v50  ;;  %6692 = vmatpush1.bf16.msra.mxu0 %v8513_v24  ;;  %v5536_v50 = vld [vmem:[%s13105_s9] sm:$0xf] }
 0x811   : > { %6864 = vmatpush1.bf16.msra.mxu1 %v8516_v32  ;;  %6693 = vmatprep.subr.bf16.mxu0 %v8521_v47  ;;  %v5541_v36 = vrot.slane %v5536_v50, %v12262_v61  ;;  %v5545_v52 = vrot.slane %v5536_v50, %v12268_v22  ;;  %v5553_v26 = vrot.slane %v5536_v50, %v4976_v1 }
 0x812   : > { %6865 = vmatprep.subr.bf16.mxu1 %v8524_v34  ;;  %6723 = vmatprep.mubr.bf16.mxu0 %v8607_v20 }
 0x813   : > { %6895 = vmatprep.mubr.bf16.mxu1 %v8607_v20  ;;  %v5549_v20 = vrot.slane %v5536_v50, %v4972_v49 }
 0x814   : > { %6694 = vmatpush1.bf16.msra.mxu0 %v8519_v17 }
 0x815   : > { %6866 = vmatpush1.bf16.msra.mxu1 %v8522_v4 }
 0x81b   : > { %7466 = vmatmul.mubr.msk.bf16.vlgmr.msra.gmra.mrb[68].mxu0 %vm6558_vm4, %v12762_v45 }
 0x81c   : > { %7467 = vmatmul.mubr.msk.bf16.vlgmr.msra.gmra.mrb[84].mxu1 %vm6558_vm4, %v12762_v45 }
 0x8ee   : > { %v6725_v46 = vpop.f32.mrb[68].mxu0 }
 0x8ef   : > { %v7858_v3 = vadd.f32 %v6725_v46, %v5541_v36  ;;  %v6897_v45 = vpop.f32.mrb[84].mxu1  ;;  %v6727_v56 = vpop.f32.mrb[69].mxu0 }
 0x8f0   : > { %v7862_v8 = vadd.f32 %v6897_v45, %v5549_v20  ;;  %v7859_v0 = vadd.f32 %v6727_v56, %v5545_v52  ;;  %v6899_v19 = vpop.f32.mrb[85].mxu1  ;;  %v6729_v33 = vpop.f32.mrb[70].mxu0 }
 0x8f1   : > { %6906 = vst [vmem:[%s352_s25] sm:$0xff] %v7858_v3  ;;  %v7863_v61 = vadd.f32 %v6899_v19, %v5553_v26  ;;  %v7860_v40 = vadd.f32 %v6729_v33, %v5541_v36  ;;  %v6901_v49 = vpop.f32.mrb[86].mxu1  ;;  %v6731_v22 = vpop.f32.mrb[71].mxu0 }
 0x8f2   : > { %6908 = vst [vmem:[%s352_s25 + $0x10] sm:$0xff] %v7862_v8  ;;  %6907 = vst [vmem:[%s352_s25 + $0x8] sm:$0xff] %v7859_v0  ;;  %v7864_v31 = vadd.f32 %v6901_v49, %v5549_v20  ;;  %v7861_v1 = vadd.f32 %v6731_v22, %v5545_v52  ;;  %v6903_v62 = vpop.f32.mrb[87].mxu1 }
 0x8f3   : > { %6909 = vst [vmem:[%s352_s25 + $0x18] sm:$0xff] %v7863_v61  ;;  %6910 = vst [vmem:[%s352_s25 + $0x20] sm:$0xff] %v7860_v40  ;;  %v7865_v12 = vadd.f32 %v6903_v62, %v5553_v26 }
 0x8f4   : > { %6912 = vst [vmem:[%s352_s25 + $0x30] sm:$0xff] %v7864_v31  ;;  %6911 = vst [vmem:[%s352_s25 + $0x28] sm:$0xff] %v7861_v1 }
 0x8f5   : > { %6913 = vst [vmem:[%s352_s25 + $0x38] sm:$0xff] %v7865_v12 }
 0x8f6   : > { %8541 = shalt.err (!%p8538_p3)
}
 0x8f7   : > { %s8542_s20 = scalar_lea.hbm %s13048_s21, 1024  ;;  %s8546_s26 = scalar_lea.hbm %s13106_s10, 2048 }
 0x8f8   : > { %p8543_p4 = scmp.ne.s32.totalorder %s13048_s21, %s8542_s20  ;;  %p8547_p9 = scmp.lt.u32.totalorder %s13048_s21, %s13106_s10 }
 0x8f9   : > { %p8548_p10 = scmp.lt.u32.totalorder %s8546_s26, %s8542_s20  ;;  %p8550_p12 = scmp.lt.u32.totalorder %s8542_s20, %s13048_s21 }
 0x8fa   : > { %p8544_p7 = pnand %p8543_p4, %p8705_p5 }
 0x8fb   : > { %p8549_p11 = por %p8548_p10, %p8547_p9 }
 0x8fc   : > { %p8545_p8 = pneg %p8544_p7 }
 0x8fd   : > { %p8551_p13 = por %p8550_p12, %p8549_p11 }
 0x8ff   : > { %p8552_p0 = pnand %p8551_p13, %p8545_p8 }
 0x901   : > { %8555 = shalt.err (!%p8552_p0)
}
 0x902   : > { %s8611_s12 = smov 512  }
 0x903   : > { %7902 = dma.vmem_to_hbm [thread:$0]  (%p8705_p5), %s13050_s28, 1024, %s13048_s21, %s13054_s0, %s8611_s12, %s8611_s12, %s13908_s11  }
 0x904 PF: > { %p7908_p1 = scmp.ge.s32.totalorder %s8590_s16, 2  ;;  %s6944_s18 = sand.u32 1, %s8578_s13  }
 0x905   : > { %s6945_s27 = scalar_lea.sflag [#allocation4], %s6944_s18 }
 0x906   : > { %p7905_p2 = pnand %p7908_p1, %p8709_p6 }
 0x908   : > { %8573 = dma.done.wait (!%p7905_p2), %s6945_s27, 1024  }
 0x909   : > { %8575 = vsyncadd (!%p7905_p2), %s6945_s27, 4294966272  ;;  %p20_p3 = scmp.ge.s32.totalorder %s8692_s19, 4   ;;  %s13951_s13 = smov %s8582_s14 }
 0x90a   : > { %s13952_s14 = smov %s8586_s15  ;;  %s13953_s15 = smov %s8703_s22 }
 0x90b   : > { %s13954_s16 = smov %s8692_s19  ;;  %22 = sbr.rel (!%p20_p3) target bundleno = 5 (0x5), region = 97 }
 0x912   :  { %6950 = vsyncpa [#allocation4], 1 }
 0x913   :  { %6952 = vsyncpa [#allocation4 + $0x1], 1 }

</bundles_post_ra>
